<compile_context>
chip_gen: v7x
topology: tpu7x:2x2x1
jax: 0.10.0
libtpu: 0.0.40
codegen_flags: <defaults>
</compile_context>

<pallas_src>
import functools
import math

import jax
import jax.numpy as jnp
from jax.experimental import pallas as pl
from jax.experimental.pallas import tpu as pltpu


# ----------------------------------------------------------------------------
# small helpers / chip detection
# ----------------------------------------------------------------------------

def _tpu_generation():
    try:
        kind = jax.devices()[0].device_kind.lower()
    except Exception:
        return 6
    for g in (7, 6, 5, 4):
        if f"v{g}" in kind:
            return g
    return 6


_GEN = _tpu_generation()


def _round_up(x, m):
    return ((x + m - 1) // m) * m


def _cdiv(a, b):
    return -(-a // b)


def _pad_axis0(a, target):
    if a.shape[0] == target:
        return a
    pad = [(0, target - a.shape[0])] + [(0, 0)] * (a.ndim - 1)
    return jnp.pad(a, pad)


def _dual_core_blk(total, blk, align=1):
    """On dual-TensorCore chips (v7x) make a 1-axis 'parallel' grid have >= 2 blocks."""
    if _GEN >= 7 and total >= 2 * align and _cdiv(total, blk) < 2:
        blk = max(align, _round_up(_cdiv(total, 2), align))
    return blk


def _softplus(x):
    # matches torch.nn.functional.softplus (threshold=20); clamp avoids exp overflow
    return jnp.where(x > 20.0, x, jnp.log(1.0 + jnp.exp(jnp.minimum(x, 20.0))))


# ----------------------------------------------------------------------------
# Tiled matmul (+bias, +exact GELU, +fused residual) — bf16 MXU, f32 accumulation
# ----------------------------------------------------------------------------

def _matmul_kernel(*refs, activation, has_residual):
    if has_residual:
        x_ref, w_ref, b_ref, r_ref, o_ref, acc_ref = refs
    else:
        x_ref, w_ref, b_ref, o_ref, acc_ref = refs
        r_ref = None

    @pl.when(pl.program_id(2) == 0)
    def _init():
        acc_ref[...] = jnp.zeros_like(acc_ref)

    acc_ref[...] += jnp.dot(x_ref[...], w_ref[...],
                            preferred_element_type=jnp.float32)

    @pl.when(pl.program_id(2) == pl.num_programs(2) - 1)
    def _store():
        y = acc_ref[...] + b_ref[...]
        if activation == "gelu":
            # exact (erf-based) GELU, matching nn.GELU default
            y = 0.5 * y * (1.0 + jax.lax.erf(y * 0.7071067811865475))
        if has_residual:
            y = y + r_ref[...].astype(jnp.float32)
        o_ref[...] = y.astype(o_ref.dtype)


def linear(x2d, w, b=None, activation=None, residual=None, out_dtype=jnp.bfloat16):
    """x2d: (M, K) @ w: (K, N) + b [+ residual] -> (M, N). bf16 operands, f32 accumulate."""
    M, K = x2d.shape
    N = w.shape[1]
    xb = x2d.astype(jnp.bfloat16)
    wb = w.astype(jnp.bfloat16)
    if b is None:
        b = jnp.zeros((N,), jnp.float32)
    b2 = b.reshape(1, N).astype(jnp.float32)

    # generation-aware tile selection
    Kp = _round_up(K, 128)
    tk = next(t for t in (512, 384, 256, 128) if Kp % t == 0)
    Np = _round_up(N, 128)
    tn = 128 if _GEN <= 5 else (256 if Np % 256 == 0 else 128)
    Mp8 = _round_up(M, 8)
    if _GEN == 6 and Mp8 % 512 == 0:
        tm = 512                      # v6e has the VMEM headroom for bigger M blocks
    elif Mp8 % 256 == 0:
        tm = 256
    elif Mp8 >= 128:
        tm = 128
    else:
        tm = Mp8
    Mp = _round_up(Mp8, tm)

    # NOTE: pads are no-ops when shapes already divide the tiles (the common large-M case).
    xb = jnp.pad(xb, ((0, Mp - M), (0, Kp - K)))
    wb = jnp.pad(wb, ((0, Kp - K), (0, Np - N)))
    bp = jnp.pad(b2, ((0, 0), (0, Np - N)))

    in_specs = [
        pl.BlockSpec((tm, tk), lambda i, j, k: (i, k)),
        pl.BlockSpec((tk, tn), lambda i, j, k: (k, j)),
        pl.BlockSpec((1, tn), lambda i, j, k: (0, j)),
    ]
    operands = [xb, wb, bp]
    has_residual = residual is not None
    if has_residual:
        rp = jnp.pad(residual.astype(jnp.bfloat16), ((0, Mp - M), (0, Np - N)))
        in_specs.append(pl.BlockSpec((tm, tn), lambda i, j, k: (i, j)))
        operands.append(rp)

    grid = (Mp // tm, Np // tn, Kp // tk)
    out = pl.pallas_call(
        functools.partial(_matmul_kernel, activation=activation,
                          has_residual=has_residual),
        grid=grid,
        in_specs=in_specs,
        out_specs=pl.BlockSpec((tm, tn), lambda i, j, k: (i, j)),
        out_shape=jax.ShapeDtypeStruct((Mp, Np), out_dtype),
        scratch_shapes=[pltpu.VMEM((tm, tn), jnp.float32)],
        compiler_params=pltpu.CompilerParams(
            dimension_semantics=("parallel", "parallel", "arbitrary")),
    )(*operands)
    return out[:M, :N]


# ----------------------------------------------------------------------------
# LayerNorm (row-tiled, bf16 I/O, f32 compute)
# ----------------------------------------------------------------------------

def _ln_kernel(x_ref, w_ref, b_ref, o_ref, *, eps):
    x = x_ref[...].astype(jnp.float32)
    mu = jnp.mean(x, axis=-1, keepdims=True)
    xc = x - mu
    var = jnp.mean(xc * xc, axis=-1, keepdims=True)
    y = xc * jax.lax.rsqrt(var + eps) * w_ref[...] + b_ref[...]
    o_ref[...] = y.astype(o_ref.dtype)


def layernorm(x, w, b, eps=1e-6):
    # eps=1e-6 matches TimeMamba's norm_layer = partial(nn.LayerNorm, eps=1e-06)
    shp = x.shape
    D = shp[-1]
    x2 = x.reshape(-1, D)
    R = x2.shape[0]
    R8 = _round_up(R, 8)
    tr = min(512, R8)
    tr = _dual_core_blk(R8, tr, align=8)
    Rp = _round_up(R8, tr)
    x2 = _pad_axis0(x2, Rp)
    out = pl.pallas_call(
        functools.partial(_ln_kernel, eps=eps),
        grid=(Rp // tr,),
        in_specs=[
            pl.BlockSpec((tr, D), lambda i: (i, 0)),
            pl.BlockSpec((1, D), lambda i: (0, 0)),
            pl.BlockSpec((1, D), lambda i: (0, 0)),
        ],
        out_specs=pl.BlockSpec((tr, D), lambda i: (i, 0)),
        out_shape=jax.ShapeDtypeStruct((Rp, D), jnp.bfloat16),
        compiler_params=pltpu.CompilerParams(dimension_semantics=("parallel",)),
    )(x2, w.reshape(1, D).astype(jnp.float32), b.reshape(1, D).astype(jnp.float32))
    return out[:R].reshape(shp)


# ----------------------------------------------------------------------------
# Multi-head attention core — lane-dense (gb, L, D) blocks, heads split in-kernel
# ----------------------------------------------------------------------------

def _attn_kernel(q_ref, k_ref, v_ref, o_ref, *, num_heads, scale):
    q = q_ref[...]                                   # (gb, L, D) bf16
    k = k_ref[...]
    v = v_ref[...]
    D = q.shape[-1]
    hd = D // num_heads
    outs = []
    for h in range(num_heads):                       # static unrolled head loop
        sl = slice(h * hd, (h + 1) * hd)
        qh, kh, vh = q[:, :, sl], k[:, :, sl], v[:, :, sl]
        s = jnp.einsum('gld,gmd->glm', qh, kh,
                       preferred_element_type=jnp.float32) * scale
        s = s - jnp.max(s, axis=-1, keepdims=True)
        p = jnp.exp(s)
        p = p * pl.reciprocal(jnp.sum(p, axis=-1, keepdims=True), approx=True)
        outs.append(jnp.einsum('glm,gmd->gld', p.astype(vh.dtype), vh,
                               preferred_element_type=jnp.float32))
    # single lane-dense store of all heads
    o_ref[...] = jnp.concatenate(outs, axis=-1).astype(o_ref.dtype)


def mha_core(q, k, v, num_heads):
    """q,k,v: (L, Nb, D) seq-first (torch nn.MultiheadAttention, batch_first=False)."""
    L, Nb, D = q.shape
    hd = D // num_heads
    scale = 1.0 / math.sqrt(hd)

    def to_batch(t):
        return jnp.transpose(t, (1, 0, 2)).astype(jnp.bfloat16)    # (Nb, L, D)

    qb, kb, vb = to_batch(q), to_batch(k), to_batch(v)

    # per-grid-step VMEM budget (scores dominate); bigger budget on v6e (128 MiB VMEM)
    budget = (8 << 20) if _GEN == 6 else (4 << 20)
    per_b = num_heads * L * L * 4 + 3 * L * D * 2 + L * D * 4
    gb = max(1, min(Nb, budget // max(1, per_b)))
    gb = _dual_core_blk(Nb, gb)
    Gp = _round_up(Nb, gb)
    qb, kb, vb = _pad_axis0(qb, Gp), _pad_axis0(kb, Gp), _pad_axis0(vb, Gp)

    out = pl.pallas_call(
        functools.partial(_attn_kernel, num_heads=num_heads, scale=scale),
        grid=(Gp // gb,),
        in_specs=[pl.BlockSpec((gb, L, D), lambda g: (g, 0, 0))] * 3,
        out_specs=pl.BlockSpec((gb, L, D), lambda g: (g, 0, 0)),
        out_shape=jax.ShapeDtypeStruct((Gp, L, D), jnp.bfloat16),
        compiler_params=pltpu.CompilerParams(dimension_semantics=("parallel",)),
    )(qb, kb, vb)
    return jnp.transpose(out[:Nb], (1, 0, 2))                      # (L, Nb, D)


# ----------------------------------------------------------------------------
# Depthwise causal conv1d + SiLU (channels on lanes; reverse folds the flip in)
# ----------------------------------------------------------------------------

def _conv_kernel(x_ref, w_ref, b_ref, o_ref, *, T, K):
    w = w_ref[...]                                   # (K, Din) f32
    b = b_ref[...][None]                             # (1, 1, Din)
    x = x_ref[...].astype(jnp.float32)               # (bn, T+K-1, Din)
    acc = jnp.zeros(o_ref.shape, jnp.float32)
    for k in range(K):                               # K = d_conv (tiny, static)
        acc = acc + w[k:k + 1, :][None] * x[:, k:k + T, :]
    acc = acc + b
    o_ref[...] = (acc * jax.nn.sigmoid(acc)).astype(o_ref.dtype)   # SiLU


def causal_conv1d_silu(x, w, b, reverse=False):
    """x: (Bn, T, Din) bf16; depthwise conv1d (padding=K-1, truncated to T) + SiLU.
    reverse=True computes flip(conv(flip(x))) without materializing the flips."""
    Bn, T, Din = x.shape
    K = w.shape[1]
    wk = (w[:, ::-1] if reverse else w).T.astype(jnp.float32)        # (K, Din)
    x = x.astype(jnp.bfloat16)
    if reverse:
        xpad = jnp.pad(x, ((0, 0), (0, K - 1), (0, 0)))
    else:
        xpad = jnp.pad(x, ((0, 0), (K - 1, 0), (0, 0)))

    per_row = (T + K - 1) * Din * 2 + T * Din * 10
    bn_blk = max(1, min(64, Bn, (8 << 20) // max(1, per_row)))
    bn_blk = _dual_core_blk(Bn, bn_blk)
    Bnp = _round_up(Bn, bn_blk)
    xpad = _pad_axis0(xpad, Bnp)

    out = pl.pallas_call(
        functools.partial(_conv_kernel, T=T, K=K),
        grid=(Bnp // bn_blk,),
        in_specs=[
            pl.BlockSpec((bn_blk, T + K - 1, Din), lambda i: (i, 0, 0)),
            pl.BlockSpec((K, Din), lambda i: (0, 0)),
            pl.BlockSpec((1, Din), lambda i: (0, 0)),
        ],
        out_specs=pl.BlockSpec((bn_blk, T, Din), lambda i: (i, 0, 0)),
        out_shape=jax.ShapeDtypeStruct((Bnp, T, Din), jnp.bfloat16),
        compiler_params=pltpu.CompilerParams(dimension_semantics=("parallel",)),
    )(xpad, wk, b.reshape(1, Din).astype(jnp.float32))
    return out[:Bn]


# ----------------------------------------------------------------------------
# Mamba selective scan (channels on lanes, hoisted exp, single full-block store)
# ----------------------------------------------------------------------------

def _scan_kernel(u_ref, dlt_ref, z_ref, B_ref, C_ref, A_ref, D_ref, dtb_ref,
                 o_ref, *, T, reverse):
    A = A_ref[...]                                    # (N, Din) f32
    u = u_ref[...].astype(jnp.float32)                # (bn, T, Din)
    z = z_ref[...].astype(jnp.float32)
    delta = _softplus(dlt_ref[...].astype(jnp.float32) + dtb_ref[...][None])
    Bm = B_ref[...].astype(jnp.float32)               # (bn, N, T)
    Cm = C_ref[...].astype(jnp.float32)               # (bn, N, T)
    bn = u.shape[0]
    N, Din = A.shape

    # Hoist all exp (EUP) and broadcast (XLU) work out of the serial recurrence so the
    # t-loop below is a pure VALU multiply-add chain + one sublane reduce per step.
    dA, dBu, Ct = [None] * T, [None] * T, [None] * T
    for t in range(T):
        dt_t = delta[:, t:t + 1, :]                   # (bn, 1, Din)
        dA[t] = jnp.exp(dt_t * A[None])               # (bn, N, Din)
        dBu[t] = (dt_t * u[:, t:t + 1, :]) * Bm[:, :, t:t + 1]    # (bn, N, Din)
        Ct[t] = Cm[:, :, t:t + 1]                     # (bn, N, 1)

    state = jnp.zeros((bn, N, Din), jnp.float32)
    ys = [None] * T
    # T = num_frames (small): static loop keeps every slice static/lane-friendly.
    steps = range(T - 1, -1, -1) if reverse else range(T)
    for t in steps:
        state = dA[t] * state + dBu[t]
        ys[t] = jnp.sum(state * Ct[t], axis=1, keepdims=True)     # (bn, 1, Din)

    y = jnp.concatenate(ys, axis=1)                   # (bn, T, Din)
    out = (y + u * D_ref[...][None]) * (z * jax.nn.sigmoid(z))    # gate with SiLU(z)
    o_ref[...] = out.astype(o_ref.dtype)              # single unmasked full-block store


def selective_scan(u, delta, z, Bmat, Cmat, A_t, D, delta_bias, reverse=False):
    """u/delta/z: (Bn, T, Din) bf16; Bmat/Cmat: (Bn, N, T); A_t: (N, Din) f32."""
    Bn, T, Din = u.shape
    N = A_t.shape[0]

    per_row = T * N * Din * 4 * 2 + T * Din * 4 * 8 + N * Din * 4
    bn_blk = max(1, min(32, Bn, (8 << 20) // max(1, per_row)))
    bn_blk = _dual_core_blk(Bn, bn_blk)
    Bnp = _round_up(Bn, bn_blk)

    u_p = _pad_axis0(u.astype(jnp.bfloat16), Bnp)
    d_p = _pad_axis0(delta.astype(jnp.bfloat16), Bnp)
    z_p = _pad_axis0(z.astype(jnp.bfloat16), Bnp)
    B_p = _pad_axis0(Bmat.astype(jnp.bfloat16), Bnp)
    C_p = _pad_axis0(Cmat.astype(jnp.bfloat16), Bnp)

    out = pl.pallas_call(
        functools.partial(_scan_kernel, T=T, reverse=reverse),
        grid=(Bnp // bn_blk,),
        in_specs=[
            pl.BlockSpec((bn_blk, T, Din), lambda i: (i, 0, 0)),   # u
            pl.BlockSpec((bn_blk, T, Din), lambda i: (i, 0, 0)),   # delta (pre-bias)
            pl.BlockSpec((bn_blk, T, Din), lambda i: (i, 0, 0)),   # z
            pl.BlockSpec((bn_blk, N, T), lambda i: (i, 0, 0)),     # B
            pl.BlockSpec((bn_blk, N, T), lambda i: (i, 0, 0)),     # C
            pl.BlockSpec((N, Din), lambda i: (0, 0)),              # A (transposed)
            pl.BlockSpec((1, Din), lambda i: (0, 0)),              # D
            pl.BlockSpec((1, Din), lambda i: (0, 0)),              # delta_bias
        ],
        out_specs=pl.BlockSpec((bn_blk, T, Din), lambda i: (i, 0, 0)),
        out_shape=jax.ShapeDtypeStruct((Bnp, T, Din), jnp.bfloat16),
        compiler_params=pltpu.CompilerParams(dimension_semantics=("parallel",)),
    )(u_p, d_p, z_p, B_p, C_p, A_t.astype(jnp.float32),
      D.reshape(1, Din).astype(jnp.float32),
      delta_bias.reshape(1, Din).astype(jnp.float32))
    return out[:Bn]


# ----------------------------------------------------------------------------
# Model sub-modules (JAX glue orchestrating the Pallas kernels)
# ----------------------------------------------------------------------------

def mamba_direction(x, z, p, reverse):
    """One direction of bimamba-v2 (== mamba_inner_fn_no_out_proj).
    x, z: (Bn, T, Din).  reverse=True is the flipped direction with flips folded in."""
    Bn, T, Din = x.shape
    dt_rank = p['dt_proj_w'].shape[1]
    N = p['A_log'].shape[1]

    xc = causal_conv1d_silu(x, p['conv_w'], p['conv_b'], reverse=reverse)   # (Bn, T, Din)

    # x_proj (dt_rank + 2N columns), then a small dt_proj matmul (no weight folding —
    # folding would inflate this projection's MXU FLOPs ~8x).
    xdbl = linear(xc.reshape(Bn * T, Din), p['x_proj_w'].T)                 # (Bn*T, dt_rank+2N)
    delta = linear(xdbl[:, :dt_rank], p['dt_proj_w'].T)                     # (Bn*T, Din), bias in scan
    Bmat = jnp.swapaxes(xdbl[:, dt_rank:dt_rank + N].reshape(Bn, T, N), 1, 2)   # (Bn, N, T)
    Cmat = jnp.swapaxes(xdbl[:, dt_rank + N:].reshape(Bn, T, N), 1, 2)          # (Bn, N, T)
    A_t = -jnp.exp(p['A_log']).T                                            # (N, Din)
    return selective_scan(xc, delta.reshape(Bn, T, Din), z, Bmat, Cmat, A_t,
                          p['D'], p['dt_proj_b'], reverse=reverse)


def mamba_forward(h, p, residual):
    """Mamba(d_model, d_conv=4, bimamba_type='v2', expand=1) with the post-Mamba
    residual (residual: (Bn, T, D)) fused into the out_proj matmul."""
    Bn, T, D = h.shape
    Din = p['in_proj_w'].shape[0] // 2
    xz = linear(h.reshape(Bn * T, D), p['in_proj_w'].T).reshape(Bn, T, 2 * Din)
    x, z = xz[..., :Din], xz[..., Din:]
    out_f = mamba_direction(x, z, p['fwd'], reverse=False)
    out_b = mamba_direction(x, z, p['bwd'], reverse=True)   # flip folded into conv/scan
    out = (out_f + out_b).reshape(Bn * T, Din)
    y = linear(out, p['out_proj_w'].T, residual=residual.reshape(Bn * T, D))  # no bias
    return y.reshape(Bn, T, D)


def multihead_attention(x, p, num_heads):
    """torch nn.MultiheadAttention(q=k=v=x), batch_first=False. x: (L, Nb, D)."""
    L, Nb, D = x.shape
    x2 = x.reshape(L * Nb, D)
    # fused QKV projection (matches torch's packed in_proj layout [q;k;v])
    wqkv = jnp.concatenate([p['wq'], p['wk'], p['wv']], axis=0).T           # (D, 3D)
    bqkv = jnp.concatenate([p['bq'], p['bk'], p['bv']])
    qkv = linear(x2, wqkv, bqkv)                                            # (L*Nb, 3D) bf16
    q = qkv[:, :D].reshape(L, Nb, D)
    k = qkv[:, D:2 * D].reshape(L, Nb, D)
    v = qkv[:, 2 * D:].reshape(L, Nb, D)
    o = mha_core(q, k, v, num_heads)
    o = linear(o.reshape(L * Nb, D), p['out_w'].T, p['out_b']).reshape(L, Nb, D)
    return o


def mlp_forward(x2, p, residual2):
    h = linear(x2, p['fc1_w'].T, p['fc1_b'], activation="gelu")
    return linear(h, p['fc2_w'].T, p['fc2_b'], residual=residual2)          # fused residual


def spacetime_block(x, params, time_n, space_f, num_heads):
    """attention_style='frozen-in-time', drop_path/dropout = 0, no tanh gating."""
    B, L1, D = x.shape
    n, T = time_n, space_f
    init_cls = x[:, :1]                                           # (B, 1, D)
    res_x = x
    xt = x[:, 1:].reshape(B, n, T, D).reshape(B * n, T, D)        # 'b (n t) d -> (b n) t d'
    xt_n = layernorm(xt, params['norm3_w'], params['norm3_b'])
    # time residual (xt + mamba(norm3(xt))) fused into the Mamba out_proj matmul
    time_res = mamba_forward(xt_n, params['mamba'], residual=xt)  # (B*n, T, D)
    time_res_b = time_res.reshape(B, n, T, D).reshape(B, n * T, D)

    cls = jnp.repeat(init_cls, T, axis=1).reshape(B * T, 1, D)
    xs = time_res_b.reshape(B, n, T, D)
    xs = jnp.transpose(xs, (0, 2, 1, 3)).reshape(B * T, n, D)     # 'b (n t) d -> (b t) n d'
    xs = jnp.concatenate([cls, xs], axis=1)                       # (B*T, 1+n, D)

    x_n = layernorm(xs, params['norm1_w'], params['norm1_b'])
    # NOTE: reproduces nn.MultiheadAttention(batch_first=False): dim0 = sequence axis.
    space_out = multihead_attention(x_n, params['attn'], num_heads)   # (B*T, 1+n, D)

    cls_out = space_out[:, 0].reshape(B, T, D).mean(axis=1, keepdims=True)   # (B, 1, D)
    sp = space_out[:, 1:].reshape(B, T, n, D)
    sp = jnp.transpose(sp, (0, 2, 1, 3)).reshape(B, n * T, D)     # '(b t) n d -> b (n t) d'

    x_comb = res_x + jnp.concatenate([cls_out, sp], axis=1)
    x_n2 = layernorm(x_comb, params['norm2_w'], params['norm2_b'])
    y = mlp_forward(x_n2.reshape(B * L1, D), params['mlp'],
                    residual2=x_comb.reshape(B * L1, D))          # MLP residual fused
    return y.reshape(B, L1, D)


def timemamba_forward(x, params, cfg):
    """x: (B, C, F, H, W) -> (B, output_dim)."""
    B, C, F, H, W = x.shape
    x = jnp.transpose(x, (0, 2, 1, 3, 4))                         # (B, F, C, H, W)
    p = cfg['patch_size']
    D = cfg['embed_dim']
    BF = B * F
    Hp, Wp = H // p, W // p
    n_patches = Hp * Wp

    # --- VideoPatchEmbed: Conv2d(k=s=p) as patch-flatten + tiled matmul (Pallas) ---
    xr = x.reshape(BF, C, H, W).reshape(BF, C, Hp, p, Wp, p)
    xr = jnp.transpose(xr, (0, 2, 4, 1, 3, 5))                    # (BF, Hp, Wp, C, p, p)
    patches = xr.reshape(BF * n_patches, C * p * p)
    w_flat = params['patch_w'].reshape(D, C * p * p).T
    emb = linear(patches, w_flat, params['patch_b']).reshape(BF, n_patches, D)

    # --- cls token + pos embed (bf16 activations from here on) ---
    # TODO(synk): the variable-resolution pos-embed interpolation branch (F.interpolate)
    # is not implemented; only the matching-size path is supported.
    cls = jnp.broadcast_to(params['cls_token'].astype(jnp.bfloat16), (BF, 1, D))
    xcat = jnp.concatenate([cls, emb], axis=1) + params['pos_embed'].astype(jnp.bfloat16)
    cls_tokens = xcat[:B, 0, :][:, None, :]                            # (B, 1, D)
    xp = xcat[:, 1:].reshape(B, F, n_patches, D)
    xp = jnp.transpose(xp, (0, 2, 1, 3)).reshape(B, n_patches * F, D)  # '(b t) n m -> b (n t) m'
    xb = jnp.concatenate([cls_tokens, xp], axis=1)                     # (B, 1+n*F, D)

    for blk in params['blocks']:
        xb = spacetime_block(xb, blk, time_n=n_patches, space_f=F,
                             num_heads=cfg['num_heads'])

    xb = layernorm(xb, params['norm_w'], params['norm_b'])[:, 0]       # (B, D)
    out = linear(xb, params['image_projection'], out_dtype=jnp.float32)  # (B, output_dim)
    return out


# ----------------------------------------------------------------------------
# Deterministic synthetic parameter initialization
# ----------------------------------------------------------------------------

def init_params(key, cfg):
    D = cfg['embed_dim']
    C = cfg['in_chans']
    p = cfg['patch_size']
    Din = cfg['expand'] * D
    N = cfg['d_state']
    K = cfg['d_conv']
    dt_rank = math.ceil(D / 16)
    hidden = int(D * cfg['mlp_ratio'])
    n_per_frame = (cfg['img_size'] // p) ** 2

    keys = list(jax.random.split(key, 128))
    it = iter(keys)

    def nrm(shape, scale=0.02):
        return (scale * jax.random.normal(next(it), shape)).astype(jnp.float32)

    def mamba_dir_params():
        return {
            'conv_w': nrm((Din, K), 0.1),
            'conv_b': jnp.zeros((Din,), jnp.float32),
            'x_proj_w': nrm((dt_rank + 2 * N, Din)),
            'dt_proj_w': nrm((Din, dt_rank), 0.1),
            'dt_proj_b': jnp.full((Din,), math.log(math.expm1(0.01)), jnp.float32),
            'A_log': jnp.log(jnp.broadcast_to(
                jnp.arange(1, N + 1, dtype=jnp.float32), (Din, N))),
            'D': jnp.ones((Din,), jnp.float32),
        }

    params = {
        'patch_w': nrm((D, C, p, p)),
        'patch_b': jnp.zeros((D,), jnp.float32),
        'cls_token': nrm((1, 1, D)),
        'pos_embed': nrm((1, n_per_frame + 1, D)),
        'norm_w': jnp.ones((D,), jnp.float32),
        'norm_b': jnp.zeros((D,), jnp.float32),
        'image_projection': nrm((D, cfg['output_dim']), D ** -0.5),
        'blocks': [],
    }
    for _ in range(cfg['depth']):
        params['blocks'].append({
            'norm1_w': jnp.ones((D,), jnp.float32), 'norm1_b': jnp.zeros((D,), jnp.float32),
            'norm2_w': jnp.ones((D,), jnp.float32), 'norm2_b': jnp.zeros((D,), jnp.float32),
            'norm3_w': jnp.ones((D,), jnp.float32), 'norm3_b': jnp.zeros((D,), jnp.float32),
            'attn': {
                'wq': nrm((D, D)), 'wk': nrm((D, D)), 'wv': nrm((D, D)),
                'bq': jnp.zeros((D,), jnp.float32),
                'bk': jnp.zeros((D,), jnp.float32),
                'bv': jnp.zeros((D,), jnp.float32),
                'out_w': nrm((D, D)), 'out_b': jnp.zeros((D,), jnp.float32),
            },
            'mlp': {
                'fc1_w': nrm((hidden, D)), 'fc1_b': jnp.zeros((hidden,), jnp.float32),
                'fc2_w': nrm((D, hidden)), 'fc2_b': jnp.zeros((D,), jnp.float32),
            },
            'mamba': {
                'in_proj_w': nrm((2 * Din, D)),
                'out_proj_w': nrm((D, Din)),
                'fwd': mamba_dir_params(),
                'bwd': mamba_dir_params(),
            },
        })
    return params


# ----------------------------------------------------------------------------
# Main
# ----------------------------------------------------------------------------

if __name__ == "__main__":
    cfg = dict(img_size=16, patch_size=8, in_chans=3, embed_dim=32, depth=2,
               num_heads=4, mlp_ratio=4.0, num_frames=4, output_dim=16,
               d_state=16, d_conv=4, expand=1)

    key = jax.random.PRNGKey(0)
    pkey, xkey = jax.random.split(key)
    params = init_params(pkey, cfg)

    B = 2
    x = jax.random.normal(
        xkey, (B, cfg['in_chans'], cfg['num_frames'], cfg['img_size'], cfg['img_size']),
        dtype=jnp.float32)

    fwd = jax.jit(lambda inp: timemamba_forward(inp, params, cfg))
    out = jax.block_until_ready(fwd(x))
    assert out.shape == (B, cfg['output_dim'])
    assert bool(jnp.all(jnp.isfinite(out)))
    print("KERNEL_OK")
</pallas_src>

<mosaic_0001>
module attributes {stable_mosaic.version = 11 : i64} {
  func.func @_matmul_kernel(%arg0: i32, %arg1: i32, %arg2: i32, %arg3: memref<32x256xbf16, #tpu.memory_space<vmem>>, %arg4: memref<256x128xbf16, #tpu.memory_space<vmem>>, %arg5: memref<1x128xf32, #tpu.memory_space<vmem>>, %arg6: memref<32x128xbf16, #tpu.memory_space<vmem>>, %arg7: memref<32x128xf32, #tpu.memory_space<vmem>>) attributes {dimension_semantics = [#tpu.dimension_semantics<parallel>, #tpu.dimension_semantics<parallel>, #tpu.dimension_semantics<arbitrary>], iteration_bounds = array<i64: 1, 1, 1>, scalar_prefetch = 0 : i64, scratch_operands = 1 : i64, tpu.core_type = #tpu.core_type<tc>, window_params = [{transform_indices = @transform_0, window_bounds = array<i64: 32, 256>}, {transform_indices = @transform_1, window_bounds = array<i64: 256, 128>}, {transform_indices = @transform_2, window_bounds = array<i64: 1, 128>}, {transform_indices = @transform_3, window_bounds = array<i64: 32, 128>}]} {
    %c0_i32 = arith.constant 0 : i32
    %0 = arith.cmpi eq, %arg2, %c0_i32 : i32
    %1 = arith.extui %0 : i1 to i32
    %c0_i32_0 = arith.constant 0 : i32
    %2 = arith.cmpi ne, %1, %c0_i32_0 : i32
    scf.if %2 {
      %cst_10 = arith.constant 0.000000e+00 : f32
      %12 = vector.broadcast %cst_10 : f32 to vector<32x128xf32>
      %c0_11 = arith.constant 0 : index
      %c0_12 = arith.constant 0 : index
      %13 = vector.load %arg7[%c0_11, %c0_12] : memref<32x128xf32, #tpu.memory_space<vmem>>, vector<32x128xf32>
      tpu.vector_store %arg7[%c0_11, %c0_12], %12 {strides = array<i32>} : memref<32x128xf32, #tpu.memory_space<vmem>>, vector<32x128xf32>,
    } else {
    }
    %c0 = arith.constant 0 : index
    %c0_1 = arith.constant 0 : index
    %3 = vector.load %arg7[%c0, %c0_1] : memref<32x128xf32, #tpu.memory_space<vmem>>, vector<32x128xf32>
    %c0_2 = arith.constant 0 : index
    %c0_3 = arith.constant 0 : index
    %4 = vector.load %arg3[%c0_2, %c0_3] : memref<32x256xbf16, #tpu.memory_space<vmem>>, vector<32x256xbf16>
    %c0_4 = arith.constant 0 : index
    %c0_5 = arith.constant 0 : index
    %5 = vector.load %arg4[%c0_4, %c0_5] : memref<256x128xbf16, #tpu.memory_space<vmem>>, vector<256x128xbf16>
    %cst = arith.constant dense<0.000000e+00> : vector<32x128xf32>
    %6 = tpu.matmul %4, %5, %cst {dimension_numbers = #tpu.dot_dimension_numbers<[1], [0], [0], [1], [0, 0, 1, 1], [], []>} : vector<32x256xbf16>, vector<256x128xbf16>, vector<32x128xf32> -> vector<32x128xf32>
    %7 = arith.addf %3, %6 : vector<32x128xf32>
    %c0_6 = arith.constant 0 : index
    %c0_7 = arith.constant 0 : index
    %8 = vector.load %arg7[%c0_6, %c0_7] : memref<32x128xf32, #tpu.memory_space<vmem>>, vector<32x128xf32>
    tpu.vector_store %arg7[%c0_6, %c0_7], %7 {strides = array<i32>} : memref<32x128xf32, #tpu.memory_space<vmem>>, vector<32x128xf32>,
    %c0_i32_8 = arith.constant 0 : i32
    %9 = arith.cmpi eq, %arg2, %c0_i32_8 : i32
    %10 = arith.extui %9 : i1 to i32
    %c0_i32_9 = arith.constant 0 : i32
    %11 = arith.cmpi ne, %10, %c0_i32_9 : i32
    scf.if %11 {
      %c0_10 = arith.constant 0 : index
      %c0_11 = arith.constant 0 : index
      %12 = vector.load %arg7[%c0_10, %c0_11] : memref<32x128xf32, #tpu.memory_space<vmem>>, vector<32x128xf32>
      %c0_12 = arith.constant 0 : index
      %c0_13 = arith.constant 0 : index
      %13 = vector.load %arg5[%c0_12, %c0_13] : memref<1x128xf32, #tpu.memory_space<vmem>>, vector<1x128xf32>
      %14 = vector.broadcast %13 : vector<1x128xf32> to vector<32x128xf32>
      %15 = arith.addf %12, %14 : vector<32x128xf32>
      %16 = arith.truncf %15 : vector<32x128xf32> to vector<32x128xbf16>
      %c0_14 = arith.constant 0 : index
      %c0_15 = arith.constant 0 : index
      %17 = vector.load %arg6[%c0_14, %c0_15] : memref<32x128xbf16, #tpu.memory_space<vmem>>, vector<32x128xbf16>
      tpu.vector_store %arg6[%c0_14, %c0_15], %16 {strides = array<i32>} : memref<32x128xbf16, #tpu.memory_space<vmem>>, vector<32x128xbf16>,
    } else {
    }
    return
  }
  func.func @transform_0(%arg0: i32, %arg1: i32, %arg2: i32) -> (i32, i32) {
    %c0_i32 = arith.constant 0 : i32
    return %arg0, %arg2 : i32, i32
  }
  func.func @transform_1(%arg0: i32, %arg1: i32, %arg2: i32) -> (i32, i32) {
    %c0_i32 = arith.constant 0 : i32
    return %arg2, %arg1 : i32, i32
  }
  func.func @transform_2(%arg0: i32, %arg1: i32, %arg2: i32) -> (i32, i32) {
    %c0_i32 = arith.constant 0 : i32
    %c0_i32_0 = arith.constant 0 : i32
    return %c0_i32, %arg1 : i32, i32
  }
  func.func @transform_3(%arg0: i32, %arg1: i32, %arg2: i32) -> (i32, i32) {
    %c0_i32 = arith.constant 0 : i32
    return %arg0, %arg1 : i32, i32
  }
}

module attributes {stable_mosaic.version = 11 : i64} {
  func.func @_ln_kernel(%arg0: i32, %arg1: memref<32x32xbf16, #tpu.memory_space<vmem>>, %arg2: memref<1x32xf32, #tpu.memory_space<vmem>>, %arg3: memref<1x32xf32, #tpu.memory_space<vmem>>, %arg4: memref<32x32xbf16, #tpu.memory_space<vmem>>) attributes {dimension_semantics = [#tpu.dimension_semantics<parallel>], iteration_bounds = array<i64: 1>, scalar_prefetch = 0 : i64, scratch_operands = 0 : i64, tpu.core_type = #tpu.core_type<tc>, window_params = [{transform_indices = @transform_0, window_bounds = array<i64: 32, 32>}, {pipeline_mode = #tpu.pipeline_mode<synchronous>, transform_indices = @transform_1, window_bounds = array<i64: 1, 32>}, {pipeline_mode = #tpu.pipeline_mode<synchronous>, transform_indices = @transform_2, window_bounds = array<i64: 1, 32>}, {transform_indices = @transform_3, window_bounds = array<i64: 32, 32>}]} {
    %c0 = arith.constant 0 : index
    %c0_0 = arith.constant 0 : index
    %0 = vector.load %arg1[%c0, %c0_0] : memref<32x32xbf16, #tpu.memory_space<vmem>>, vector<32x32xbf16>
    %1 = arith.extf %0 : vector<32x32xbf16> to vector<32x32xf32>
    %cst = arith.constant dense<0.000000e+00> : vector<32xf32>
    %2 = vector.multi_reduction <add>, %1, %cst [1] : vector<32x32xf32> to vector<32xf32>
    %3 = vector.shape_cast %2 : vector<32xf32> to vector<32x1xf32>
    %cst_1 = arith.constant 3.200000e+01 : f32
    %4 = vector.broadcast %cst_1 : f32 to vector<32x1xf32>
    %5 = arith.divf %3, %4 : vector<32x1xf32>
    %6 = vector.broadcast %5 : vector<32x1xf32> to vector<32x32xf32>
    %7 = arith.subf %1, %6 : vector<32x32xf32>
    %8 = arith.mulf %7, %7 : vector<32x32xf32>
    %cst_2 = arith.constant dense<0.000000e+00> : vector<32xf32>
    %9 = vector.multi_reduction <add>, %8, %cst_2 [1] : vector<32x32xf32> to vector<32xf32>
    %10 = vector.shape_cast %9 : vector<32xf32> to vector<32x1xf32>
    %cst_3 = arith.constant 3.200000e+01 : f32
    %11 = vector.broadcast %cst_3 : f32 to vector<32x1xf32>
    %12 = arith.divf %10, %11 : vector<32x1xf32>
    %cst_4 = arith.constant 9.99999997E-7 : f32
    %13 = vector.broadcast %cst_4 : f32 to vector<32x1xf32>
    %14 = arith.addf %12, %13 : vector<32x1xf32>
    %15 = math.rsqrt %14 : vector<32x1xf32>
    %16 = vector.broadcast %15 : vector<32x1xf32> to vector<32x32xf32>
    %17 = arith.mulf %7, %16 : vector<32x32xf32>
    %c0_5 = arith.constant 0 : index
    %c0_6 = arith.constant 0 : index
    %18 = vector.load %arg2[%c0_5, %c0_6] : memref<1x32xf32, #tpu.memory_space<vmem>>, vector<1x32xf32>
    %19 = vector.broadcast %18 : vector<1x32xf32> to vector<32x32xf32>
    %20 = arith.mulf %17, %19 : vector<32x32xf32>
    %c0_7 = arith.constant 0 : index
    %c0_8 = arith.constant 0 : index
    %21 = vector.load %arg3[%c0_7, %c0_8] : memref<1x32xf32, #tpu.memory_space<vmem>>, vector<1x32xf32>
    %22 = vector.broadcast %21 : vector<1x32xf32> to vector<32x32xf32>
    %23 = arith.addf %20, %22 : vector<32x32xf32>
    %24 = arith.truncf %23 : vector<32x32xf32> to vector<32x32xbf16>
    %c0_9 = arith.constant 0 : index
    %c0_10 = arith.constant 0 : index
    %25 = vector.load %arg4[%c0_9, %c0_10] : memref<32x32xbf16, #tpu.memory_space<vmem>>, vector<32x32xbf16>
    tpu.vector_store %arg4[%c0_9, %c0_10], %24 {strides = array<i32>} : memref<32x32xbf16, #tpu.memory_space<vmem>>, vector<32x32xbf16>,
    return
  }
  func.func @transform_0(%arg0: i32) -> (i32, i32) {
    %c0_i32 = arith.constant 0 : i32
    %c0_i32_0 = arith.constant 0 : i32
    return %arg0, %c0_i32 : i32, i32
  }
  func.func @transform_1(%arg0: i32) -> (i32, i32) {
    %c0_i32 = arith.constant 0 : i32
    %c0_i32_0 = arith.constant 0 : i32
    %c0_i32_1 = arith.constant 0 : i32
    return %c0_i32, %c0_i32_0 : i32, i32
  }
  func.func @transform_2(%arg0: i32) -> (i32, i32) {
    %c0_i32 = arith.constant 0 : i32
    %c0_i32_0 = arith.constant 0 : i32
    %c0_i32_1 = arith.constant 0 : i32
    return %c0_i32, %c0_i32_0 : i32, i32
  }
  func.func @transform_3(%arg0: i32) -> (i32, i32) {
    %c0_i32 = arith.constant 0 : i32
    %c0_i32_0 = arith.constant 0 : i32
    return %arg0, %c0_i32 : i32, i32
  }
}

module attributes {stable_mosaic.version = 11 : i64} {
  func.func @_matmul_kernel(%arg0: i32, %arg1: i32, %arg2: i32, %arg3: memref<32x128xbf16, #tpu.memory_space<vmem>>, %arg4: memref<128x128xbf16, #tpu.memory_space<vmem>>, %arg5: memref<1x128xf32, #tpu.memory_space<vmem>>, %arg6: memref<32x128xbf16, #tpu.memory_space<vmem>>, %arg7: memref<32x128xf32, #tpu.memory_space<vmem>>) attributes {dimension_semantics = [#tpu.dimension_semantics<parallel>, #tpu.dimension_semantics<parallel>, #tpu.dimension_semantics<arbitrary>], iteration_bounds = array<i64: 1, 1, 1>, scalar_prefetch = 0 : i64, scratch_operands = 1 : i64, tpu.core_type = #tpu.core_type<tc>, window_params = [{transform_indices = @transform_0, window_bounds = array<i64: 32, 128>}, {transform_indices = @transform_1, window_bounds = array<i64: 128, 128>}, {transform_indices = @transform_2, window_bounds = array<i64: 1, 128>}, {transform_indices = @transform_3, window_bounds = array<i64: 32, 128>}]} {
    %c0_i32 = arith.constant 0 : i32
    %0 = arith.cmpi eq, %arg2, %c0_i32 : i32
    %1 = arith.extui %0 : i1 to i32
    %c0_i32_0 = arith.constant 0 : i32
    %2 = arith.cmpi ne, %1, %c0_i32_0 : i32
    scf.if %2 {
      %cst_10 = arith.constant 0.000000e+00 : f32
      %12 = vector.broadcast %cst_10 : f32 to vector<32x128xf32>
      %c0_11 = arith.constant 0 : index
      %c0_12 = arith.constant 0 : index
      %13 = vector.load %arg7[%c0_11, %c0_12] : memref<32x128xf32, #tpu.memory_space<vmem>>, vector<32x128xf32>
      tpu.vector_store %arg7[%c0_11, %c0_12], %12 {strides = array<i32>} : memref<32x128xf32, #tpu.memory_space<vmem>>, vector<32x128xf32>,
    } else {
    }
    %c0 = arith.constant 0 : index
    %c0_1 = arith.constant 0 : index
    %3 = vector.load %arg7[%c0, %c0_1] : memref<32x128xf32, #tpu.memory_space<vmem>>, vector<32x128xf32>
    %c0_2 = arith.constant 0 : index
    %c0_3 = arith.constant 0 : index
    %4 = vector.load %arg3[%c0_2, %c0_3] : memref<32x128xbf16, #tpu.memory_space<vmem>>, vector<32x128xbf16>
    %c0_4 = arith.constant 0 : index
    %c0_5 = arith.constant 0 : index
    %5 = vector.load %arg4[%c0_4, %c0_5] : memref<128x128xbf16, #tpu.memory_space<vmem>>, vector<128x128xbf16>
    %cst = arith.constant dense<0.000000e+00> : vector<32x128xf32>
    %6 = tpu.matmul %4, %5, %cst {dimension_numbers = #tpu.dot_dimension_numbers<[1], [0], [0], [1], [0, 0, 1, 1], [], []>} : vector<32x128xbf16>, vector<128x128xbf16>, vector<32x128xf32> -> vector<32x128xf32>
    %7 = arith.addf %3, %6 : vector<32x128xf32>
    %c0_6 = arith.constant 0 : index
    %c0_7 = arith.constant 0 : index
    %8 = vector.load %arg7[%c0_6, %c0_7] : memref<32x128xf32, #tpu.memory_space<vmem>>, vector<32x128xf32>
    tpu.vector_store %arg7[%c0_6, %c0_7], %7 {strides = array<i32>} : memref<32x128xf32, #tpu.memory_space<vmem>>, vector<32x128xf32>,
    %c0_i32_8 = arith.constant 0 : i32
    %9 = arith.cmpi eq, %arg2, %c0_i32_8 : i32
    %10 = arith.extui %9 : i1 to i32
    %c0_i32_9 = arith.constant 0 : i32
    %11 = arith.cmpi ne, %10, %c0_i32_9 : i32
    scf.if %11 {
      %c0_10 = arith.constant 0 : index
      %c0_11 = arith.constant 0 : index
      %12 = vector.load %arg7[%c0_10, %c0_11] : memref<32x128xf32, #tpu.memory_space<vmem>>, vector<32x128xf32>
      %c0_12 = arith.constant 0 : index
      %c0_13 = arith.constant 0 : index
      %13 = vector.load %arg5[%c0_12, %c0_13] : memref<1x128xf32, #tpu.memory_space<vmem>>, vector<1x128xf32>
      %14 = vector.broadcast %13 : vector<1x128xf32> to vector<32x128xf32>
      %15 = arith.addf %12, %14 : vector<32x128xf32>
      %16 = arith.truncf %15 : vector<32x128xf32> to vector<32x128xbf16>
      %c0_14 = arith.constant 0 : index
      %c0_15 = arith.constant 0 : index
      %17 = vector.load %arg6[%c0_14, %c0_15] : memref<32x128xbf16, #tpu.memory_space<vmem>>, vector<32x128xbf16>
      tpu.vector_store %arg6[%c0_14, %c0_15], %16 {strides = array<i32>} : memref<32x128xbf16, #tpu.memory_space<vmem>>, vector<32x128xbf16>,
    } else {
    }
    return
  }
  func.func @transform_0(%arg0: i32, %arg1: i32, %arg2: i32) -> (i32, i32) {
    %c0_i32 = arith.constant 0 : i32
    return %arg0, %arg2 : i32, i32
  }
  func.func @transform_1(%arg0: i32, %arg1: i32, %arg2: i32) -> (i32, i32) {
    %c0_i32 = arith.constant 0 : i32
    return %arg2, %arg1 : i32, i32
  }
  func.func @transform_2(%arg0: i32, %arg1: i32, %arg2: i32) -> (i32, i32) {
    %c0_i32 = arith.constant 0 : i32
    %c0_i32_0 = arith.constant 0 : i32
    return %c0_i32, %arg1 : i32, i32
  }
  func.func @transform_3(%arg0: i32, %arg1: i32, %arg2: i32) -> (i32, i32) {
    %c0_i32 = arith.constant 0 : i32
    return %arg0, %arg1 : i32, i32
  }
}

module attributes {stable_mosaic.version = 11 : i64} {
  func.func @_conv_kernel(%arg0: i32, %arg1: memref<8x7x32xbf16, #tpu.memory_space<vmem>>, %arg2: memref<4x32xf32, #tpu.memory_space<vmem>>, %arg3: memref<1x32xf32, #tpu.memory_space<vmem>>, %arg4: memref<8x4x32xbf16, #tpu.memory_space<vmem>>) attributes {dimension_semantics = [#tpu.dimension_semantics<parallel>], iteration_bounds = array<i64: 1>, scalar_prefetch = 0 : i64, scratch_operands = 0 : i64, tpu.core_type = #tpu.core_type<tc>, window_params = [{transform_indices = @transform_0, window_bounds = array<i64: 8, 7, 32>}, {pipeline_mode = #tpu.pipeline_mode<synchronous>, transform_indices = @transform_1, window_bounds = array<i64: 4, 32>}, {pipeline_mode = #tpu.pipeline_mode<synchronous>, transform_indices = @transform_2, window_bounds = array<i64: 1, 32>}, {transform_indices = @transform_3, window_bounds = array<i64: 8, 4, 32>}]} {
    %c0 = arith.constant 0 : index
    %c0_0 = arith.constant 0 : index
    %0 = vector.load %arg2[%c0, %c0_0] : memref<4x32xf32, #tpu.memory_space<vmem>>, vector<4x32xf32>
    %c0_1 = arith.constant 0 : index
    %c0_2 = arith.constant 0 : index
    %1 = vector.load %arg3[%c0_1, %c0_2] : memref<1x32xf32, #tpu.memory_space<vmem>>, vector<1x32xf32>
    %2 = vector.shape_cast %1 : vector<1x32xf32> to vector<1x1x32xf32>
    %c0_3 = arith.constant 0 : index
    %c0_4 = arith.constant 0 : index
    %c0_5 = arith.constant 0 : index
    %3 = vector.load %arg1[%c0_3, %c0_4, %c0_5] : memref<8x7x32xbf16, #tpu.memory_space<vmem>>, vector<8x7x32xbf16>
    %4 = arith.extf %3 : vector<8x7x32xbf16> to vector<8x7x32xf32>
    %cst = arith.constant 0.000000e+00 : f32
    %5 = vector.broadcast %cst : f32 to vector<8x4x32xf32>
    %6 = vector.extract_strided_slice %0 {offsets = [0, 0], sizes = [1, 32], strides = [1, 1]} : vector<4x32xf32> to vector<1x32xf32>
    %7 = vector.shape_cast %6 : vector<1x32xf32> to vector<1x1x32xf32>
    %8 = vector.extract_strided_slice %4 {offsets = [0, 0, 0], sizes = [8, 4, 32], strides = [1, 1, 1]} : vector<8x7x32xf32> to vector<8x4x32xf32>
    %9 = vector.broadcast %7 : vector<1x1x32xf32> to vector<8x4x32xf32>
    %10 = arith.mulf %9, %8 : vector<8x4x32xf32>
    %11 = arith.addf %5, %10 : vector<8x4x32xf32>
    %12 = vector.extract_strided_slice %0 {offsets = [1, 0], sizes = [1, 32], strides = [1, 1]} : vector<4x32xf32> to vector<1x32xf32>
    %13 = vector.shape_cast %12 : vector<1x32xf32> to vector<1x1x32xf32>
    %14 = vector.extract_strided_slice %4 {offsets = [0, 1, 0], sizes = [8, 4, 32], strides = [1, 1, 1]} : vector<8x7x32xf32> to vector<8x4x32xf32>
    %15 = vector.broadcast %13 : vector<1x1x32xf32> to vector<8x4x32xf32>
    %16 = arith.mulf %15, %14 : vector<8x4x32xf32>
    %17 = arith.addf %11, %16 : vector<8x4x32xf32>
    %18 = vector.extract_strided_slice %0 {offsets = [2, 0], sizes = [1, 32], strides = [1, 1]} : vector<4x32xf32> to vector<1x32xf32>
    %19 = vector.shape_cast %18 : vector<1x32xf32> to vector<1x1x32xf32>
    %20 = vector.extract_strided_slice %4 {offsets = [0, 2, 0], sizes = [8, 4, 32], strides = [1, 1, 1]} : vector<8x7x32xf32> to vector<8x4x32xf32>
    %21 = vector.broadcast %19 : vector<1x1x32xf32> to vector<8x4x32xf32>
    %22 = arith.mulf %21, %20 : vector<8x4x32xf32>
    %23 = arith.addf %17, %22 : vector<8x4x32xf32>
    %24 = vector.extract_strided_slice %0 {offsets = [3, 0], sizes = [1, 32], strides = [1, 1]} : vector<4x32xf32> to vector<1x32xf32>
    %25 = vector.shape_cast %24 : vector<1x32xf32> to vector<1x1x32xf32>
    %26 = vector.extract_strided_slice %4 {offsets = [0, 3, 0], sizes = [8, 4, 32], strides = [1, 1, 1]} : vector<8x7x32xf32> to vector<8x4x32xf32>
    %27 = vector.broadcast %25 : vector<1x1x32xf32> to vector<8x4x32xf32>
    %28 = arith.mulf %27, %26 : vector<8x4x32xf32>
    %29 = arith.addf %23, %28 : vector<8x4x32xf32>
    %30 = vector.broadcast %2 : vector<1x1x32xf32> to vector<8x4x32xf32>
    %31 = arith.addf %29, %30 : vector<8x4x32xf32>
    %32 = arith.negf %31 : vector<8x4x32xf32>
    %33 = math.exp %32 : vector<8x4x32xf32>
    %cst_6 = arith.constant 1.000000e+00 : f32
    %34 = vector.broadcast %cst_6 : f32 to vector<8x4x32xf32>
    %35 = arith.addf %34, %33 : vector<8x4x32xf32>
    %36 = arith.divf %34, %35 : vector<8x4x32xf32>
    %37 = arith.mulf %31, %36 : vector<8x4x32xf32>
    %38 = arith.truncf %37 : vector<8x4x32xf32> to vector<8x4x32xbf16>
    %c0_7 = arith.constant 0 : index
    %c0_8 = arith.constant 0 : index
    %c0_9 = arith.constant 0 : index
    %39 = vector.load %arg4[%c0_7, %c0_8, %c0_9] : memref<8x4x32xbf16, #tpu.memory_space<vmem>>, vector<8x4x32xbf16>
    tpu.vector_store %arg4[%c0_7, %c0_8, %c0_9], %38 {strides = array<i32>} : memref<8x4x32xbf16, #tpu.memory_space<vmem>>, vector<8x4x32xbf16>,
    return
  }
  func.func @transform_0(%arg0: i32) -> (i32, i32, i32) {
    %c0_i32 = arith.constant 0 : i32
    %c0_i32_0 = arith.constant 0 : i32
    %c0_i32_1 = arith.constant 0 : i32
    return %arg0, %c0_i32, %c0_i32_0 : i32, i32, i32
  }
  func.func @transform_1(%arg0: i32) -> (i32, i32) {
    %c0_i32 = arith.constant 0 : i32
    %c0_i32_0 = arith.constant 0 : i32
    %c0_i32_1 = arith.constant 0 : i32
    return %c0_i32, %c0_i32_0 : i32, i32
  }
  func.func @transform_2(%arg0: i32) -> (i32, i32) {
    %c0_i32 = arith.constant 0 : i32
    %c0_i32_0 = arith.constant 0 : i32
    %c0_i32_1 = arith.constant 0 : i32
    return %c0_i32, %c0_i32_0 : i32, i32
  }
  func.func @transform_3(%arg0: i32) -> (i32, i32, i32) {
    %c0_i32 = arith.constant 0 : i32
    %c0_i32_0 = arith.constant 0 : i32
    %c0_i32_1 = arith.constant 0 : i32
    return %arg0, %c0_i32, %c0_i32_0 : i32, i32, i32
  }
}

module attributes {stable_mosaic.version = 11 : i64} {
  func.func @_scan_kernel(%arg0: i32, %arg1: memref<8x4x32xbf16, #tpu.memory_space<vmem>>, %arg2: memref<8x4x32xbf16, #tpu.memory_space<vmem>>, %arg3: memref<8x4x32xbf16, #tpu.memory_space<vmem>>, %arg4: memref<8x16x4xbf16, #tpu.memory_space<vmem>>, %arg5: memref<8x16x4xbf16, #tpu.memory_space<vmem>>, %arg6: memref<16x32xf32, #tpu.memory_space<vmem>>, %arg7: memref<1x32xf32, #tpu.memory_space<vmem>>, %arg8: memref<1x32xf32, #tpu.memory_space<vmem>>, %arg9: memref<8x4x32xbf16, #tpu.memory_space<vmem>>) attributes {dimension_semantics = [#tpu.dimension_semantics<parallel>], iteration_bounds = array<i64: 1>, scalar_prefetch = 0 : i64, scratch_operands = 0 : i64, tpu.core_type = #tpu.core_type<tc>, window_params = [{transform_indices = @transform_0, window_bounds = array<i64: 8, 4, 32>}, {transform_indices = @transform_1, window_bounds = array<i64: 8, 4, 32>}, {transform_indices = @transform_2, window_bounds = array<i64: 8, 4, 32>}, {transform_indices = @transform_3, window_bounds = array<i64: 8, 16, 4>}, {transform_indices = @transform_4, window_bounds = array<i64: 8, 16, 4>}, {pipeline_mode = #tpu.pipeline_mode<synchronous>, transform_indices = @transform_5, window_bounds = array<i64: 16, 32>}, {pipeline_mode = #tpu.pipeline_mode<synchronous>, transform_indices = @transform_6, window_bounds = array<i64: 1, 32>}, {pipeline_mode = #tpu.pipeline_mode<synchronous>, transform_indices = @transform_7, window_bounds = array<i64: 1, 32>}, {transform_indices = @transform_8, window_bounds = array<i64: 8, 4, 32>}]} {
    %c0 = arith.constant 0 : index
    %c0_0 = arith.constant 0 : index
    %0 = vector.load %arg6[%c0, %c0_0] : memref<16x32xf32, #tpu.memory_space<vmem>>, vector<16x32xf32>
    %c0_1 = arith.constant 0 : index
    %c0_2 = arith.constant 0 : index
    %c0_3 = arith.constant 0 : index
    %1 = vector.load %arg1[%c0_1, %c0_2, %c0_3] : memref<8x4x32xbf16, #tpu.memory_space<vmem>>, vector<8x4x32xbf16>
    %2 = arith.extf %1 : vector<8x4x32xbf16> to vector<8x4x32xf32>
    %c0_4 = arith.constant 0 : index
    %c0_5 = arith.constant 0 : index
    %c0_6 = arith.constant 0 : index
    %3 = vector.load %arg3[%c0_4, %c0_5, %c0_6] : memref<8x4x32xbf16, #tpu.memory_space<vmem>>, vector<8x4x32xbf16>
    %4 = arith.extf %3 : vector<8x4x32xbf16> to vector<8x4x32xf32>
    %c0_7 = arith.constant 0 : index
    %c0_8 = arith.constant 0 : index
    %c0_9 = arith.constant 0 : index
    %5 = vector.load %arg2[%c0_7, %c0_8, %c0_9] : memref<8x4x32xbf16, #tpu.memory_space<vmem>>, vector<8x4x32xbf16>
    %6 = arith.extf %5 : vector<8x4x32xbf16> to vector<8x4x32xf32>
    %c0_10 = arith.constant 0 : index
    %c0_11 = arith.constant 0 : index
    %7 = vector.load %arg8[%c0_10, %c0_11] : memref<1x32xf32, #tpu.memory_space<vmem>>, vector<1x32xf32>
    %8 = vector.shape_cast %7 : vector<1x32xf32> to vector<1x1x32xf32>
    %9 = vector.broadcast %8 : vector<1x1x32xf32> to vector<8x4x32xf32>
    %10 = arith.addf %6, %9 : vector<8x4x32xf32>
    %cst = arith.constant 2.000000e+01 : f32
    %11 = vector.broadcast %cst : f32 to vector<8x4x32xf32>
    %12 = arith.cmpf ogt, %10, %11 : vector<8x4x32xf32>
    %cst_12 = arith.constant 2.000000e+01 : f32
    %13 = vector.broadcast %cst_12 : f32 to vector<8x4x32xf32>
    %14 = arith.minimumf %10, %13 : vector<8x4x32xf32>
    %15 = math.exp %14 : vector<8x4x32xf32>
    %cst_13 = arith.constant 1.000000e+00 : f32
    %16 = vector.broadcast %cst_13 : f32 to vector<8x4x32xf32>
    %17 = arith.addf %16, %15 : vector<8x4x32xf32>
    %18 = math.log %17 : vector<8x4x32xf32>
    %19 = arith.select %12, %10, %18 : vector<8x4x32xi1>, vector<8x4x32xf32>
    %c0_14 = arith.constant 0 : index
    %c0_15 = arith.constant 0 : index
    %c0_16 = arith.constant 0 : index
    %20 = vector.load %arg4[%c0_14, %c0_15, %c0_16] : memref<8x16x4xbf16, #tpu.memory_space<vmem>>, vector<8x16x4xbf16>
    %21 = arith.extf %20 : vector<8x16x4xbf16> to vector<8x16x4xf32>
    %c0_17 = arith.constant 0 : index
    %c0_18 = arith.constant 0 : index
    %c0_19 = arith.constant 0 : index
    %22 = vector.load %arg5[%c0_17, %c0_18, %c0_19] : memref<8x16x4xbf16, #tpu.memory_space<vmem>>, vector<8x16x4xbf16>
    %23 = arith.extf %22 : vector<8x16x4xbf16> to vector<8x16x4xf32>
    %24 = vector.extract_strided_slice %19 {offsets = [0, 0, 0], sizes = [8, 1, 32], strides = [1, 1, 1]} : vector<8x4x32xf32> to vector<8x1x32xf32>
    %25 = vector.shape_cast %0 : vector<16x32xf32> to vector<1x16x32xf32>
    %26 = vector.broadcast %24 : vector<8x1x32xf32> to vector<8x16x32xf32>
    %27 = vector.broadcast %25 : vector<1x16x32xf32> to vector<8x16x32xf32>
    %28 = arith.mulf %26, %27 : vector<8x16x32xf32>
    %29 = math.exp %28 : vector<8x16x32xf32>
    %30 = vector.extract_strided_slice %2 {offsets = [0, 0, 0], sizes = [8, 1, 32], strides = [1, 1, 1]} : vector<8x4x32xf32> to vector<8x1x32xf32>
    %31 = arith.mulf %24, %30 : vector<8x1x32xf32>
    %32 = vector.extract_strided_slice %21 {offsets = [0, 0, 0], sizes = [8, 16, 1], strides = [1, 1, 1]} : vector<8x16x4xf32> to vector<8x16x1xf32>
    %33 = vector.broadcast %31 : vector<8x1x32xf32> to vector<8x16x32xf32>
    %34 = vector.broadcast %32 : vector<8x16x1xf32> to vector<8x16x32xf32>
    %35 = arith.mulf %33, %34 : vector<8x16x32xf32>
    %36 = vector.extract_strided_slice %23 {offsets = [0, 0, 0], sizes = [8, 16, 1], strides = [1, 1, 1]} : vector<8x16x4xf32> to vector<8x16x1xf32>
    %37 = vector.extract_strided_slice %19 {offsets = [0, 1, 0], sizes = [8, 1, 32], strides = [1, 1, 1]} : vector<8x4x32xf32> to vector<8x1x32xf32>
    %38 = vector.shape_cast %0 : vector<16x32xf32> to vector<1x16x32xf32>
    %39 = vector.broadcast %37 : vector<8x1x32xf32> to vector<8x16x32xf32>
    %40 = vector.broadcast %38 : vector<1x16x32xf32> to vector<8x16x32xf32>
    %41 = arith.mulf %39, %40 : vector<8x16x32xf32>
    %42 = math.exp %41 : vector<8x16x32xf32>
    %43 = vector.extract_strided_slice %2 {offsets = [0, 1, 0], sizes = [8, 1, 32], strides = [1, 1, 1]} : vector<8x4x32xf32> to vector<8x1x32xf32>
    %44 = arith.mulf %37, %43 : vector<8x1x32xf32>
    %45 = vector.extract_strided_slice %21 {offsets = [0, 0, 1], sizes = [8, 16, 1], strides = [1, 1, 1]} : vector<8x16x4xf32> to vector<8x16x1xf32>
    %46 = vector.broadcast %44 : vector<8x1x32xf32> to vector<8x16x32xf32>
    %47 = vector.broadcast %45 : vector<8x16x1xf32> to vector<8x16x32xf32>
    %48 = arith.mulf %46, %47 : vector<8x16x32xf32>
    %49 = vector.extract_strided_slice %23 {offsets = [0, 0, 1], sizes = [8, 16, 1], strides = [1, 1, 1]} : vector<8x16x4xf32> to vector<8x16x1xf32>
    %50 = vector.extract_strided_slice %19 {offsets = [0, 2, 0], sizes = [8, 1, 32], strides = [1, 1, 1]} : vector<8x4x32xf32> to vector<8x1x32xf32>
    %51 = vector.shape_cast %0 : vector<16x32xf32> to vector<1x16x32xf32>
    %52 = vector.broadcast %50 : vector<8x1x32xf32> to vector<8x16x32xf32>
    %53 = vector.broadcast %51 : vector<1x16x32xf32> to vector<8x16x32xf32>
    %54 = arith.mulf %52, %53 : vector<8x16x32xf32>
    %55 = math.exp %54 : vector<8x16x32xf32>
    %56 = vector.extract_strided_slice %2 {offsets = [0, 2, 0], sizes = [8, 1, 32], strides = [1, 1, 1]} : vector<8x4x32xf32> to vector<8x1x32xf32>
    %57 = arith.mulf %50, %56 : vector<8x1x32xf32>
    %58 = vector.extract_strided_slice %21 {offsets = [0, 0, 2], sizes = [8, 16, 1], strides = [1, 1, 1]} : vector<8x16x4xf32> to vector<8x16x1xf32>
    %59 = vector.broadcast %57 : vector<8x1x32xf32> to vector<8x16x32xf32>
    %60 = vector.broadcast %58 : vector<8x16x1xf32> to vector<8x16x32xf32>
    %61 = arith.mulf %59, %60 : vector<8x16x32xf32>
    %62 = vector.extract_strided_slice %23 {offsets = [0, 0, 2], sizes = [8, 16, 1], strides = [1, 1, 1]} : vector<8x16x4xf32> to vector<8x16x1xf32>
    %63 = vector.extract_strided_slice %19 {offsets = [0, 3, 0], sizes = [8, 1, 32], strides = [1, 1, 1]} : vector<8x4x32xf32> to vector<8x1x32xf32>
    %64 = vector.shape_cast %0 : vector<16x32xf32> to vector<1x16x32xf32>
    %65 = vector.broadcast %63 : vector<8x1x32xf32> to vector<8x16x32xf32>
    %66 = vector.broadcast %64 : vector<1x16x32xf32> to vector<8x16x32xf32>
    %67 = arith.mulf %65, %66 : vector<8x16x32xf32>
    %68 = math.exp %67 : vector<8x16x32xf32>
    %69 = vector.extract_strided_slice %2 {offsets = [0, 3, 0], sizes = [8, 1, 32], strides = [1, 1, 1]} : vector<8x4x32xf32> to vector<8x1x32xf32>
    %70 = arith.mulf %63, %69 : vector<8x1x32xf32>
    %71 = vector.extract_strided_slice %21 {offsets = [0, 0, 3], sizes = [8, 16, 1], strides = [1, 1, 1]} : vector<8x16x4xf32> to vector<8x16x1xf32>
    %72 = vector.broadcast %70 : vector<8x1x32xf32> to vector<8x16x32xf32>
    %73 = vector.broadcast %71 : vector<8x16x1xf32> to vector<8x16x32xf32>
    %74 = arith.mulf %72, %73 : vector<8x16x32xf32>
    %75 = vector.extract_strided_slice %23 {offsets = [0, 0, 3], sizes = [8, 16, 1], strides = [1, 1, 1]} : vector<8x16x4xf32> to vector<8x16x1xf32>
    %cst_20 = arith.constant 0.000000e+00 : f32
    %76 = vector.broadcast %cst_20 : f32 to vector<8x16x32xf32>
    %77 = arith.mulf %68, %76 : vector<8x16x32xf32>
    %78 = arith.addf %77, %74 : vector<8x16x32xf32>
    %79 = vector.broadcast %75 : vector<8x16x1xf32> to vector<8x16x32xf32>
    %80 = arith.mulf %78, %79 : vector<8x16x32xf32>
    %cst_21 = arith.constant dense<0.000000e+00> : vector<8x32xf32>
    %81 = vector.multi_reduction <add>, %80, %cst_21 [1] : vector<8x16x32xf32> to vector<8x32xf32>
    %82 = vector.shape_cast %81 : vector<8x32xf32> to vector<8x1x32xf32>
    %83 = arith.mulf %55, %78 : vector<8x16x32xf32>
    %84 = arith.addf %83, %61 : vector<8x16x32xf32>
    %85 = vector.broadcast %62 : vector<8x16x1xf32> to vector<8x16x32xf32>
    %86 = arith.mulf %84, %85 : vector<8x16x32xf32>
    %cst_22 = arith.constant dense<0.000000e+00> : vector<8x32xf32>
    %87 = vector.multi_reduction <add>, %86, %cst_22 [1] : vector<8x16x32xf32> to vector<8x32xf32>
    %88 = vector.shape_cast %87 : vector<8x32xf32> to vector<8x1x32xf32>
    %89 = arith.mulf %42, %84 : vector<8x16x32xf32>
    %90 = arith.addf %89, %48 : vector<8x16x32xf32>
    %91 = vector.broadcast %49 : vector<8x16x1xf32> to vector<8x16x32xf32>
    %92 = arith.mulf %90, %91 : vector<8x16x32xf32>
    %cst_23 = arith.constant dense<0.000000e+00> : vector<8x32xf32>
    %93 = vector.multi_reduction <add>, %92, %cst_23 [1] : vector<8x16x32xf32> to vector<8x32xf32>
    %94 = vector.shape_cast %93 : vector<8x32xf32> to vector<8x1x32xf32>
    %95 = arith.mulf %29, %90 : vector<8x16x32xf32>
    %96 = arith.addf %95, %35 : vector<8x16x32xf32>
    %97 = vector.broadcast %36 : vector<8x16x1xf32> to vector<8x16x32xf32>
    %98 = arith.mulf %96, %97 : vector<8x16x32xf32>
    %cst_24 = arith.constant dense<0.000000e+00> : vector<8x32xf32>
    %99 = vector.multi_reduction <add>, %98, %cst_24 [1] : vector<8x16x32xf32> to vector<8x32xf32>
    %100 = vector.shape_cast %99 : vector<8x32xf32> to vector<8x1x32xf32>
    %101 = tpu.concatenate %100, %94, %88, %82 in 1 : vector<8x1x32xf32>, vector<8x1x32xf32>, vector<8x1x32xf32>, vector<8x1x32xf32> -> vector<8x4x32xf32>
    %c0_25 = arith.constant 0 : index
    %c0_26 = arith.constant 0 : index
    %102 = vector.load %arg7[%c0_25, %c0_26] : memref<1x32xf32, #tpu.memory_space<vmem>>, vector<1x32xf32>
    %103 = vector.shape_cast %102 : vector<1x32xf32> to vector<1x1x32xf32>
    %104 = vector.broadcast %103 : vector<1x1x32xf32> to vector<8x4x32xf32>
    %105 = arith.mulf %2, %104 : vector<8x4x32xf32>
    %106 = arith.addf %101, %105 : vector<8x4x32xf32>
    %107 = arith.negf %4 : vector<8x4x32xf32>
    %108 = math.exp %107 : vector<8x4x32xf32>
    %cst_27 = arith.constant 1.000000e+00 : f32
    %109 = vector.broadcast %cst_27 : f32 to vector<8x4x32xf32>
    %110 = arith.addf %109, %108 : vector<8x4x32xf32>
    %111 = arith.divf %109, %110 : vector<8x4x32xf32>
    %112 = arith.mulf %4, %111 : vector<8x4x32xf32>
    %113 = arith.mulf %106, %112 : vector<8x4x32xf32>
    %114 = arith.truncf %113 : vector<8x4x32xf32> to vector<8x4x32xbf16>
    %c0_28 = arith.constant 0 : index
    %c0_29 = arith.constant 0 : index
    %c0_30 = arith.constant 0 : index
    %115 = vector.load %arg9[%c0_28, %c0_29, %c0_30] : memref<8x4x32xbf16, #tpu.memory_space<vmem>>, vector<8x4x32xbf16>
    tpu.vector_store %arg9[%c0_28, %c0_29, %c0_30], %114 {strides = array<i32>} : memref<8x4x32xbf16, #tpu.memory_space<vmem>>, vector<8x4x32xbf16>,
    return
  }
  func.func @transform_0(%arg0: i32) -> (i32, i32, i32) {
    %c0_i32 = arith.constant 0 : i32
    %c0_i32_0 = arith.constant 0 : i32
    %c0_i32_1 = arith.constant 0 : i32
    return %arg0, %c0_i32, %c0_i32_0 : i32, i32, i32
  }
  func.func @transform_1(%arg0: i32) -> (i32, i32, i32) {
    %c0_i32 = arith.constant 0 : i32
    %c0_i32_0 = arith.constant 0 : i32
    %c0_i32_1 = arith.constant 0 : i32
    return %arg0, %c0_i32, %c0_i32_0 : i32, i32, i32
  }
  func.func @transform_2(%arg0: i32) -> (i32, i32, i32) {
    %c0_i32 = arith.constant 0 : i32
    %c0_i32_0 = arith.constant 0 : i32
    %c0_i32_1 = arith.constant 0 : i32
    return %arg0, %c0_i32, %c0_i32_0 : i32, i32, i32
  }
  func.func @transform_3(%arg0: i32) -> (i32, i32, i32) {
    %c0_i32 = arith.constant 0 : i32
    %c0_i32_0 = arith.constant 0 : i32
    %c0_i32_1 = arith.constant 0 : i32
    return %arg0, %c0_i32, %c0_i32_0 : i32, i32, i32
  }
  func.func @transform_4(%arg0: i32) -> (i32, i32, i32) {
    %c0_i32 = arith.constant 0 : i32
    %c0_i32_0 = arith.constant 0 : i32
    %c0_i32_1 = arith.constant 0 : i32
    return %arg0, %c0_i32, %c0_i32_0 : i32, i32, i32
  }
  func.func @transform_5(%arg0: i32) -> (i32, i32) {
    %c0_i32 = arith.constant 0 : i32
    %c0_i32_0 = arith.constant 0 : i32
    %c0_i32_1 = arith.constant 0 : i32
    return %c0_i32, %c0_i32_0 : i32, i32
  }
  func.func @transform_6(%arg0: i32) -> (i32, i32) {
    %c0_i32 = arith.constant 0 : i32
    %c0_i32_0 = arith.constant 0 : i32
    %c0_i32_1 = arith.constant 0 : i32
    return %c0_i32, %c0_i32_0 : i32, i32
  }
  func.func @transform_7(%arg0: i32) -> (i32, i32) {
    %c0_i32 = arith.constant 0 : i32
    %c0_i32_0 = arith.constant 0 : i32
    %c0_i32_1 = arith.constant 0 : i32
    return %c0_i32, %c0_i32_0 : i32, i32
  }
  func.func @transform_8(%arg0: i32) -> (i32, i32, i32) {
    %c0_i32 = arith.constant 0 : i32
    %c0_i32_0 = arith.constant 0 : i32
    %c0_i32_1 = arith.constant 0 : i32
    return %arg0, %c0_i32, %c0_i32_0 : i32, i32, i32
  }
}

module attributes {stable_mosaic.version = 11 : i64} {
  func.func @_scan_kernel(%arg0: i32, %arg1: memref<8x4x32xbf16, #tpu.memory_space<vmem>>, %arg2: memref<8x4x32xbf16, #tpu.memory_space<vmem>>, %arg3: memref<8x4x32xbf16, #tpu.memory_space<vmem>>, %arg4: memref<8x16x4xbf16, #tpu.memory_space<vmem>>, %arg5: memref<8x16x4xbf16, #tpu.memory_space<vmem>>, %arg6: memref<16x32xf32, #tpu.memory_space<vmem>>, %arg7: memref<1x32xf32, #tpu.memory_space<vmem>>, %arg8: memref<1x32xf32, #tpu.memory_space<vmem>>, %arg9: memref<8x4x32xbf16, #tpu.memory_space<vmem>>) attributes {dimension_semantics = [#tpu.dimension_semantics<parallel>], iteration_bounds = array<i64: 1>, scalar_prefetch = 0 : i64, scratch_operands = 0 : i64, tpu.core_type = #tpu.core_type<tc>, window_params = [{transform_indices = @transform_0, window_bounds = array<i64: 8, 4, 32>}, {transform_indices = @transform_1, window_bounds = array<i64: 8, 4, 32>}, {transform_indices = @transform_2, window_bounds = array<i64: 8, 4, 32>}, {transform_indices = @transform_3, window_bounds = array<i64: 8, 16, 4>}, {transform_indices = @transform_4, window_bounds = array<i64: 8, 16, 4>}, {pipeline_mode = #tpu.pipeline_mode<synchronous>, transform_indices = @transform_5, window_bounds = array<i64: 16, 32>}, {pipeline_mode = #tpu.pipeline_mode<synchronous>, transform_indices = @transform_6, window_bounds = array<i64: 1, 32>}, {pipeline_mode = #tpu.pipeline_mode<synchronous>, transform_indices = @transform_7, window_bounds = array<i64: 1, 32>}, {transform_indices = @transform_8, window_bounds = array<i64: 8, 4, 32>}]} {
    %c0 = arith.constant 0 : index
    %c0_0 = arith.constant 0 : index
    %0 = vector.load %arg6[%c0, %c0_0] : memref<16x32xf32, #tpu.memory_space<vmem>>, vector<16x32xf32>
    %c0_1 = arith.constant 0 : index
    %c0_2 = arith.constant 0 : index
    %c0_3 = arith.constant 0 : index
    %1 = vector.load %arg1[%c0_1, %c0_2, %c0_3] : memref<8x4x32xbf16, #tpu.memory_space<vmem>>, vector<8x4x32xbf16>
    %2 = arith.extf %1 : vector<8x4x32xbf16> to vector<8x4x32xf32>
    %c0_4 = arith.constant 0 : index
    %c0_5 = arith.constant 0 : index
    %c0_6 = arith.constant 0 : index
    %3 = vector.load %arg3[%c0_4, %c0_5, %c0_6] : memref<8x4x32xbf16, #tpu.memory_space<vmem>>, vector<8x4x32xbf16>
    %4 = arith.extf %3 : vector<8x4x32xbf16> to vector<8x4x32xf32>
    %c0_7 = arith.constant 0 : index
    %c0_8 = arith.constant 0 : index
    %c0_9 = arith.constant 0 : index
    %5 = vector.load %arg2[%c0_7, %c0_8, %c0_9] : memref<8x4x32xbf16, #tpu.memory_space<vmem>>, vector<8x4x32xbf16>
    %6 = arith.extf %5 : vector<8x4x32xbf16> to vector<8x4x32xf32>
    %c0_10 = arith.constant 0 : index
    %c0_11 = arith.constant 0 : index
    %7 = vector.load %arg8[%c0_10, %c0_11] : memref<1x32xf32, #tpu.memory_space<vmem>>, vector<1x32xf32>
    %8 = vector.shape_cast %7 : vector<1x32xf32> to vector<1x1x32xf32>
    %9 = vector.broadcast %8 : vector<1x1x32xf32> to vector<8x4x32xf32>
    %10 = arith.addf %6, %9 : vector<8x4x32xf32>
    %cst = arith.constant 2.000000e+01 : f32
    %11 = vector.broadcast %cst : f32 to vector<8x4x32xf32>
    %12 = arith.cmpf ogt, %10, %11 : vector<8x4x32xf32>
    %cst_12 = arith.constant 2.000000e+01 : f32
    %13 = vector.broadcast %cst_12 : f32 to vector<8x4x32xf32>
    %14 = arith.minimumf %10, %13 : vector<8x4x32xf32>
    %15 = math.exp %14 : vector<8x4x32xf32>
    %cst_13 = arith.constant 1.000000e+00 : f32
    %16 = vector.broadcast %cst_13 : f32 to vector<8x4x32xf32>
    %17 = arith.addf %16, %15 : vector<8x4x32xf32>
    %18 = math.log %17 : vector<8x4x32xf32>
    %19 = arith.select %12, %10, %18 : vector<8x4x32xi1>, vector<8x4x32xf32>
    %c0_14 = arith.constant 0 : index
    %c0_15 = arith.constant 0 : index
    %c0_16 = arith.constant 0 : index
    %20 = vector.load %arg4[%c0_14, %c0_15, %c0_16] : memref<8x16x4xbf16, #tpu.memory_space<vmem>>, vector<8x16x4xbf16>
    %21 = arith.extf %20 : vector<8x16x4xbf16> to vector<8x16x4xf32>
    %c0_17 = arith.constant 0 : index
    %c0_18 = arith.constant 0 : index
    %c0_19 = arith.constant 0 : index
    %22 = vector.load %arg5[%c0_17, %c0_18, %c0_19] : memref<8x16x4xbf16, #tpu.memory_space<vmem>>, vector<8x16x4xbf16>
    %23 = arith.extf %22 : vector<8x16x4xbf16> to vector<8x16x4xf32>
    %24 = vector.extract_strided_slice %19 {offsets = [0, 0, 0], sizes = [8, 1, 32], strides = [1, 1, 1]} : vector<8x4x32xf32> to vector<8x1x32xf32>
    %25 = vector.shape_cast %0 : vector<16x32xf32> to vector<1x16x32xf32>
    %26 = vector.broadcast %24 : vector<8x1x32xf32> to vector<8x16x32xf32>
    %27 = vector.broadcast %25 : vector<1x16x32xf32> to vector<8x16x32xf32>
    %28 = arith.mulf %26, %27 : vector<8x16x32xf32>
    %29 = math.exp %28 : vector<8x16x32xf32>
    %30 = vector.extract_strided_slice %2 {offsets = [0, 0, 0], sizes = [8, 1, 32], strides = [1, 1, 1]} : vector<8x4x32xf32> to vector<8x1x32xf32>
    %31 = arith.mulf %24, %30 : vector<8x1x32xf32>
    %32 = vector.extract_strided_slice %21 {offsets = [0, 0, 0], sizes = [8, 16, 1], strides = [1, 1, 1]} : vector<8x16x4xf32> to vector<8x16x1xf32>
    %33 = vector.broadcast %31 : vector<8x1x32xf32> to vector<8x16x32xf32>
    %34 = vector.broadcast %32 : vector<8x16x1xf32> to vector<8x16x32xf32>
    %35 = arith.mulf %33, %34 : vector<8x16x32xf32>
    %36 = vector.extract_strided_slice %23 {offsets = [0, 0, 0], sizes = [8, 16, 1], strides = [1, 1, 1]} : vector<8x16x4xf32> to vector<8x16x1xf32>
    %37 = vector.extract_strided_slice %19 {offsets = [0, 1, 0], sizes = [8, 1, 32], strides = [1, 1, 1]} : vector<8x4x32xf32> to vector<8x1x32xf32>
    %38 = vector.shape_cast %0 : vector<16x32xf32> to vector<1x16x32xf32>
    %39 = vector.broadcast %37 : vector<8x1x32xf32> to vector<8x16x32xf32>
    %40 = vector.broadcast %38 : vector<1x16x32xf32> to vector<8x16x32xf32>
    %41 = arith.mulf %39, %40 : vector<8x16x32xf32>
    %42 = math.exp %41 : vector<8x16x32xf32>
    %43 = vector.extract_strided_slice %2 {offsets = [0, 1, 0], sizes = [8, 1, 32], strides = [1, 1, 1]} : vector<8x4x32xf32> to vector<8x1x32xf32>
    %44 = arith.mulf %37, %43 : vector<8x1x32xf32>
    %45 = vector.extract_strided_slice %21 {offsets = [0, 0, 1], sizes = [8, 16, 1], strides = [1, 1, 1]} : vector<8x16x4xf32> to vector<8x16x1xf32>
    %46 = vector.broadcast %44 : vector<8x1x32xf32> to vector<8x16x32xf32>
    %47 = vector.broadcast %45 : vector<8x16x1xf32> to vector<8x16x32xf32>
    %48 = arith.mulf %46, %47 : vector<8x16x32xf32>
    %49 = vector.extract_strided_slice %23 {offsets = [0, 0, 1], sizes = [8, 16, 1], strides = [1, 1, 1]} : vector<8x16x4xf32> to vector<8x16x1xf32>
    %50 = vector.extract_strided_slice %19 {offsets = [0, 2, 0], sizes = [8, 1, 32], strides = [1, 1, 1]} : vector<8x4x32xf32> to vector<8x1x32xf32>
    %51 = vector.shape_cast %0 : vector<16x32xf32> to vector<1x16x32xf32>
    %52 = vector.broadcast %50 : vector<8x1x32xf32> to vector<8x16x32xf32>
    %53 = vector.broadcast %51 : vector<1x16x32xf32> to vector<8x16x32xf32>
    %54 = arith.mulf %52, %53 : vector<8x16x32xf32>
    %55 = math.exp %54 : vector<8x16x32xf32>
    %56 = vector.extract_strided_slice %2 {offsets = [0, 2, 0], sizes = [8, 1, 32], strides = [1, 1, 1]} : vector<8x4x32xf32> to vector<8x1x32xf32>
    %57 = arith.mulf %50, %56 : vector<8x1x32xf32>
    %58 = vector.extract_strided_slice %21 {offsets = [0, 0, 2], sizes = [8, 16, 1], strides = [1, 1, 1]} : vector<8x16x4xf32> to vector<8x16x1xf32>
    %59 = vector.broadcast %57 : vector<8x1x32xf32> to vector<8x16x32xf32>
    %60 = vector.broadcast %58 : vector<8x16x1xf32> to vector<8x16x32xf32>
    %61 = arith.mulf %59, %60 : vector<8x16x32xf32>
    %62 = vector.extract_strided_slice %23 {offsets = [0, 0, 2], sizes = [8, 16, 1], strides = [1, 1, 1]} : vector<8x16x4xf32> to vector<8x16x1xf32>
    %63 = vector.extract_strided_slice %19 {offsets = [0, 3, 0], sizes = [8, 1, 32], strides = [1, 1, 1]} : vector<8x4x32xf32> to vector<8x1x32xf32>
    %64 = vector.shape_cast %0 : vector<16x32xf32> to vector<1x16x32xf32>
    %65 = vector.broadcast %63 : vector<8x1x32xf32> to vector<8x16x32xf32>
    %66 = vector.broadcast %64 : vector<1x16x32xf32> to vector<8x16x32xf32>
    %67 = arith.mulf %65, %66 : vector<8x16x32xf32>
    %68 = math.exp %67 : vector<8x16x32xf32>
    %69 = vector.extract_strided_slice %2 {offsets = [0, 3, 0], sizes = [8, 1, 32], strides = [1, 1, 1]} : vector<8x4x32xf32> to vector<8x1x32xf32>
    %70 = arith.mulf %63, %69 : vector<8x1x32xf32>
    %71 = vector.extract_strided_slice %21 {offsets = [0, 0, 3], sizes = [8, 16, 1], strides = [1, 1, 1]} : vector<8x16x4xf32> to vector<8x16x1xf32>
    %72 = vector.broadcast %70 : vector<8x1x32xf32> to vector<8x16x32xf32>
    %73 = vector.broadcast %71 : vector<8x16x1xf32> to vector<8x16x32xf32>
    %74 = arith.mulf %72, %73 : vector<8x16x32xf32>
    %75 = vector.extract_strided_slice %23 {offsets = [0, 0, 3], sizes = [8, 16, 1], strides = [1, 1, 1]} : vector<8x16x4xf32> to vector<8x16x1xf32>
    %cst_20 = arith.constant 0.000000e+00 : f32
    %76 = vector.broadcast %cst_20 : f32 to vector<8x16x32xf32>
    %77 = arith.mulf %29, %76 : vector<8x16x32xf32>
    %78 = arith.addf %77, %35 : vector<8x16x32xf32>
    %79 = vector.broadcast %36 : vector<8x16x1xf32> to vector<8x16x32xf32>
    %80 = arith.mulf %78, %79 : vector<8x16x32xf32>
    %cst_21 = arith.constant dense<0.000000e+00> : vector<8x32xf32>
    %81 = vector.multi_reduction <add>, %80, %cst_21 [1] : vector<8x16x32xf32> to vector<8x32xf32>
    %82 = vector.shape_cast %81 : vector<8x32xf32> to vector<8x1x32xf32>
    %83 = arith.mulf %42, %78 : vector<8x16x32xf32>
    %84 = arith.addf %83, %48 : vector<8x16x32xf32>
    %85 = vector.broadcast %49 : vector<8x16x1xf32> to vector<8x16x32xf32>
    %86 = arith.mulf %84, %85 : vector<8x16x32xf32>
    %cst_22 = arith.constant dense<0.000000e+00> : vector<8x32xf32>
    %87 = vector.multi_reduction <add>, %86, %cst_22 [1] : vector<8x16x32xf32> to vector<8x32xf32>
    %88 = vector.shape_cast %87 : vector<8x32xf32> to vector<8x1x32xf32>
    %89 = arith.mulf %55, %84 : vector<8x16x32xf32>
    %90 = arith.addf %89, %61 : vector<8x16x32xf32>
    %91 = vector.broadcast %62 : vector<8x16x1xf32> to vector<8x16x32xf32>
    %92 = arith.mulf %90, %91 : vector<8x16x32xf32>
    %cst_23 = arith.constant dense<0.000000e+00> : vector<8x32xf32>
    %93 = vector.multi_reduction <add>, %92, %cst_23 [1] : vector<8x16x32xf32> to vector<8x32xf32>
    %94 = vector.shape_cast %93 : vector<8x32xf32> to vector<8x1x32xf32>
    %95 = arith.mulf %68, %90 : vector<8x16x32xf32>
    %96 = arith.addf %95, %74 : vector<8x16x32xf32>
    %97 = vector.broadcast %75 : vector<8x16x1xf32> to vector<8x16x32xf32>
    %98 = arith.mulf %96, %97 : vector<8x16x32xf32>
    %cst_24 = arith.constant dense<0.000000e+00> : vector<8x32xf32>
    %99 = vector.multi_reduction <add>, %98, %cst_24 [1] : vector<8x16x32xf32> to vector<8x32xf32>
    %100 = vector.shape_cast %99 : vector<8x32xf32> to vector<8x1x32xf32>
    %101 = tpu.concatenate %82, %88, %94, %100 in 1 : vector<8x1x32xf32>, vector<8x1x32xf32>, vector<8x1x32xf32>, vector<8x1x32xf32> -> vector<8x4x32xf32>
    %c0_25 = arith.constant 0 : index
    %c0_26 = arith.constant 0 : index
    %102 = vector.load %arg7[%c0_25, %c0_26] : memref<1x32xf32, #tpu.memory_space<vmem>>, vector<1x32xf32>
    %103 = vector.shape_cast %102 : vector<1x32xf32> to vector<1x1x32xf32>
    %104 = vector.broadcast %103 : vector<1x1x32xf32> to vector<8x4x32xf32>
    %105 = arith.mulf %2, %104 : vector<8x4x32xf32>
    %106 = arith.addf %101, %105 : vector<8x4x32xf32>
    %107 = arith.negf %4 : vector<8x4x32xf32>
    %108 = math.exp %107 : vector<8x4x32xf32>
    %cst_27 = arith.constant 1.000000e+00 : f32
    %109 = vector.broadcast %cst_27 : f32 to vector<8x4x32xf32>
    %110 = arith.addf %109, %108 : vector<8x4x32xf32>
    %111 = arith.divf %109, %110 : vector<8x4x32xf32>
    %112 = arith.mulf %4, %111 : vector<8x4x32xf32>
    %113 = arith.mulf %106, %112 : vector<8x4x32xf32>
    %114 = arith.truncf %113 : vector<8x4x32xf32> to vector<8x4x32xbf16>
    %c0_28 = arith.constant 0 : index
    %c0_29 = arith.constant 0 : index
    %c0_30 = arith.constant 0 : index
    %115 = vector.load %arg9[%c0_28, %c0_29, %c0_30] : memref<8x4x32xbf16, #tpu.memory_space<vmem>>, vector<8x4x32xbf16>
    tpu.vector_store %arg9[%c0_28, %c0_29, %c0_30], %114 {strides = array<i32>} : memref<8x4x32xbf16, #tpu.memory_space<vmem>>, vector<8x4x32xbf16>,
    return
  }
  func.func @transform_0(%arg0: i32) -> (i32, i32, i32) {
    %c0_i32 = arith.constant 0 : i32
    %c0_i32_0 = arith.constant 0 : i32
    %c0_i32_1 = arith.constant 0 : i32
    return %arg0, %c0_i32, %c0_i32_0 : i32, i32, i32
  }
  func.func @transform_1(%arg0: i32) -> (i32, i32, i32) {
    %c0_i32 = arith.constant 0 : i32
    %c0_i32_0 = arith.constant 0 : i32
    %c0_i32_1 = arith.constant 0 : i32
    return %arg0, %c0_i32, %c0_i32_0 : i32, i32, i32
  }
  func.func @transform_2(%arg0: i32) -> (i32, i32, i32) {
    %c0_i32 = arith.constant 0 : i32
    %c0_i32_0 = arith.constant 0 : i32
    %c0_i32_1 = arith.constant 0 : i32
    return %arg0, %c0_i32, %c0_i32_0 : i32, i32, i32
  }
  func.func @transform_3(%arg0: i32) -> (i32, i32, i32) {
    %c0_i32 = arith.constant 0 : i32
    %c0_i32_0 = arith.constant 0 : i32
    %c0_i32_1 = arith.constant 0 : i32
    return %arg0, %c0_i32, %c0_i32_0 : i32, i32, i32
  }
  func.func @transform_4(%arg0: i32) -> (i32, i32, i32) {
    %c0_i32 = arith.constant 0 : i32
    %c0_i32_0 = arith.constant 0 : i32
    %c0_i32_1 = arith.constant 0 : i32
    return %arg0, %c0_i32, %c0_i32_0 : i32, i32, i32
  }
  func.func @transform_5(%arg0: i32) -> (i32, i32) {
    %c0_i32 = arith.constant 0 : i32
    %c0_i32_0 = arith.constant 0 : i32
    %c0_i32_1 = arith.constant 0 : i32
    return %c0_i32, %c0_i32_0 : i32, i32
  }
  func.func @transform_6(%arg0: i32) -> (i32, i32) {
    %c0_i32 = arith.constant 0 : i32
    %c0_i32_0 = arith.constant 0 : i32
    %c0_i32_1 = arith.constant 0 : i32
    return %c0_i32, %c0_i32_0 : i32, i32
  }
  func.func @transform_7(%arg0: i32) -> (i32, i32) {
    %c0_i32 = arith.constant 0 : i32
    %c0_i32_0 = arith.constant 0 : i32
    %c0_i32_1 = arith.constant 0 : i32
    return %c0_i32, %c0_i32_0 : i32, i32
  }
  func.func @transform_8(%arg0: i32) -> (i32, i32, i32) {
    %c0_i32 = arith.constant 0 : i32
    %c0_i32_0 = arith.constant 0 : i32
    %c0_i32_1 = arith.constant 0 : i32
    return %arg0, %c0_i32, %c0_i32_0 : i32, i32, i32
  }
}

module attributes {stable_mosaic.version = 11 : i64} {
  func.func @_matmul_kernel(%arg0: i32, %arg1: i32, %arg2: i32, %arg3: memref<32x128xbf16, #tpu.memory_space<vmem>>, %arg4: memref<128x128xbf16, #tpu.memory_space<vmem>>, %arg5: memref<1x128xf32, #tpu.memory_space<vmem>>, %arg6: memref<32x128xbf16, #tpu.memory_space<vmem>>, %arg7: memref<32x128xbf16, #tpu.memory_space<vmem>>, %arg8: memref<32x128xf32, #tpu.memory_space<vmem>>) attributes {dimension_semantics = [#tpu.dimension_semantics<parallel>, #tpu.dimension_semantics<parallel>, #tpu.dimension_semantics<arbitrary>], iteration_bounds = array<i64: 1, 1, 1>, scalar_prefetch = 0 : i64, scratch_operands = 1 : i64, tpu.core_type = #tpu.core_type<tc>, window_params = [{transform_indices = @transform_0, window_bounds = array<i64: 32, 128>}, {transform_indices = @transform_1, window_bounds = array<i64: 128, 128>}, {transform_indices = @transform_2, window_bounds = array<i64: 1, 128>}, {transform_indices = @transform_3, window_bounds = array<i64: 32, 128>}, {transform_indices = @transform_4, window_bounds = array<i64: 32, 128>}]} {
    %c0_i32 = arith.constant 0 : i32
    %0 = arith.cmpi eq, %arg2, %c0_i32 : i32
    %1 = arith.extui %0 : i1 to i32
    %c0_i32_0 = arith.constant 0 : i32
    %2 = arith.cmpi ne, %1, %c0_i32_0 : i32
    scf.if %2 {
      %cst_10 = arith.constant 0.000000e+00 : f32
      %12 = vector.broadcast %cst_10 : f32 to vector<32x128xf32>
      %c0_11 = arith.constant 0 : index
      %c0_12 = arith.constant 0 : index
      %13 = vector.load %arg8[%c0_11, %c0_12] : memref<32x128xf32, #tpu.memory_space<vmem>>, vector<32x128xf32>
      tpu.vector_store %arg8[%c0_11, %c0_12], %12 {strides = array<i32>} : memref<32x128xf32, #tpu.memory_space<vmem>>, vector<32x128xf32>,
    } else {
    }
    %c0 = arith.constant 0 : index
    %c0_1 = arith.constant 0 : index
    %3 = vector.load %arg8[%c0, %c0_1] : memref<32x128xf32, #tpu.memory_space<vmem>>, vector<32x128xf32>
    %c0_2 = arith.constant 0 : index
    %c0_3 = arith.constant 0 : index
    %4 = vector.load %arg3[%c0_2, %c0_3] : memref<32x128xbf16, #tpu.memory_space<vmem>>, vector<32x128xbf16>
    %c0_4 = arith.constant 0 : index
    %c0_5 = arith.constant 0 : index
    %5 = vector.load %arg4[%c0_4, %c0_5] : memref<128x128xbf16, #tpu.memory_space<vmem>>, vector<128x128xbf16>
    %cst = arith.constant dense<0.000000e+00> : vector<32x128xf32>
    %6 = tpu.matmul %4, %5, %cst {dimension_numbers = #tpu.dot_dimension_numbers<[1], [0], [0], [1], [0, 0, 1, 1], [], []>} : vector<32x128xbf16>, vector<128x128xbf16>, vector<32x128xf32> -> vector<32x128xf32>
    %7 = arith.addf %3, %6 : vector<32x128xf32>
    %c0_6 = arith.constant 0 : index
    %c0_7 = arith.constant 0 : index
    %8 = vector.load %arg8[%c0_6, %c0_7] : memref<32x128xf32, #tpu.memory_space<vmem>>, vector<32x128xf32>
    tpu.vector_store %arg8[%c0_6, %c0_7], %7 {strides = array<i32>} : memref<32x128xf32, #tpu.memory_space<vmem>>, vector<32x128xf32>,
    %c0_i32_8 = arith.constant 0 : i32
    %9 = arith.cmpi eq, %arg2, %c0_i32_8 : i32
    %10 = arith.extui %9 : i1 to i32
    %c0_i32_9 = arith.constant 0 : i32
    %11 = arith.cmpi ne, %10, %c0_i32_9 : i32
    scf.if %11 {
      %c0_10 = arith.constant 0 : index
      %c0_11 = arith.constant 0 : index
      %12 = vector.load %arg8[%c0_10, %c0_11] : memref<32x128xf32, #tpu.memory_space<vmem>>, vector<32x128xf32>
      %c0_12 = arith.constant 0 : index
      %c0_13 = arith.constant 0 : index
      %13 = vector.load %arg5[%c0_12, %c0_13] : memref<1x128xf32, #tpu.memory_space<vmem>>, vector<1x128xf32>
      %14 = vector.broadcast %13 : vector<1x128xf32> to vector<32x128xf32>
      %15 = arith.addf %12, %14 : vector<32x128xf32>
      %c0_14 = arith.constant 0 : index
      %c0_15 = arith.constant 0 : index
      %16 = vector.load %arg6[%c0_14, %c0_15] : memref<32x128xbf16, #tpu.memory_space<vmem>>, vector<32x128xbf16>
      %17 = arith.extf %16 : vector<32x128xbf16> to vector<32x128xf32>
      %18 = arith.addf %15, %17 : vector<32x128xf32>
      %19 = arith.truncf %18 : vector<32x128xf32> to vector<32x128xbf16>
      %c0_16 = arith.constant 0 : index
      %c0_17 = arith.constant 0 : index
      %20 = vector.load %arg7[%c0_16, %c0_17] : memref<32x128xbf16, #tpu.memory_space<vmem>>, vector<32x128xbf16>
      tpu.vector_store %arg7[%c0_16, %c0_17], %19 {strides = array<i32>} : memref<32x128xbf16, #tpu.memory_space<vmem>>, vector<32x128xbf16>,
    } else {
    }
    return
  }
  func.func @transform_0(%arg0: i32, %arg1: i32, %arg2: i32) -> (i32, i32) {
    %c0_i32 = arith.constant 0 : i32
    return %arg0, %arg2 : i32, i32
  }
  func.func @transform_1(%arg0: i32, %arg1: i32, %arg2: i32) -> (i32, i32) {
    %c0_i32 = arith.constant 0 : i32
    return %arg2, %arg1 : i32, i32
  }
  func.func @transform_2(%arg0: i32, %arg1: i32, %arg2: i32) -> (i32, i32) {
    %c0_i32 = arith.constant 0 : i32
    %c0_i32_0 = arith.constant 0 : i32
    return %c0_i32, %arg1 : i32, i32
  }
  func.func @transform_3(%arg0: i32, %arg1: i32, %arg2: i32) -> (i32, i32) {
    %c0_i32 = arith.constant 0 : i32
    return %arg0, %arg1 : i32, i32
  }
  func.func @transform_4(%arg0: i32, %arg1: i32, %arg2: i32) -> (i32, i32) {
    %c0_i32 = arith.constant 0 : i32
    return %arg0, %arg1 : i32, i32
  }
}

module attributes {stable_mosaic.version = 11 : i64} {
  func.func @_matmul_kernel(%arg0: i32, %arg1: i32, %arg2: i32, %arg3: memref<40x128xbf16, #tpu.memory_space<vmem>>, %arg4: memref<128x128xbf16, #tpu.memory_space<vmem>>, %arg5: memref<1x128xf32, #tpu.memory_space<vmem>>, %arg6: memref<40x128xbf16, #tpu.memory_space<vmem>>, %arg7: memref<40x128xf32, #tpu.memory_space<vmem>>) attributes {dimension_semantics = [#tpu.dimension_semantics<parallel>, #tpu.dimension_semantics<parallel>, #tpu.dimension_semantics<arbitrary>], iteration_bounds = array<i64: 1, 1, 1>, scalar_prefetch = 0 : i64, scratch_operands = 1 : i64, tpu.core_type = #tpu.core_type<tc>, window_params = [{transform_indices = @transform_0, window_bounds = array<i64: 40, 128>}, {transform_indices = @transform_1, window_bounds = array<i64: 128, 128>}, {transform_indices = @transform_2, window_bounds = array<i64: 1, 128>}, {transform_indices = @transform_3, window_bounds = array<i64: 40, 128>}]} {
    %c0_i32 = arith.constant 0 : i32
    %0 = arith.cmpi eq, %arg2, %c0_i32 : i32
    %1 = arith.extui %0 : i1 to i32
    %c0_i32_0 = arith.constant 0 : i32
    %2 = arith.cmpi ne, %1, %c0_i32_0 : i32
    scf.if %2 {
      %cst_10 = arith.constant 0.000000e+00 : f32
      %12 = vector.broadcast %cst_10 : f32 to vector<40x128xf32>
      %c0_11 = arith.constant 0 : index
      %c0_12 = arith.constant 0 : index
      %13 = vector.load %arg7[%c0_11, %c0_12] : memref<40x128xf32, #tpu.memory_space<vmem>>, vector<40x128xf32>
      tpu.vector_store %arg7[%c0_11, %c0_12], %12 {strides = array<i32>} : memref<40x128xf32, #tpu.memory_space<vmem>>, vector<40x128xf32>,
    } else {
    }
    %c0 = arith.constant 0 : index
    %c0_1 = arith.constant 0 : index
    %3 = vector.load %arg7[%c0, %c0_1] : memref<40x128xf32, #tpu.memory_space<vmem>>, vector<40x128xf32>
    %c0_2 = arith.constant 0 : index
    %c0_3 = arith.constant 0 : index
    %4 = vector.load %arg3[%c0_2, %c0_3] : memref<40x128xbf16, #tpu.memory_space<vmem>>, vector<40x128xbf16>
    %c0_4 = arith.constant 0 : index
    %c0_5 = arith.constant 0 : index
    %5 = vector.load %arg4[%c0_4, %c0_5] : memref<128x128xbf16, #tpu.memory_space<vmem>>, vector<128x128xbf16>
    %cst = arith.constant dense<0.000000e+00> : vector<40x128xf32>
    %6 = tpu.matmul %4, %5, %cst {dimension_numbers = #tpu.dot_dimension_numbers<[1], [0], [0], [1], [0, 0, 1, 1], [], []>} : vector<40x128xbf16>, vector<128x128xbf16>, vector<40x128xf32> -> vector<40x128xf32>
    %7 = arith.addf %3, %6 : vector<40x128xf32>
    %c0_6 = arith.constant 0 : index
    %c0_7 = arith.constant 0 : index
    %8 = vector.load %arg7[%c0_6, %c0_7] : memref<40x128xf32, #tpu.memory_space<vmem>>, vector<40x128xf32>
    tpu.vector_store %arg7[%c0_6, %c0_7], %7 {strides = array<i32>} : memref<40x128xf32, #tpu.memory_space<vmem>>, vector<40x128xf32>,
    %c0_i32_8 = arith.constant 0 : i32
    %9 = arith.cmpi eq, %arg2, %c0_i32_8 : i32
    %10 = arith.extui %9 : i1 to i32
    %c0_i32_9 = arith.constant 0 : i32
    %11 = arith.cmpi ne, %10, %c0_i32_9 : i32
    scf.if %11 {
      %c0_10 = arith.constant 0 : index
      %c0_11 = arith.constant 0 : index
      %12 = vector.load %arg7[%c0_10, %c0_11] : memref<40x128xf32, #tpu.memory_space<vmem>>, vector<40x128xf32>
      %c0_12 = arith.constant 0 : index
      %c0_13 = arith.constant 0 : index
      %13 = vector.load %arg5[%c0_12, %c0_13] : memref<1x128xf32, #tpu.memory_space<vmem>>, vector<1x128xf32>
      %14 = vector.broadcast %13 : vector<1x128xf32> to vector<40x128xf32>
      %15 = arith.addf %12, %14 : vector<40x128xf32>
      %16 = arith.truncf %15 : vector<40x128xf32> to vector<40x128xbf16>
      %c0_14 = arith.constant 0 : index
      %c0_15 = arith.constant 0 : index
      %17 = vector.load %arg6[%c0_14, %c0_15] : memref<40x128xbf16, #tpu.memory_space<vmem>>, vector<40x128xbf16>
      tpu.vector_store %arg6[%c0_14, %c0_15], %16 {strides = array<i32>} : memref<40x128xbf16, #tpu.memory_space<vmem>>, vector<40x128xbf16>,
    } else {
    }
    return
  }
  func.func @transform_0(%arg0: i32, %arg1: i32, %arg2: i32) -> (i32, i32) {
    %c0_i32 = arith.constant 0 : i32
    return %arg0, %arg2 : i32, i32
  }
  func.func @transform_1(%arg0: i32, %arg1: i32, %arg2: i32) -> (i32, i32) {
    %c0_i32 = arith.constant 0 : i32
    return %arg2, %arg1 : i32, i32
  }
  func.func @transform_2(%arg0: i32, %arg1: i32, %arg2: i32) -> (i32, i32) {
    %c0_i32 = arith.constant 0 : i32
    %c0_i32_0 = arith.constant 0 : i32
    return %c0_i32, %arg1 : i32, i32
  }
  func.func @transform_3(%arg0: i32, %arg1: i32, %arg2: i32) -> (i32, i32) {
    %c0_i32 = arith.constant 0 : i32
    return %arg0, %arg1 : i32, i32
  }
}

module attributes {stable_mosaic.version = 11 : i64} {
  func.func @_ln_kernel(%arg0: i32, %arg1: memref<40x32xbf16, #tpu.memory_space<vmem>>, %arg2: memref<1x32xf32, #tpu.memory_space<vmem>>, %arg3: memref<1x32xf32, #tpu.memory_space<vmem>>, %arg4: memref<40x32xbf16, #tpu.memory_space<vmem>>) attributes {dimension_semantics = [#tpu.dimension_semantics<parallel>], iteration_bounds = array<i64: 1>, scalar_prefetch = 0 : i64, scratch_operands = 0 : i64, tpu.core_type = #tpu.core_type<tc>, window_params = [{transform_indices = @transform_0, window_bounds = array<i64: 40, 32>}, {pipeline_mode = #tpu.pipeline_mode<synchronous>, transform_indices = @transform_1, window_bounds = array<i64: 1, 32>}, {pipeline_mode = #tpu.pipeline_mode<synchronous>, transform_indices = @transform_2, window_bounds = array<i64: 1, 32>}, {transform_indices = @transform_3, window_bounds = array<i64: 40, 32>}]} {
    %c0 = arith.constant 0 : index
    %c0_0 = arith.constant 0 : index
    %0 = vector.load %arg1[%c0, %c0_0] : memref<40x32xbf16, #tpu.memory_space<vmem>>, vector<40x32xbf16>
    %1 = arith.extf %0 : vector<40x32xbf16> to vector<40x32xf32>
    %cst = arith.constant dense<0.000000e+00> : vector<40xf32>
    %2 = vector.multi_reduction <add>, %1, %cst [1] : vector<40x32xf32> to vector<40xf32>
    %3 = vector.shape_cast %2 : vector<40xf32> to vector<40x1xf32>
    %cst_1 = arith.constant 3.200000e+01 : f32
    %4 = vector.broadcast %cst_1 : f32 to vector<40x1xf32>
    %5 = arith.divf %3, %4 : vector<40x1xf32>
    %6 = vector.broadcast %5 : vector<40x1xf32> to vector<40x32xf32>
    %7 = arith.subf %1, %6 : vector<40x32xf32>
    %8 = arith.mulf %7, %7 : vector<40x32xf32>
    %cst_2 = arith.constant dense<0.000000e+00> : vector<40xf32>
    %9 = vector.multi_reduction <add>, %8, %cst_2 [1] : vector<40x32xf32> to vector<40xf32>
    %10 = vector.shape_cast %9 : vector<40xf32> to vector<40x1xf32>
    %cst_3 = arith.constant 3.200000e+01 : f32
    %11 = vector.broadcast %cst_3 : f32 to vector<40x1xf32>
    %12 = arith.divf %10, %11 : vector<40x1xf32>
    %cst_4 = arith.constant 9.99999997E-7 : f32
    %13 = vector.broadcast %cst_4 : f32 to vector<40x1xf32>
    %14 = arith.addf %12, %13 : vector<40x1xf32>
    %15 = math.rsqrt %14 : vector<40x1xf32>
    %16 = vector.broadcast %15 : vector<40x1xf32> to vector<40x32xf32>
    %17 = arith.mulf %7, %16 : vector<40x32xf32>
    %c0_5 = arith.constant 0 : index
    %c0_6 = arith.constant 0 : index
    %18 = vector.load %arg2[%c0_5, %c0_6] : memref<1x32xf32, #tpu.memory_space<vmem>>, vector<1x32xf32>
    %19 = vector.broadcast %18 : vector<1x32xf32> to vector<40x32xf32>
    %20 = arith.mulf %17, %19 : vector<40x32xf32>
    %c0_7 = arith.constant 0 : index
    %c0_8 = arith.constant 0 : index
    %21 = vector.load %arg3[%c0_7, %c0_8] : memref<1x32xf32, #tpu.memory_space<vmem>>, vector<1x32xf32>
    %22 = vector.broadcast %21 : vector<1x32xf32> to vector<40x32xf32>
    %23 = arith.addf %20, %22 : vector<40x32xf32>
    %24 = arith.truncf %23 : vector<40x32xf32> to vector<40x32xbf16>
    %c0_9 = arith.constant 0 : index
    %c0_10 = arith.constant 0 : index
    %25 = vector.load %arg4[%c0_9, %c0_10] : memref<40x32xbf16, #tpu.memory_space<vmem>>, vector<40x32xbf16>
    tpu.vector_store %arg4[%c0_9, %c0_10], %24 {strides = array<i32>} : memref<40x32xbf16, #tpu.memory_space<vmem>>, vector<40x32xbf16>,
    return
  }
  func.func @transform_0(%arg0: i32) -> (i32, i32) {
    %c0_i32 = arith.constant 0 : i32
    %c0_i32_0 = arith.constant 0 : i32
    return %arg0, %c0_i32 : i32, i32
  }
  func.func @transform_1(%arg0: i32) -> (i32, i32) {
    %c0_i32 = arith.constant 0 : i32
    %c0_i32_0 = arith.constant 0 : i32
    %c0_i32_1 = arith.constant 0 : i32
    return %c0_i32, %c0_i32_0 : i32, i32
  }
  func.func @transform_2(%arg0: i32) -> (i32, i32) {
    %c0_i32 = arith.constant 0 : i32
    %c0_i32_0 = arith.constant 0 : i32
    %c0_i32_1 = arith.constant 0 : i32
    return %c0_i32, %c0_i32_0 : i32, i32
  }
  func.func @transform_3(%arg0: i32) -> (i32, i32) {
    %c0_i32 = arith.constant 0 : i32
    %c0_i32_0 = arith.constant 0 : i32
    return %arg0, %c0_i32 : i32, i32
  }
}

module attributes {stable_mosaic.version = 11 : i64} {
  func.func @_attn_kernel(%arg0: i32, %arg1: memref<5x8x32xbf16, #tpu.memory_space<vmem>>, %arg2: memref<5x8x32xbf16, #tpu.memory_space<vmem>>, %arg3: memref<5x8x32xbf16, #tpu.memory_space<vmem>>, %arg4: memref<5x8x32xbf16, #tpu.memory_space<vmem>>) attributes {dimension_semantics = [#tpu.dimension_semantics<parallel>], iteration_bounds = array<i64: 1>, scalar_prefetch = 0 : i64, scratch_operands = 0 : i64, tpu.core_type = #tpu.core_type<tc>, window_params = [{transform_indices = @transform_0, window_bounds = array<i64: 5, 8, 32>}, {transform_indices = @transform_1, window_bounds = array<i64: 5, 8, 32>}, {transform_indices = @transform_2, window_bounds = array<i64: 5, 8, 32>}, {transform_indices = @transform_3, window_bounds = array<i64: 5, 8, 32>}]} {
    %c0 = arith.constant 0 : index
    %c0_0 = arith.constant 0 : index
    %c0_1 = arith.constant 0 : index
    %0 = vector.load %arg1[%c0, %c0_0, %c0_1] : memref<5x8x32xbf16, #tpu.memory_space<vmem>>, vector<5x8x32xbf16>
    %c0_2 = arith.constant 0 : index
    %c0_3 = arith.constant 0 : index
    %c0_4 = arith.constant 0 : index
    %1 = vector.load %arg2[%c0_2, %c0_3, %c0_4] : memref<5x8x32xbf16, #tpu.memory_space<vmem>>, vector<5x8x32xbf16>
    %c0_5 = arith.constant 0 : index
    %c0_6 = arith.constant 0 : index
    %c0_7 = arith.constant 0 : index
    %2 = vector.load %arg3[%c0_5, %c0_6, %c0_7] : memref<5x8x32xbf16, #tpu.memory_space<vmem>>, vector<5x8x32xbf16>
    %3 = vector.extract_strided_slice %0 {offsets = [0, 0, 0], sizes = [5, 8, 8], strides = [1, 1, 1]} : vector<5x8x32xbf16> to vector<5x8x8xbf16>
    %4 = vector.extract_strided_slice %1 {offsets = [0, 0, 0], sizes = [5, 8, 8], strides = [1, 1, 1]} : vector<5x8x32xbf16> to vector<5x8x8xbf16>
    %5 = vector.extract_strided_slice %2 {offsets = [0, 0, 0], sizes = [5, 8, 8], strides = [1, 1, 1]} : vector<5x8x32xbf16> to vector<5x8x8xbf16>
    "tpu.trace_start"() <{level = 10 : i32, message = "gld,gmd->glm"}> : () -> ()
    %cst = arith.constant dense<0.000000e+00> : vector<5x8x8xf32>
    %6 = tpu.matmul %3, %4, %cst {dimension_numbers = #tpu.dot_dimension_numbers<[2], [2], [1], [1], [0, 0, 0, 1, 1, 1], [0], [0]>} : vector<5x8x8xbf16>, vector<5x8x8xbf16>, vector<5x8x8xf32> -> vector<5x8x8xf32>
    "tpu.trace_stop"() : () -> ()
    %cst_8 = arith.constant 0.353553385 : f32
    %7 = vector.broadcast %cst_8 : f32 to vector<5x8x8xf32>
    %8 = arith.mulf %6, %7 : vector<5x8x8xf32>
    %cst_9 = arith.constant dense<0xFF800000> : vector<5x8xf32>
    %9 = vector.multi_reduction <maximumf>, %8, %cst_9 [2] : vector<5x8x8xf32> to vector<5x8xf32>
    %10 = vector.shape_cast %9 : vector<5x8xf32> to vector<5x8x1xf32>
    %11 = vector.broadcast %10 : vector<5x8x1xf32> to vector<5x8x8xf32>
    %12 = arith.subf %8, %11 : vector<5x8x8xf32>
    %13 = math.exp %12 : vector<5x8x8xf32>
    %cst_10 = arith.constant dense<0.000000e+00> : vector<5x8xf32>
    %14 = vector.multi_reduction <add>, %13, %cst_10 [2] : vector<5x8x8xf32> to vector<5x8xf32>
    %15 = vector.shape_cast %14 : vector<5x8xf32> to vector<5x8x1xf32>
    %16 = tpu.reciprocal %15 {approx = true} : vector<5x8x1xf32> -> vector<5x8x1xf32>
    %17 = vector.broadcast %16 : vector<5x8x1xf32> to vector<5x8x8xf32>
    %18 = arith.mulf %13, %17 : vector<5x8x8xf32>
    %19 = arith.truncf %18 : vector<5x8x8xf32> to vector<5x8x8xbf16>
    "tpu.trace_start"() <{level = 10 : i32, message = "glm,gmd->gld"}> : () -> ()
    %cst_11 = arith.constant dense<0.000000e+00> : vector<5x8x8xf32>
    %20 = tpu.matmul %19, %5, %cst_11 {dimension_numbers = #tpu.dot_dimension_numbers<[2], [1], [1], [2], [0, 0, 0, 1, 1, 2], [0], [0]>} : vector<5x8x8xbf16>, vector<5x8x8xbf16>, vector<5x8x8xf32> -> vector<5x8x8xf32>
    "tpu.trace_stop"() : () -> ()
    %21 = vector.extract_strided_slice %0 {offsets = [0, 0, 8], sizes = [5, 8, 8], strides = [1, 1, 1]} : vector<5x8x32xbf16> to vector<5x8x8xbf16>
    %22 = vector.extract_strided_slice %1 {offsets = [0, 0, 8], sizes = [5, 8, 8], strides = [1, 1, 1]} : vector<5x8x32xbf16> to vector<5x8x8xbf16>
    %23 = vector.extract_strided_slice %2 {offsets = [0, 0, 8], sizes = [5, 8, 8], strides = [1, 1, 1]} : vector<5x8x32xbf16> to vector<5x8x8xbf16>
    "tpu.trace_start"() <{level = 10 : i32, message = "gld,gmd->glm"}> : () -> ()
    %cst_12 = arith.constant dense<0.000000e+00> : vector<5x8x8xf32>
    %24 = tpu.matmul %21, %22, %cst_12 {dimension_numbers = #tpu.dot_dimension_numbers<[2], [2], [1], [1], [0, 0, 0, 1, 1, 1], [0], [0]>} : vector<5x8x8xbf16>, vector<5x8x8xbf16>, vector<5x8x8xf32> -> vector<5x8x8xf32>
    "tpu.trace_stop"() : () -> ()
    %cst_13 = arith.constant 0.353553385 : f32
    %25 = vector.broadcast %cst_13 : f32 to vector<5x8x8xf32>
    %26 = arith.mulf %24, %25 : vector<5x8x8xf32>
    %cst_14 = arith.constant dense<0xFF800000> : vector<5x8xf32>
    %27 = vector.multi_reduction <maximumf>, %26, %cst_14 [2] : vector<5x8x8xf32> to vector<5x8xf32>
    %28 = vector.shape_cast %27 : vector<5x8xf32> to vector<5x8x1xf32>
    %29 = vector.broadcast %28 : vector<5x8x1xf32> to vector<5x8x8xf32>
    %30 = arith.subf %26, %29 : vector<5x8x8xf32>
    %31 = math.exp %30 : vector<5x8x8xf32>
    %cst_15 = arith.constant dense<0.000000e+00> : vector<5x8xf32>
    %32 = vector.multi_reduction <add>, %31, %cst_15 [2] : vector<5x8x8xf32> to vector<5x8xf32>
    %33 = vector.shape_cast %32 : vector<5x8xf32> to vector<5x8x1xf32>
    %34 = tpu.reciprocal %33 {approx = true} : vector<5x8x1xf32> -> vector<5x8x1xf32>
    %35 = vector.broadcast %34 : vector<5x8x1xf32> to vector<5x8x8xf32>
    %36 = arith.mulf %31, %35 : vector<5x8x8xf32>
    %37 = arith.truncf %36 : vector<5x8x8xf32> to vector<5x8x8xbf16>
    "tpu.trace_start"() <{level = 10 : i32, message = "glm,gmd->gld"}> : () -> ()
    %cst_16 = arith.constant dense<0.000000e+00> : vector<5x8x8xf32>
    %38 = tpu.matmul %37, %23, %cst_16 {dimension_numbers = #tpu.dot_dimension_numbers<[2], [1], [1], [2], [0, 0, 0, 1, 1, 2], [0], [0]>} : vector<5x8x8xbf16>, vector<5x8x8xbf16>, vector<5x8x8xf32> -> vector<5x8x8xf32>
    "tpu.trace_stop"() : () -> ()
    %39 = vector.extract_strided_slice %0 {offsets = [0, 0, 16], sizes = [5, 8, 8], strides = [1, 1, 1]} : vector<5x8x32xbf16> to vector<5x8x8xbf16>
    %40 = vector.extract_strided_slice %1 {offsets = [0, 0, 16], sizes = [5, 8, 8], strides = [1, 1, 1]} : vector<5x8x32xbf16> to vector<5x8x8xbf16>
    %41 = vector.extract_strided_slice %2 {offsets = [0, 0, 16], sizes = [5, 8, 8], strides = [1, 1, 1]} : vector<5x8x32xbf16> to vector<5x8x8xbf16>
    "tpu.trace_start"() <{level = 10 : i32, message = "gld,gmd->glm"}> : () -> ()
    %cst_17 = arith.constant dense<0.000000e+00> : vector<5x8x8xf32>
    %42 = tpu.matmul %39, %40, %cst_17 {dimension_numbers = #tpu.dot_dimension_numbers<[2], [2], [1], [1], [0, 0, 0, 1, 1, 1], [0], [0]>} : vector<5x8x8xbf16>, vector<5x8x8xbf16>, vector<5x8x8xf32> -> vector<5x8x8xf32>
    "tpu.trace_stop"() : () -> ()
    %cst_18 = arith.constant 0.353553385 : f32
    %43 = vector.broadcast %cst_18 : f32 to vector<5x8x8xf32>
    %44 = arith.mulf %42, %43 : vector<5x8x8xf32>
    %cst_19 = arith.constant dense<0xFF800000> : vector<5x8xf32>
    %45 = vector.multi_reduction <maximumf>, %44, %cst_19 [2] : vector<5x8x8xf32> to vector<5x8xf32>
    %46 = vector.shape_cast %45 : vector<5x8xf32> to vector<5x8x1xf32>
    %47 = vector.broadcast %46 : vector<5x8x1xf32> to vector<5x8x8xf32>
    %48 = arith.subf %44, %47 : vector<5x8x8xf32>
    %49 = math.exp %48 : vector<5x8x8xf32>
    %cst_20 = arith.constant dense<0.000000e+00> : vector<5x8xf32>
    %50 = vector.multi_reduction <add>, %49, %cst_20 [2] : vector<5x8x8xf32> to vector<5x8xf32>
    %51 = vector.shape_cast %50 : vector<5x8xf32> to vector<5x8x1xf32>
    %52 = tpu.reciprocal %51 {approx = true} : vector<5x8x1xf32> -> vector<5x8x1xf32>
    %53 = vector.broadcast %52 : vector<5x8x1xf32> to vector<5x8x8xf32>
    %54 = arith.mulf %49, %53 : vector<5x8x8xf32>
    %55 = arith.truncf %54 : vector<5x8x8xf32> to vector<5x8x8xbf16>
    "tpu.trace_start"() <{level = 10 : i32, message = "glm,gmd->gld"}> : () -> ()
    %cst_21 = arith.constant dense<0.000000e+00> : vector<5x8x8xf32>
    %56 = tpu.matmul %55, %41, %cst_21 {dimension_numbers = #tpu.dot_dimension_numbers<[2], [1], [1], [2], [0, 0, 0, 1, 1, 2], [0], [0]>} : vector<5x8x8xbf16>, vector<5x8x8xbf16>, vector<5x8x8xf32> -> vector<5x8x8xf32>
    "tpu.trace_stop"() : () -> ()
    %57 = vector.extract_strided_slice %0 {offsets = [0, 0, 24], sizes = [5, 8, 8], strides = [1, 1, 1]} : vector<5x8x32xbf16> to vector<5x8x8xbf16>
    %58 = vector.extract_strided_slice %1 {offsets = [0, 0, 24], sizes = [5, 8, 8], strides = [1, 1, 1]} : vector<5x8x32xbf16> to vector<5x8x8xbf16>
    %59 = vector.extract_strided_slice %2 {offsets = [0, 0, 24], sizes = [5, 8, 8], strides = [1, 1, 1]} : vector<5x8x32xbf16> to vector<5x8x8xbf16>
    "tpu.trace_start"() <{level = 10 : i32, message = "gld,gmd->glm"}> : () -> ()
    %cst_22 = arith.constant dense<0.000000e+00> : vector<5x8x8xf32>
    %60 = tpu.matmul %57, %58, %cst_22 {dimension_numbers = #tpu.dot_dimension_numbers<[2], [2], [1], [1], [0, 0, 0, 1, 1, 1], [0], [0]>} : vector<5x8x8xbf16>, vector<5x8x8xbf16>, vector<5x8x8xf32> -> vector<5x8x8xf32>
    "tpu.trace_stop"() : () -> ()
    %cst_23 = arith.constant 0.353553385 : f32
    %61 = vector.broadcast %cst_23 : f32 to vector<5x8x8xf32>
    %62 = arith.mulf %60, %61 : vector<5x8x8xf32>
    %cst_24 = arith.constant dense<0xFF800000> : vector<5x8xf32>
    %63 = vector.multi_reduction <maximumf>, %62, %cst_24 [2] : vector<5x8x8xf32> to vector<5x8xf32>
    %64 = vector.shape_cast %63 : vector<5x8xf32> to vector<5x8x1xf32>
    %65 = vector.broadcast %64 : vector<5x8x1xf32> to vector<5x8x8xf32>
    %66 = arith.subf %62, %65 : vector<5x8x8xf32>
    %67 = math.exp %66 : vector<5x8x8xf32>
    %cst_25 = arith.constant dense<0.000000e+00> : vector<5x8xf32>
    %68 = vector.multi_reduction <add>, %67, %cst_25 [2] : vector<5x8x8xf32> to vector<5x8xf32>
    %69 = vector.shape_cast %68 : vector<5x8xf32> to vector<5x8x1xf32>
    %70 = tpu.reciprocal %69 {approx = true} : vector<5x8x1xf32> -> vector<5x8x1xf32>
    %71 = vector.broadcast %70 : vector<5x8x1xf32> to vector<5x8x8xf32>
    %72 = arith.mulf %67, %71 : vector<5x8x8xf32>
    %73 = arith.truncf %72 : vector<5x8x8xf32> to vector<5x8x8xbf16>
    "tpu.trace_start"() <{level = 10 : i32, message = "glm,gmd->gld"}> : () -> ()
    %cst_26 = arith.constant dense<0.000000e+00> : vector<5x8x8xf32>
    %74 = tpu.matmul %73, %59, %cst_26 {dimension_numbers = #tpu.dot_dimension_numbers<[2], [1], [1], [2], [0, 0, 0, 1, 1, 2], [0], [0]>} : vector<5x8x8xbf16>, vector<5x8x8xbf16>, vector<5x8x8xf32> -> vector<5x8x8xf32>
    "tpu.trace_stop"() : () -> ()
    %75 = tpu.concatenate %20, %38, %56, %74 in 2 : vector<5x8x8xf32>, vector<5x8x8xf32>, vector<5x8x8xf32>, vector<5x8x8xf32> -> vector<5x8x32xf32>
    %76 = arith.truncf %75 : vector<5x8x32xf32> to vector<5x8x32xbf16>
    %c0_27 = arith.constant 0 : index
    %c0_28 = arith.constant 0 : index
    %c0_29 = arith.constant 0 : index
    %77 = vector.load %arg4[%c0_27, %c0_28, %c0_29] : memref<5x8x32xbf16, #tpu.memory_space<vmem>>, vector<5x8x32xbf16>
    tpu.vector_store %arg4[%c0_27, %c0_28, %c0_29], %76 {strides = array<i32>} : memref<5x8x32xbf16, #tpu.memory_space<vmem>>, vector<5x8x32xbf16>,
    return
  }
  func.func @transform_0(%arg0: i32) -> (i32, i32, i32) {
    %c0_i32 = arith.constant 0 : i32
    %c0_i32_0 = arith.constant 0 : i32
    %c0_i32_1 = arith.constant 0 : i32
    return %arg0, %c0_i32, %c0_i32_0 : i32, i32, i32
  }
  func.func @transform_1(%arg0: i32) -> (i32, i32, i32) {
    %c0_i32 = arith.constant 0 : i32
    %c0_i32_0 = arith.constant 0 : i32
    %c0_i32_1 = arith.constant 0 : i32
    return %arg0, %c0_i32, %c0_i32_0 : i32, i32, i32
  }
  func.func @transform_2(%arg0: i32) -> (i32, i32, i32) {
    %c0_i32 = arith.constant 0 : i32
    %c0_i32_0 = arith.constant 0 : i32
    %c0_i32_1 = arith.constant 0 : i32
    return %arg0, %c0_i32, %c0_i32_0 : i32, i32, i32
  }
  func.func @transform_3(%arg0: i32) -> (i32, i32, i32) {
    %c0_i32 = arith.constant 0 : i32
    %c0_i32_0 = arith.constant 0 : i32
    %c0_i32_1 = arith.constant 0 : i32
    return %arg0, %c0_i32, %c0_i32_0 : i32, i32, i32
  }
}

module attributes {stable_mosaic.version = 11 : i64} {
  func.func @_matmul_kernel(%arg0: i32, %arg1: i32, %arg2: i32, %arg3: memref<40x128xbf16, #tpu.memory_space<vmem>>, %arg4: memref<128x128xbf16, #tpu.memory_space<vmem>>, %arg5: memref<1x128xf32, #tpu.memory_space<vmem>>, %arg6: memref<40x128xbf16, #tpu.memory_space<vmem>>, %arg7: memref<40x128xf32, #tpu.memory_space<vmem>>) attributes {dimension_semantics = [#tpu.dimension_semantics<parallel>, #tpu.dimension_semantics<parallel>, #tpu.dimension_semantics<arbitrary>], iteration_bounds = array<i64: 1, 1, 1>, scalar_prefetch = 0 : i64, scratch_operands = 1 : i64, tpu.core_type = #tpu.core_type<tc>, window_params = [{transform_indices = @transform_0, window_bounds = array<i64: 40, 128>}, {transform_indices = @transform_1, window_bounds = array<i64: 128, 128>}, {transform_indices = @transform_2, window_bounds = array<i64: 1, 128>}, {transform_indices = @transform_3, window_bounds = array<i64: 40, 128>}]} {
    %c0_i32 = arith.constant 0 : i32
    %0 = arith.cmpi eq, %arg2, %c0_i32 : i32
    %1 = arith.extui %0 : i1 to i32
    %c0_i32_0 = arith.constant 0 : i32
    %2 = arith.cmpi ne, %1, %c0_i32_0 : i32
    scf.if %2 {
      %cst_10 = arith.constant 0.000000e+00 : f32
      %12 = vector.broadcast %cst_10 : f32 to vector<40x128xf32>
      %c0_11 = arith.constant 0 : index
      %c0_12 = arith.constant 0 : index
      %13 = vector.load %arg7[%c0_11, %c0_12] : memref<40x128xf32, #tpu.memory_space<vmem>>, vector<40x128xf32>
      tpu.vector_store %arg7[%c0_11, %c0_12], %12 {strides = array<i32>} : memref<40x128xf32, #tpu.memory_space<vmem>>, vector<40x128xf32>,
    } else {
    }
    %c0 = arith.constant 0 : index
    %c0_1 = arith.constant 0 : index
    %3 = vector.load %arg7[%c0, %c0_1] : memref<40x128xf32, #tpu.memory_space<vmem>>, vector<40x128xf32>
    %c0_2 = arith.constant 0 : index
    %c0_3 = arith.constant 0 : index
    %4 = vector.load %arg3[%c0_2, %c0_3] : memref<40x128xbf16, #tpu.memory_space<vmem>>, vector<40x128xbf16>
    %c0_4 = arith.constant 0 : index
    %c0_5 = arith.constant 0 : index
    %5 = vector.load %arg4[%c0_4, %c0_5] : memref<128x128xbf16, #tpu.memory_space<vmem>>, vector<128x128xbf16>
    %cst = arith.constant dense<0.000000e+00> : vector<40x128xf32>
    %6 = tpu.matmul %4, %5, %cst {dimension_numbers = #tpu.dot_dimension_numbers<[1], [0], [0], [1], [0, 0, 1, 1], [], []>} : vector<40x128xbf16>, vector<128x128xbf16>, vector<40x128xf32> -> vector<40x128xf32>
    %7 = arith.addf %3, %6 : vector<40x128xf32>
    %c0_6 = arith.constant 0 : index
    %c0_7 = arith.constant 0 : index
    %8 = vector.load %arg7[%c0_6, %c0_7] : memref<40x128xf32, #tpu.memory_space<vmem>>, vector<40x128xf32>
    tpu.vector_store %arg7[%c0_6, %c0_7], %7 {strides = array<i32>} : memref<40x128xf32, #tpu.memory_space<vmem>>, vector<40x128xf32>,
    %c0_i32_8 = arith.constant 0 : i32
    %9 = arith.cmpi eq, %arg2, %c0_i32_8 : i32
    %10 = arith.extui %9 : i1 to i32
    %c0_i32_9 = arith.constant 0 : i32
    %11 = arith.cmpi ne, %10, %c0_i32_9 : i32
    scf.if %11 {
      %c0_10 = arith.constant 0 : index
      %c0_11 = arith.constant 0 : index
      %12 = vector.load %arg7[%c0_10, %c0_11] : memref<40x128xf32, #tpu.memory_space<vmem>>, vector<40x128xf32>
      %c0_12 = arith.constant 0 : index
      %c0_13 = arith.constant 0 : index
      %13 = vector.load %arg5[%c0_12, %c0_13] : memref<1x128xf32, #tpu.memory_space<vmem>>, vector<1x128xf32>
      %14 = vector.broadcast %13 : vector<1x128xf32> to vector<40x128xf32>
      %15 = arith.addf %12, %14 : vector<40x128xf32>
      %cst_14 = arith.constant 5.000000e-01 : f32
      %16 = vector.broadcast %cst_14 : f32 to vector<40x128xf32>
      %17 = arith.mulf %16, %15 : vector<40x128xf32>
      %cst_15 = arith.constant 0.707106769 : f32
      %18 = vector.broadcast %cst_15 : f32 to vector<40x128xf32>
      %19 = arith.mulf %15, %18 : vector<40x128xf32>
      %20 = math.erf %19 : vector<40x128xf32>
      %cst_16 = arith.constant 1.000000e+00 : f32
      %21 = vector.broadcast %cst_16 : f32 to vector<40x128xf32>
      %22 = arith.addf %21, %20 : vector<40x128xf32>
      %23 = arith.mulf %17, %22 : vector<40x128xf32>
      %24 = arith.truncf %23 : vector<40x128xf32> to vector<40x128xbf16>
      %c0_17 = arith.constant 0 : index
      %c0_18 = arith.constant 0 : index
      %25 = vector.load %arg6[%c0_17, %c0_18] : memref<40x128xbf16, #tpu.memory_space<vmem>>, vector<40x128xbf16>
      tpu.vector_store %arg6[%c0_17, %c0_18], %24 {strides = array<i32>} : memref<40x128xbf16, #tpu.memory_space<vmem>>, vector<40x128xbf16>,
    } else {
    }
    return
  }
  func.func @transform_0(%arg0: i32, %arg1: i32, %arg2: i32) -> (i32, i32) {
    %c0_i32 = arith.constant 0 : i32
    return %arg0, %arg2 : i32, i32
  }
  func.func @transform_1(%arg0: i32, %arg1: i32, %arg2: i32) -> (i32, i32) {
    %c0_i32 = arith.constant 0 : i32
    return %arg2, %arg1 : i32, i32
  }
  func.func @transform_2(%arg0: i32, %arg1: i32, %arg2: i32) -> (i32, i32) {
    %c0_i32 = arith.constant 0 : i32
    %c0_i32_0 = arith.constant 0 : i32
    return %c0_i32, %arg1 : i32, i32
  }
  func.func @transform_3(%arg0: i32, %arg1: i32, %arg2: i32) -> (i32, i32) {
    %c0_i32 = arith.constant 0 : i32
    return %arg0, %arg1 : i32, i32
  }
}

module attributes {stable_mosaic.version = 11 : i64} {
  func.func @_matmul_kernel(%arg0: i32, %arg1: i32, %arg2: i32, %arg3: memref<40x128xbf16, #tpu.memory_space<vmem>>, %arg4: memref<128x128xbf16, #tpu.memory_space<vmem>>, %arg5: memref<1x128xf32, #tpu.memory_space<vmem>>, %arg6: memref<40x128xbf16, #tpu.memory_space<vmem>>, %arg7: memref<40x128xbf16, #tpu.memory_space<vmem>>, %arg8: memref<40x128xf32, #tpu.memory_space<vmem>>) attributes {dimension_semantics = [#tpu.dimension_semantics<parallel>, #tpu.dimension_semantics<parallel>, #tpu.dimension_semantics<arbitrary>], iteration_bounds = array<i64: 1, 1, 1>, scalar_prefetch = 0 : i64, scratch_operands = 1 : i64, tpu.core_type = #tpu.core_type<tc>, window_params = [{transform_indices = @transform_0, window_bounds = array<i64: 40, 128>}, {transform_indices = @transform_1, window_bounds = array<i64: 128, 128>}, {transform_indices = @transform_2, window_bounds = array<i64: 1, 128>}, {transform_indices = @transform_3, window_bounds = array<i64: 40, 128>}, {transform_indices = @transform_4, window_bounds = array<i64: 40, 128>}]} {
    %c0_i32 = arith.constant 0 : i32
    %0 = arith.cmpi eq, %arg2, %c0_i32 : i32
    %1 = arith.extui %0 : i1 to i32
    %c0_i32_0 = arith.constant 0 : i32
    %2 = arith.cmpi ne, %1, %c0_i32_0 : i32
    scf.if %2 {
      %cst_10 = arith.constant 0.000000e+00 : f32
      %12 = vector.broadcast %cst_10 : f32 to vector<40x128xf32>
      %c0_11 = arith.constant 0 : index
      %c0_12 = arith.constant 0 : index
      %13 = vector.load %arg8[%c0_11, %c0_12] : memref<40x128xf32, #tpu.memory_space<vmem>>, vector<40x128xf32>
      tpu.vector_store %arg8[%c0_11, %c0_12], %12 {strides = array<i32>} : memref<40x128xf32, #tpu.memory_space<vmem>>, vector<40x128xf32>,
    } else {
    }
    %c0 = arith.constant 0 : index
    %c0_1 = arith.constant 0 : index
    %3 = vector.load %arg8[%c0, %c0_1] : memref<40x128xf32, #tpu.memory_space<vmem>>, vector<40x128xf32>
    %c0_2 = arith.constant 0 : index
    %c0_3 = arith.constant 0 : index
    %4 = vector.load %arg3[%c0_2, %c0_3] : memref<40x128xbf16, #tpu.memory_space<vmem>>, vector<40x128xbf16>
    %c0_4 = arith.constant 0 : index
    %c0_5 = arith.constant 0 : index
    %5 = vector.load %arg4[%c0_4, %c0_5] : memref<128x128xbf16, #tpu.memory_space<vmem>>, vector<128x128xbf16>
    %cst = arith.constant dense<0.000000e+00> : vector<40x128xf32>
    %6 = tpu.matmul %4, %5, %cst {dimension_numbers = #tpu.dot_dimension_numbers<[1], [0], [0], [1], [0, 0, 1, 1], [], []>} : vector<40x128xbf16>, vector<128x128xbf16>, vector<40x128xf32> -> vector<40x128xf32>
    %7 = arith.addf %3, %6 : vector<40x128xf32>
    %c0_6 = arith.constant 0 : index
    %c0_7 = arith.constant 0 : index
    %8 = vector.load %arg8[%c0_6, %c0_7] : memref<40x128xf32, #tpu.memory_space<vmem>>, vector<40x128xf32>
    tpu.vector_store %arg8[%c0_6, %c0_7], %7 {strides = array<i32>} : memref<40x128xf32, #tpu.memory_space<vmem>>, vector<40x128xf32>,
    %c0_i32_8 = arith.constant 0 : i32
    %9 = arith.cmpi eq, %arg2, %c0_i32_8 : i32
    %10 = arith.extui %9 : i1 to i32
    %c0_i32_9 = arith.constant 0 : i32
    %11 = arith.cmpi ne, %10, %c0_i32_9 : i32
    scf.if %11 {
      %c0_10 = arith.constant 0 : index
      %c0_11 = arith.constant 0 : index
      %12 = vector.load %arg8[%c0_10, %c0_11] : memref<40x128xf32, #tpu.memory_space<vmem>>, vector<40x128xf32>
      %c0_12 = arith.constant 0 : index
      %c0_13 = arith.constant 0 : index
      %13 = vector.load %arg5[%c0_12, %c0_13] : memref<1x128xf32, #tpu.memory_space<vmem>>, vector<1x128xf32>
      %14 = vector.broadcast %13 : vector<1x128xf32> to vector<40x128xf32>
      %15 = arith.addf %12, %14 : vector<40x128xf32>
      %c0_14 = arith.constant 0 : index
      %c0_15 = arith.constant 0 : index
      %16 = vector.load %arg6[%c0_14, %c0_15] : memref<40x128xbf16, #tpu.memory_space<vmem>>, vector<40x128xbf16>
      %17 = arith.extf %16 : vector<40x128xbf16> to vector<40x128xf32>
      %18 = arith.addf %15, %17 : vector<40x128xf32>
      %19 = arith.truncf %18 : vector<40x128xf32> to vector<40x128xbf16>
      %c0_16 = arith.constant 0 : index
      %c0_17 = arith.constant 0 : index
      %20 = vector.load %arg7[%c0_16, %c0_17] : memref<40x128xbf16, #tpu.memory_space<vmem>>, vector<40x128xbf16>
      tpu.vector_store %arg7[%c0_16, %c0_17], %19 {strides = array<i32>} : memref<40x128xbf16, #tpu.memory_space<vmem>>, vector<40x128xbf16>,
    } else {
    }
    return
  }
  func.func @transform_0(%arg0: i32, %arg1: i32, %arg2: i32) -> (i32, i32) {
    %c0_i32 = arith.constant 0 : i32
    return %arg0, %arg2 : i32, i32
  }
  func.func @transform_1(%arg0: i32, %arg1: i32, %arg2: i32) -> (i32, i32) {
    %c0_i32 = arith.constant 0 : i32
    return %arg2, %arg1 : i32, i32
  }
  func.func @transform_2(%arg0: i32, %arg1: i32, %arg2: i32) -> (i32, i32) {
    %c0_i32 = arith.constant 0 : i32
    %c0_i32_0 = arith.constant 0 : i32
    return %c0_i32, %arg1 : i32, i32
  }
  func.func @transform_3(%arg0: i32, %arg1: i32, %arg2: i32) -> (i32, i32) {
    %c0_i32 = arith.constant 0 : i32
    return %arg0, %arg1 : i32, i32
  }
  func.func @transform_4(%arg0: i32, %arg1: i32, %arg2: i32) -> (i32, i32) {
    %c0_i32 = arith.constant 0 : i32
    return %arg0, %arg1 : i32, i32
  }
}

module attributes {stable_mosaic.version = 11 : i64} {
  func.func @_matmul_kernel(%arg0: i32, %arg1: i32, %arg2: i32, %arg3: memref<8x128xbf16, #tpu.memory_space<vmem>>, %arg4: memref<128x128xbf16, #tpu.memory_space<vmem>>, %arg5: memref<1x128xf32, #tpu.memory_space<vmem>>, %arg6: memref<8x128xf32, #tpu.memory_space<vmem>>, %arg7: memref<8x128xf32, #tpu.memory_space<vmem>>) attributes {dimension_semantics = [#tpu.dimension_semantics<parallel>, #tpu.dimension_semantics<parallel>, #tpu.dimension_semantics<arbitrary>], iteration_bounds = array<i64: 1, 1, 1>, scalar_prefetch = 0 : i64, scratch_operands = 1 : i64, tpu.core_type = #tpu.core_type<tc>, window_params = [{transform_indices = @transform_0, window_bounds = array<i64: 8, 128>}, {transform_indices = @transform_1, window_bounds = array<i64: 128, 128>}, {transform_indices = @transform_2, window_bounds = array<i64: 1, 128>}, {transform_indices = @transform_3, window_bounds = array<i64: 8, 128>}]} {
    %c0_i32 = arith.constant 0 : i32
    %0 = arith.cmpi eq, %arg2, %c0_i32 : i32
    %1 = arith.extui %0 : i1 to i32
    %c0_i32_0 = arith.constant 0 : i32
    %2 = arith.cmpi ne, %1, %c0_i32_0 : i32
    scf.if %2 {
      %cst_10 = arith.constant 0.000000e+00 : f32
      %12 = vector.broadcast %cst_10 : f32 to vector<8x128xf32>
      %c0_11 = arith.constant 0 : index
      %c0_12 = arith.constant 0 : index
      %13 = vector.load %arg7[%c0_11, %c0_12] : memref<8x128xf32, #tpu.memory_space<vmem>>, vector<8x128xf32>
      tpu.vector_store %arg7[%c0_11, %c0_12], %12 {strides = array<i32>} : memref<8x128xf32, #tpu.memory_space<vmem>>, vector<8x128xf32>,
    } else {
    }
    %c0 = arith.constant 0 : index
    %c0_1 = arith.constant 0 : index
    %3 = vector.load %arg7[%c0, %c0_1] : memref<8x128xf32, #tpu.memory_space<vmem>>, vector<8x128xf32>
    %c0_2 = arith.constant 0 : index
    %c0_3 = arith.constant 0 : index
    %4 = vector.load %arg3[%c0_2, %c0_3] : memref<8x128xbf16, #tpu.memory_space<vmem>>, vector<8x128xbf16>
    %c0_4 = arith.constant 0 : index
    %c0_5 = arith.constant 0 : index
    %5 = vector.load %arg4[%c0_4, %c0_5] : memref<128x128xbf16, #tpu.memory_space<vmem>>, vector<128x128xbf16>
    %cst = arith.constant dense<0.000000e+00> : vector<8x128xf32>
    %6 = tpu.matmul %4, %5, %cst {dimension_numbers = #tpu.dot_dimension_numbers<[1], [0], [0], [1], [0, 0, 1, 1], [], []>} : vector<8x128xbf16>, vector<128x128xbf16>, vector<8x128xf32> -> vector<8x128xf32>
    %7 = arith.addf %3, %6 : vector<8x128xf32>
    %c0_6 = arith.constant 0 : index
    %c0_7 = arith.constant 0 : index
    %8 = vector.load %arg7[%c0_6, %c0_7] : memref<8x128xf32, #tpu.memory_space<vmem>>, vector<8x128xf32>
    tpu.vector_store %arg7[%c0_6, %c0_7], %7 {strides = array<i32>} : memref<8x128xf32, #tpu.memory_space<vmem>>, vector<8x128xf32>,
    %c0_i32_8 = arith.constant 0 : i32
    %9 = arith.cmpi eq, %arg2, %c0_i32_8 : i32
    %10 = arith.extui %9 : i1 to i32
    %c0_i32_9 = arith.constant 0 : i32
    %11 = arith.cmpi ne, %10, %c0_i32_9 : i32
    scf.if %11 {
      %c0_10 = arith.constant 0 : index
      %c0_11 = arith.constant 0 : index
      %12 = vector.load %arg7[%c0_10, %c0_11] : memref<8x128xf32, #tpu.memory_space<vmem>>, vector<8x128xf32>
      %c0_12 = arith.constant 0 : index
      %c0_13 = arith.constant 0 : index
      %13 = vector.load %arg5[%c0_12, %c0_13] : memref<1x128xf32, #tpu.memory_space<vmem>>, vector<1x128xf32>
      %14 = vector.broadcast %13 : vector<1x128xf32> to vector<8x128xf32>
      %15 = arith.addf %12, %14 : vector<8x128xf32>
      %c0_14 = arith.constant 0 : index
      %c0_15 = arith.constant 0 : index
      %16 = vector.load %arg6[%c0_14, %c0_15] : memref<8x128xf32, #tpu.memory_space<vmem>>, vector<8x128xf32>
      tpu.vector_store %arg6[%c0_14, %c0_15], %15 {strides = array<i32>} : memref<8x128xf32, #tpu.memory_space<vmem>>, vector<8x128xf32>,
    } else {
    }
    return
  }
  func.func @transform_0(%arg0: i32, %arg1: i32, %arg2: i32) -> (i32, i32) {
    %c0_i32 = arith.constant 0 : i32
    return %arg0, %arg2 : i32, i32
  }
  func.func @transform_1(%arg0: i32, %arg1: i32, %arg2: i32) -> (i32, i32) {
    %c0_i32 = arith.constant 0 : i32
    return %arg2, %arg1 : i32, i32
  }
  func.func @transform_2(%arg0: i32, %arg1: i32, %arg2: i32) -> (i32, i32) {
    %c0_i32 = arith.constant 0 : i32
    %c0_i32_0 = arith.constant 0 : i32
    return %c0_i32, %arg1 : i32, i32
  }
  func.func @transform_3(%arg0: i32, %arg1: i32, %arg2: i32) -> (i32, i32) {
    %c0_i32 = arith.constant 0 : i32
    return %arg0, %arg1 : i32, i32
  }
}

</mosaic_0001>

<bundles_post_ra>
// kernel: _lambda_.40
= control target key start
LH: loop header
LB: loop body
LE: loop exit
PB: predicated region body
PF: predicated region fallthrough
CT: control target
= control target key end

     0   :  { %vm22_vm0 = vcmask 261120   ;;  %vm114_vm1 = vcmask 257024   ;;  %s206_s0 = inlined_call_operand.vmem [shape: bf16[32,32], index: 0, kind: input, shape index: {}]   ;;  %s207_s1 = inlined_call_operand.vmem [shape: f32[1,32], index: 1, kind: input, shape index: {}]   ;;  %s208_s2 = inlined_call_operand.vmem [shape: f32[1,32], index: 2, kind: input, shape index: {}]   ;;  %s209_s3 = inlined_call_operand.vmem [shape: bf16[32,32], index: 3, kind: output, shape index: {}]  }
   0x1   :  { %v134_v0 = vld [vmem:[%s206_s0] sm:$0xff]   ;;  %v141_v1 = vld [vmem:[%s206_s0 + $0x8] sm:$0xff]  }
   0x2   :  { %v135_v2 = vunpack.c.l.bf16 %v134_v0  ;;  %v139_v3 = vunpack.c.l.bf16 %v141_v1  ;;  %v136_v4 = vunpack.c.h.bf16 %v134_v0  ;;  %v140_v5 = vunpack.c.h.bf16 %v141_v1  ;;  %v123_v43 = vld [vmem:[%s207_s1] ss:$0 sm:$0xff] }
   0x3   :  { %v124_v45 = vld [vmem:[%s208_s2] ss:$0 sm:$0xff] }
   0x4   :  { %v23_v6 = vsel %vm22_vm0, %v135_v2, 0.0  ;;  %v29_v7 = vsel %vm22_vm0, %v139_v3, 0.0  ;;  %v26_v8 = vsel %vm22_vm0, %v136_v4, 0.0  ;;  %v32_v9 = vsel %vm22_vm0, %v140_v5, 0.0 }
   0x5   :  { %24 = vadd.xlane.f32.xlu0 %v23_v6  ;;  %30 = vadd.xlane.f32.xlu1 %v29_v7 }
   0x9   :  { %27 = vadd.xlane.f32.xlu0 %v26_v8  ;;  %33 = vadd.xlane.f32.xlu1 %v32_v9 }
  0x92   :  { %v25_v10 = vpop.xlane.xlu0 %24  ;;  %v31_v11 = vpop.xlane.xlu1 %30 }
  0x93   :  { %v36_v12 = vmul.f32 0.03125, %v25_v10  ;;  %v38_v13 = vmul.f32 0.03125, %v31_v11 }
  0x95   :  { %v40_v14 = vsub.f32 %v135_v2, %v36_v12  ;;  %v42_v15 = vsub.f32 %v139_v3, %v38_v13 }
  0x96   :  { %v28_v16 = vpop.xlane.xlu0 %27  ;;  %v34_v17 = vpop.xlane.xlu1 %33 }
  0x97   :  { %v37_v18 = vmul.f32 0.03125, %v28_v16  ;;  %v39_v19 = vmul.f32 0.03125, %v34_v17  ;;  %v44_v20 = vmul.f32 %v40_v14, %v40_v14  ;;  %v46_v21 = vmul.f32 %v42_v15, %v42_v15 }
  0x99   :  { %v41_v22 = vsub.f32 %v136_v4, %v37_v18  ;;  %v43_v23 = vsub.f32 %v140_v5, %v39_v19  ;;  %v48_v24 = vsel %vm22_vm0, %v44_v20, 0.0  ;;  %v54_v25 = vsel %vm22_vm0, %v46_v21, 0.0 }
  0x9a   :  { %49 = vadd.xlane.f32.xlu0 %v48_v24 }
  0x9b   :  { %v45_v26 = vmul.f32 %v41_v22, %v41_v22  ;;  %v47_v27 = vmul.f32 %v43_v23, %v43_v23 }
  0x9d   :  { %v51_v28 = vsel %vm22_vm0, %v45_v26, 0.0  ;;  %v57_v29 = vsel %vm22_vm0, %v47_v27, 0.0 }
  0x9e   :  { %55 = vadd.xlane.f32.xlu0 %v54_v25  ;;  %52 = vadd.xlane.f32.xlu1 %v51_v28 }
  0xa2   :  { %58 = vadd.xlane.f32.xlu1 %v57_v29 }
 0x127   :  { %v50_v30 = vpop.xlane.xlu0 %49 }
 0x128   :  { %v60_v31 = vmul.f32 0.03125, %v50_v30 }
 0x12a   :  { %v64_v32 = vadd.f32 1e-06, %v60_v31 }
 0x12b   :  { %v53_v33 = vpop.xlane.xlu1 %52  ;;  %v56_v34 = vpop.xlane.xlu0 %55 }
 0x12c   :  { %142 = vrsqrt.f32 %v64_v32  ;;  %v61_v35 = vmul.f32 0.03125, %v53_v33  ;;  %v62_v36 = vmul.f32 0.03125, %v56_v34 }
 0x12e   :  { %v65_v37 = vadd.f32 1e-06, %v61_v35  ;;  %v66_v38 = vadd.f32 1e-06, %v62_v36 }
 0x12f   :  { %v59_v39 = vpop.xlane.xlu1 %58 }
 0x130   :  { %144 = vrsqrt.f32 %v65_v37  ;;  %v63_v40 = vmul.f32 0.03125, %v59_v39 }
 0x131   :  { %146 = vrsqrt.f32 %v66_v38 }
 0x132   :  { %v67_v41 = vadd.f32 1e-06, %v63_v40 }
 0x134   :  { %148 = vrsqrt.f32 %v67_v41 }
 0x136   :  { %v143_v42 = vpop.eup %142 }
 0x137   :  { %v72_v44 = vmul.f32 %v143_v42, %v40_v14 }
 0x139   :  { %v83_v46 = vmul.f32 %v123_v43, %v72_v44 }
 0x13a   :  { %v145_v47 = vpop.eup %144 }
 0x13b   :  { %v147_v48 = vpop.eup %146  ;;  %v94_v49 = vadd.f32 %v124_v45, %v83_v46  ;;  %v73_v50 = vmul.f32 %v145_v47, %v41_v22 }
 0x13c   :  { %v74_v51 = vmul.f32 %v147_v48, %v42_v15 }
 0x13d   :  { %v129_v52 = vpack.c.bf16 %v94_v49, %v94_v49  ;;  %v84_v53 = vmul.f32 %v123_v43, %v73_v50 }
 0x13e   :  { %v149_v54 = vpop.eup %148  ;;  %v85_v55 = vmul.f32 %v123_v43, %v74_v51 }
 0x13f   :  { %115 = vst.msk [vmem:[%s209_s3] sm:$0xf] %vm114_vm1, %v129_v52  ;;  %v95_v56 = vadd.f32 %v124_v45, %v84_v53  ;;  %v75_v57 = vmul.f32 %v149_v54, %v43_v23 }
 0x140   :  { %v96_v58 = vadd.f32 %v124_v45, %v85_v55 }
 0x141   :  { %v130_v59 = vpack.c.bf16 %v95_v56, %v95_v56  ;;  %v86_v60 = vmul.f32 %v123_v43, %v75_v57 }
 0x142   :  { %v131_v61 = vpack.c.bf16 %v96_v58, %v96_v58 }
 0x143   :  { %116 = vst.msk [vmem:[%s209_s3 + $0x4] sm:$0xf] %vm114_vm1, %v130_v59  ;;  %v97_v62 = vadd.f32 %v124_v45, %v86_v60 }
 0x144   :  { %117 = vst.msk [vmem:[%s209_s3 + $0x8] sm:$0xf] %vm114_vm1, %v131_v61 }
 0x145   :  { %v132_v63 = vpack.c.bf16 %v97_v62, %v97_v62 }
 0x147   :  { %118 = vst.msk [vmem:[%s209_s3 + $0xc] sm:$0xf] %vm114_vm1, %v132_v63 }

// kernel: _lambda_.39
= control target key start
LH: loop header
LB: loop body
LE: loop exit
PB: predicated region body
PF: predicated region fallthrough
CT: control target
= control target key end

     0   :  { %s473_s1 = inlined_call_operand.vmem [shape: bf16[256,128], index: 1, kind: input, shape index: {}]   ;;  %s474_s0 = inlined_call_operand.vmem [shape: bf16[32,256], index: 0, kind: input, shape index: {}]   ;;  %s475_s2 = inlined_call_operand.vmem [shape: f32[1,128], index: 2, kind: input, shape index: {}]   ;;  %s476_s3 = inlined_call_operand.vmem [shape: bf16[32,128], index: 3, kind: output, shape index: {}]  }
   0x1   :  { %v362_v0 = vld [vmem:[%s473_s1 + $0x40] sm:$0xff]   ;;  %v364_v2 = vld [vmem:[%s473_s1 + $0x48] sm:$0xff]   ;;  %v366_v4 = vld [vmem:[%s473_s1 + $0x50] sm:$0xff]  }
   0x2   :  { %v363_v1 = vld [vmem:[%s473_s1] sm:$0xff]   ;;  %318 = vmatprep.subr.bf16.mxu0 %v362_v0  ;;  %346 = vmatprep.subr.bf16.mxu1 %v362_v0  ;;  %v365_v3 = vld [vmem:[%s473_s1 + $0x8] sm:$0xff]   ;;  %v367_v5 = vld [vmem:[%s473_s1 + $0x10] sm:$0xff]  }
   0x3   :  { %319 = vmatpush3.bf16.msra.mxu0 %v363_v1  ;;  %354 = vmatpush3.bf16.msra.mxu1 %v363_v1  ;;  %v368_v6 = vld [vmem:[%s473_s1 + $0x58] sm:$0xff]   ;;  %v370_v8 = vld [vmem:[%s473_s1 + $0x60] sm:$0xff]   ;;  %v372_v10 = vld [vmem:[%s473_s1 + $0x68] sm:$0xff]  }
   0x4   :  { %320 = vmatprep.subr.bf16.mxu0 %v364_v2  ;;  %347 = vmatprep.subr.bf16.mxu1 %v364_v2  ;;  %v369_v7 = vld [vmem:[%s473_s1 + $0x18] sm:$0xff]   ;;  %v371_v9 = vld [vmem:[%s473_s1 + $0x20] sm:$0xff]   ;;  %v373_v13 = vld [vmem:[%s473_s1 + $0x28] sm:$0xff]  }
   0x5   :  { %v380_v11 = vld [vmem:[%s474_s0 + $0x4] ss:$8 sps:$4 sm:$0xff]   ;;  %v383_v12 = vld [vmem:[%s474_s0 + $0x14] ss:$8 sps:$4 sm:$0xff]   ;;  %v378_v18 = vld [vmem:[%s474_s0] ss:$8 sps:$4 sm:$0xff]  }
   0x6   :  { %v374_v14 = vld [vmem:[%s473_s1 + $0x70] sm:$0xff]   ;;  %211 = vmatprep.mubr.bf16.mxu0 %v380_v11  ;;  %219 = vmatprep.mubr.bf16.mxu1 %v383_v12  ;;  %v376_v16 = vld [vmem:[%s473_s1 + $0x78] sm:$0xff]   ;;  %v298_v28 = vld [vmem:[%s475_s2] ss:$0 sm:$0xff] }
   0x7   :  { %321 = vmatpush3.bf16.msra.mxu0 %v365_v3  ;;  %355 = vmatpush3.bf16.msra.mxu1 %v365_v3  ;;  %v375_v15 = vld [vmem:[%s473_s1 + $0x30] sm:$0xff]   ;;  %v377_v17 = vld [vmem:[%s473_s1 + $0x38] sm:$0xff]  }
   0x8   :  { %322 = vmatprep.subr.bf16.mxu0 %v366_v4  ;;  %348 = vmatprep.subr.bf16.mxu1 %v366_v4  ;;  %v381_v19 = vld [vmem:[%s474_s0 + $0x10] ss:$8 sps:$4 sm:$0xff]  }
   0xb   :  { %323 = vmatpush3.bf16.msra.mxu0 %v367_v5  ;;  %356 = vmatpush3.bf16.msra.mxu1 %v367_v5 }
   0xc   :  { %324 = vmatprep.subr.bf16.mxu0 %v368_v6  ;;  %349 = vmatprep.subr.bf16.mxu1 %v368_v6 }
   0xf   :  { %325 = vmatpush3.bf16.msra.mxu0 %v369_v7  ;;  %357 = vmatpush3.bf16.msra.mxu1 %v369_v7 }
  0x10   :  { %326 = vmatprep.subr.bf16.mxu0 %v370_v8  ;;  %350 = vmatprep.subr.bf16.mxu1 %v370_v8 }
  0x13   :  { %327 = vmatpush3.bf16.msra.mxu0 %v371_v9  ;;  %358 = vmatpush3.bf16.msra.mxu1 %v371_v9 }
  0x14   :  { %328 = vmatprep.subr.bf16.mxu0 %v372_v10  ;;  %351 = vmatprep.subr.bf16.mxu1 %v372_v10 }
  0x17   :  { %329 = vmatpush3.bf16.msra.mxu0 %v373_v13  ;;  %359 = vmatpush3.bf16.msra.mxu1 %v373_v13 }
  0x18   :  { %330 = vmatprep.subr.bf16.mxu0 %v374_v14  ;;  %352 = vmatprep.subr.bf16.mxu1 %v374_v14 }
  0x1b   :  { %331 = vmatpush3.bf16.msra.mxu0 %v375_v15  ;;  %360 = vmatpush3.bf16.msra.mxu1 %v375_v15 }
  0x1c   :  { %332 = vmatprep.subr.bf16.mxu0 %v376_v16  ;;  %353 = vmatprep.subr.bf16.mxu1 %v376_v16 }
  0x1f   :  { %333 = vmatpush3.bf16.msra.mxu0 %v377_v17  ;;  %361 = vmatpush3.bf16.msra.mxu1 %v377_v17 }
  0x22   :  { %212 = vmatmul.mubr.bf16.vlgmr.msra.gmra.mrb[0].mxu0 %v378_v18  ;;  %220 = vmatmul.mubr.bf16.vlgmr.msra.gmra.mrb[0].mxu1 %v381_v19 }
  0xf5   :  { %v334_v20 = vpop.f32.mrb[0].mxu0  ;;  %v340_v21 = vpop.f32.mrb[0].mxu1 }
  0xf6   :  { %v335_v22 = vpop.f32.mrb[1].mxu0  ;;  %v341_v23 = vpop.f32.mrb[1].mxu1 }
  0xf7   :  { %v336_v24 = vadd.f32 %v335_v22, %v334_v20  ;;  %v342_v25 = vadd.f32 %v341_v23, %v340_v21  ;;  %v337_v26 = vpop.f32.mrb[2].mxu0  ;;  %v343_v27 = vpop.f32.mrb[2].mxu1 }
  0xf8   :  { %v338_v29 = vpop.f32.mrb[3].mxu0  ;;  %v344_v30 = vpop.f32.mrb[3].mxu1 }
  0xf9   :  { %v339_v31 = vadd.f32 %v338_v29, %v337_v26  ;;  %v345_v32 = vadd.f32 %v344_v30, %v343_v27  ;;  %v250_v33 = vadd.f32 %v336_v24, %v298_v28  ;;  %v252_v34 = vadd.f32 %v342_v25, %v298_v28 }
  0xfb   :  { %v251_v35 = vadd.f32 %v339_v31, %v298_v28  ;;  %v253_v36 = vadd.f32 %v345_v32, %v298_v28 }
  0xfd   :  { %v310_v37 = vpack.c.bf16 %v251_v35, %v250_v33  ;;  %v315_v38 = vpack.c.bf16 %v253_v36, %v252_v34 }
  0xff   :  { %311 = vst [vmem:[%s476_s3] sm:$0xff] %v310_v37   ;;  %317 = vst [vmem:[%s476_s3 + $0x8] sm:$0xff] %v315_v38  }

// kernel: _lambda_.41
= control target key start
LH: loop header
LB: loop body
LE: loop exit
PB: predicated region body
PF: predicated region fallthrough
CT: control target
= control target key end

     0   :  { %s335_s1 = inlined_call_operand.vmem [shape: bf16[128,128], index: 1, kind: input, shape index: {}]   ;;  %s336_s0 = inlined_call_operand.vmem [shape: bf16[32,128], index: 0, kind: input, shape index: {}]   ;;  %s337_s2 = inlined_call_operand.vmem [shape: f32[1,128], index: 2, kind: input, shape index: {}]   ;;  %s338_s3 = inlined_call_operand.vmem [shape: bf16[32,128], index: 3, kind: output, shape index: {}]  }
   0x1   :  { %v266_v0 = vld [vmem:[%s335_s1] sm:$0xff]   ;;  %v267_v1 = vld [vmem:[%s335_s1 + $0x8] sm:$0xff]   ;;  %v268_v2 = vld [vmem:[%s335_s1 + $0x10] sm:$0xff]  }
   0x2   :  { %246 = vmatprep.subr.bf16.mxu0 %v266_v0  ;;  %v269_v3 = vld [vmem:[%s335_s1 + $0x18] sm:$0xff]   ;;  %v274_v4 = vld [vmem:[%s336_s0] sm:$0xff]   ;;  %v271_v6 = vld [vmem:[%s335_s1 + $0x28] sm:$0xff]  }
   0x3   :  { %247 = vmatpush3.bf16.msra.mxu0 %v266_v0  ;;  %262 = vmatprep.mubr.bf16.mxu0 %v274_v4  ;;  %v270_v5 = vld [vmem:[%s335_s1 + $0x20] sm:$0xff]   ;;  %v272_v7 = vld [vmem:[%s335_s1 + $0x30] sm:$0xff]   ;;  %v273_v8 = vld [vmem:[%s335_s1 + $0x38] sm:$0xff]  }
   0x4   :  { %248 = vmatprep.subr.bf16.mxu0 %v267_v1  ;;  %v275_v9 = vld [vmem:[%s336_s0 + $0x8] sm:$0xff]   ;;  %v216_v11 = vld [vmem:[%s337_s2] ss:$0 sm:$0xff] }
   0x7   :  { %249 = vmatpush3.bf16.msra.mxu0 %v267_v1 }
   0x8   :  { %250 = vmatprep.subr.bf16.mxu0 %v268_v2 }
   0xb   :  { %251 = vmatpush3.bf16.msra.mxu0 %v268_v2 }
   0xc   :  { %252 = vmatprep.subr.bf16.mxu0 %v269_v3 }
   0xf   :  { %253 = vmatpush3.bf16.msra.mxu0 %v269_v3 }
  0x10   :  { %254 = vmatprep.subr.bf16.mxu0 %v270_v5 }
  0x13   :  { %255 = vmatpush3.bf16.msra.mxu0 %v270_v5 }
  0x14   :  { %256 = vmatprep.subr.bf16.mxu0 %v271_v6 }
  0x17   :  { %257 = vmatpush3.bf16.msra.mxu0 %v271_v6 }
  0x18   :  { %258 = vmatprep.subr.bf16.mxu0 %v272_v7 }
  0x1b   :  { %259 = vmatpush3.bf16.msra.mxu0 %v272_v7 }
  0x1c   :  { %260 = vmatprep.subr.bf16.mxu0 %v273_v8 }
  0x1f   :  { %261 = vmatpush3.bf16.msra.mxu0 %v273_v8 }
  0x22   :  { %263 = vmatmul.mubr.bf16.vlgmr.msra.gmra.mrb[0].mxu0 %v275_v9 }
  0xf5   :  { %v264_v10 = vpop.f32.mrb[0].mxu0 }
  0xf6   :  { %v141_v12 = vpop.f32.mrb[1].mxu0  ;;  %v180_v14 = vadd.f32 %v264_v10, %v216_v11 }
  0xf7   :  { %v265_v13 = vpop.f32.mrb[2].mxu0  ;;  %v178_v17 = vadd.f32 %v216_v11, %v141_v12 }
  0xf8   :  { %v181_v15 = vadd.f32 %v265_v13, %v216_v11  ;;  %v144_v16 = vpop.f32.mrb[3].mxu0 }
  0xf9   :  { %v179_v18 = vadd.f32 %v216_v11, %v144_v16 }
  0xfa   :  { %v233_v19 = vpack.c.bf16 %v181_v15, %v180_v14 }
  0xfb   :  { %v228_v20 = vpack.c.bf16 %v179_v18, %v178_v17 }
  0xfc   :  { %235 = vst [vmem:[%s338_s3 + $0x8] sm:$0xff] %v233_v19  }
  0xfd   :  { %229 = vst [vmem:[%s338_s3] sm:$0xff] %v228_v20  }

// kernel: _lambda_.42
= control target key start
LH: loop header
LB: loop body
LE: loop exit
PB: predicated region body
PF: predicated region fallthrough
CT: control target
= control target key end

     0   :  { %v32_v0 = vlaneseq  ;;  %vm262_vm0 = vcmask 254976   ;;  %s497_s0 = inlined_call_operand.vmem [shape: bf16[8,7,32], index: 0, kind: input, shape index: {}]   ;;  %s498_s1 = inlined_call_operand.vmem [shape: f32[4,32], index: 1, kind: input, shape index: {}]   ;;  %s499_s2 = inlined_call_operand.vmem [shape: f32[1,32], index: 2, kind: input, shape index: {}]   ;;  %s500_s3 = inlined_call_operand.vmem [shape: bf16[8,4,32], index: 3, kind: output, shape index: {}]  }
   0x1   :  { %v285_v1 = vld [vmem:[%s497_s0] sm:$0xff]   ;;  %v300_v3 = vld [vmem:[%s497_s0 + $0x8] sm:$0xff]   ;;  %v301_v10 = vld [vmem:[%s497_s0 + $0x10] sm:$0xff]  }
   0x2   :  { %v33_v2 = vshrl.u32 %v32_v0, 7  ;;  %v14_v4 = vld [vmem:[%s498_s1] sm:$0xf]  ;;  %v286_v5 = vunpack.c.l.bf16 %v285_v1  ;;  %v302_v11 = vld [vmem:[%s497_s0 + $0x18] sm:$0xff]   ;;  %v287_v12 = vunpack.c.h.bf16 %v285_v1  ;;  %v290_v13 = vunpack.c.l.bf16 %v300_v3 }
   0x3   :  { %v291_v14 = vunpack.c.h.bf16 %v300_v3  ;;  %v294_v19 = vunpack.c.l.bf16 %v301_v10  ;;  %v378_v20 = vunpack.c.h.bf16 %v301_v10  ;;  %v380_v21 = vunpack.c.l.bf16 %v302_v11  ;;  %v403_v51 = vld [vmem:[%s499_s2] ss:$0 sm:$0xff] }
   0x4   :  { %v34_v6 = vsub.s32 0, %v33_v2  ;;  %v54_v7 = vsub.s32 1, %v33_v2  ;;  %v98_v8 = vsub.s32 2, %v33_v2  ;;  %v142_v9 = vsub.s32 3, %v33_v2 }
   0x5   :  { %v382_v22 = vunpack.c.h.bf16 %v302_v11 }
   0x6   :  { %v370_v15 = vrot.slane %v14_v4, %v34_v6  ;;  %v372_v16 = vrot.slane %v14_v4, %v54_v7  ;;  %v374_v17 = vrot.slane %v14_v4, %v98_v8  ;;  %v376_v18 = vrot.slane %v14_v4, %v142_v9 }
   0x8   :  { %v36_v23 = vmul.f32 %v286_v5, %v370_v15  ;;  %v56_v24 = vmul.f32 %v286_v5, %v372_v16  ;;  %v100_v25 = vmul.f32 %v286_v5, %v374_v17  ;;  %v144_v26 = vmul.f32 %v286_v5, %v376_v18 }
   0x9   :  { %v37_v27 = vmul.f32 %v287_v12, %v370_v15  ;;  %v57_v28 = vmul.f32 %v287_v12, %v372_v16  ;;  %v101_v29 = vmul.f32 %v287_v12, %v374_v17  ;;  %v145_v30 = vmul.f32 %v287_v12, %v376_v18 }
   0xa   :  { %v72_v31 = vrot.slane %v56_v24, 1  ;;  %v116_v32 = vrot.slane %v100_v25, 2  ;;  %v160_v33 = vrot.slane %v144_v26, 3  ;;  %v38_v34 = vmul.f32 %v290_v13, %v370_v15 }
   0xb   :  { %v73_v35 = vrot.slane %v57_v28, 1  ;;  %v117_v36 = vrot.slane %v101_v29, 2  ;;  %v161_v37 = vrot.slane %v145_v30, 3  ;;  %v58_v38 = vmul.f32 %v290_v13, %v372_v16 }
   0xc   :  { %v88_v39 = vadd.f32 %v72_v31, %v36_v23  ;;  %v102_v40 = vmul.f32 %v290_v13, %v374_v17  ;;  %v146_v41 = vmul.f32 %v290_v13, %v376_v18  ;;  %v39_v42 = vmul.f32 %v291_v14, %v370_v15 }
   0xd   :  { %v89_v43 = vadd.f32 %v73_v35, %v37_v27  ;;  %v74_v44 = vrot.slane %v58_v38, 1  ;;  %v59_v45 = vmul.f32 %v291_v14, %v372_v16  ;;  %v103_v46 = vmul.f32 %v291_v14, %v374_v17 }
   0xe   :  { %v132_v47 = vadd.f32 %v116_v32, %v88_v39  ;;  %v118_v48 = vrot.slane %v102_v40, 2  ;;  %v162_v49 = vrot.slane %v146_v41, 3  ;;  %v147_v50 = vmul.f32 %v291_v14, %v376_v18 }
   0xf   :  { %v133_v52 = vadd.f32 %v117_v36, %v89_v43  ;;  %v90_v53 = vadd.f32 %v74_v44, %v38_v34  ;;  %v75_v54 = vrot.slane %v59_v45, 1  ;;  %v119_v55 = vrot.slane %v103_v46, 2 }
  0x10   :  { %v176_v56 = vadd.f32 %v160_v33, %v132_v47  ;;  %v163_v57 = vrot.slane %v147_v50, 3  ;;  %v40_v58 = vmul.f32 %v294_v19, %v370_v15  ;;  %v60_v59 = vmul.f32 %v294_v19, %v372_v16 }
  0x11   :  { %v177_v60 = vadd.f32 %v161_v37, %v133_v52  ;;  %v134_v61 = vadd.f32 %v118_v48, %v90_v53  ;;  %v91_v62 = vadd.f32 %v75_v54, %v39_v42  ;;  %v104_v63 = vmul.f32 %v294_v19, %v374_v17 }
  0x12   :  { %v409_v0 = vadd.f32 %v403_v51, %v176_v56  ;;  %v76_v1 = vrot.slane %v60_v59, 1  ;;  %v148_v2 = vmul.f32 %v294_v19, %v376_v18  ;;  %v41_v3 = vmul.f32 %v378_v20, %v370_v15 }
  0x13   :  { %v415_v4 = vadd.f32 %v403_v51, %v177_v60  ;;  %v178_v5 = vadd.f32 %v162_v49, %v134_v61  ;;  %v135_v6 = vadd.f32 %v119_v55, %v91_v62  ;;  %v120_v7 = vrot.slane %v104_v63, 2 }
  0x14   :  { %v276_v8 = vmul.f32 -1.442695, %v409_v0  ;;  %v92_v9 = vadd.f32 %v76_v1, %v40_v58  ;;  %v164_v10 = vrot.slane %v148_v2, 3  ;;  %v61_v11 = vmul.f32 %v378_v20, %v372_v16 }
  0x15   :  { %v277_v12 = vmul.f32 -1.442695, %v415_v4  ;;  %v422_v13 = vadd.f32 %v403_v51, %v178_v5  ;;  %v179_v14 = vadd.f32 %v163_v57, %v135_v6  ;;  %v105_v19 = vmul.f32 %v378_v20, %v374_v17 }
  0x16   :  { %303 = vpow2.f32 %v276_v8  ;;  %v136_v23 = vadd.f32 %v120_v7, %v92_v9  ;;  %v77_v24 = vrot.slane %v61_v11, 1  ;;  %v149_v25 = vmul.f32 %v378_v20, %v376_v18 }
  0x17   :  { %305 = vpow2.f32 %v277_v12  ;;  %v278_v26 = vmul.f32 -1.442695, %v422_v13  ;;  %v430_v27 = vadd.f32 %v403_v51, %v179_v14  ;;  %v121_v28 = vrot.slane %v105_v19, 2 }
  0x18   :  { %v180_v29 = vadd.f32 %v164_v10, %v136_v23  ;;  %v93_v30 = vadd.f32 %v77_v24, %v41_v3  ;;  %v165_v31 = vrot.slane %v149_v25, 3  ;;  %v42_v32 = vmul.f32 %v380_v21, %v370_v15 }
  0x19   :  { %307 = vpow2.f32 %v278_v26  ;;  %v279_v33 = vmul.f32 -1.442695, %v430_v27  ;;  %v62_v34 = vmul.f32 %v380_v21, %v372_v16  ;;  %v106_v20 = vmul.f32 %v380_v21, %v374_v17 }
  0x1a   :  { %v440_v35 = vadd.f32 %v403_v51, %v180_v29  ;;  %v137_v36 = vadd.f32 %v121_v28, %v93_v30  ;;  %v150_v37 = vmul.f32 %v380_v21, %v376_v18  ;;  %v43_v38 = vmul.f32 %v382_v22, %v370_v15 }
  0x1b   :  { %309 = vpow2.f32 %v279_v33  ;;  %v78_v39 = vrot.slane %v62_v34, 1  ;;  %v122_v40 = vrot.slane %v106_v20, 2  ;;  %v63_v41 = vmul.f32 %v382_v22, %v372_v16 }
  0x1c   :  { %v280_v42 = vmul.f32 -1.442695, %v440_v35  ;;  %v181_v43 = vadd.f32 %v165_v31, %v137_v36  ;;  %v107_v44 = vmul.f32 %v382_v22, %v374_v17  ;;  %v166_v46 = vrot.slane %v150_v37, 3 }
  0x1d   :  { %v94_v45 = vadd.f32 %v78_v39, %v42_v32  ;;  %v79_v47 = vrot.slane %v63_v41, 1  ;;  %v151_v21 = vmul.f32 %v382_v22, %v376_v18 }
  0x1e   :  { %311 = vpow2.f32 %v280_v42  ;;  %v454_v15 = vadd.f32 %v403_v51, %v181_v43  ;;  %v123_v48 = vrot.slane %v107_v44, 2 }
  0x1f   :  { %v138_v49 = vadd.f32 %v122_v40, %v94_v45  ;;  %v95_v50 = vadd.f32 %v79_v47, %v43_v38  ;;  %v167_v16 = vrot.slane %v151_v21, 3 }
  0x20   :  { %v304_v52 = vpop.eup %303  ;;  %v281_v53 = vmul.f32 -1.442695, %v454_v15 }
  0x21   :  { %v306_v54 = vpop.eup %305  ;;  %v222_v55 = vadd.f32 1.0, %v304_v52  ;;  %v182_v17 = vadd.f32 %v166_v46, %v138_v49  ;;  %v139_v56 = vadd.f32 %v123_v48, %v95_v50 }
  0x22   :  { %v223_v57 = vadd.f32 1.0, %v306_v54  ;;  %313 = vpow2.f32 %v281_v53 }
  0x23   :  { %v308_v58 = vpop.eup %307  ;;  %315 = vrcp.f32 %v222_v55  ;;  %v196_v18 = vadd.f32 %v403_v51, %v182_v17  ;;  %v183_v22 = vadd.f32 %v167_v16, %v139_v56 }
  0x24   :  { %317 = vrcp.f32 %v223_v57  ;;  %v224_v59 = vadd.f32 1.0, %v308_v58 }
  0x25   :  { %v310_v60 = vpop.eup %309  ;;  %v282_v61 = vmul.f32 -1.442695, %v196_v18  ;;  %v197_v62 = vadd.f32 %v403_v51, %v183_v22 }
  0x26   :  { %319 = vrcp.f32 %v224_v59  ;;  %v225_v63 = vadd.f32 1.0, %v310_v60 }
  0x27   :  { %321 = vpow2.f32 %v282_v61  ;;  %v283_v1 = vmul.f32 -1.442695, %v197_v62 }
  0x28   :  { %v312_v2 = vpop.eup %311  ;;  %323 = vrcp.f32 %v225_v63 }
  0x29   :  { %v226_v3 = vadd.f32 1.0, %v312_v2  ;;  %325 = vpow2.f32 %v283_v1 }
  0x2b   :  { %327 = vrcp.f32 %v226_v3 }
  0x2c   :  { %v314_v5 = vpop.eup %313 }
  0x2d   :  { %v316_v6 = vpop.eup %315  ;;  %v227_v7 = vadd.f32 1.0, %v314_v5 }
  0x2e   :  { %v318_v8 = vpop.eup %317  ;;  %v246_v9 = vmul.f32 %v316_v6, %v409_v0 }
  0x2f   :  { %v247_v10 = vmul.f32 %v318_v8, %v415_v4  ;;  %329 = vrcp.f32 %v227_v7 }
  0x30   :  { %v320_v51 = vpop.eup %319  ;;  %v254_v11 = vpack.c.bf16 %v246_v9, %v246_v9 }
  0x31   :  { %v322_v12 = vpop.eup %321  ;;  %v255_v14 = vpack.c.bf16 %v247_v10, %v247_v10  ;;  %v248_v19 = vmul.f32 %v320_v51, %v422_v13 }
  0x32   :  { %v324_v23 = vpop.eup %323  ;;  %263 = vst.msk [vmem:[%s500_s3] sm:$0x3] %vm262_vm0, %v254_v11  ;;  %v228_v24 = vadd.f32 1.0, %v322_v12 }
  0x33   :  { %v326_v25 = vpop.eup %325  ;;  %264 = vst.msk [vmem:[%s500_s3 + $0x2] sm:$0x3] %vm262_vm0, %v255_v14  ;;  %v256_v0 = vpack.c.bf16 %v248_v19, %v248_v19  ;;  %v249_v4 = vmul.f32 %v324_v23, %v430_v27 }
  0x34   :  { %331 = vrcp.f32 %v228_v24  ;;  %v229_v26 = vadd.f32 1.0, %v326_v25 }
  0x35   :  { %v328_v28 = vpop.eup %327  ;;  %265 = vst.msk [vmem:[%s500_s3 + $0x4] sm:$0x3] %vm262_vm0, %v256_v0  ;;  %v257_v13 = vpack.c.bf16 %v249_v4, %v249_v4 }
  0x36   :  { %v250_v29 = vmul.f32 %v328_v28, %v440_v35  ;;  %333 = vrcp.f32 %v229_v26 }
  0x37   :  { %266 = vst.msk [vmem:[%s500_s3 + $0x6] sm:$0x3] %vm262_vm0, %v257_v13 }
  0x38   :  { %v258_v30 = vpack.c.bf16 %v250_v29, %v250_v29 }
  0x39   :  { %v330_v31 = vpop.eup %329 }
  0x3a   :  { %267 = vst.msk [vmem:[%s500_s3 + $0x8] sm:$0x3] %vm262_vm0, %v258_v30  ;;  %v251_v27 = vmul.f32 %v330_v31, %v454_v15 }
  0x3c   :  { %v259_v32 = vpack.c.bf16 %v251_v27, %v251_v27 }
  0x3e   :  { %v332_v33 = vpop.eup %331  ;;  %268 = vst.msk [vmem:[%s500_s3 + $0xa] sm:$0x3] %vm262_vm0, %v259_v32 }
  0x3f   :  { %v252_v34 = vmul.f32 %v332_v33, %v196_v18 }
  0x40   :  { %v334_v20 = vpop.eup %333 }
  0x41   :  { %v260_v35 = vpack.c.bf16 %v252_v34, %v252_v34  ;;  %v253_v36 = vmul.f32 %v334_v20, %v197_v62 }
  0x43   :  { %269 = vst.msk [vmem:[%s500_s3 + $0xc] sm:$0x3] %vm262_vm0, %v260_v35  ;;  %v261_v37 = vpack.c.bf16 %v253_v36, %v253_v36 }
  0x45   :  { %270 = vst.msk [vmem:[%s500_s3 + $0xe] sm:$0x3] %vm262_vm0, %v261_v37 }

// kernel: _lambda_.50
= control target key start
LH: loop header
LB: loop body
LE: loop exit
PB: predicated region body
PF: predicated region fallthrough
CT: control target
= control target key end

     0   :  { %s370_s1 = inlined_call_operand.vmem [shape: bf16[128,128], index: 1, kind: input, shape index: {}]   ;;  %s371_s0 = inlined_call_operand.vmem [shape: bf16[32,128], index: 0, kind: input, shape index: {}]   ;;  %s372_s2 = inlined_call_operand.vmem [shape: f32[1,128], index: 2, kind: input, shape index: {}]   ;;  %s373_s3 = inlined_call_operand.vmem [shape: bf16[32,128], index: 3, kind: input, shape index: {}]   ;;  %s374_s4 = inlined_call_operand.vmem [shape: bf16[32,128], index: 4, kind: output, shape index: {}]  }
   0x1   :  { %v290_v0 = vld [vmem:[%s370_s1] sm:$0xff]   ;;  %v291_v1 = vld [vmem:[%s370_s1 + $0x8] sm:$0xff]   ;;  %v292_v2 = vld [vmem:[%s370_s1 + $0x10] sm:$0xff]  }
   0x2   :  { %270 = vmatprep.subr.bf16.mxu0 %v290_v0  ;;  %v293_v3 = vld [vmem:[%s370_s1 + $0x18] sm:$0xff]   ;;  %v298_v4 = vld [vmem:[%s371_s0] sm:$0xff]   ;;  %v295_v6 = vld [vmem:[%s370_s1 + $0x28] sm:$0xff]  }
   0x3   :  { %271 = vmatpush3.bf16.msra.mxu0 %v290_v0  ;;  %286 = vmatprep.mubr.bf16.mxu0 %v298_v4  ;;  %v294_v5 = vld [vmem:[%s370_s1 + $0x20] sm:$0xff]   ;;  %v296_v7 = vld [vmem:[%s370_s1 + $0x30] sm:$0xff]   ;;  %v297_v8 = vld [vmem:[%s370_s1 + $0x38] sm:$0xff]  }
   0x4   :  { %272 = vmatprep.subr.bf16.mxu0 %v291_v1  ;;  %v299_v9 = vld [vmem:[%s371_s0 + $0x8] sm:$0xff]   ;;  %v231_v10 = vld [vmem:[%s372_s2] ss:$0 sm:$0xff] }
   0x5   :  { %v258_v11 = vld [vmem:[%s373_s3 + $0x8] sm:$0xff]   ;;  %v241_v12 = vld [vmem:[%s373_s3] sm:$0xff]  }
   0x6   :  { %v246_v15 = vunpack.c.l.bf16 %v258_v11  ;;  %v247_v17 = vunpack.c.h.bf16 %v258_v11  ;;  %v242_v19 = vunpack.c.l.bf16 %v241_v12  ;;  %v243_v21 = vunpack.c.h.bf16 %v241_v12 }
   0x7   :  { %273 = vmatpush3.bf16.msra.mxu0 %v291_v1 }
   0x8   :  { %274 = vmatprep.subr.bf16.mxu0 %v292_v2 }
   0xb   :  { %275 = vmatpush3.bf16.msra.mxu0 %v292_v2 }
   0xc   :  { %276 = vmatprep.subr.bf16.mxu0 %v293_v3 }
   0xf   :  { %277 = vmatpush3.bf16.msra.mxu0 %v293_v3 }
  0x10   :  { %278 = vmatprep.subr.bf16.mxu0 %v294_v5 }
  0x13   :  { %279 = vmatpush3.bf16.msra.mxu0 %v294_v5 }
  0x14   :  { %280 = vmatprep.subr.bf16.mxu0 %v295_v6 }
  0x17   :  { %281 = vmatpush3.bf16.msra.mxu0 %v295_v6 }
  0x18   :  { %282 = vmatprep.subr.bf16.mxu0 %v296_v7 }
  0x1b   :  { %283 = vmatpush3.bf16.msra.mxu0 %v296_v7 }
  0x1c   :  { %284 = vmatprep.subr.bf16.mxu0 %v297_v8 }
  0x1f   :  { %285 = vmatpush3.bf16.msra.mxu0 %v297_v8 }
  0x22   :  { %287 = vmatmul.mubr.bf16.vlgmr.msra.gmra.mrb[0].mxu0 %v299_v9 }
  0xf5   :  { %v288_v13 = vpop.f32.mrb[0].mxu0 }
  0xf6   :  { %v183_v14 = vadd.f32 %v288_v13, %v231_v10  ;;  %v144_v16 = vpop.f32.mrb[1].mxu0 }
  0xf7   :  { %v181_v18 = vadd.f32 %v231_v10, %v144_v16  ;;  %v289_v20 = vpop.f32.mrb[2].mxu0 }
  0xf8   :  { %v184_v22 = vadd.f32 %v289_v20, %v231_v10  ;;  %v147_v23 = vpop.f32.mrb[3].mxu0  ;;  %v195_v25 = vadd.f32 %v246_v15, %v183_v14 }
  0xf9   :  { %v182_v24 = vadd.f32 %v231_v10, %v147_v23  ;;  %v193_v27 = vadd.f32 %v242_v19, %v181_v18 }
  0xfa   :  { %v196_v26 = vadd.f32 %v247_v17, %v184_v22 }
  0xfb   :  { %v194_v28 = vadd.f32 %v243_v21, %v182_v24 }
  0xfc   :  { %v256_v29 = vpack.c.bf16 %v196_v26, %v195_v25 }
  0xfd   :  { %v251_v30 = vpack.c.bf16 %v194_v28, %v193_v27 }
  0xfe   :  { %259 = vst [vmem:[%s374_s4 + $0x8] sm:$0xff] %v256_v29  }
  0xff   :  { %252 = vst [vmem:[%s374_s4] sm:$0xff] %v251_v30  }

// kernel: _lambda_.49
= control target key start
LH: loop header
LB: loop body
LE: loop exit
PB: predicated region body
PF: predicated region fallthrough
CT: control target
= control target key end

     0   :  { %v2520_v0 = vmov 3   ;;  %v4232_v1 = vmov 0   ;;  %v4230_v51 = vmov 1   ;;  %vm1142_vm8 = vcmask 261120   ;;  %s4219_s3 = inlined_call_operand.vmem [shape: bf16[8,16,4], index: 3, kind: input, shape index: {}]   ;;  %s4220_s4 = inlined_call_operand.vmem [shape: bf16[8,16,4], index: 4, kind: input, shape index: {}]   ;;  %s4221_s1 = inlined_call_operand.vmem [shape: bf16[8,4,32], index: 1, kind: input, shape index: {}]   ;;  %s4222_s7 = inlined_call_operand.vmem [shape: f32[1,32], index: 7, kind: input, shape index: {}]   ;;  %s4223_s0 = inlined_call_operand.vmem [shape: bf16[8,4,32], index: 0, kind: input, shape index: {}]   ;;  %s4224_s6 = inlined_call_operand.vmem [shape: f32[1,32], index: 6, kind: input, shape index: {}]   ;;  %s4225_s5 = inlined_call_operand.vmem [shape: f32[16,32], index: 5, kind: input, shape index: {}]   ;;  %s4226_s2 = inlined_call_operand.vmem [shape: bf16[8,4,32], index: 2, kind: input, shape index: {}]   ;;  %s4227_s8 = inlined_call_operand.vmem [shape: bf16[8,4,32], index: 8, kind: output, shape index: {}]  }
   0x1   :  { %2062 = vset.pattern.permute.xlu0 %v2520_v0  ;;  %1994 = vset.pattern.permute.xlu1 %v4232_v1  ;;  %v1977_v2 = vld [vmem:[%s4219_s3 + $0x10] sm:$0xff]   ;;  %v1913_v3 = vld [vmem:[%s4219_s3] sm:$0xff]   ;;  %v1978_v4 = vld [vmem:[%s4219_s3 + $0x18] sm:$0xff]   ;;  %vm1767_vm9 = vcmask 1040384   ;;  %vm1776_vm10 = vcmask 1041408   ;;  %vm1785_vm11 = vcmask 1042432  }
   0x2   :  { %v1922_v5 = vunpack.c.l.bf16 %v1977_v2  ;;  %v1923_v6 = vunpack.c.h.bf16 %v1977_v2  ;;  %v1914_v7 = vunpack.c.l.bf16 %v1913_v3  ;;  %v1915_v8 = vunpack.c.h.bf16 %v1913_v3  ;;  %v1980_v11 = vld [vmem:[%s4219_s3 + $0x28] sm:$0xff]   ;;  %v1982_v17 = vld [vmem:[%s4219_s3 + $0x38] sm:$0xff]   ;;  %v1979_v32 = vld [vmem:[%s4219_s3 + $0x20] sm:$0xff]  }
   0x3   :  { %v1926_v9 = vunpack.c.l.bf16 %v1978_v4  ;;  %v1927_v10 = vunpack.c.h.bf16 %v1978_v4  ;;  %v1934_v15 = vunpack.c.l.bf16 %v1980_v11  ;;  %v1935_v16 = vunpack.c.h.bf16 %v1980_v11  ;;  %v1983_v21 = vld [vmem:[%s4220_s4 + $0x8] sm:$0xff]   ;;  %v1985_v23 = vld [vmem:[%s4220_s4 + $0x18] sm:$0xff]   ;;  %v1981_v35 = vld [vmem:[%s4219_s3 + $0x30] sm:$0xff]  }
   0x4   :  { %v2583_v12 = vpack.i.bf16 %v1923_v6, %v1922_v5  ;;  %v2585_v13 = vpack.i.bf16 %v1915_v8, %v1914_v7  ;;  %v1942_v18 = vunpack.c.l.bf16 %v1982_v17  ;;  %v1943_v19 = vunpack.c.h.bf16 %v1982_v17  ;;  %v1976_v22 = vld [vmem:[%s4219_s3 + $0x8] sm:$0xff]   ;;  %v1989_v33 = vld [vmem:[%s4220_s4 + $0x38] sm:$0xff]   ;;  %v1986_v36 = vld [vmem:[%s4220_s4 + $0x20] sm:$0xff]  }
   0x5   :  { %v2589_v14 = vpack.i.bf16 %v1927_v10, %v1926_v9  ;;  %v2596_v20 = vpack.i.bf16 %v1935_v16, %v1934_v15  ;;  %v1950_v25 = vunpack.c.l.bf16 %v1983_v21  ;;  %v1951_v26 = vunpack.c.h.bf16 %v1983_v21  ;;  %v1987_v31 = vld [vmem:[%s4220_s4 + $0x28] sm:$0xff]   ;;  %v1988_v41 = vld [vmem:[%s4220_s4 + $0x30] sm:$0xff]   ;;  %v63_v57 = vld [vmem:[%s4221_s1] sm:$0x3] }
   0x6   :  { %1996 = vperm.xlu1 %1994, %v2583_v12   ;;  %2064 = vperm.xlu0 %2062, %v2585_v13   ;;  %v2607_v24 = vpack.i.bf16 %v1943_v19, %v1942_v18  ;;  %v1918_v27 = vunpack.c.l.bf16 %v1976_v22  ;;  %v1919_v28 = vunpack.c.h.bf16 %v1976_v22  ;;  %v1958_v29 = vunpack.c.l.bf16 %v1985_v23  ;;  %v66_v60 = vld [vmem:[%s4221_s1 + $0x6] sm:$0x3]  ;;  %v2663_v62 = vld [vmem:[%s4222_s7] ss:$0 sm:$0xff]  ;;  %v70_v3 = vld [vmem:[%s4221_s1 + $0xe] sm:$0x3] }
   0x7   :  { %v1959_v30 = vunpack.c.h.bf16 %v1985_v23  ;;  %v2620_v34 = vpack.i.bf16 %v1951_v26, %v1950_v25  ;;  %v1966_v39 = vunpack.c.l.bf16 %v1987_v31  ;;  %v1967_v40 = vunpack.c.h.bf16 %v1987_v31  ;;  %v68_v4 = vld [vmem:[%s4221_s1 + $0xa] sm:$0x3]  ;;  %v2678_v5 = vld [vmem:[%s4223_s0 + $0xe] sm:$0x3]  ;;  %v65_v6 = vld [vmem:[%s4221_s1 + $0x4] sm:$0x3] }
   0x8   :  { %v2630_v37 = vpack.i.bf16 %v1919_v28, %v1918_v27  ;;  %v1930_v42 = vunpack.c.l.bf16 %v1979_v32  ;;  %v1931_v43 = vunpack.c.h.bf16 %v1979_v32  ;;  %v1974_v44 = vunpack.c.l.bf16 %v1989_v33  ;;  %v2693_v15 = vld [vmem:[%s4224_s6] ss:$0 sm:$0xff]  ;;  %v64_v28 = vld [vmem:[%s4221_s1 + $0x2] sm:$0x3] }
   0x9   :  { %v2632_v38 = vpack.i.bf16 %v1959_v30, %v1958_v29  ;;  %v1975_v45 = vunpack.c.h.bf16 %v1989_v33  ;;  %v1938_v46 = vunpack.c.l.bf16 %v1981_v35  ;;  %v1939_v47 = vunpack.c.h.bf16 %v1981_v35  ;;  %v67_v30 = vld [vmem:[%s4221_s1 + $0x8] sm:$0x3] }
   0xa   :  { %2001 = vperm.xlu1 %1994, %v2589_v14   ;;  %2080 = vperm.xlu0 %2062, %v2589_v14   ;;  %v1962_v48 = vunpack.c.l.bf16 %v1986_v36  ;;  %v1963_v49 = vunpack.c.h.bf16 %v1986_v36  ;;  %v1970_v50 = vunpack.c.l.bf16 %v1988_v41  ;;  %v1971_v52 = vunpack.c.h.bf16 %v1988_v41 }
   0xb   :  { %v2639_v53 = vpack.i.bf16 %v1931_v43, %v1930_v42  ;;  %v2641_v54 = vpack.i.bf16 %v1967_v40, %v1966_v39  ;;  %v2643_v55 = vpack.i.bf16 %v1939_v47, %v1938_v46  ;;  %v2646_v56 = vpack.i.bf16 %v1975_v45, %v1974_v44  ;;  %v69_v43 = vld [vmem:[%s4221_s1 + $0xc] sm:$0x3] }
   0xc   :  { %v2651_v58 = vpack.i.bf16 %v1963_v49, %v1962_v48  ;;  %v2653_v59 = vpack.i.bf16 %v1971_v52, %v1970_v50  ;;  %v71_v61 = vunpack.c.l.bf16 %v63_v57  ;;  %v74_v63 = vunpack.c.l.bf16 %v66_v60 }
   0xd   :  { %v78_v8 = vunpack.c.l.bf16 %v70_v3  ;;  %v76_v10 = vunpack.c.l.bf16 %v68_v4  ;;  %v46_v11 = vunpack.c.l.bf16 %v2678_v5  ;;  %v73_v16 = vunpack.c.l.bf16 %v65_v6  ;;  %v1984_v5 = vld [vmem:[%s4220_s4 + $0x10] sm:$0xff]  }
   0xe   :  { %2006 = vperm.xlu1 %1994, %v2596_v20   ;;  %2090 = vperm.xlu0 %2062, %v2596_v20   ;;  %v2666_v2 = vadd.f32 %v2663_v62, %v71_v61  ;;  %v2685_v7 = vadd.f32 %v2663_v62, %v74_v63  ;;  %v2523_v25 = vmov 2   ;;  %v72_v32 = vunpack.c.l.bf16 %v64_v28 }
   0xf   :  { %v2696_v17 = vadd.f32 %v2663_v62, %v78_v8  ;;  %v2702_v18 = vmul.f32 %v2693_v15, %v46_v11  ;;  %v2707_v23 = vadd.f32 %v2663_v62, %v76_v10  ;;  %v2711_v26 = vadd.f32 %v2663_v62, %v73_v16 }
  0x10   :  { %v102_v9 = vmin.f32 %v2666_v2, 20.0  ;;  %v105_v19 = vmin.f32 %v2685_v7, 20.0  ;;  %v75_v35 = vunpack.c.l.bf16 %v67_v30  ;;  %v2727_v39 = vadd.f32 %v2663_v62, %v72_v32 }
  0x11   :  { %4279 = vst [vmem:[#allocation2_spill] sm:$0xff] %v2702_v18  ;;  %v109_v21 = vmin.f32 %v2696_v17, 20.0  ;;  %v107_v31 = vmin.f32 %v2707_v23, 20.0  ;;  %v104_v33 = vmin.f32 %v2711_v26, 20.0  ;;  %v77_v48 = vunpack.c.l.bf16 %v69_v43 }
  0x12   :  { %2011 = vperm.xlu1 %1994, %v2607_v24   ;;  %2100 = vperm.xlu0 %2062, %v2607_v24   ;;  %v110_v22 = vmul.f32 1.442695, %v102_v9  ;;  %v116_v29 = vmul.f32 1.442695, %v105_v19  ;;  %v2731_v41 = vadd.f32 %v2663_v62, %v75_v35  ;;  %v103_v42 = vmin.f32 %v2727_v39, 20.0  ;;  %v1945_v19 = vld [vmem:[%s4220_s4] sm:$0xff]  }
  0x13   :  { %v124_v27 = vmul.f32 1.442695, %v109_v21  ;;  %v120_v36 = vmul.f32 1.442695, %v107_v31  ;;  %v114_v40 = vmul.f32 1.442695, %v104_v33  ;;  %v2744_v60 = vadd.f32 %v2663_v62, %v77_v48 }
  0x14   :  { %v106_v47 = vmin.f32 %v2731_v41, 20.0  ;;  %v112_v49 = vmul.f32 1.442695, %v103_v42  ;;  %v222_v6 = vlaneseq  ;;  %vm101_vm0 = vcmp.gt.f32.partialorder %v2696_v17, 20.0 }
  0x15   :  { %2325 = vpow2.f32 %v124_v27  ;;  %v108_v4 = vmin.f32 %v2744_v60, 20.0  ;;  %v1946_v30 = vunpack.c.l.bf16 %v1945_v19  ;;  %vm94_vm1 = vcmp.gt.f32.partialorder %v2666_v2, 20.0 }
  0x16   :  { %2015 = vset.pattern.permute.xlu1 %v4230_v51  ;;  %2110 = vperm.xlu0 %2062, %v2620_v34   ;;  %2327 = vpow2.f32 %v110_v22  ;;  %v118_v57 = vmul.f32 1.442695, %v106_v47  ;;  %v1955_v42 = vunpack.c.h.bf16 %v1984_v5  ;;  %vm97_vm2 = vcmp.gt.f32.partialorder %v2685_v7, 20.0  ;;  %v33_v47 = vld [vmem:[%s4223_s0 + $0x4] sm:$0x3] }
  0x17   :  { %2017 = vperm.xlu1 %2015, %v2630_v37   ;;  %2329 = vpow2.f32 %v116_v29  ;;  %v122_v16 = vmul.f32 1.442695, %v108_v4  ;;  %vm99_vm3 = vcmp.gt.f32.partialorder %v2707_v23, 20.0  ;;  %vm96_vm4 = vcmp.gt.f32.partialorder %v2711_v26, 20.0 }
  0x18   :  { %2331 = vpow2.f32 %v120_v36  ;;  %vm95_vm5 = vcmp.gt.f32.partialorder %v2727_v39, 20.0  ;;  %vm98_vm6 = vcmp.gt.f32.partialorder %v2731_v41, 20.0  ;;  %vm100_vm7 = vcmp.gt.f32.partialorder %v2744_v60, 20.0 }
  0x19   :  { %2333 = vpow2.f32 %v114_v40  ;;  %v1954_v40 = vunpack.c.l.bf16 %v1984_v5  ;;  %v35_v5 = vld [vmem:[%s4223_s0 + $0x8] sm:$0x3]  ;;  %vm1889_vm12 = vcmask 254976  }
  0x1a   :  { %2120 = vperm.xlu0 %2062, %v2632_v38  }
  0x1b   :  { %2022 = vperm.xlu1 %2015, %v2583_v12  }
  0x1e   :  { %2130 = vperm.xlu0 %2062, %v2641_v54  }
  0x1f   :  { %2027 = vperm.xlu1 %2015, %v2639_v53   ;;  %v2326_v44 = vpop.eup %2325 }
  0x20   :  { %v2328_v45 = vpop.eup %2327  ;;  %v133_v46 = vadd.f32 1.0, %v2326_v44 }
  0x21   :  { %v2330_v50 = vpop.eup %2329  ;;  %v126_v52 = vadd.f32 1.0, %v2328_v45 }
  0x22   :  { %2140 = vperm.xlu0 %2062, %v2646_v56   ;;  %2335 = vlog2.f32 %v133_v46  ;;  %v129_v61 = vadd.f32 1.0, %v2330_v50  ;;  %v2332_v63 = vpop.eup %2331  ;;  %v2794_v46 = vpack.i.bf16 %v1955_v42, %v1954_v40 }
  0x23   :  { %2032 = vperm.xlu1 %2015, %v2643_v55   ;;  %2337 = vpow2.f32 %v112_v49  ;;  %v2334_v3 = vpop.eup %2333  ;;  %v131_v8 = vadd.f32 1.0, %v2332_v63  ;;  %v2816_v63 = vld [vmem:[%s4225_s5] sm:$0xff] }
  0x24   :  { %2339 = vlog2.f32 %v126_v52  ;;  %v128_v62 = vadd.f32 1.0, %v2334_v3 }
  0x25   :  { %2341 = vpow2.f32 %v118_v57  ;;  %v41_v57 = vunpack.c.l.bf16 %v33_v47 }
  0x26   :  { %2144 = vset.pattern.permute.xlu0 %v2523_v25  ;;  %2343 = vlog2.f32 %v129_v61 }
  0x27   :  { %2036 = vset.pattern.permute.xlu1 %v2523_v25  ;;  %2146 = vperm.xlu0 %2144, %v2630_v37   ;;  %2345 = vlog2.f32 %v131_v8 }
  0x28   :  { %2038 = vperm.xlu1 %2036, %v2585_v13   ;;  %2347 = vlog2.f32 %v128_v62  ;;  %v2834_v62 = vld [vmem:[%s4223_s0 + $0x2] sm:$0x3] }
  0x29   :  { %2349 = vpow2.f32 %v122_v16  ;;  %v2840_v16 = vmul.f32 %v2693_v15, %v41_v57 }
  0x2b   :  { %2151 = vperm.xlu0 %2144, %v2639_v53   ;;  %4283 = vst [vmem:[#allocation6_spill] sm:$0xff] %v2840_v16 }
  0x2c   :  { %2043 = vperm.xlu1 %2036, %v2583_v12   ;;  %v2336_v9 = vpop.eup %2335 }
  0x2d   :  { %v149_v10 = vmul.f32 0.6931472, %v2336_v9  ;;  %v2338_v22 = vpop.eup %2337 }
  0x2e   :  { %v127_v33 = vadd.f32 1.0, %v2338_v22  ;;  %v2850_v22 = vld [vmem:[%s4223_s0 + $0xa] sm:$0x3] }
  0x2f   :  { %2156 = vperm.xlu0 %2144, %v2643_v55   ;;  %v2760_v21 = vsel %vm101_vm0, %v2696_v17, %v149_v10  ;;  %v1947_v17 = vunpack.c.h.bf16 %v1945_v19  ;;  %v2845_v19 = vld [vmem:[%s4225_s5 + $0x8] sm:$0xff]  ;;  %4284 = vst [vmem:[#allocation7_spill] sm:$0xff] %v2850_v22 }
  0x30   :  { %2048 = vperm.xlu1 %2036, %v2589_v14   ;;  %4280 = vst [vmem:[#allocation3_spill] sm:$0xff] %v2760_v21  ;;  %v2768_v28 = vmul.f32 %v2760_v21, %v46_v11  ;;  %2351 = vlog2.f32 %v127_v33 }
  0x31   :  { %v2786_v36 = vpack.i.bf16 %v1947_v17, %v1946_v30 }
  0x33   :  { %2167 = vperm.xlu0 %2144, %v2620_v34  }
  0x34   :  { %2053 = vperm.xlu1 %2036, %v2596_v20  }
  0x37   :  { %2182 = vperm.xlu0 %2144, %v2651_v58  }
  0x38   :  { %2058 = vperm.xlu1 %2036, %v2607_v24  }
  0x3b   :  { %2192 = vperm.xlu0 %2144, %v2653_v59  }
  0x3c   :  { %2068 = vset.pattern.permute.xlu1 %v2520_v0  ;;  %v2754_v0 = vshrl.u32 %v222_v6, 7 }
  0x3d   :  { %2070 = vperm.xlu1 %2068, %v2630_v37  }
  0x3e   :  { %v2763_v27 = vsub.s32 3, %v2754_v0  ;;  %v2800_v48 = vsub.s32 2, %v2754_v0  ;;  %v2837_v10 = vsub.s32 0, %v2754_v0 }
  0x3f   :  { %2196 = vset.pattern.permute.xlu0 %v4230_v51 }
  0x40   :  { %2198 = vperm.xlu0 %2196, %v2585_v13   ;;  %v2774_v31 = vrot.slane %v2768_v28, %v2763_v27  ;;  %v2781_v11 = vrot.slane %v2760_v21, %v2763_v27  ;;  %v2827_v6 = vrot.slane %v2760_v21, %v2800_v48 }
  0x41   :  { %2075 = vperm.xlu1 %2068, %v2583_v12   ;;  %v2340_v12 = vpop.eup %2339 }
  0x42   :  { %v2342_v29 = vpop.eup %2341 }
  0x43   :  { %v2344_v32 = vpop.eup %2343  ;;  %v130_v35 = vadd.f32 1.0, %v2342_v29 }
  0x44   :  { %2203 = vperm.xlu0 %2196, %v2589_v14   ;;  %v135_v14 = vmul.f32 0.6931472, %v2340_v12  ;;  %v141_v43 = vmul.f32 0.6931472, %v2344_v32  ;;  %v2346_v45 = vpop.eup %2345  ;;  %v2869_v32 = vld [vmem:[%s4223_s0 + $0xc] sm:$0x3] }
  0x45   :  { %2085 = vperm.xlu1 %2068, %v2639_v53   ;;  %2353 = vlog2.f32 %v130_v35  ;;  %v145_v52 = vmul.f32 0.6931472, %v2346_v45  ;;  %v40_v35 = vunpack.c.l.bf16 %v2834_v62  ;;  %v4228_v45 = vunpack.c.l.bf16 %v2850_v22 }
  0x46   :  { %v2789_v44 = vsel %vm94_vm1, %v2666_v2, %v135_v14  ;;  %v2805_v50 = vsel %vm97_vm2, %v2685_v7, %v141_v43  ;;  %v2821_v7 = vld [vmem:[%s4223_s0 + $0x6] sm:$0x3] }
  0x47   :  { %v825_v49 = vrot.slane %v2789_v44, %v2763_v27  ;;  %4281 = vst [vmem:[#allocation4_spill] sm:$0xff] %v2805_v50  ;;  %4282 = vst [vmem:[#allocation5_spill] sm:$0xff] %v2821_v7  ;;  %v837_v3 = vrot.slane %v2805_v50, %v2763_v27  ;;  %v2855_v12 = vsel %vm99_vm3, %v2707_v23, %v145_v52  ;;  %v4229_v17 = vunpack.c.l.bf16 %v2821_v7 }
  0x48   :  { %2208 = vperm.xlu0 %2196, %v2596_v20   ;;  %v2348_v20 = vpop.eup %2347  ;;  %4285 = vst [vmem:[#allocation8_spill] sm:$0xff] %v2855_v12  ;;  %v2873_v23 = vrot.slane %v2768_v28, %v2800_v48  ;;  %v845_v47 = vrot.slane %v2855_v12, %v2763_v27 }
  0x49   :  { %2095 = vperm.xlu1 %2068, %v2643_v55   ;;  %v2350_v2 = vpop.eup %2349  ;;  %v139_v61 = vmul.f32 0.6931472, %v2348_v20  ;;  %v854_v9 = vmul.f32 %v825_v49, %v2816_v63  ;;  %v855_v29 = vmul.f32 %v825_v49, %v2845_v19  ;;  %v860_v40 = vmul.f32 %v837_v3, %v2816_v63 }
  0x4a   :  { %v132_v4 = vadd.f32 1.0, %v2350_v2  ;;  %4287 = vst [vmem:[#allocation10_spill] sm:$0xff] %v2873_v23  ;;  %v2352_v14 = vpop.eup %2351  ;;  %v2885_v20 = vsub.s32 1, %v2754_v0  ;;  %v2890_v2 = vmul.f32 %v2693_v15, %v40_v35  ;;  %v43_v49 = vunpack.c.l.bf16 %v35_v5 }
  0x4b   :  { %v2879_v33 = vsel %vm96_vm4, %v2711_v26, %v139_v61  ;;  %v870_v43 = vmul.f32 1.442695, %v854_v9  ;;  %v861_v26 = vmul.f32 %v837_v3, %v2845_v19  ;;  %v872_v61 = vmul.f32 1.442695, %v855_v29 }
  0x4c   :  { %2213 = vperm.xlu0 %2196, %v2607_v24   ;;  %v31_v24 = vld [vmem:[%s4223_s0] sm:$0x3]  ;;  %2355 = vlog2.f32 %v132_v4  ;;  %4288 = vst [vmem:[#allocation11_spill] sm:$0xff] %v2890_v2  ;;  %v2896_v52 = vmul.f32 %v2879_v33, %v41_v57  ;;  %v137_v0 = vmul.f32 0.6931472, %v2352_v14  ;;  %v2902_v3 = vmul.f32 %v2693_v15, %v43_v49 }
  0x4d   :  { %2105 = vperm.xlu1 %2068, %v2786_v36   ;;  %v39_v8 = vunpack.c.l.bf16 %v31_v24  ;;  %v4231_v24 = vunpack.c.l.bf16 %v2869_v32  ;;  %v882_v4 = vmul.f32 1.442695, %v860_v40  ;;  %2357 = vpow2.f32 %v870_v43 }
  0x4e   :  { %4289 = vst [vmem:[#allocation12_spill] sm:$0xff] %v2902_v3  ;;  %v2910_v57 = vmul.f32 %v2805_v50, %v4229_v17  ;;  %v864_v29 = vmul.f32 %v845_v47, %v2816_v63  ;;  %v884_v5 = vmul.f32 1.442695, %v861_v26  ;;  %v865_v14 = vmul.f32 %v845_v47, %v2845_v19 }
  0x4f   :  { %v2860_v30 = vmul.f32 %v2693_v15, %v39_v8  ;;  %v2354_v42 = vpop.eup %2353  ;;  %v2905_v62 = vmul.f32 %v2789_v44, %v39_v8  ;;  %v2918_v40 = vmul.f32 %v2693_v15, %v4231_v24  ;;  %v2922_v8 = vrot.slane %v2879_v33, %v2763_v27 }
  0x50   :  { %2223 = vperm.xlu0 %2196, %v2786_v36   ;;  %v143_v9 = vmul.f32 0.6931472, %v2354_v42  ;;  %v2927_v42 = vrot.slane %v2896_v52, %v2837_v10  ;;  %2359 = vpow2.f32 %v872_v61  ;;  %v2932_v43 = vsel %vm95_vm5, %v2727_v39, %v137_v0 }
  0x51   :  { %2115 = vperm.xlu1 %2068, %v2794_v46   ;;  %4286 = vst [vmem:[#allocation9_spill] sm:$0xff] %v2860_v30  ;;  %4290 = vst [vmem:[#allocation13_spill] sm:$0xff] %v2918_v40  ;;  %v633_v15 = vrot.slane %v2789_v44, %v2800_v48  ;;  %v2940_v47 = vmul.f32 %v2855_v12, %v4228_v45  ;;  %2361 = vpow2.f32 %v882_v4  ;;  %v890_v4 = vmul.f32 1.442695, %v864_v29 }
  0x52   :  { %v2945_v26 = vsel %vm98_vm6, %v2731_v41, %v143_v9  ;;  %v868_v39 = vmul.f32 %v2781_v11, %v2816_v63  ;;  %v2952_v61 = vrot.slane %v2905_v62, %v2763_v27  ;;  %v2960_v0 = vrot.slane %v2896_v52, %v2885_v20 }
  0x53   :  { %v2963_v9 = vmul.f32 %v2932_v43, %v40_v35  ;;  %2363 = vpow2.f32 %v884_v5  ;;  %v892_v45 = vmul.f32 1.442695, %v865_v14  ;;  %v869_v17 = vmul.f32 %v2781_v11, %v2845_v19 }
  0x54   :  { %2239 = vperm.xlu0 %2196, %v2632_v38   ;;  %4291 = vst [vmem:[#allocation14_spill] sm:$0xff] %v2960_v0  ;;  %v2970_v51 = vrot.slane %v2910_v57, %v2763_v27  ;;  %v2973_v24 = vmul.f32 %v2945_v26, %v43_v49  ;;  %v662_v29 = vmul.f32 %v633_v15, %v2816_v63  ;;  %v898_v14 = vmul.f32 1.442695, %v868_v39 }
  0x55   :  { %2125 = vperm.xlu1 %2068, %v2651_v58   ;;  %v645_v35 = vrot.slane %v2805_v50, %v2800_v48  ;;  %v2981_v5 = vrot.slane %v2940_v47, %v2837_v10  ;;  %v2985_v11 = vrot.slane %v2940_v47, %v2763_v27  ;;  %v2991_v49 = vrot.slane %v2768_v28, %v2837_v10 }
  0x56   :  { %v2356_v41 = vpop.eup %2355  ;;  %2365 = vpow2.f32 %v890_v4  ;;  %v2997_v22 = vrot.slane %v2963_v9, %v2885_v20  ;;  %v900_v7 = vmul.f32 1.442695, %v869_v17  ;;  %v3005_v16 = vrot.slane %v2973_v24, %v2885_v20 }
  0x57   :  { %4292 = vst [vmem:[#allocation15_spill] sm:$0xff] %v2981_v5  ;;  %v147_v18 = vmul.f32 0.6931472, %v2356_v41  ;;  %2367 = vpow2.f32 %v892_v45  ;;  %v2358_v39 = vpop.eup %2357  ;;  %v678_v4 = vmul.f32 1.442695, %v662_v29  ;;  %v3009_v41 = vrot.slane %v2905_v62, %v2800_v48 }
  0x58   :  { %2249 = vperm.xlu0 %2196, %v2641_v54   ;;  %4293 = vst [vmem:[#allocation16_spill] sm:$0xff] %v2997_v22  ;;  %4295 = vst [vmem:[#allocation18_spill] sm:$0xff] %v3005_v16  ;;  %v668_v30 = vmul.f32 %v645_v35, %v2816_v63  ;;  %2369 = vpow2.f32 %v898_v14  ;;  %v3015_v45 = vrot.slane %v2973_v24, %v2800_v48  ;;  %v3031_v23 = vmul.f32 0.0, %v2358_v39 }
  0x59   :  { %2135 = vperm.xlu1 %2068, %v2653_v59   ;;  %4296 = vst [vmem:[#allocation19_spill] sm:$0xff] %v3009_v41  ;;  %v669_v40 = vmul.f32 %v645_v35, %v2845_v19  ;;  %v3022_v29 = vsel %vm100_vm7, %v2744_v60, %v147_v18  ;;  %v3026_v2 = vrot.slane %v2896_v52, %v2800_v48  ;;  %2371 = vpow2.f32 %v900_v7 }
  0x5a   :  { %4297 = vst [vmem:[#allocation20_spill] sm:$0xff] %v3015_v45  ;;  %v2360_v3 = vpop.eup %2359  ;;  %v3035_v35 = vrot.slane %v2910_v57, %v2800_v48  ;;  %2373 = vpow2.f32 %v678_v4  ;;  %v690_v60 = vmul.f32 1.442695, %v668_v30  ;;  %v829_v45 = vrot.slane %v2932_v43, %v2763_v27 }
  0x5b   :  { %4298 = vst [vmem:[#allocation21_spill] sm:$0xff] %v3026_v2  ;;  %v2362_v14 = vpop.eup %2361  ;;  %v676_v2 = vmul.f32 %v2827_v6, %v2816_v63  ;;  %v3043_v39 = vmul.f32 0.0, %v2360_v3  ;;  %v4300_v7 = vunpack.c.l.bf16 %v2869_v32  ;;  %v677_v30 = vmul.f32 %v2827_v6, %v2845_v19 }
  0x5c   :  { %2259 = vperm.xlu0 %2196, %v2646_v56   ;;  %4299 = vst [vmem:[#allocation22_spill] sm:$0xff] %v3035_v35  ;;  %v692_v35 = vmul.f32 1.442695, %v669_v40  ;;  %v3058_v3 = vrot.slane %v2940_v47, %v2800_v48  ;;  %v441_v40 = vrot.slane %v2789_v44, %v2885_v20 }
  0x5d   :  { %2160 = vset.pattern.permute.xlu1 %v2523_v25  ;;  %v2956_v25 = vrot.slane %v2910_v57, %v2837_v10  ;;  %v3048_v16 = vmul.f32 %v3022_v29, %v4300_v7 }
  0x5e   :  { %2162 = vperm.xlu1 %2160, %v2786_v36   ;;  %4301 = vst [vmem:[#allocation23_spill] sm:$0xff] %v3058_v3  ;;  %v708_v3 = vmul.f32 1.442695, %v677_v30  ;;  %v470_v30 = vmul.f32 %v441_v40, %v2816_v63 }
  0x60   :  { %2263 = vset.pattern.permute.xlu0 %v4232_v1  ;;  %v663_v1 = vmul.f32 %v633_v15, %v2845_v19  ;;  %v3001_v15 = vrot.slane %v2963_v9, %v2800_v48 }
  0x61   :  { %2265 = vperm.xlu0 %2263, %v2585_v13   ;;  %v653_v13 = vrot.slane %v2855_v12, %v2800_v48 }
  0x62   :  { %2172 = vperm.xlu1 %2160, %v2794_v46   ;;  %4294 = vst [vmem:[#allocation17_spill] sm:$0xff] %v3001_v15  ;;  %v680_v17 = vmul.f32 1.442695, %v663_v1  ;;  %v2364_v15 = vpop.eup %2363 }
  0x63   :  { %v672_v1 = vmul.f32 %v653_v13, %v2816_v63  ;;  %v673_v18 = vmul.f32 %v653_v13, %v2845_v19  ;;  %v3053_v13 = vmul.f32 0.0, %v2362_v14  ;;  %v2366_v7 = vpop.eup %2365  ;;  %v3063_v6 = vmul.f32 0.0, %v2364_v15 }
  0x64   :  { %2375 = vpow2.f32 %v680_v17  ;;  %v706_v14 = vmul.f32 1.442695, %v676_v2  ;;  %v856_v17 = vmul.f32 %v829_v45, %v2816_v63  ;;  %v858_v2 = vmul.f32 %v2922_v8, %v2816_v63 }
  0x65   :  { %2270 = vperm.xlu0 %2263, %v2630_v37   ;;  %v637_v37 = vrot.slane %v2932_v43, %v2800_v48  ;;  %v698_v4 = vmul.f32 1.442695, %v672_v1  ;;  %2377 = vpow2.f32 %v690_v60  ;;  %v2368_v1 = vpop.eup %2367  ;;  %v453_v60 = vrot.slane %v2805_v50, %v2885_v20 }
  0x66   :  { %2177 = vperm.xlu1 %2160, %v2632_v38   ;;  %2379 = vpow2.f32 %v692_v35  ;;  %v2370_v22 = vpop.eup %2369  ;;  %v3088_v41 = vmul.f32 0.0, %v2366_v7  ;;  %v3099_v7 = vmul.f32 0.0, %v2368_v1  ;;  %v849_v1 = vrot.slane %v3022_v29, %v2763_v27 }
  0x67   :  { %v664_v0 = vmul.f32 %v637_v37, %v2816_v63  ;;  %v665_v32 = vmul.f32 %v637_v37, %v2845_v19  ;;  %v857_v37 = vmul.f32 %v829_v45, %v2845_v19  ;;  %2381 = vpow2.f32 %v698_v4 }
  0x68   :  { %v874_v45 = vmul.f32 1.442695, %v856_v17  ;;  %v471_v4 = vmul.f32 %v441_v40, %v2845_v19  ;;  %v878_v40 = vmul.f32 1.442695, %v858_v2  ;;  %v476_v17 = vmul.f32 %v453_v60, %v2816_v63 }
  0x69   :  { %2275 = vperm.xlu0 %2263, %v2639_v53   ;;  %v700_v53 = vmul.f32 1.442695, %v673_v18  ;;  %v3069_v18 = vrot.slane %v3048_v16, %v2885_v20  ;;  %v682_v15 = vmul.f32 1.442695, %v664_v0  ;;  %v684_v35 = vmul.f32 1.442695, %v665_v32 }
  0x6a   :  { %2187 = vperm.xlu1 %2160, %v2641_v54   ;;  %v649_v0 = vrot.slane %v2945_v26, %v2800_v48  ;;  %v876_v50 = vmul.f32 1.442695, %v857_v37  ;;  %v477_v37 = vmul.f32 %v453_v60, %v2845_v19  ;;  %v488_v5 = vmul.f32 1.442695, %v471_v4 }
  0x6b   :  { %4302 = vst [vmem:[#allocation24_spill] sm:$0xff] %v3069_v18  ;;  %2383 = vpow2.f32 %v700_v53  ;;  %v3085_v18 = vpop.eup %2371  ;;  %v859_v53 = vmul.f32 %v2922_v8, %v2845_v19  ;;  %v461_v2 = vrot.slane %v2855_v12, %v2885_v20  ;;  %v3115_v60 = vrot.slane %v2963_v9, %v2763_v27 }
  0x6c   :  { %2385 = vpow2.f32 %v706_v14  ;;  %v3092_v32 = vpop.eup %2373  ;;  %v4304_v14 = vmov 1  }
  0x6d   :  { %2280 = vperm.xlu0 %2263, %v2643_v55   ;;  %v3079_v55 = vrot.slane %v3048_v16, %v2800_v48  ;;  %2387 = vpow2.f32 %v708_v3  ;;  %v486_v3 = vmul.f32 1.442695, %v470_v30  ;;  %4306 = vst [vmem:[#allocation27_spill] sm:$0xff] %v3115_v60  ;;  %v498_v30 = vmul.f32 1.442695, %v476_v17 }
  0x6e   :  { %2218 = vperm.xlu1 %2160, %v2646_v56   ;;  %2389 = vpow2.f32 %v682_v15  ;;  %v3102_v8 = vpop.eup %2375  ;;  %v670_v15 = vmul.f32 %v649_v0, %v2816_v63  ;;  %v480_v17 = vmul.f32 %v461_v2, %v2816_v63 }
  0x6f   :  { %4303 = vst [vmem:[#allocation25_spill] sm:$0xff] %v3079_v55  ;;  %v841_v55 = vrot.slane %v2945_v26, %v2763_v27  ;;  %2391 = vpow2.f32 %v684_v35  ;;  %v3111_v35 = vpop.eup %2377 }
  0x70   :  { %2393 = vpow2.f32 %v874_v45  ;;  %4305 = vst [vmem:[#allocation26_spill] sm:$0xff] %v3111_v35  ;;  %v3118_v4 = vpop.eup %2379  ;;  %v3126_v35 = vmul.f32 0.0, %v2370_v22 }
  0x71   :  { %2291 = vperm.xlu0 %2263, %v2620_v34   ;;  %2395 = vpow2.f32 %v876_v50  ;;  %v862_v45 = vmul.f32 %v841_v55, %v2816_v63  ;;  %4307 = vst [vmem:[#allocation28_spill] sm:$0xff] %v3118_v4  ;;  %v500_v50 = vmul.f32 1.442695, %v477_v37  ;;  %v3124_v12 = vpop.eup %2381  ;;  %v866_v37 = vmul.f32 %v849_v1, %v2816_v63 }
  0x72   :  { %2227 = vset.pattern.permute.xlu1 %v4304_v14  ;;  %v880_v14 = vmul.f32 1.442695, %v859_v53  ;;  %2397 = vpow2.f32 %v878_v40  ;;  %v657_v53 = vrot.slane %v3022_v29, %v2800_v48  ;;  %4308 = vst [vmem:[#allocation29_spill] sm:$0xff] %v3124_v12  ;;  %v694_v40 = vmul.f32 1.442695, %v670_v15 }
  0x73   :  { %2229 = vperm.xlu1 %2227, %v2620_v34   ;;  %v671_v34 = vmul.f32 %v649_v0, %v2845_v19  ;;  %2399 = vpow2.f32 %v486_v3  ;;  %v863_v0 = vmul.f32 %v841_v55, %v2845_v19  ;;  %v3134_v3 = vrot.slane %v2905_v62, %v2885_v20 }
  0x74   :  { %2401 = vpow2.f32 %v488_v5  ;;  %v886_v22 = vmul.f32 1.442695, %v862_v45  ;;  %v481_v5 = vmul.f32 %v461_v2, %v2845_v19  ;;  %v469_v15 = vrot.slane %v2760_v21, %v2885_v20 }
  0x75   :  { %2306 = vperm.xlu0 %2263, %v2651_v58   ;;  %v3129_v60 = vpop.eup %2383  ;;  %4310 = vst [vmem:[#allocation31_spill] sm:$0xff] %v3134_v3  ;;  %2403 = vpow2.f32 %v880_v14  ;;  %v696_v55 = vmul.f32 1.442695, %v671_v34  ;;  %v3147_v3 = vrot.slane %v2896_v52, %v2763_v27  ;;  %v888_v14 = vmul.f32 1.442695, %v863_v0 }
  0x76   :  { %4309 = vst [vmem:[#allocation30_spill] sm:$0xff] %v3129_v60  ;;  %v3137_v4 = vpop.eup %2385  ;;  %2405 = vpow2.f32 %v498_v30  ;;  %v674_v34 = vmul.f32 %v657_v53, %v2816_v63  ;;  %v506_v30 = vmul.f32 1.442695, %v480_v17  ;;  %v675_v2 = vmul.f32 %v657_v53, %v2845_v19 }
  0x77   :  { %2234 = vperm.xlu1 %2227, %v2794_v46   ;;  %v3142_v60 = vpop.eup %2387  ;;  %4311 = vst [vmem:[#allocation32_spill] sm:$0xff] %v3147_v3  ;;  %2407 = vpow2.f32 %v500_v50  ;;  %v641_v45 = vrot.slane %v2879_v33, %v2800_v48  ;;  %v867_v52 = vmul.f32 %v849_v1, %v2845_v19  ;;  %v894_v50 = vmul.f32 1.442695, %v866_v37 }
  0x78   :  { %v3150_v12 = vpop.eup %2389  ;;  %2409 = vpow2.f32 %v694_v40  ;;  %v508_v3 = vmul.f32 1.442695, %v481_v5  ;;  %v484_v40 = vmul.f32 %v469_v15, %v2816_v63  ;;  %v229_v53 = vrot.slane %v2932_v43, %v2837_v10 }
  0x79   :  { %2316 = vperm.xlu0 %2263, %v2653_v59   ;;  %4312 = vst [vmem:[#allocation33_spill] sm:$0xff] %v3150_v12  ;;  %v3155_v21 = vpop.eup %2391  ;;  %2411 = vpow2.f32 %v696_v55  ;;  %v3169_v48 = vrot.slane %v2910_v57, %v2885_v20  ;;  %v485_v1 = vmul.f32 %v469_v15, %v2845_v19  ;;  %v704_v37 = vmul.f32 1.442695, %v675_v2 }
  0x7a   :  { %4313 = vst [vmem:[#allocation34_spill] sm:$0xff] %v3155_v21  ;;  %v2394_v0 = vpop.eup %2393  ;;  %2413 = vpow2.f32 %v886_v22  ;;  %v666_v22 = vmul.f32 %v641_v45, %v2816_v63  ;;  %v445_v5 = vrot.slane %v2932_v43, %v2885_v20  ;;  %v896_v57 = vmul.f32 1.442695, %v867_v52 }
  0x7b   :  { %2244 = vperm.xlu1 %2227, %v2651_v58   ;;  %v3158_v58 = vmul.f32 0.0, %v3085_v18  ;;  %v3164_v17 = vpop.eup %2395  ;;  %4314 = vst [vmem:[#allocation35_spill] sm:$0xff] %v3169_v48  ;;  %2415 = vpow2.f32 %v888_v14  ;;  %v702_v18 = vmul.f32 1.442695, %v674_v34  ;;  %v667_v14 = vmul.f32 %v641_v45, %v2845_v19 }
  0x7c   :  { %v2398_v55 = vpop.eup %2397  ;;  %2417 = vpow2.f32 %v506_v30  ;;  %v514_v15 = vmul.f32 1.442695, %v484_v40  ;;  %v256_v30 = vmul.f32 %v229_v53, %v2816_v63  ;;  %v449_v2 = vrot.slane %v2879_v33, %v2885_v20 }
  0x7d   :  { %v3175_v21 = vpop.eup %2399  ;;  %2419 = vpow2.f32 %v894_v50  ;;  %v4317_v48 = vmov 0   ;;  %v3190_v12 = vrot.slane %v2940_v47, %v2885_v20  ;;  %v516_v52 = vmul.f32 1.442695, %v485_v1 }
  0x7e   :  { %v3182_v34 = vpop.eup %2401  ;;  %2421 = vpow2.f32 %v508_v3  ;;  %v257_v45 = vmul.f32 %v229_v53, %v2845_v19  ;;  %v686_v3 = vmul.f32 1.442695, %v666_v22  ;;  %v472_v40 = vmul.f32 %v445_v5, %v2816_v63 }
  0x7f   :  { %2254 = vperm.xlu1 %2227, %v2653_v59   ;;  %v3179_v59 = vrot.slane %v2973_v24, %v2763_v27  ;;  %4316 = vst [vmem:[#allocation37_spill] sm:$0xff] %v3182_v34  ;;  %v2404_v43 = vpop.eup %2403  ;;  %4318 = vst [vmem:[#allocation38_spill] sm:$0xff] %v3190_v12  ;;  %2423 = vpow2.f32 %v702_v18  ;;  %v688_v18 = vmul.f32 1.442695, %v667_v14  ;;  %v473_v53 = vmul.f32 %v445_v5, %v2845_v19 }
  0x80   :  { %v3193_v50 = vpop.eup %2405  ;;  %2425 = vpow2.f32 %v704_v37  ;;  %v3212_v37 = vrot.slane %v3048_v16, %v2763_v27  ;;  %v474_v22 = vmul.f32 %v449_v2, %v2816_v63  ;;  %v276_v5 = vmul.f32 1.442695, %v257_v45 }
  0x81   :  { %4315 = vst [vmem:[#allocation36_spill] sm:$0xff] %v3179_v59  ;;  %v225_v59 = vrot.slane %v2789_v44, %v2837_v10  ;;  %2427 = vpow2.f32 %v896_v57  ;;  %v274_v44 = vmul.f32 1.442695, %v256_v30  ;;  %v3219_v57 = vrot.slane %v2768_v28, %v2885_v20 }
  0x82   :  { %4321 = vst [vmem:[#allocation41_spill] sm:$0xff] %v3212_v37  ;;  %2429 = vpow2.f32 %v514_v15  ;;  %v475_v14 = vmul.f32 %v449_v2, %v2845_v19  ;;  %v490_v27 = vmul.f32 1.442695, %v472_v40  ;;  %v492_v28 = vmul.f32 1.442695, %v473_v53 }
  0x83   :  { %2284 = vset.pattern.permute.xlu1 %v4317_v48  ;;  %v3199_v48 = vpop.eup %2407  ;;  %4323 = vst [vmem:[#allocation43_spill] sm:$0xff] %v3219_v57  ;;  %2431 = vpow2.f32 %v516_v52  ;;  %v254_v15 = vmul.f32 %v225_v59, %v2816_v63  ;;  %v241_v52 = vrot.slane %v2945_v26, %v2837_v10  ;;  %v3238_v57 = vmul.f32 0.0, %v2404_v43 }
  0x84   :  { %2286 = vperm.xlu1 %2284, %v2786_v36   ;;  %4319 = vst [vmem:[#allocation39_spill] sm:$0xff] %v3199_v48  ;;  %v457_v36 = vrot.slane %v2945_v26, %v2885_v20  ;;  %v3208_v1 = vpop.eup %2409  ;;  %2433 = vpow2.f32 %v686_v3  ;;  %v494_v3 = vmul.f32 1.442695, %v474_v22  ;;  %v255_v53 = vmul.f32 %v225_v59, %v2845_v19 }
  0x85   :  { %v3201_v34 = vpop.permute.xlu1 %1996  ;;  %v3203_v47 = vpop.permute.xlu0 %2064  ;;  %4320 = vst [vmem:[#allocation40_spill] sm:$0xff] %v3208_v1  ;;  %v3223_v1 = vmul.f32 0.0, %v2394_v0  ;;  %2435 = vpow2.f32 %v688_v18  ;;  %v3236_v0 = vmul.f32 0.0, %v2398_v55  ;;  %4326 = vst [vmem:[#allocation46_spill] sm:$0xff] %v3238_v57  ;;  %v496_v18 = vmul.f32 1.442695, %v475_v14 }
  0x86   :  { %v3215_v12 = vpop.eup %2411  ;;  %v478_v2 = vmul.f32 %v457_v36, %v2816_v63  ;;  %2437 = vpow2.f32 %v274_v44  ;;  %v270_v55 = vmul.f32 1.442695, %v254_v15  ;;  %v262_v59 = vmul.f32 %v241_v52, %v2816_v63 }
  0x87   :  { %4322 = vst [vmem:[#allocation42_spill] sm:$0xff] %v3215_v12  ;;  %v2414_v48 = vpop.eup %2413  ;;  %4324 = vst [vmem:[#allocation44_spill] sm:$0xff] %v3223_v1  ;;  %2439 = vpow2.f32 %v276_v5 }
  0x88   :  { %2296 = vperm.xlu1 %2284, %v2794_v46   ;;  %v2416_v30 = vpop.eup %2415  ;;  %v3234_v46 = vmul.f32 0.0, %v3164_v17  ;;  %4325 = vst [vmem:[#allocation45_spill] sm:$0xff] %v3236_v0  ;;  %v3244_v26 = vmul.f32 0.0, %v2414_v48  ;;  %2441 = vpow2.f32 %v490_v27  ;;  %v479_v17 = vmul.f32 %v457_v36, %v2845_v19 }
  0x89   :  { %v3226_v37 = vpop.permute.xlu1 %2001  ;;  %v2081_v12 = vpop.permute.xlu0 %2080  ;;  %v3251_v22 = vmul.f32 0.0, %v2416_v30  ;;  %2443 = vpow2.f32 %v492_v28  ;;  %v502_v5 = vmul.f32 1.442695, %v478_v2 }
  0x8a   :  { %v3231_v45 = vpop.eup %2417  ;;  %4328 = vst [vmem:[#allocation48_spill] sm:$0xff] %v3244_v26  ;;  %2445 = vpow2.f32 %v494_v3  ;;  %v2083_v27 = vunpack.i.h.bf16 %v2081_v12  ;;  %v2082_v15 = vunpack.i.l.bf16 %v2081_v12  ;;  %v504_v2 = vmul.f32 1.442695, %v479_v17 }
  0x8b   :  { %v2420_v40 = vpop.eup %2419  ;;  %4330 = vst [vmem:[#allocation50_spill] sm:$0xff] %v3251_v22  ;;  %2447 = vpow2.f32 %v496_v18  ;;  %v1998_v3 = vunpack.i.l.bf16 %v3201_v34  ;;  %v263_v18 = vmul.f32 %v241_v52, %v2845_v19  ;;  %v2066_v17 = vunpack.i.l.bf16 %v3203_v47 }
  0x8c   :  { %v3241_v1 = vpop.eup %2421  ;;  %2301 = vperm.xlu1 %2284, %v2632_v38   ;;  %v3256_v26 = vmul.f32 0.0, %v2420_v40  ;;  %2449 = vpow2.f32 %v270_v55  ;;  %v1004_v55 = vmul.f32 %v2082_v15, %v2970_v51 }
  0x8d   :  { %4327 = vst [vmem:[#allocation47_spill] sm:$0xff] %v3241_v1  ;;  %v3247_v0 = vpop.eup %2423  ;;  %v3249_v44 = vpop.permute.xlu1 %2006  ;;  %2451 = vpow2.f32 %v502_v5  ;;  %v1005_v1 = vmul.f32 %v2083_v27, %v2970_v51  ;;  %v3298_v27 = vrot.slane %v2905_v62, %v2837_v10  ;;  %v3314_v62 = vmul.f32 %v1998_v3, %v2927_v42 }
  0x8e   :  { %4329 = vst [vmem:[#allocation49_spill] sm:$0xff] %v3247_v0  ;;  %v2091_v43 = vpop.permute.xlu0 %2090  ;;  %v3254_v14 = vpop.eup %2425  ;;  %4332 = vst [vmem:[#allocation52_spill] sm:$0xff] %v3256_v26  ;;  %v272_v0 = vmul.f32 1.442695, %v255_v53  ;;  %v286_v53 = vmul.f32 1.442695, %v262_v59  ;;  %2453 = vpow2.f32 %v504_v2  ;;  %v998_v2 = vmul.f32 %v2066_v17, %v2952_v61 }
  0x8f   :  { %4331 = vst [vmem:[#allocation51_spill] sm:$0xff] %v3254_v14  ;;  %v2093_v38 = vunpack.i.h.bf16 %v2091_v43  ;;  %v2092_v48 = vunpack.i.l.bf16 %v2091_v43  ;;  %v2428_v36 = vpop.eup %2427  ;;  %4339 = vst [vmem:[#allocation59_spill] sm:$0xff] %v3314_v62 }
  0x90   :  { %v3258_v57 = vpop.eup %2429  ;;  %2311 = vperm.xlu1 %2284, %v2641_v54   ;;  %v2067_v54 = vunpack.i.h.bf16 %v3203_v47  ;;  %v3294_v51 = vmul.f32 0.0, %v2428_v36  ;;  %2455 = vpow2.f32 %v272_v0 }
  0x91   :  { %v3261_v30 = vmul.f32 %v2092_v48, %v2985_v11  ;;  %v3264_v28 = vmul.f32 %v2093_v38, %v2985_v11  ;;  %v3267_v40 = vpop.eup %2431  ;;  %v2012_v43 = vpop.permute.xlu1 %2011  ;;  %2457 = vpow2.f32 %v286_v53  ;;  %v2003_v53 = vunpack.i.l.bf16 %v3226_v37 }
  0x92   :  { %v2101_v12 = vpop.permute.xlu0 %2100  ;;  %v3271_v14 = vpop.eup %2433  ;;  %v2014_v48 = vunpack.i.h.bf16 %v2012_v43  ;;  %v2013_v26 = vunpack.i.l.bf16 %v2012_v43 }
  0x93   :  { %v2103_v11 = vunpack.i.h.bf16 %v2101_v12  ;;  %v2102_v38 = vunpack.i.l.bf16 %v2101_v12  ;;  %v3273_v22 = vpop.eup %2435 }
  0x94   :  { %v3279_v52 = vpop.eup %2437  ;;  %v3282_v59 = vmul.f32 %v2013_v26, %v2991_v49  ;;  %v3285_v5 = vmul.f32 %v2014_v48, %v2991_v49  ;;  %2321 = vperm.xlu1 %2284, %v2646_v56   ;;  %v288_v26 = vmul.f32 1.442695, %v263_v18  ;;  %v1999_v48 = vunpack.i.h.bf16 %v3201_v34 }
  0x95   :  { %4333 = vst [vmem:[#allocation53_spill] sm:$0xff] %v3279_v52  ;;  %v1012_v43 = vmul.f32 %v2102_v38, %v2774_v31  ;;  %v1013_v12 = vmul.f32 %v2103_v11, %v2774_v31  ;;  %v3290_v47 = vpop.eup %2439  ;;  %v999_v18 = vmul.f32 %v2067_v54, %v2952_v61  ;;  %v3321_v11 = vadd.f32 %v3053_v13, %v1004_v55 }
  0x96   :  { %4334 = vst [vmem:[#allocation54_spill] sm:$0xff] %v3282_v59  ;;  %4335 = vst [vmem:[#allocation55_spill] sm:$0xff] %v3285_v5  ;;  %v3292_v15 = vpop.permute.xlu0 %2110  ;;  %v3300_v49 = vpop.eup %2441  ;;  %v2004_v61 = vunpack.i.h.bf16 %v3226_v37  ;;  %v249_v13 = vrot.slane %v3022_v29, %v2837_v10  ;;  %2459 = vpow2.f32 %v288_v26 }
  0x97   :  { %4336 = vst [vmem:[#allocation56_spill] sm:$0xff] %v3290_v47  ;;  %4337 = vst [vmem:[#allocation57_spill] sm:$0xff] %v3300_v49  ;;  %v3303_v38 = vpop.permute.xlu1 %2017  ;;  %v3306_v56 = vadd.f32 %v3126_v35, %v1012_v43  ;;  %v3309_v31 = vadd.f32 %v3158_v58, %v1013_v12  ;;  %v3311_v36 = vpop.eup %2443  ;;  %v3324_v35 = vadd.f32 %v3063_v6, %v1005_v1 }
  0x98   :  { %4338 = vst [vmem:[#allocation58_spill] sm:$0xff] %v3311_v36  ;;  %v3318_v34 = vpop.eup %2445  ;;  %v465_v6 = vrot.slane %v3022_v29, %v2885_v20  ;;  %v3351_v43 = vrot.slane %v2963_v9, %v2837_v10  ;;  %v3356_v12 = vadd.f32 %v3031_v23, %v998_v2  ;;  %v3359_v20 = vadd.f32 %v3043_v39, %v999_v18 }
  0x99   :  { %4340 = vst [vmem:[#allocation60_spill] sm:$0xff] %v3318_v34  ;;  %v3328_v58 = vmul.f32 %v3137_v4, %v3306_v56  ;;  %v3332_v0 = vmul.f32 %v3142_v60, %v3309_v31  ;;  %v3334_v3 = vpop.eup %2447  ;;  %v3345_v4 = vmul.f32 %v1999_v48, %v2927_v42  ;;  %v3363_v42 = vrot.slane %v2973_v24, %v2837_v10 }
  0x9a   :  { %4341 = vst [vmem:[#allocation61_spill] sm:$0xff] %v3334_v3  ;;  %v2121_v54 = vpop.permute.xlu0 %2120  ;;  %v3342_v1 = vpop.eup %2449  ;;  %4344 = vst [vmem:[#allocation64_spill] sm:$0xff] %v3351_v43  ;;  %v1040_v9 = vadd.f32 %v3088_v41, %v3261_v30  ;;  %v3372_v23 = vmul.f32 %v2003_v53, %v2956_v25  ;;  %v3375_v39 = vmul.f32 %v2004_v61, %v2956_v25  ;;  %v4411_v36 = vunpack.i.h.bf16 %v3292_v15 }
  0x9b   :  { %4342 = vst [vmem:[#allocation62_spill] sm:$0xff] %v3342_v1  ;;  %4343 = vst [vmem:[#allocation63_spill] sm:$0xff] %v3345_v4  ;;  %v2123_v60 = vunpack.i.h.bf16 %v2121_v54  ;;  %v2122_v17 = vunpack.i.l.bf16 %v2121_v54  ;;  %v3347_v55 = vpop.permute.xlu1 %2022  ;;  %v3353_v37 = vpop.eup %2451  ;;  %v1041_v54 = vadd.f32 %v3099_v7, %v3264_v28  ;;  %v266_v24 = vmul.f32 %v249_v13, %v2816_v63  ;;  %v3386_v7 = vld [vmem:[%s4226_s2 + $0x2] sm:$0x3] }
  0x9c   :  { %4345 = vst [vmem:[#allocation65_spill] sm:$0xff] %v3353_v37  ;;  %4346 = vst [vmem:[#allocation66_spill] sm:$0xff] %v3363_v42  ;;  %v482_v26 = vmul.f32 %v465_v6, %v2816_v63  ;;  %v3388_v25 = vpop.eup %2453  ;;  %v2008_v28 = vunpack.i.l.bf16 %v3249_v44  ;;  %v1215_v53 = vmul.f32 %v3092_v32, %v3356_v12  ;;  %v4358_v32 = vld [vmem:[#allocation28_spill] sm:$0xff]  ;;  %v4375_v37 = vld [vmem:[#allocation18_spill] sm:$0xff] }
  0x9d   :  { %v1132_v29 = vmul.f32 %v2122_v17, %v3321_v11  ;;  %v1133_v48 = vmul.f32 %v2123_v60, %v3324_v35  ;;  %4347 = vst [vmem:[#allocation67_spill] sm:$0xff] %v3372_v23  ;;  %4348 = vst [vmem:[#allocation68_spill] sm:$0xff] %v3375_v39  ;;  %v1216_v39 = vmul.f32 %v3102_v8, %v3359_v20  ;;  %v4353_v8 = vld [vmem:[#allocation15_spill] sm:$0xff] }
  0x9e   :  { %v2131_v2 = vpop.permute.xlu0 %2130  ;;  %4349 = vst [vmem:[#allocation69_spill] sm:$0xff] %v3388_v25  ;;  %v3412_v1 = vmul.f32 %v2008_v28, %v4353_v8  ;;  %v3427_v28 = vmul.f32 %v4358_v32, %v3324_v35 }
  0x9f   :  { %v1170_v18 = vsel %vm1142_vm8, %v1132_v29, 0.0  ;;  %v1171_v60 = vsel %vm1142_vm8, %v1133_v48, 0.0  ;;  %v2133_v17 = vunpack.i.h.bf16 %v2131_v2  ;;  %v2132_v41 = vunpack.i.l.bf16 %v2131_v2  ;;  %v3381_v30 = vpop.permute.xlu1 %2027  ;;  %v3394_v48 = vpop.eup %2455 }
  0xa0   :  { %v1172_v61 = vadd.f32 %v1171_v60, %v1170_v18  ;;  %v267_v29 = vmul.f32 %v249_v13, %v2845_v19  ;;  %4350 = vst [vmem:[#allocation70_spill] sm:$0xff] %v3394_v48  ;;  %v2009_v2 = vunpack.i.h.bf16 %v3249_v44  ;;  %v3399_v23 = vpop.eup %2457  ;;  %v3403_v18 = vrot.slane %v3048_v16, %v2837_v10  ;;  %4354 = vst [vmem:[#allocation15_spill] sm:$0xff] %v3412_v1  ;;  %v4359_v1 = vld [vmem:[#allocation29_spill] sm:$0xff] }
  0xa1   :  { %v1136_v5 = vmul.f32 %v2132_v41, %v1040_v9  ;;  %v1137_v59 = vmul.f32 %v2133_v17, %v1041_v54  ;;  %4351 = vst [vmem:[#allocation71_spill] sm:$0xff] %v3399_v23  ;;  %v294_v60 = vmul.f32 1.442695, %v266_v24  ;;  %v483_v13 = vmul.f32 %v465_v6, %v2845_v19 }
  0xa2   :  { %v2141_v4 = vpop.permute.xlu0 %2140  ;;  %4352 = vst [vmem:[#allocation72_spill] sm:$0xff] %v3403_v18  ;;  %v1173_v3 = vrot.slane %v1172_v61, 4  ;;  %v296_v16 = vmul.f32 1.442695, %v267_v29  ;;  %v3415_v23 = vmul.f32 %v2009_v2, %v4353_v8  ;;  %v510_v29 = vmul.f32 1.442695, %v482_v26 }
  0xa3   :  { %v1188_v62 = vsel %vm1142_vm8, %v1136_v5, 0.0  ;;  %v1189_v44 = vsel %vm1142_vm8, %v1137_v59, 0.0  ;;  %v2143_v17 = vunpack.i.h.bf16 %v2141_v4  ;;  %v2142_v41 = vunpack.i.l.bf16 %v2141_v4  ;;  %v3409_v48 = vpop.permute.xlu1 %2032  ;;  %v4356_v5 = vld [vmem:[#allocation26_spill] sm:$0xff]  ;;  %v3423_v4 = vpop.eup %2459 }
  0xa4   :  { %v1190_v34 = vadd.f32 %v1189_v44, %v1188_v62  ;;  %4355 = vst [vmem:[#allocation73_spill] sm:$0xff] %v3415_v23  ;;  %v3421_v59 = vmul.f32 %v4356_v5, %v3321_v11  ;;  %4357 = vst [vmem:[#allocation26_spill] sm:$0xff] %v3423_v4  ;;  %v3430_v62 = vmul.f32 %v4359_v1, %v1040_v9  ;;  %2461 = vpow2.f32 %v294_v60  ;;  %v4360_v44 = vld [vmem:[#allocation30_spill] sm:$0xff] }
  0xa5   :  { %v1140_v24 = vmul.f32 %v2142_v41, %v3306_v56  ;;  %v1141_v6 = vmul.f32 %v2143_v17, %v3309_v31  ;;  %v3437_v11 = vmul.f32 %v4360_v44, %v1041_v54  ;;  %v4361_v17 = vunpack.c.l.bf16 %v3386_v7 }
  0xa6   :  { %v3434_v31 = vpop.permute.xlu0 %2146  ;;  %v1174_v8 = vadd.f32 %v1173_v3, %v1172_v61  ;;  %2463 = vpow2.f32 %v296_v16  ;;  %v233_v1 = vrot.slane %v2879_v33, %v2837_v10  ;;  %v2020_v5 = vunpack.i.h.bf16 %v3303_v38  ;;  %v4364_v61 = vld [vmem:[#allocation19_spill] sm:$0xff] }
  0xa7   :  { %v1206_v2 = vsel %vm1142_vm8, %v1140_v24, 0.0  ;;  %v1207_v56 = vsel %vm1142_vm8, %v1141_v6, 0.0  ;;  %v1905_v41 = vmul.f32 -1.442695, %v4361_v17  ;;  %v2039_v32 = vpop.permute.xlu1 %2038  ;;  %v4363_v24 = vld [vmem:[#allocation4_spill] sm:$0xff]  ;;  %v2019_v3 = vunpack.i.l.bf16 %v3303_v38 }
  0xa8   :  { %v3441_v35 = vadd.f32 %v1207_v56, %v1206_v2  ;;  %v2041_v26 = vunpack.i.h.bf16 %v2039_v32  ;;  %v2040_v60 = vunpack.i.l.bf16 %v2039_v32  ;;  %v237_v6 = vrot.slane %v4363_v24, %v2837_v10 }
  0xa9   :  { %2465 = vpow2.f32 %v510_v29  ;;  %v512_v33 = vmul.f32 1.442695, %v483_v13  ;;  %v1175_v44 = vrot.slane %v1174_v8, 2  ;;  %v2024_v17 = vunpack.i.l.bf16 %v3347_v55 }
  0xaa   :  { %4362 = vst [vmem:[#allocation28_spill] sm:$0xff] %v3441_v35  ;;  %v806_v2 = vmul.f32 %v2040_v60, %v4364_v61  ;;  %v807_v16 = vmul.f32 %v2041_v26, %v4364_v61  ;;  %v3453_v56 = vpop.permute.xlu0 %2151  ;;  %2467 = vpow2.f32 %v1905_v41  ;;  %v1191_v32 = vrot.slane %v1190_v34, 4  ;;  %v4365_v60 = vld [vmem:[#allocation16_spill] sm:$0xff] }
  0xab   :  { %v3456_v24 = vpop.permute.xlu1 %2043  ;;  %v258_v9 = vmul.f32 %v233_v1, %v2816_v63  ;;  %v2025_v54 = vunpack.i.h.bf16 %v3347_v55  ;;  %v260_v26 = vmul.f32 %v237_v6, %v2816_v63  ;;  %v3466_v61 = vmul.f32 %v2019_v3, %v4365_v60 }
  0xac   :  { %v3460_v38 = vadd.f32 %v1215_v53, %v806_v2  ;;  %v3462_v29 = vadd.f32 %v1216_v39, %v807_v16  ;;  %v2030_v13 = vunpack.i.h.bf16 %v3381_v30  ;;  %v2029_v41 = vunpack.i.l.bf16 %v3381_v30  ;;  %v4370_v2 = vld [vmem:[#allocation14_spill] sm:$0xff] }
  0xad   :  { %4366 = vst [vmem:[#allocation29_spill] sm:$0xff] %v3466_v61  ;;  %v2034_v35 = vunpack.i.l.bf16 %v3409_v48  ;;  %v3472_v23 = vmul.f32 %v2020_v5, %v4365_v60  ;;  %v2035_v55 = vunpack.i.h.bf16 %v3409_v48  ;;  %2469 = vpow2.f32 %v512_v33 }
  0xae   :  { %v3475_v53 = vpop.permute.xlu0 %2156  ;;  %v3478_v39 = vmul.f32 %v237_v6, %v2845_v19  ;;  %v3480_v63 = vpop.eup %2461  ;;  %v3482_v3 = vadd.f32 %v1175_v44, %v1174_v8  ;;  %v3485_v16 = vmul.f32 %v2024_v17, %v4370_v2  ;;  %v3487_v30 = vadd.f32 %v1191_v32, %v1190_v34  ;;  %v4378_v44 = vld [vmem:[#allocation24_spill] sm:$0xff]  ;;  %v4381_v17 = vld [vmem:[#allocation22_spill] sm:$0xff] }
  0xaf   :  { %4367 = vst [vmem:[#allocation30_spill] sm:$0xff] %v3472_v23  ;;  %4368 = vst [vmem:[#allocation4_spill] sm:$0xff] %v3480_v63  ;;  %v2049_v4 = vpop.permute.xlu1 %2048  ;;  %v278_v5 = vmul.f32 1.442695, %v258_v9  ;;  %v3490_v60 = vmul.f32 %v2025_v54, %v4370_v2  ;;  %v3492_v33 = vmul.f32 1.442695, %v260_v26  ;;  %v3497_v63 = vmul.f32 %v2029_v41, %v4375_v37 }
  0xb0   :  { %4369 = vst [vmem:[#allocation19_spill] sm:$0xff] %v3482_v3  ;;  %4371 = vst [vmem:[#allocation16_spill] sm:$0xff] %v3485_v16  ;;  %v2051_v48 = vunpack.i.h.bf16 %v2049_v4  ;;  %v2050_v25 = vunpack.i.l.bf16 %v2049_v4  ;;  %v3494_v6 = vpop.eup %2463  ;;  %v3500_v8 = vmul.f32 %v2030_v13, %v4375_v37  ;;  %v3503_v34 = vmul.f32 %v2034_v35, %v4378_v44 }
  0xb1   :  { %4372 = vst [vmem:[#allocation14_spill] sm:$0xff] %v3487_v30  ;;  %4373 = vst [vmem:[#allocation74_spill] sm:$0xff] %v3490_v60  ;;  %v2149_v9 = vunpack.i.h.bf16 %v3434_v31  ;;  %v3507_v54 = vmul.f32 %v2035_v55, %v4378_v44  ;;  %v259_v41 = vmul.f32 %v233_v1, %v2845_v19  ;;  %v2148_v13 = vunpack.i.l.bf16 %v3434_v31  ;;  %v3528_v19 = vld [vmem:[%s4226_s2 + $0x8] sm:$0x3]  ;;  %v4384_v1 = vld [vmem:[#allocation17_spill] sm:$0xff] }
  0xb2   :  { %4374 = vst [vmem:[#allocation75_spill] sm:$0xff] %v3494_v6  ;;  %4376 = vst [vmem:[#allocation18_spill] sm:$0xff] %v3497_v63  ;;  %v812_v4 = vmul.f32 %v2050_v25, %v4381_v17  ;;  %v813_v32 = vmul.f32 %v2051_v48, %v4381_v17  ;;  %v3511_v26 = vpop.permute.xlu0 %2167  ;;  %2471 = vpow2.f32 %v278_v5  ;;  %v2154_v31 = vunpack.i.h.bf16 %v3453_v56 }
  0xb3   :  { %4377 = vst [vmem:[#allocation76_spill] sm:$0xff] %v3500_v8  ;;  %4379 = vst [vmem:[#allocation24_spill] sm:$0xff] %v3503_v34  ;;  %v3514_v2 = vpop.eup %2465  ;;  %v2054_v6 = vpop.permute.xlu1 %2053  ;;  %v3531_v35 = vmul.f32 %v2149_v9, %v4384_v1  ;;  %v2153_v5 = vunpack.i.l.bf16 %v3453_v56  ;;  %v280_v30 = vmul.f32 1.442695, %v259_v41  ;;  %v2159_v3 = vunpack.i.h.bf16 %v3475_v53 }
  0xb4   :  { %4380 = vst [vmem:[#allocation77_spill] sm:$0xff] %v3507_v54  ;;  %4382 = vst [vmem:[#allocation22_spill] sm:$0xff] %v3514_v2  ;;  %v2468_v55 = vpop.eup %2467  ;;  %v3520_v44 = vadd.f32 %v3421_v59, %v812_v4  ;;  %v3523_v25 = vadd.f32 %v3427_v28, %v813_v32  ;;  %v2056_v48 = vunpack.i.h.bf16 %v2054_v6  ;;  %v2055_v17 = vunpack.i.l.bf16 %v2054_v6  ;;  %v4385_v28 = vld [vmem:[#allocation23_spill] sm:$0xff] }
  0xb5   :  { %4383 = vst [vmem:[#allocation78_spill] sm:$0xff] %v3528_v19  ;;  %v2046_v59 = vunpack.i.h.bf16 %v3456_v24  ;;  %v2045_v4 = vunpack.i.l.bf16 %v3456_v24  ;;  %v2158_v9 = vunpack.i.l.bf16 %v3475_v53  ;;  %v1842_v34 = vadd.f32 1.0, %v2468_v55  ;;  %v4388_v55 = vld [vmem:[#allocation21_spill] sm:$0xff] }
  0xb6   :  { %v816_v32 = vmul.f32 %v2055_v17, %v4385_v28  ;;  %v817_v6 = vmul.f32 %v2056_v48, %v4385_v28  ;;  %v3539_v37 = vpop.permute.xlu0 %2182  ;;  %v808_v41 = vmul.f32 %v2148_v13, %v4384_v1  ;;  %v4387_v28 = vld [vmem:[#allocation20_spill] sm:$0xff]  ;;  %2473 = vpow2.f32 %v280_v30 }
  0xb7   :  { %v2059_v54 = vpop.permute.xlu1 %2058  ;;  %v3544_v56 = vpop.eup %2469  ;;  %v3554_v16 = vmul.f32 %v2153_v5, %v4387_v28  ;;  %v3557_v53 = vmul.f32 %v2154_v31, %v4387_v28  ;;  %v3560_v2 = vmul.f32 %v2046_v59, %v4388_v55  ;;  %v3575_v1 = vmul.f32 %v2045_v4, %v4388_v55  ;;  %v4391_v31 = vld [vmem:[#allocation25_spill] sm:$0xff] }
  0xb8   :  { %4386 = vst [vmem:[#allocation17_spill] sm:$0xff] %v3544_v56  ;;  %v3547_v60 = vadd.f32 %v3430_v62, %v816_v32  ;;  %v3550_v24 = vadd.f32 %v3437_v11, %v817_v6  ;;  %v2061_v48 = vunpack.i.h.bf16 %v2059_v54  ;;  %v2060_v17 = vunpack.i.l.bf16 %v2059_v54  ;;  %v4389_v56 = vld [vmem:[#allocation10_spill] sm:$0xff]  ;;  %v4390_v54 = vld [vmem:[#allocation37_spill] sm:$0xff] }
  0xb9   :  { %v3568_v11 = vmul.f32 %v3175_v21, %v3460_v38  ;;  %v3572_v13 = vmul.f32 %v4390_v54, %v3462_v29  ;;  %v3578_v5 = vmul.f32 %v2159_v3, %v4391_v31  ;;  %v4392_v59 = vunpack.c.l.bf16 %v3528_v19  ;;  %v4399_v19 = vld [vmem:[#allocation39_spill] sm:$0xff] }
  0xba   :  { %v820_v8 = vmul.f32 %v2060_v17, %v4389_v56  ;;  %v821_v62 = vmul.f32 %v2061_v48, %v4389_v56  ;;  %v3564_v32 = vpop.permute.xlu0 %2192  ;;  %v3585_v56 = vld [vmem:[%s4226_s2 + $0xc] sm:$0x3]  ;;  %v3588_v21 = vmul.f32 %v2158_v9, %v4391_v31  ;;  %2475 = vrcp.f32 %v1842_v34 }
  0xbb   :  { %v1908_v6 = vmul.f32 -1.442695, %v4392_v59  ;;  %4393 = vst [vmem:[#allocation23_spill] sm:$0xff] %v3585_v56  ;;  %v2170_v28 = vunpack.i.h.bf16 %v3511_v26  ;;  %v4397_v59 = vld [vmem:[#allocation8_spill] sm:$0xff]  ;;  %v2169_v9 = vunpack.i.l.bf16 %v3511_v26  ;;  %v4398_v34 = vld [vmem:[#allocation27_spill] sm:$0xff] }
  0xbc   :  { %v3591_v48 = vadd.f32 %v3328_v58, %v820_v8  ;;  %v3594_v4 = vadd.f32 %v3332_v0, %v821_v62  ;;  %v2071_v3 = vpop.permute.xlu1 %2070  ;;  %v3596_v17 = vpop.eup %2471  ;;  %v245_v30 = vrot.slane %v4397_v59, %v2837_v10  ;;  %v284_v59 = vmul.f32 1.442695, %v3478_v39  ;;  %v4400_v8 = vld [vmem:[#allocation3_spill] sm:$0xff] }
  0xbd   :  { %4396 = vst [vmem:[#allocation10_spill] sm:$0xff] %v3596_v17  ;;  %v2073_v55 = vunpack.i.h.bf16 %v2071_v3  ;;  %v2072_v54 = vunpack.i.l.bf16 %v2071_v3  ;;  %2477 = vpow2.f32 %v1908_v6  ;;  %v3624_v63 = vrot.slane %v4400_v8, %v2837_v10  ;;  %v4403_v10 = vld [vmem:[#allocation33_spill] sm:$0xff] }
  0xbe   :  { %4394 = vst [vmem:[#allocation20_spill] sm:$0xff] %v3591_v48  ;;  %4395 = vst [vmem:[#allocation21_spill] sm:$0xff] %v3594_v4  ;;  %v3604_v58 = vmul.f32 %v3258_v57, %v3591_v48  ;;  %v3608_v0 = vmul.f32 %v3267_v40, %v3594_v4  ;;  %v3616_v57 = vmul.f32 %v3193_v50, %v3520_v44  ;;  %2479 = vpow2.f32 %v3492_v33  ;;  %v3653_v33 = vld [vmem:[%s4225_s5 + $0x8] sm:$0xff]  ;;  %v4419_v4 = vld [vmem:[#allocation36_spill] sm:$0xff] }
  0xbf   :  { %v1000_v62 = vmul.f32 %v2072_v54, %v4398_v34  ;;  %v1001_v31 = vmul.f32 %v2073_v55, %v4398_v34  ;;  %v2199_v3 = vpop.permute.xlu0 %2198  ;;  %v3620_v40 = vmul.f32 %v4399_v19, %v3523_v25  ;;  %v4401_v54 = vld [vmem:[#allocation44_spill] sm:$0xff]  ;;  %v2517_v34 = vld [vmem:[%s4225_s5] sm:$0xff]  ;;  %v4402_v19 = vunpack.c.l.bf16 %v3585_v56 }
  0xc0   :  { %v2200_v17 = vunpack.i.l.bf16 %v2199_v3  ;;  %v2076_v26 = vpop.permute.xlu1 %2075  ;;  %v264_v50 = vmul.f32 %v2517_v34, %v245_v30  ;;  %v2201_v47 = vunpack.i.h.bf16 %v2199_v3  ;;  %v4404_v55 = vld [vmem:[#allocation34_spill] sm:$0xff]  ;;  %2481 = vpow2.f32 %v284_v59  ;;  %v3656_v59 = vpop.eup %2473 }
  0xc1   :  { %v1032_v6 = vadd.f32 %v4401_v54, %v1000_v62  ;;  %v1033_v39 = vadd.f32 %v3234_v46, %v1001_v31  ;;  %v1910_v52 = vmul.f32 -1.442695, %v4402_v19  ;;  %v4405_v62 = vld [vmem:[#allocation31_spill] sm:$0xff]  ;;  %v3644_v3 = vmul.f32 %v3231_v45, %v3547_v60  ;;  %4407 = vst [vmem:[#allocation37_spill] sm:$0xff] %v3656_v59 }
  0xc2   :  { %v614_v54 = vmul.f32 %v2200_v17, %v4405_v62  ;;  %v4406_v19 = vld [vmem:[#allocation47_spill] sm:$0xff]  ;;  %v265_v17 = vmul.f32 %v3653_v33, %v245_v30  ;;  %v290_v31 = vmul.f32 1.442695, %v264_v50  ;;  %v615_v48 = vmul.f32 %v2201_v47, %v4405_v62 }
  0xc3   :  { %v1217_v8 = vmul.f32 %v4403_v10, %v1032_v6  ;;  %v1218_v42 = vmul.f32 %v4404_v55, %v1033_v39  ;;  %v2204_v46 = vpop.permute.xlu0 %2203  ;;  %v3648_v18 = vmul.f32 %v4406_v19, %v3550_v24  ;;  %v4410_v19 = vunpack.i.l.bf16 %v3292_v15  ;;  %v3672_v55 = vld [vmem:[%s4226_s2] sm:$0x3] }
  0xc4   :  { %v3640_v23 = vpop.permute.xlu1 %2085  ;;  %v2476_v56 = vpop.eup %2475  ;;  %v1129_v49 = vmul.f32 %v4411_v36, %v1033_v39  ;;  %v2205_v30 = vunpack.i.l.bf16 %v2204_v46  ;;  %4412 = vst [vmem:[#allocation27_spill] sm:$0xff] %v3672_v55  ;;  %v2078_v15 = vunpack.i.h.bf16 %v2076_v26  ;;  %v2077_v36 = vunpack.i.l.bf16 %v2076_v26 }
  0xc5   :  { %v3659_v10 = vadd.f32 %v1217_v8, %v808_v41  ;;  %v3662_v45 = vadd.f32 %v1218_v42, %v3531_v35  ;;  %v1128_v61 = vmul.f32 %v4410_v19, %v1032_v6  ;;  %v2206_v35 = vunpack.i.h.bf16 %v2204_v46 }
  0xc6   :  { %v3679_v6 = vadd.f32 %v3568_v11, %v614_v54  ;;  %2483 = vpow2.f32 %v1910_v52  ;;  %v3683_v47 = vmul.f32 1.442695, %v265_v17  ;;  %v4413_v62 = vunpack.c.l.bf16 %v3386_v7  ;;  %v4415_v54 = vld [vmem:[#allocation35_spill] sm:$0xff] }
  0xc7   :  { %4408 = vst [vmem:[#allocation25_spill] sm:$0xff] %v3659_v10  ;;  %4409 = vst [vmem:[#allocation8_spill] sm:$0xff] %v3662_v45  ;;  %v1313_v41 = vmul.f32 %v2169_v9, %v3659_v10  ;;  %v1314_v42 = vmul.f32 %v2170_v28, %v3662_v45  ;;  %v3676_v50 = vpop.permute.xlu0 %2208  ;;  %v3685_v8 = vpop.eup %2477  ;;  %2485 = vpow2.f32 %v290_v31  ;;  %v3693_v46 = vmul.f32 %v2517_v34, %v3624_v63  ;;  %v4417_v28 = vld [vmem:[#allocation32_spill] sm:$0xff] }
  0xc8   :  { %v3681_v39 = vpop.permute.xlu1 %2095  ;;  %v3689_v9 = vmul.f32 %v2476_v56, %v4413_v62  ;;  %v1152_v11 = vsel %vm1142_vm8, %v1128_v61, 0.0  ;;  %v1153_v26 = vsel %vm1142_vm8, %v1129_v49, 0.0  ;;  %v620_v52 = vmul.f32 %v2205_v30, %v4415_v54  ;;  %v3705_v34 = vpop.eup %2479 }
  0xc9   :  { %v2087_v17 = vunpack.i.l.bf16 %v3640_v23  ;;  %v1336_v19 = vsel %vm1142_vm8, %v1313_v41, 0.0  ;;  %v1337_v7 = vsel %vm1142_vm8, %v1314_v42, 0.0  ;;  %v621_v56 = vmul.f32 %v2206_v35, %v4415_v54  ;;  %4416 = vst [vmem:[#allocation3_spill] sm:$0xff] %v3705_v34 }
  0xca   :  { %4414 = vst [vmem:[#allocation39_spill] sm:$0xff] %v3689_v9  ;;  %v3703_v31 = vadd.f32 %v3572_v13, %v615_v48  ;;  %v1002_v61 = vmul.f32 %v2077_v36, %v4417_v28  ;;  %v1003_v49 = vmul.f32 %v2078_v15, %v4417_v28  ;;  %v3709_v45 = vpop.eup %2481  ;;  %v1154_v41 = vadd.f32 %v1153_v26, %v1152_v11  ;;  %v4420_v48 = vld [vmem:[#allocation43_spill] sm:$0xff] }
  0xcb   :  { %v2214_v62 = vpop.permute.xlu0 %2213  ;;  %4418 = vst [vmem:[#allocation44_spill] sm:$0xff] %v3709_v45  ;;  %v2088_v42 = vunpack.i.h.bf16 %v3640_v23  ;;  %v1338_v54 = vadd.f32 %v1337_v7, %v1336_v19  ;;  %v1006_v13 = vmul.f32 %v2087_v17, %v4419_v4  ;;  %v3722_v11 = vadd.f32 %v3616_v57, %v620_v52  ;;  %v4423_v19 = vld [vmem:[#allocation45_spill] sm:$0xff] }
  0xcc   :  { %v2216_v59 = vunpack.i.h.bf16 %v2214_v62  ;;  %v2215_v30 = vunpack.i.l.bf16 %v2214_v62  ;;  %v2106_v9 = vpop.permute.xlu1 %2105  ;;  %v3725_v23 = vadd.f32 %v3620_v40, %v621_v56  ;;  %v3728_v7 = vadd.f32 %v4423_v19, %v1002_v61 }
  0xcd   :  { %v2108_v10 = vunpack.i.h.bf16 %v2106_v9  ;;  %v2107_v35 = vunpack.i.l.bf16 %v2106_v9  ;;  %4421 = vst [vmem:[#allocation33_spill] sm:$0xff] %v3722_v11  ;;  %v1155_v52 = vrot.slane %v1154_v41, 4  ;;  %v1339_v19 = vrot.slane %v1338_v54, 4 }
  0xce   :  { %v3714_v43 = vmul.f32 %v2215_v30, %v4420_v48  ;;  %v3717_v36 = vmul.f32 %v2216_v59, %v4420_v48  ;;  %4422 = vst [vmem:[#allocation34_spill] sm:$0xff] %v3725_v23  ;;  %v4424_v30 = vld [vmem:[#allocation46_spill] sm:$0xff]  ;;  %v3740_v48 = vmul.f32 %v3653_v33, %v3624_v63  ;;  %2487 = vpow2.f32 %v3683_v47 }
  0xcf   :  { %v1126_v15 = vmul.f32 %v2107_v35, %v3356_v12  ;;  %v1127_v28 = vmul.f32 %v2108_v10, %v3359_v20  ;;  %v2224_v62 = vpop.permute.xlu0 %2223  ;;  %v3731_v59 = vadd.f32 %v4424_v30, %v1003_v49  ;;  %v1007_v49 = vmul.f32 %v2088_v42, %v4419_v4 }
  0xd0   :  { %v2226_v9 = vunpack.i.h.bf16 %v2224_v62  ;;  %v2225_v26 = vunpack.i.l.bf16 %v2224_v62  ;;  %v2116_v17 = vpop.permute.xlu1 %2115  ;;  %v3735_v57 = vpop.eup %2483 }
  0xd1   :  { %v1143_v12 = vsel %vm1142_vm8, %v1126_v15, 0.0  ;;  %v1144_v20 = vsel %vm1142_vm8, %v1127_v28, 0.0  ;;  %v2118_v10 = vunpack.i.h.bf16 %v2116_v17  ;;  %v2117_v35 = vunpack.i.l.bf16 %v2116_v17  ;;  %v3742_v61 = vpop.eup %2485 }
  0xd2   :  { %v1145_v40 = vadd.f32 %v1144_v20, %v1143_v12  ;;  %v1495_v56 = vmul.f32 %v2225_v26, %v3679_v6  ;;  %4425 = vst [vmem:[#allocation31_spill] sm:$0xff] %v3742_v61  ;;  %v1496_v15 = vmul.f32 %v2226_v9, %v3703_v31  ;;  %v4426_v20 = vld [vmem:[#allocation48_spill] sm:$0xff] }
  0xd3   :  { %v1130_v28 = vmul.f32 %v2117_v35, %v3728_v7  ;;  %v1131_v62 = vmul.f32 %v2118_v10, %v3731_v59  ;;  %v2240_v17 = vpop.permute.xlu0 %2239  ;;  %v1038_v45 = vadd.f32 %v4426_v20, %v1006_v13  ;;  %v4427_v35 = vunpack.c.l.bf16 %v3672_v55 }
  0xd4   :  { %v1511_v30 = vsel %vm1142_vm8, %v1495_v56, 0.0  ;;  %v2242_v12 = vunpack.i.h.bf16 %v2240_v17  ;;  %v2126_v26 = vpop.permute.xlu1 %2125  ;;  %v1512_v63 = vsel %vm1142_vm8, %v1496_v15, 0.0  ;;  %v2241_v42 = vunpack.i.l.bf16 %v2240_v17  ;;  %v4428_v17 = vld [vmem:[#allocation50_spill] sm:$0xff] }
  0xd5   :  { %v1161_v33 = vsel %vm1142_vm8, %v1130_v28, 0.0  ;;  %v1162_v4 = vsel %vm1142_vm8, %v1131_v62, 0.0  ;;  %v1513_v9 = vadd.f32 %v1512_v63, %v1511_v30  ;;  %v3755_v10 = vmul.f32 -1.442695, %v4427_v35  ;;  %v4429_v35 = vld [vmem:[#allocation40_spill] sm:$0xff] }
  0xd6   :  { %v1163_v61 = vadd.f32 %v1162_v4, %v1161_v33  ;;  %v1501_v56 = vmul.f32 %v2241_v42, %v3722_v11  ;;  %v1502_v34 = vmul.f32 %v2242_v12, %v3725_v23  ;;  %v2128_v13 = vunpack.i.h.bf16 %v2126_v26 }
  0xd7   :  { %v2127_v20 = vunpack.i.l.bf16 %v2126_v26  ;;  %v1156_v15 = vadd.f32 %v1155_v52, %v1154_v41  ;;  %v2211_v28 = vunpack.i.h.bf16 %v3676_v50  ;;  %v2210_v62 = vunpack.i.l.bf16 %v3676_v50  ;;  %v4430_v52 = vld [vmem:[#allocation42_spill] sm:$0xff] }
  0xd8   :  { %v1039_v30 = vadd.f32 %v4428_v17, %v1007_v49  ;;  %v1340_v63 = vadd.f32 %v1339_v19, %v1338_v54  ;;  %v1538_v33 = vsel %vm1142_vm8, %v1501_v56, 0.0  ;;  %v1539_v4 = vsel %vm1142_vm8, %v1502_v34, 0.0  ;;  %v4432_v49 = vld [vmem:[#allocation38_spill] sm:$0xff] }
  0xd9   :  { %v1223_v47 = vmul.f32 %v4429_v35, %v1038_v45  ;;  %v1146_v55 = vrot.slane %v1145_v40, 4  ;;  %v3766_v42 = vadd.f32 %v1539_v4, %v1538_v33  ;;  %v1134_v12 = vmul.f32 %v2127_v20, %v1038_v45  ;;  %v2250_v45 = vpop.permute.xlu0 %2249 }
  0xda   :  { %v1845_v26 = vadd.f32 1.0, %v3685_v8  ;;  %v1135_v41 = vmul.f32 %v2128_v13, %v1039_v30  ;;  %v1224_v23 = vmul.f32 %v4430_v52, %v1039_v30  ;;  %v3774_v54 = vmul.f32 1.442695, %v3693_v46 }
  0xdb   :  { %v3771_v50 = vadd.f32 %v1223_v47, %v3554_v16  ;;  %v624_v19 = vmul.f32 %v2210_v62, %v4432_v49  ;;  %v625_v34 = vmul.f32 %v2211_v28, %v4432_v49  ;;  %v2098_v56 = vunpack.i.h.bf16 %v3681_v39  ;;  %v4436_v49 = vld [vmem:[#allocation41_spill] sm:$0xff] }
  0xdc   :  { %4431 = vst [vmem:[#allocation47_spill] sm:$0xff] %v3774_v54  ;;  %v2097_v17 = vunpack.i.l.bf16 %v3681_v39  ;;  %v1157_v20 = vrot.slane %v1156_v15, 2  ;;  %v1341_v8 = vrot.slane %v1340_v63, 2  ;;  %v3781_v13 = vadd.f32 %v1224_v23, %v3557_v53  ;;  %v2136_v53 = vpop.permute.xlu1 %2135  ;;  %v3792_v23 = vpop.eup %2487 }
  0xdd   :  { %v4433_v16 = vunpack.i.l.bf16 %v3539_v37  ;;  %v1147_v46 = vadd.f32 %v1146_v55, %v1145_v40  ;;  %v1514_v33 = vrot.slane %v1513_v9, 4  ;;  %v1179_v62 = vsel %vm1142_vm8, %v1134_v12, 0.0  ;;  %4435 = vst [vmem:[#allocation35_spill] sm:$0xff] %v3792_v23 }
  0xde   :  { %v1180_v28 = vsel %vm1142_vm8, %v1135_v41, 0.0  ;;  %v4434_v4 = vunpack.i.h.bf16 %v3539_v37  ;;  %v2252_v47 = vunpack.i.h.bf16 %v2250_v45  ;;  %v2251_v52 = vunpack.i.l.bf16 %v2250_v45 }
  0xdf   :  { %v1319_v30 = vmul.f32 %v4433_v16, %v3771_v50  ;;  %v1010_v54 = vmul.f32 %v2097_v17, %v4436_v49  ;;  %v1011_v55 = vmul.f32 %v2098_v56, %v4436_v49  ;;  %v1164_v40 = vrot.slane %v1163_v61, 4 }
  0xe0   :  { %v1320_v39 = vmul.f32 %v4434_v4, %v3781_v13  ;;  %v3797_v12 = vadd.f32 %v3644_v3, %v624_v19  ;;  %v3799_v41 = vadd.f32 %v1157_v20, %v1156_v15  ;;  %v3801_v16 = vadd.f32 %v1341_v8, %v1340_v63  ;;  %v4437_v15 = vld [vmem:[#allocation52_spill] sm:$0xff] }
  0xe1   :  { %v1363_v35 = vsel %vm1142_vm8, %v1319_v30, 0.0  ;;  %v3805_v30 = vadd.f32 %v3648_v18, %v625_v34  ;;  %v1148_v45 = vrot.slane %v1147_v46, 2  ;;  %v1515_v4 = vadd.f32 %v1514_v33, %v1513_v9  ;;  %v2260_v33 = vpop.permute.xlu0 %2259 }
  0xe2   :  { %v1364_v37 = vsel %vm1142_vm8, %v1320_v39, 0.0  ;;  %v1181_v23 = vadd.f32 %v1180_v28, %v1179_v62  ;;  %v1505_v17 = vmul.f32 %v2251_v52, %v3797_v12  ;;  %v2138_v49 = vunpack.i.h.bf16 %v2136_v53  ;;  %v2163_v62 = vpop.permute.xlu1 %2162  ;;  %v4438_v52 = vld [vmem:[#allocation49_spill] sm:$0xff] }
  0xe3   :  { %v1365_v11 = vadd.f32 %v1364_v37, %v1363_v35  ;;  %v1506_v56 = vmul.f32 %v2252_v47, %v3805_v30  ;;  %v2137_v3 = vunpack.i.l.bf16 %v2136_v53  ;;  %v1165_v19 = vadd.f32 %v1164_v40, %v1163_v61 }
  0xe4   :  { %v1042_v20 = vadd.f32 %v4437_v15, %v1010_v54  ;;  %v1043_v63 = vadd.f32 %v3294_v51, %v1011_v55  ;;  %2489 = vrcp.f32 %v1845_v26  ;;  %v1159_v8 = vrot.slane %v3799_v41, 1  ;;  %v4439_v26 = vld [vmem:[#allocation51_spill] sm:$0xff] }
  0xe5   :  { %v1343_v18 = vrot.slane %v3801_v16, 1  ;;  %v1556_v9 = vsel %vm1142_vm8, %v1505_v17, 0.0  ;;  %v1557_v34 = vsel %vm1142_vm8, %v1506_v56, 0.0  ;;  %v1149_v28 = vadd.f32 %v1148_v45, %v1147_v46 }
  0xe6   :  { %v1182_v39 = vrot.slane %v1181_v23, 4  ;;  %v3815_v35 = vadd.f32 %v1557_v34, %v1556_v9  ;;  %v1138_v61 = vmul.f32 %v2137_v3, %v1042_v20  ;;  %v1516_v47 = vrot.slane %v1515_v4, 2 }
  0xe7   :  { %v1139_v54 = vmul.f32 %v2138_v49, %v1043_v63  ;;  %v1227_v51 = vmul.f32 %v4438_v52, %v1042_v20  ;;  %v1228_v53 = vmul.f32 %v4439_v26, %v1043_v63  ;;  %v1166_v55 = vrot.slane %v1165_v19, 2 }
  0xe8   :  { %v1541_v40 = vrot.slane %v3766_v42, 4  ;;  %v1197_v37 = vsel %vm1142_vm8, %v1138_v61, 0.0  ;;  %v2261_v17 = vunpack.i.l.bf16 %v2260_v33  ;;  %v2262_v3 = vunpack.i.h.bf16 %v2260_v33 }
  0xe9   :  { %v1198_v56 = vsel %vm1142_vm8, %v1139_v54, 0.0  ;;  %v3823_v46 = vadd.f32 %v1227_v51, %v3588_v21  ;;  %v3826_v45 = vadd.f32 %v1228_v53, %v3578_v5  ;;  %v1183_v49 = vadd.f32 %v1182_v39, %v1181_v23  ;;  %v2173_v23 = vpop.permute.xlu1 %2172 }
  0xea   :  { %v1366_v15 = vrot.slane %v1365_v11, 4  ;;  %v1199_v20 = vadd.f32 %v1198_v56, %v1197_v37  ;;  %v3830_v63 = vadd.f32 %v3604_v58, %v3714_v43  ;;  %v1150_v9 = vrot.slane %v1149_v28, 1  ;;  %v3844_v58 = vpop.permute.xlu0 %2265 }
  0xeb   :  { %v4441_v34 = vunpack.i.l.bf16 %v3564_v32  ;;  %v4442_v21 = vunpack.i.h.bf16 %v3564_v32  ;;  %v3840_v5 = vadd.f32 %v3608_v0, %v3717_v36  ;;  %v1517_v33 = vadd.f32 %v1516_v47, %v1515_v4 }
  0xec   :  { %4440 = vst [vmem:[#allocation32_spill] sm:$0xff] %v3830_v63  ;;  %v1542_v39 = vadd.f32 %v1541_v40, %v3766_v42  ;;  %v1200_v52 = vrot.slane %v1199_v20, 4  ;;  %v1509_v43 = vmul.f32 %v2261_v17, %v3830_v63  ;;  %v2165_v53 = vunpack.i.h.bf16 %v2163_v62 }
  0xed   :  { %v1323_v61 = vmul.f32 %v4441_v34, %v3823_v46  ;;  %v1324_v54 = vmul.f32 %v4442_v21, %v3826_v45  ;;  %4443 = vst [vmem:[#allocation36_spill] sm:$0xff] %v3840_v5  ;;  %v1510_v32 = vmul.f32 %v2262_v3, %v3840_v5  ;;  %v1167_v0 = vadd.f32 %v1166_v55, %v1165_v19  ;;  %v2178_v55 = vpop.permute.xlu1 %2177  ;;  %v4455_v5 = vld [vmem:[#allocation53_spill] sm:$0xff] }
  0xee   :  { %v3849_v37 = vpop.eup %2489  ;;  %v1184_v36 = vrot.slane %v1183_v49, 2  ;;  %v1367_v56 = vadd.f32 %v1366_v15, %v1365_v11  ;;  %v1574_v42 = vsel %vm1142_vm8, %v1509_v43, 0.0  ;;  %v2164_v40 = vunpack.i.l.bf16 %v2163_v62 }
  0xef   :  { %v1381_v51 = vsel %vm1142_vm8, %v1323_v61, 0.0  ;;  %v1382_v26 = vsel %vm1142_vm8, %v1324_v54, 0.0  ;;  %v1575_v47 = vsel %vm1142_vm8, %v1510_v32, 0.0  ;;  %v1312_v17 = vmul.f32 %v2165_v53, %v3462_v29 }
  0xf0   :  { %v1383_v4 = vadd.f32 %v1382_v26, %v1381_v51  ;;  %v1543_v34 = vrot.slane %v1542_v39, 2  ;;  %v1201_v61 = vadd.f32 %v1200_v52, %v1199_v20  ;;  %v3854_v54 = vadd.f32 %v1575_v47, %v1574_v42  ;;  %v3867_v52 = vpop.permute.xlu0 %2270 }
  0xf1   :  { %v3857_v3 = vadd.f32 %v1159_v8, %v3799_v41  ;;  %v1311_v19 = vmul.f32 %v2164_v40, %v3460_v38  ;;  %v1328_v11 = vsel %vm1142_vm8, %v1312_v17, 0.0  ;;  %v3862_v15 = vmul.f32 1.442695, %v3740_v48 }
  0xf2   :  { %v1384_v21 = vrot.slane %v1383_v4, 4  ;;  %4444 = vst [vmem:[#allocation43_spill] sm:$0xff] %v3854_v54  ;;  %v3865_v62 = vadd.f32 %v1343_v18, %v3801_v16  ;;  %v1518_v29 = vrot.slane %v1517_v33, 1  ;;  %v1185_v43 = vadd.f32 %v1184_v36, %v1183_v49 }
  0xf3   :  { %v1368_v20 = vrot.slane %v1367_v56, 2  ;;  %v3869_v51 = vadd.f32 %v1150_v9, %v1149_v28  ;;  %v1168_v41 = vrot.slane %v1167_v0, 1  ;;  %v1327_v38 = vsel %vm1142_vm8, %v1311_v19, 0.0 }
  0xf4   :  { %v1385_v8 = vadd.f32 %v1384_v21, %v1383_v4  ;;  %v3872_v26 = vadd.f32 %v1543_v34, %v1542_v39  ;;  %v1559_v32 = vrot.slane %v3815_v35, 4  ;;  %v1202_v48 = vrot.slane %v1201_v61, 2 }
  0xf5   :  { %v1329_v53 = vadd.f32 %v1328_v11, %v1327_v38  ;;  %v2175_v42 = vunpack.i.h.bf16 %v2173_v23  ;;  %v2174_v16 = vunpack.i.l.bf16 %v2173_v23  ;;  %v1219_v18 = vmul.f32 %v3271_v14, %v3728_v7  ;;  %v2188_v23 = vpop.permute.xlu1 %2187 }
  0xf6   :  { %v1220_v49 = vmul.f32 %v3273_v22, %v3731_v59  ;;  %v3879_v28 = vadd.f32 %v1518_v29, %v1517_v33  ;;  %v1186_v9 = vrot.slane %v1185_v43, 1  ;;  %v1369_v36 = vadd.f32 %v1368_v20, %v1367_v56  ;;  %v3893_v33 = vpop.permute.xlu0 %2275 }
  0xf7   :  { %v1330_v4 = vrot.slane %v1329_v53, 4  ;;  %v3881_v47 = vadd.f32 %v1168_v41, %v1167_v0  ;;  %v1386_v39 = vrot.slane %v1385_v8, 2  ;;  %v3884_v40 = vadd.f32 %v1219_v18, %v3575_v1 }
  0xf8   :  { %v3887_v17 = vadd.f32 %v1220_v49, %v3560_v2  ;;  %v3891_v7 = vadd.f32 %v1559_v32, %v3815_v35  ;;  %v2180_v59 = vunpack.i.h.bf16 %v2178_v55  ;;  %v1203_v56 = vadd.f32 %v1202_v48, %v1201_v61 }
  0xf9   :  { %v1331_v22 = vadd.f32 %v1330_v4, %v1329_v53  ;;  %v1315_v0 = vmul.f32 %v2174_v16, %v3884_v40  ;;  %v2179_v1 = vunpack.i.l.bf16 %v2178_v55  ;;  %v3897_v21 = vadd.f32 %v1186_v9, %v1185_v43 }
  0xfa   :  { %v1316_v34 = vmul.f32 %v2175_v42, %v3887_v17  ;;  %v1370_v2 = vrot.slane %v1369_v36, 1  ;;  %v2268_v19 = vunpack.i.h.bf16 %v3844_v58  ;;  %v1318_v11 = vmul.f32 %v2180_v59, %v3523_v25  ;;  %v2219_v25 = vpop.permute.xlu1 %2218  ;;  %v2281_v9 = vpop.permute.xlu0 %2280 }
  0xfb   :  { %v1387_v29 = vadd.f32 %v1386_v39, %v1385_v8  ;;  %v1345_v35 = vsel %vm1142_vm8, %v1315_v0, 0.0  ;;  %v1317_v41 = vmul.f32 %v2179_v1, %v3520_v44  ;;  %v1332_v61 = vrot.slane %v1331_v22, 2 }
  0xfc   :  { %v1346_v20 = vsel %vm1142_vm8, %v1316_v34, 0.0  ;;  %v2267_v38 = vunpack.i.l.bf16 %v3844_v58  ;;  %v1355_v55 = vsel %vm1142_vm8, %v1318_v11, 0.0  ;;  %v1204_v43 = vrot.slane %v1203_v56, 1 }
  0xfd   :  { %v1347_v32 = vadd.f32 %v1346_v20, %v1345_v35  ;;  %v2273_v48 = vunpack.i.h.bf16 %v3867_v52  ;;  %v1354_v53 = vsel %vm1142_vm8, %v1317_v41, 0.0  ;;  %v2190_v42 = vunpack.i.h.bf16 %v2188_v23 }
  0xfe   :  { %v2272_v16 = vunpack.i.l.bf16 %v3867_v52  ;;  %v1356_v18 = vadd.f32 %v1355_v55, %v1354_v53  ;;  %v2189_v49 = vunpack.i.l.bf16 %v2188_v23  ;;  %v3909_v44 = vadd.f32 %v1370_v2, %v1369_v36  ;;  %v4445_v23 = vld [vmem:[#allocation64_spill] sm:$0xff]  ;;  %v4448_v53 = vld [vmem:[#allocation25_spill] sm:$0xff] }
  0xff   :  { %v1348_v8 = vrot.slane %v1347_v32, 4  ;;  %v1388_v4 = vrot.slane %v1387_v29, 1  ;;  %v1322_v39 = vmul.f32 %v2190_v42, %v3550_v24  ;;  %v1333_v59 = vadd.f32 %v1332_v61, %v1331_v22  ;;  %v2230_v61 = vpop.permute.xlu1 %2229  ;;  %v4449_v42 = vld [vmem:[#allocation57_spill] sm:$0xff] }
 0x100   :  { %v3914_v0 = vmul.f32 %v2267_v38, %v3298_v27  ;;  %v3917_v34 = vmul.f32 %v2268_v19, %v3298_v27  ;;  %v1321_v1 = vmul.f32 %v2189_v49, %v3547_v60  ;;  %v3920_v52 = vadd.f32 %v1204_v43, %v1203_v56  ;;  %v4446_v60 = vld [vmem:[#allocation21_spill] sm:$0xff]  ;;  %v4447_v43 = vld [vmem:[#allocation20_spill] sm:$0xff] }
 0x101   :  { %v425_v11 = vmul.f32 %v2273_v48, %v4445_v23  ;;  %v1373_v36 = vsel %vm1142_vm8, %v1322_v39, 0.0  ;;  %v2221_v2 = vunpack.i.h.bf16 %v2219_v25  ;;  %v1349_v35 = vadd.f32 %v1348_v8, %v1347_v32  ;;  %v2292_v32 = vpop.permute.xlu0 %2291  ;;  %v4450_v49 = vld [vmem:[#allocation8_spill] sm:$0xff] }
 0x102   :  { %v424_v20 = vmul.f32 %v2272_v16, %v4445_v23  ;;  %v1372_v24 = vsel %vm1142_vm8, %v1321_v1, 0.0  ;;  %v2220_v22 = vunpack.i.l.bf16 %v2219_v25  ;;  %v3926_v41 = vadd.f32 %v1388_v4, %v1387_v29  ;;  %v4451_v4 = vld [vmem:[#allocation58_spill] sm:$0xff] }
 0x103   :  { %v2278_v27 = vunpack.i.h.bf16 %v3893_v33  ;;  %v3929_v19 = vadd.f32 %v1373_v36, %v1372_v24  ;;  %v1326_v56 = vmul.f32 %v2221_v2, %v4446_v60  ;;  %v1334_v38 = vrot.slane %v1333_v59, 1  ;;  %v4452_v36 = vld [vmem:[#allocation29_spill] sm:$0xff] }
 0x104   :  { %v2277_v55 = vunpack.i.l.bf16 %v3893_v33  ;;  %v1325_v48 = vmul.f32 %v2220_v22, %v4447_v43  ;;  %v1401_v8 = vmul.f32 %v4449_v42, %v4448_v53  ;;  %v1357_v16 = vrot.slane %v1356_v18, 4  ;;  %v4453_v22 = vld [vmem:[#allocation30_spill] sm:$0xff] }
 0x105   :  { %v2283_v25 = vunpack.i.h.bf16 %v2281_v9  ;;  %v1391_v29 = vsel %vm1142_vm8, %v1326_v56, 0.0  ;;  %v1402_v39 = vmul.f32 %v4451_v4, %v4450_v49  ;;  %v1350_v1 = vrot.slane %v1349_v35, 2  ;;  %v4454_v53 = vld [vmem:[#allocation66_spill] sm:$0xff] }
 0x106   :  { %v1390_v23 = vsel %vm1142_vm8, %v1325_v48, 0.0  ;;  %v1417_v2 = vadd.f32 %v1401_v8, %v4452_v36  ;;  %v2232_v24 = vunpack.i.h.bf16 %v2230_v61  ;;  %v2282_v33 = vunpack.i.l.bf16 %v2281_v9  ;;  %v4456_v48 = vld [vmem:[#allocation56_spill] sm:$0xff] }
 0x107   :  { %v3941_v60 = vadd.f32 %v1391_v29, %v1390_v23  ;;  %v1418_v43 = vadd.f32 %v1402_v39, %v4453_v22  ;;  %v2231_v14 = vunpack.i.l.bf16 %v2230_v61  ;;  %v430_v42 = vmul.f32 %v2277_v55, %v4454_v53  ;;  %v2307_v61 = vpop.permute.xlu0 %2306  ;;  %v4457_v23 = vld [vmem:[#allocation72_spill] sm:$0xff] }
 0x108   :  { %v431_v58 = vmul.f32 %v2278_v27, %v4454_v53  ;;  %v2293_v56 = vunpack.i.l.bf16 %v2292_v32  ;;  %v1585_v63 = vmul.f32 %v4455_v5, %v1417_v2  ;;  %v3947_v49 = vadd.f32 %v1357_v16, %v1356_v18  ;;  %v4461_v22 = vld [vmem:[#allocation76_spill] sm:$0xff] }
 0x109   :  { %v2294_v4 = vunpack.i.h.bf16 %v2292_v32  ;;  %v1586_v54 = vmul.f32 %v4456_v48, %v1418_v43  ;;  %v1497_v8 = vmul.f32 %v2231_v14, %v1417_v2  ;;  %v3950_v36 = vadd.f32 %v1334_v38, %v1333_v59  ;;  %v4458_v14 = vld [vmem:[#allocation65_spill] sm:$0xff] }
 0x10a   :  { %v3952_v9 = vadd.f32 %v1350_v1, %v1349_v35  ;;  %v1601_v29 = vadd.f32 %v1585_v63, %v424_v20  ;;  %v1498_v39 = vmul.f32 %v2232_v24, %v1418_v43  ;;  %v3955_v55 = vmul.f32 %v2282_v33, %v4457_v23  ;;  %v4459_v35 = vld [vmem:[#allocation69_spill] sm:$0xff]  ;;  %v4460_v24 = vld [vmem:[#allocation18_spill] sm:$0xff] }
 0x10b   :  { %v3958_v27 = vmul.f32 %v2283_v25, %v4457_v23  ;;  %v1602_v5 = vadd.f32 %v1586_v54, %v425_v11  ;;  %v1520_v18 = vsel %vm1142_vm8, %v1497_v8, 0.0  ;;  %v1407_v59 = vmul.f32 %v4458_v14, %v3771_v50  ;;  %v2235_v25 = vpop.permute.xlu1 %2234  ;;  %v4462_v8 = vld [vmem:[#allocation71_spill] sm:$0xff] }
 0x10c   :  { %v1681_v32 = vmul.f32 %v2293_v56, %v1601_v29  ;;  %v1521_v16 = vsel %vm1142_vm8, %v1498_v39, 0.0  ;;  %v1408_v63 = vmul.f32 %v4459_v35, %v3781_v13  ;;  %v1375_v38 = vrot.slane %v3929_v19, 4  ;;  %v4463_v39 = vld [vmem:[#allocation26_spill] sm:$0xff] }
 0x10d   :  { %v1682_v1 = vmul.f32 %v2294_v4, %v1602_v5  ;;  %v1522_v2 = vadd.f32 %v1521_v16, %v1520_v18  ;;  %v1352_v54 = vrot.slane %v3952_v9, 1  ;;  %v1423_v33 = vadd.f32 %v1407_v59, %v4460_v24  ;;  %v3975_v5 = vpop.permute.xlu0 %2316  ;;  %v4465_v59 = vld [vmem:[#allocation61_spill] sm:$0xff] }
 0x10e   :  { %v1704_v11 = vsel %vm1142_vm8, %v1681_v32, 0.0  ;;  %v1424_v43 = vadd.f32 %v1408_v63, %v4461_v22  ;;  %v2309_v56 = vunpack.i.h.bf16 %v2307_v61  ;;  %v2308_v13 = vunpack.i.l.bf16 %v2307_v61  ;;  %v4464_v32 = vld [vmem:[#allocation60_spill] sm:$0xff] }
 0x10f   :  { %v1705_v50 = vsel %vm1142_vm8, %v1682_v1, 0.0  ;;  %v1523_v53 = vrot.slane %v1522_v2, 4  ;;  %v1591_v29 = vmul.f32 %v4462_v8, %v1423_v33  ;;  %v2237_v23 = vunpack.i.h.bf16 %v2235_v25  ;;  %v4466_v22 = vld [vmem:[#allocation16_spill] sm:$0xff]  ;;  %v4467_v8 = vld [vmem:[#allocation74_spill] sm:$0xff] }
 0x110   :  { %v1706_v48 = vadd.f32 %v1705_v50, %v1704_v11  ;;  %v1592_v4 = vmul.f32 %v4463_v39, %v1424_v43  ;;  %v2236_v16 = vunpack.i.l.bf16 %v2235_v25  ;;  %v1403_v14 = vmul.f32 %v4464_v32, %v3884_v40  ;;  %v2245_v40 = vpop.permute.xlu1 %2244 }
 0x111   :  { %v1524_v18 = vadd.f32 %v1523_v53, %v1522_v2  ;;  %v1404_v35 = vmul.f32 %v4465_v59, %v3887_v17  ;;  %v3982_v63 = vadd.f32 %v1375_v38, %v3929_v19  ;;  %v1607_v1 = vadd.f32 %v1591_v29, %v430_v42  ;;  %v4468_v29 = vld [vmem:[#allocation22_spill] sm:$0xff] }
 0x112   :  { %v1707_v61 = vrot.slane %v1706_v48, 4  ;;  %v1608_v11 = vadd.f32 %v1592_v4, %v431_v58  ;;  %v3985_v50 = vadd.f32 %v1403_v14, %v4466_v22  ;;  %v2319_v25 = vunpack.i.h.bf16 %v3975_v5 }
 0x113   :  { %v1525_v24 = vrot.slane %v1524_v18, 2  ;;  %v3988_v2 = vadd.f32 %v1404_v35, %v4467_v8  ;;  %v1687_v17 = vmul.f32 %v2308_v13, %v1607_v1  ;;  %v2318_v19 = vunpack.i.l.bf16 %v3975_v5 }
 0x114   :  { %v1708_v53 = vadd.f32 %v1707_v61, %v1706_v48  ;;  %v1688_v39 = vmul.f32 %v2309_v56, %v1608_v11  ;;  %v1499_v58 = vmul.f32 %v2236_v16, %v3985_v50  ;;  %v1411_v4 = vmul.f32 %v4468_v29, %v3823_v46  ;;  %v4469_v48 = vld [vmem:[#allocation17_spill] sm:$0xff] }
 0x115   :  { %v1526_v42 = vadd.f32 %v1525_v24, %v1524_v18  ;;  %v1500_v38 = vmul.f32 %v2237_v23, %v3988_v2  ;;  %v1731_v14 = vsel %vm1142_vm8, %v1687_v17, 0.0  ;;  %v1412_v13 = vmul.f32 %v4469_v48, %v3826_v45  ;;  %v4470_v23 = vld [vmem:[#allocation24_spill] sm:$0xff]  ;;  %v4471_v11 = vld [vmem:[#allocation77_spill] sm:$0xff] }
 0x116   :  { %v1709_v32 = vrot.slane %v1708_v53, 2  ;;  %v1732_v59 = vsel %vm1142_vm8, %v1688_v39, 0.0  ;;  %v1529_v5 = vsel %vm1142_vm8, %v1499_v58, 0.0  ;;  %v1427_v1 = vadd.f32 %v1411_v4, %v4470_v23  ;;  %v2255_v39 = vpop.permute.xlu1 %2254  ;;  %v4472_v45 = vld [vmem:[#allocation4_spill] sm:$0xff] }
 0x117   :  { %v1527_v56 = vrot.slane %v1526_v42, 1  ;;  %v1733_v35 = vadd.f32 %v1732_v59, %v1731_v14  ;;  %v1530_v18 = vsel %vm1142_vm8, %v1500_v38, 0.0  ;;  %v1428_v46 = vadd.f32 %v1412_v13, %v4471_v11  ;;  %v4473_v14 = vld [vmem:[#allocation75_spill] sm:$0xff] }
 0x118   :  { %v1710_v16 = vadd.f32 %v1709_v32, %v1708_v53  ;;  %v1531_v61 = vadd.f32 %v1530_v18, %v1529_v5  ;;  %v2247_v8 = vunpack.i.h.bf16 %v2245_v40  ;;  %v2246_v17 = vunpack.i.l.bf16 %v2245_v40 }
 0x119   :  { %v1528_v24 = vadd.f32 %v1527_v56, %v1526_v42  ;;  %v1734_v22 = vrot.slane %v1733_v35, 4  ;;  %v1595_v48 = vmul.f32 %v4472_v45, %v1427_v1  ;;  %v1596_v59 = vmul.f32 %v4473_v14, %v1428_v46  ;;  %v4475_v45 = vld [vmem:[#allocation78_spill] sm:$0xff] }
 0x11a   :  { %v1711_v29 = vrot.slane %v1710_v16, 1  ;;  %v1532_v20 = vrot.slane %v1531_v61, 4  ;;  %v4007_v58 = vadd.f32 %v1352_v54, %v3952_v9  ;;  %v1503_v38 = vmul.f32 %v2246_v17, %v1423_v33 }
 0x11b   :  { %v1735_v53 = vadd.f32 %v1734_v22, %v1733_v35  ;;  %v1504_v32 = vmul.f32 %v2247_v8, %v1424_v43  ;;  %v1611_v42 = vadd.f32 %v1595_v48, %v3955_v55  ;;  %v1612_v40 = vadd.f32 %v1596_v59, %v3958_v27  ;;  %v2287_v55 = vpop.permute.xlu1 %2286  ;;  %v4477_v59 = vld [vmem:[#allocation39_spill] sm:$0xff] }
 0x11c   :  { %v1712_v4 = vadd.f32 %v1711_v29, %v1710_v16  ;;  %v1533_v13 = vadd.f32 %v1532_v20, %v1531_v61  ;;  %v1547_v5 = vsel %vm1142_vm8, %v1503_v38, 0.0  ;;  %v2257_v23 = vunpack.i.h.bf16 %v2255_v39 }
 0x11d   :  { %v1736_v56 = vrot.slane %v1735_v53, 2  ;;  %v1548_v18 = vsel %vm1142_vm8, %v1504_v32, 0.0  ;;  %v1691_v54 = vmul.f32 %v2318_v19, %v1611_v42  ;;  %v1692_v35 = vmul.f32 %v2319_v25, %v1612_v40 }
 0x11e   :  { %v1769_v11 = vsel %vm1767_vm9, %v1712_v4, %v1528_v24  ;;  %v1534_v9 = vrot.slane %v1533_v13, 2  ;;  %v1549_v20 = vadd.f32 %v1548_v18, %v1547_v5  ;;  %v2256_v16 = vunpack.i.l.bf16 %v2255_v39  ;;  %v4474_v24 = vld [vmem:[#allocation11_spill] sm:$0xff] }
 0x11f   :  { %v1778_v33 = vsel %vm1776_vm10, %v1769_v11, %v3865_v62  ;;  %v1737_v43 = vadd.f32 %v1736_v56, %v1735_v53  ;;  %v1749_v22 = vsel %vm1142_vm8, %v1691_v54, 0.0  ;;  %v1750_v8 = vsel %vm1142_vm8, %v1692_v35, 0.0  ;;  %v4040_v35 = vld [vmem:[%s4226_s2 + $0x4] sm:$0x3] }
 0x120   :  { %v1787_v27 = vsel %vm1785_vm11, %v1778_v33, %v3857_v3  ;;  %v4018_v61 = vadd.f32 %v1534_v9, %v1533_v13  ;;  %v1751_v25 = vadd.f32 %v1750_v8, %v1749_v22  ;;  %v1550_v29 = vrot.slane %v1549_v20, 4  ;;  %v4479_v9 = vld [vmem:[#allocation70_spill] sm:$0xff] }
 0x121   :  { %v1810_v17 = vadd.f32 %v4474_v24, %v1787_v27  ;;  %v1738_v19 = vrot.slane %v1737_v43, 1  ;;  %v4476_v62 = vunpack.c.l.bf16 %v4475_v45  ;;  %v1507_v39 = vmul.f32 %v2256_v16, %v1427_v1  ;;  %v2297_v1 = vpop.permute.xlu1 %2296  ;;  %v4481_v45 = vld [vmem:[#allocation37_spill] sm:$0xff] }
 0x122   :  { %v1508_v14 = vmul.f32 %v2257_v23, %v1428_v46  ;;  %v1847_v3 = vadd.f32 1.0, %v3735_v57  ;;  %v1536_v38 = vrot.slane %v4018_v61, 1  ;;  %v1752_v32 = vrot.slane %v1751_v25, 4  ;;  %v4478_v57 = vld [vmem:[#allocation62_spill] sm:$0xff] }
 0x123   :  { %v4026_v48 = vmul.f32 %v3849_v37, %v4476_v62  ;;  %v1874_v53 = vmul.f32 %v4477_v59, %v1810_v17  ;;  %v1551_v4 = vadd.f32 %v1550_v29, %v1549_v20  ;;  %v1739_v13 = vadd.f32 %v1738_v19, %v1737_v43  ;;  %v4482_v59 = vld [vmem:[#allocation59_spill] sm:$0xff] }
 0x124   :  { %v1565_v42 = vsel %vm1142_vm8, %v1507_v39, 0.0  ;;  %v1566_v40 = vsel %vm1142_vm8, %v1508_v14, 0.0  ;;  %2491 = vrcp.f32 %v1847_v3  ;;  %v1753_v5 = vadd.f32 %v1752_v32, %v1751_v25  ;;  %v4480_v25 = vld [vmem:[#allocation10_spill] sm:$0xff]  ;;  %v4483_v32 = vld [vmem:[#allocation63_spill] sm:$0xff] }
 0x125   :  { %v1882_v56 = vpack.c.bf16 %v1874_v53, %v1874_v53  ;;  %v1552_v37 = vrot.slane %v1551_v4, 2  ;;  %v1567_v18 = vadd.f32 %v1566_v40, %v1565_v42  ;;  %v2289_v46 = vunpack.i.h.bf16 %v2287_v55 }
 0x126   :  { %v2288_v23 = vunpack.i.l.bf16 %v2287_v55  ;;  %v1583_v11 = vmul.f32 %v4478_v57, %v3679_v6  ;;  %v1584_v54 = vmul.f32 %v4479_v9, %v3703_v31  ;;  %v1754_v33 = vrot.slane %v1753_v5, 2  ;;  %v4484_v57 = vld [vmem:[#allocation23_spill] sm:$0xff] }
 0x127   :  { %1891 = vst.msk [vmem:[%s4227_s8 + $0x2] sm:$0x3] %vm1889_vm12, %v1882_v56  ;;  %v1553_v43 = vadd.f32 %v1552_v37, %v1551_v4  ;;  %v1568_v20 = vrot.slane %v1567_v18, 4  ;;  %2493 = vpow2.f32 %v3755_v10  ;;  %v2299_v31 = vunpack.i.h.bf16 %v2297_v1 }
 0x128   :  { %v1599_v6 = vadd.f32 %v1583_v11, %v3914_v0  ;;  %v1600_v16 = vadd.f32 %v1584_v54, %v3917_v34  ;;  %v2298_v55 = vunpack.i.l.bf16 %v2297_v1  ;;  %v1755_v27 = vadd.f32 %v1754_v33, %v1753_v5  ;;  %v4486_v33 = vld [vmem:[#allocation12_spill] sm:$0xff] }
 0x129   :  { %v1554_v22 = vrot.slane %v1553_v43, 1  ;;  %v1569_v8 = vadd.f32 %v1568_v20, %v1567_v18  ;;  %v57_v24 = vunpack.c.l.bf16 %v4040_v35  ;;  %v1587_v29 = vmul.f32 %v4480_v25, %v3985_v50  ;;  %v4488_v25 = vld [vmem:[#allocation3_spill] sm:$0xff]  ;;  %v2519_v35 = vld [vmem:[%s4224_s6] ss:$0 sm:$0xff] }
 0x12a   :  { %v1679_v17 = vmul.f32 %v2288_v23, %v1599_v6  ;;  %v1680_v19 = vmul.f32 %v2289_v46, %v1600_v16  ;;  %v1588_v62 = vmul.f32 %v4481_v45, %v3988_v2  ;;  %v1756_v10 = vrot.slane %v1755_v27, 1  ;;  %v2302_v2 = vpop.permute.xlu1 %2301 }
 0x12b   :  { %v1555_v39 = vadd.f32 %v1554_v22, %v1553_v43  ;;  %v1570_v0 = vrot.slane %v1569_v8, 2  ;;  %v1906_v34 = vmul.f32 -1.442695, %v57_v24  ;;  %v1603_v53 = vadd.f32 %v1587_v29, %v4482_v59 }
 0x12c   :  { %v1695_v14 = vsel %vm1142_vm8, %v1679_v17, 0.0  ;;  %v1696_v3 = vsel %vm1142_vm8, %v1680_v19, 0.0  ;;  %v1604_v4 = vadd.f32 %v1588_v62, %v4483_v32  ;;  %v1757_v42 = vadd.f32 %v1756_v10, %v1755_v27  ;;  %v4487_v19 = vld [vmem:[#allocation33_spill] sm:$0xff] }
 0x12d   :  { %v1772_v50 = vsel %vm1767_vm9, %v1739_v13, %v1555_v39  ;;  %v1571_v40 = vadd.f32 %v1570_v0, %v1569_v8  ;;  %v1697_v56 = vadd.f32 %v1696_v3, %v1695_v14  ;;  %v1683_v18 = vmul.f32 %v2298_v55, %v1603_v53  ;;  %v4070_v13 = vld [vmem:[%s4226_s2 + $0x6] sm:$0x3]  ;;  %v4490_v0 = vld [vmem:[#allocation44_spill] sm:$0xff] }
 0x12e   :  { %v2492_v5 = vpop.eup %2491  ;;  %v1781_v37 = vsel %vm1776_vm10, %v1772_v50, %v3909_v44  ;;  %v1684_v1 = vmul.f32 %v2299_v31, %v1604_v4  ;;  %2495 = vpow2.f32 %v1906_v34  ;;  %v4485_v11 = vunpack.c.l.bf16 %v4484_v57  ;;  %v4489_v39 = vld [vmem:[#allocation34_spill] sm:$0xff]  ;;  %v2312_v14 = vpop.permute.xlu1 %2311 }
 0x12f   :  { %v1790_v46 = vsel %vm1785_vm11, %v1781_v37, %v3897_v21  ;;  %v1572_v23 = vrot.slane %v1571_v40, 1  ;;  %v1698_v54 = vrot.slane %v1697_v56, 4  ;;  %v1713_v44 = vsel %vm1142_vm8, %v1683_v18, 0.0 }
 0x130   :  { %v1871_v9 = vmul.f32 %v2492_v5, %v4485_v11  ;;  %v1813_v43 = vadd.f32 %v4486_v33, %v1790_v46  ;;  %v1714_v20 = vsel %vm1142_vm8, %v1684_v1, 0.0  ;;  %v2304_v6 = vunpack.i.h.bf16 %v2302_v2 }
 0x131   :  { %v2494_v16 = vpop.eup %2493  ;;  %v1573_v31 = vadd.f32 %v1572_v23, %v1571_v40  ;;  %v1699_v21 = vadd.f32 %v1698_v54, %v1697_v56  ;;  %v1715_v55 = vadd.f32 %v1714_v20, %v1713_v44  ;;  %v2303_v27 = vunpack.i.l.bf16 %v2302_v2  ;;  %v4492_v40 = vld [vmem:[#allocation68_spill] sm:$0xff]  ;;  %v4091_v56 = vld [vmem:[%s4226_s2 + $0xa] sm:$0x3] }
 0x132   :  { %v1877_v22 = vmul.f32 %v4026_v48, %v1813_v43  ;;  %v1841_v8 = vadd.f32 1.0, %v2494_v16  ;;  %v58_v17 = vunpack.c.l.bf16 %v4070_v13  ;;  %v1589_v29 = vmul.f32 %v4488_v25, %v4487_v19  ;;  %v4491_v48 = vld [vmem:[#allocation67_spill] sm:$0xff] }
 0x133   :  { %v1774_v45 = vsel %vm1767_vm9, %v1757_v42, %v1573_v31  ;;  %v1700_v62 = vrot.slane %v1699_v21, 2  ;;  %v1716_v10 = vrot.slane %v1715_v55, 4  ;;  %v1590_v34 = vmul.f32 %v4490_v0, %v4489_v39 }
 0x134   :  { %v1885_v3 = vpack.c.bf16 %v1877_v22, %v1877_v22  ;;  %v1783_v59 = vsel %vm1776_vm10, %v1774_v45, %v3926_v41  ;;  %2497 = vrcp.f32 %v1841_v8  ;;  %v1605_v53 = vadd.f32 %v1589_v29, %v4491_v48  ;;  %v4493_v41 = vld [vmem:[#allocation13_spill] sm:$0xff]  ;;  %v4496_v29 = vld [vmem:[#allocation15_spill] sm:$0xff] }
 0x135   :  { %v1792_v32 = vsel %vm1785_vm11, %v1783_v59, %v3920_v52  ;;  %v1701_v4 = vadd.f32 %v1700_v62, %v1699_v21  ;;  %v1717_v50 = vadd.f32 %v1716_v10, %v1715_v55  ;;  %v1606_v42 = vadd.f32 %v1590_v34, %v4492_v40  ;;  %v4494_v55 = vld [vmem:[#allocation31_spill] sm:$0xff]  ;;  %v4498_v34 = vld [vmem:[#allocation9_spill] sm:$0xff] }
 0x136   :  { %1894 = vst.msk [vmem:[%s4227_s8 + $0x8] sm:$0x3] %vm1889_vm12, %v1885_v3  ;;  %v1815_v2 = vadd.f32 %v4493_v41, %v1792_v32  ;;  %v1685_v5 = vmul.f32 %v2303_v27, %v1605_v53  ;;  %v1907_v52 = vmul.f32 -1.442695, %v58_v17  ;;  %v2314_v37 = vunpack.i.h.bf16 %v2312_v14 }
 0x137   :  { %v1702_v18 = vrot.slane %v1701_v4, 1  ;;  %v1718_v1 = vrot.slane %v1717_v50, 2  ;;  %v1686_v46 = vmul.f32 %v2304_v6, %v1606_v42  ;;  %v2313_v23 = vunpack.i.l.bf16 %v2312_v14  ;;  %v4495_v6 = vld [vmem:[#allocation35_spill] sm:$0xff] }
 0x138   :  { %v2496_v57 = vpop.eup %2495  ;;  %v1879_v11 = vmul.f32 %v1871_v9, %v1815_v2  ;;  %v1722_v54 = vsel %vm1142_vm8, %v1685_v5, 0.0  ;;  %2499 = vpow2.f32 %v1907_v52  ;;  %v60_v33 = vunpack.c.l.bf16 %v4091_v56 }
 0x139   :  { %v1703_v43 = vadd.f32 %v1702_v18, %v1701_v4  ;;  %v1719_v44 = vadd.f32 %v1718_v1, %v1717_v50  ;;  %v1843_v20 = vadd.f32 1.0, %v2496_v57  ;;  %v1723_v16 = vsel %vm1142_vm8, %v1686_v46, 0.0  ;;  %v4500_v4 = vld [vmem:[#allocation27_spill] sm:$0xff] }
 0x13a   :  { %v1887_v31 = vpack.c.bf16 %v1879_v11, %v1879_v11  ;;  %v1724_v21 = vadd.f32 %v1723_v16, %v1722_v54  ;;  %v1593_v27 = vmul.f32 %v4494_v55, %v3797_v12  ;;  %v1594_v22 = vmul.f32 %v4495_v6, %v3805_v30  ;;  %v4497_v30 = vld [vmem:[#allocation73_spill] sm:$0xff] }
 0x13b   :  { %v1768_v9 = vsel %vm1767_vm9, %v1703_v43, %v3879_v28  ;;  %v1720_v8 = vrot.slane %v1719_v44, 1  ;;  %2501 = vrcp.f32 %v1843_v20  ;;  %v1909_v19 = vmul.f32 -1.442695, %v60_v33  ;;  %v4122_v28 = vld [vmem:[%s4226_s2 + $0xe] sm:$0x3] }
 0x13c   :  { %1896 = vst.msk [vmem:[%s4227_s8 + $0xc] sm:$0x3] %vm1889_vm12, %v1887_v31  ;;  %v1777_v25 = vsel %vm1776_vm10, %v1768_v9, %v3950_v36  ;;  %v1725_v12 = vrot.slane %v1724_v21, 4  ;;  %v1609_v45 = vadd.f32 %v1593_v27, %v4496_v29  ;;  %v1610_v62 = vadd.f32 %v1594_v22, %v4497_v30  ;;  %v4506_v9 = vld [vmem:[#allocation19_spill] sm:$0xff] }
 0x13d   :  { %v1537_v10 = vadd.f32 %v1536_v38, %v4018_v61  ;;  %v1786_v39 = vsel %vm1785_vm11, %v1777_v25, %v3869_v51  ;;  %v1721_v0 = vadd.f32 %v1720_v8, %v1719_v44  ;;  %2503 = vpow2.f32 %v1909_v19  ;;  %v4504_v44 = vld [vmem:[#allocation6_spill] sm:$0xff] }
 0x13e   :  { %v2498_v36 = vpop.eup %2497  ;;  %v1809_v14 = vadd.f32 %v4498_v34, %v1786_v39  ;;  %v1726_v3 = vadd.f32 %v1725_v12, %v1724_v21  ;;  %v1689_v59 = vmul.f32 %v2313_v23, %v1609_v45  ;;  %v1690_v48 = vmul.f32 %v2314_v37, %v1610_v62  ;;  %v4502_v37 = vld [vmem:[#allocation47_spill] sm:$0xff]  ;;  %v4508_v25 = vld [vmem:[#allocation14_spill] sm:$0xff] }
 0x13f   :  { %v4499_v53 = vrot.slane %v3947_v49, 2  ;;  %v4501_v50 = vunpack.c.l.bf16 %v4500_v4  ;;  %v1770_v61 = vsel %vm1767_vm9, %v1721_v0, %v1537_v10  ;;  %v62_v38 = vunpack.c.l.bf16 %v4122_v28 }
 0x140   :  { %v1779_v51 = vsel %vm1776_vm10, %v1770_v61, %v4007_v58  ;;  %v1727_v42 = vrot.slane %v1726_v3, 2  ;;  %v1740_v41 = vsel %vm1142_vm8, %v1689_v59, 0.0  ;;  %v1741_v2 = vsel %vm1142_vm8, %v1690_v48, 0.0  ;;  %v4512_v61 = vld [vmem:[#allocation43_spill] sm:$0xff] }
 0x141   :  { %v1360_v32 = vadd.f32 %v4499_v53, %v3947_v49  ;;  %v1865_v40 = vmul.f32 %v2498_v36, %v4501_v50  ;;  %v1788_v52 = vsel %vm1785_vm11, %v1779_v51, %v3881_v47  ;;  %v1742_v49 = vadd.f32 %v1741_v2, %v1740_v41  ;;  %v4513_v41 = vld [vmem:[#allocation32_spill] sm:$0xff] }
 0x142   :  { %2505 = vpow2.f32 %v4502_v37  ;;  %v2500_v18 = vpop.eup %2499  ;;  %v1377_v1 = vrot.slane %v3982_v63, 2  ;;  %v1728_v46 = vadd.f32 %v1727_v42, %v1726_v3  ;;  %v1911_v58 = vmul.f32 -1.442695, %v62_v38  ;;  %v4514_v37 = vld [vmem:[#allocation36_spill] sm:$0xff] }
 0x143   :  { %v1873_v5 = vmul.f32 %v1865_v40, %v1809_v14  ;;  %2507 = vpow2.f32 %v3862_v15  ;;  %v1361_v23 = vrot.slane %v1360_v32, 1  ;;  %v1844_v11 = vadd.f32 1.0, %v2500_v18  ;;  %v2322_v14 = vpop.permute.xlu1 %2321 }
 0x144   :  { %v1743_v54 = vrot.slane %v1742_v49, 4  ;;  %v4503_v43 = vrot.slane %v3891_v7, 2  ;;  %v1811_v20 = vadd.f32 %v4504_v44, %v1788_v52  ;;  %v1729_v16 = vrot.slane %v1728_v46, 1 }
 0x145   :  { %v1881_v57 = vpack.c.bf16 %v1873_v5, %v1873_v5  ;;  %2509 = vpow2.f32 %v1911_v58  ;;  %v2502_v31 = vpop.eup %2501  ;;  %v4505_v21 = vrot.slane %v3872_v26, 1  ;;  %v1378_v27 = vadd.f32 %v1377_v1, %v3982_v63 }
 0x146   :  { %v1562_v47 = vadd.f32 %v4503_v43, %v3891_v7  ;;  %2511 = vrcp.f32 %v1844_v11  ;;  %v1744_v15 = vadd.f32 %v1743_v54, %v1742_v49  ;;  %v1867_v7 = vmul.f32 %v2502_v31, %v57_v24  ;;  %v4510_v24 = vld [vmem:[#allocation5_spill] sm:$0xff]  ;;  %v4516_v11 = vld [vmem:[#allocation54_spill] sm:$0xff] }
 0x147   :  { %1890 = vst.msk [vmem:[%s4227_s8] sm:$0x3] %vm1889_vm12, %v1881_v57  ;;  %v1546_v55 = vadd.f32 %v4505_v21, %v3872_v26  ;;  %v1730_v6 = vadd.f32 %v1729_v16, %v1728_v46  ;;  %v2504_v22 = vpop.eup %2503  ;;  %v4507_v8 = vrot.slane %v4506_v9, 1  ;;  %v4509_v12 = vrot.slane %v4508_v25, 2  ;;  %v4515_v46 = vld [vmem:[#allocation28_spill] sm:$0xff] }
 0x148   :  { %v1362_v45 = vadd.f32 %v1361_v23, %v1360_v32  ;;  %v1745_v30 = vrot.slane %v1744_v15, 2  ;;  %v1563_v62 = vrot.slane %v1562_v47, 1  ;;  %v1875_v10 = vmul.f32 %v1867_v7, %v1811_v20 }
 0x149   :  { %v1178_v19 = vadd.f32 %v4507_v8, %v4506_v9  ;;  %v1194_v29 = vadd.f32 %v4509_v12, %v4508_v25  ;;  %v1771_v26 = vsel %vm1767_vm9, %v1730_v6, %v1546_v55  ;;  %v1846_v63 = vadd.f32 1.0, %v2504_v22 }
 0x14a   :  { %v4511_v39 = vunpack.c.l.bf16 %v4510_v24  ;;  %v1780_v36 = vsel %vm1776_vm10, %v1771_v26, %v1362_v45  ;;  %v1746_v34 = vadd.f32 %v1745_v30, %v1744_v15  ;;  %v1379_v3 = vrot.slane %v1378_v27, 1  ;;  %v4519_v15 = vld [vmem:[#allocation55_spill] sm:$0xff] }
 0x14b   :  { %v1883_v59 = vpack.c.bf16 %v1875_v10, %v1875_v10  ;;  %v1789_v48 = vsel %vm1785_vm11, %v1780_v36, %v1178_v19  ;;  %2513 = vrcp.f32 %v1846_v63  ;;  %v1195_v32 = vrot.slane %v1194_v29, 1 }
 0x14c   :  { %v1804_v0 = vmul.f32 %v2519_v35, %v4511_v39  ;;  %v2506_v53 = vpop.eup %2505  ;;  %v1747_v4 = vrot.slane %v1746_v34, 1  ;;  %v1564_v40 = vadd.f32 %v1563_v62, %v1562_v47  ;;  %v1577_v51 = vrot.slane %v4512_v61, 4  ;;  %v4517_v47 = vld [vmem:[#allocation7_spill] sm:$0xff] }
 0x14d   :  { %v2508_v50 = vpop.eup %2507  ;;  %1892 = vst.msk [vmem:[%s4227_s8 + $0x4] sm:$0x3] %vm1889_vm12, %v1883_v59  ;;  %v2323_v42 = vunpack.i.l.bf16 %v2322_v14  ;;  %v1597_v2 = vmul.f32 %v2506_v53, %v4513_v41  ;;  %v1393_v5 = vrot.slane %v3941_v60, 4  ;;  %v2324_v49 = vunpack.i.h.bf16 %v2322_v14 }
 0x14e   :  { %v1748_v52 = vadd.f32 %v1747_v4, %v1746_v34  ;;  %v1598_v18 = vmul.f32 %v2508_v50, %v4514_v37  ;;  %v1209_v58 = vrot.slane %v4515_v46, 4  ;;  %v1380_v23 = vadd.f32 %v1379_v3, %v1378_v27 }
 0x14f   :  { %v2510_v1 = vpop.eup %2509  ;;  %v1812_v57 = vadd.f32 %v1804_v0, %v1789_v48  ;;  %v1613_v54 = vadd.f32 %v1597_v2, %v4516_v11  ;;  %v4518_v44 = vunpack.c.l.bf16 %v4517_v47  ;;  %v1196_v16 = vadd.f32 %v1195_v32, %v1194_v29 }
 0x150   :  { %v2512_v43 = vpop.eup %2511  ;;  %v1773_v31 = vsel %vm1767_vm9, %v1748_v52, %v1564_v40  ;;  %v1614_v21 = vadd.f32 %v1598_v18, %v4519_v15  ;;  %v1578_v55 = vadd.f32 %v1577_v51, %v4512_v61  ;;  %v1394_v22 = vadd.f32 %v1393_v5, %v3941_v60  ;;  %v4520_v5 = vld [vmem:[#allocation2_spill] sm:$0xff] }
 0x151   :  { %v1806_v20 = vmul.f32 %v2519_v35, %v4518_v44  ;;  %v1868_v7 = vmul.f32 %v2512_v43, %v58_v17  ;;  %v1782_v6 = vsel %vm1776_vm10, %v1773_v31, %v1380_v23  ;;  %v1693_v27 = vmul.f32 %v2323_v42, %v1613_v54 }
 0x152   :  { %v1791_v9 = vsel %vm1785_vm11, %v1782_v6, %v1196_v16  ;;  %v1694_v8 = vmul.f32 %v2324_v49, %v1614_v21  ;;  %v1210_v19 = vadd.f32 %v1209_v58, %v4515_v46  ;;  %v1848_v29 = vadd.f32 1.0, %v2510_v1 }
 0x153   :  { %v1876_v25 = vmul.f32 %v1868_v7, %v1812_v57  ;;  %v1758_v12 = vsel %vm1142_vm8, %v1693_v27, 0.0  ;;  %v1814_v45 = vadd.f32 %v1806_v20, %v1791_v9  ;;  %v1579_v13 = vrot.slane %v1578_v55, 2 }
 0x154   :  { %v1759_v30 = vsel %vm1142_vm8, %v1694_v8, 0.0  ;;  %v1395_v26 = vrot.slane %v1394_v22, 2  ;;  %v1211_v63 = vrot.slane %v1210_v19, 2  ;;  %2515 = vrcp.f32 %v1848_v29 }
 0x155   :  { %v2514_v62 = vpop.eup %2513  ;;  %v1884_v17 = vpack.c.bf16 %v1876_v25, %v1876_v25  ;;  %v1760_v10 = vadd.f32 %v1759_v30, %v1758_v12  ;;  %v1580_v39 = vadd.f32 %v1579_v13, %v1578_v55 }
 0x156   :  { %v1870_v60 = vmul.f32 %v2514_v62, %v60_v33  ;;  %v1396_v36 = vadd.f32 %v1395_v26, %v1394_v22  ;;  %v1212_v14 = vadd.f32 %v1211_v63, %v1210_v19 }
 0x157   :  { %1893 = vst.msk [vmem:[%s4227_s8 + $0x6] sm:$0x3] %vm1889_vm12, %v1884_v17  ;;  %v1761_v35 = vrot.slane %v1760_v10, 4  ;;  %v1581_v56 = vrot.slane %v1580_v39, 1 }
 0x158   :  { %v1878_v24 = vmul.f32 %v1870_v60, %v1814_v45  ;;  %v1397_v59 = vrot.slane %v1396_v36, 1  ;;  %v1213_v48 = vrot.slane %v1212_v14, 1 }
 0x159   :  { %v1762_v0 = vadd.f32 %v1761_v35, %v1760_v10  ;;  %v1582_v4 = vadd.f32 %v1581_v56, %v1580_v39 }
 0x15a   :  { %v1886_v34 = vpack.c.bf16 %v1878_v24, %v1878_v24  ;;  %v1398_v40 = vadd.f32 %v1397_v59, %v1396_v36  ;;  %v1214_v61 = vadd.f32 %v1213_v48, %v1212_v14 }
 0x15b   :  { %v1763_v3 = vrot.slane %v1762_v0, 2 }
 0x15c   :  { %1895 = vst.msk [vmem:[%s4227_s8 + $0xa] sm:$0x3] %vm1889_vm12, %v1886_v34 }
 0x15d   :  { %v1764_v33 = vadd.f32 %v1763_v3, %v1762_v0 }
 0x15e   :  { %v2516_v32 = vpop.eup %2515 }
 0x15f   :  { %v1765_v53 = vrot.slane %v1764_v33, 1  ;;  %v1872_v41 = vmul.f32 %v2516_v32, %v62_v38 }
 0x161   :  { %v1766_v50 = vadd.f32 %v1765_v53, %v1764_v33 }
 0x163   :  { %v1775_v51 = vsel %vm1767_vm9, %v1766_v50, %v1582_v4 }
 0x164   :  { %v1784_v42 = vsel %vm1776_vm10, %v1775_v51, %v1398_v40 }
 0x165   :  { %v1793_v2 = vsel %vm1785_vm11, %v1784_v42, %v1214_v61 }
 0x166   :  { %v1816_v52 = vadd.f32 %v4520_v5, %v1793_v2 }
 0x168   :  { %v1880_v49 = vmul.f32 %v1872_v41, %v1816_v52 }
 0x16a   :  { %v1888_v37 = vpack.c.bf16 %v1880_v49, %v1880_v49 }
 0x16c   :  { %1897 = vst.msk [vmem:[%s4227_s8 + $0xe] sm:$0x3] %vm1889_vm12, %v1888_v37 }

// kernel: _lambda_.45
= control target key start
LH: loop header
LB: loop body
LE: loop exit
PB: predicated region body
PF: predicated region fallthrough
CT: control target
= control target key end

     0   :  { %v2523_v0 = vmov 0   ;;  %v4118_v52 = vmov 1   ;;  %vm1142_vm8 = vcmask 261120   ;;  %vm1767_vm9 = vcmask 1040384   ;;  %s4108_s3 = inlined_call_operand.vmem [shape: bf16[8,16,4], index: 3, kind: input, shape index: {}]   ;;  %s4109_s4 = inlined_call_operand.vmem [shape: bf16[8,16,4], index: 4, kind: input, shape index: {}]   ;;  %s4110_s1 = inlined_call_operand.vmem [shape: bf16[8,4,32], index: 1, kind: input, shape index: {}]   ;;  %s4111_s7 = inlined_call_operand.vmem [shape: f32[1,32], index: 7, kind: input, shape index: {}]   ;;  %s4112_s0 = inlined_call_operand.vmem [shape: bf16[8,4,32], index: 0, kind: input, shape index: {}]   ;;  %s4113_s6 = inlined_call_operand.vmem [shape: f32[1,32], index: 6, kind: input, shape index: {}]   ;;  %s4114_s5 = inlined_call_operand.vmem [shape: f32[16,32], index: 5, kind: input, shape index: {}]   ;;  %s4115_s2 = inlined_call_operand.vmem [shape: bf16[8,4,32], index: 2, kind: input, shape index: {}]   ;;  %s4116_s8 = inlined_call_operand.vmem [shape: bf16[8,4,32], index: 8, kind: output, shape index: {}]  }
   0x1   :  { %2005 = vset.pattern.permute.xlu1 %v2523_v0  ;;  %1994 = vset.pattern.permute.xlu0 %v2523_v0  ;;  %v1977_v1 = vld [vmem:[%s4108_s3 + $0x10] sm:$0xff]   ;;  %v1913_v2 = vld [vmem:[%s4108_s3] sm:$0xff]   ;;  %v1978_v3 = vld [vmem:[%s4108_s3 + $0x18] sm:$0xff]   ;;  %vm1785_vm10 = vcmask 1042432   ;;  %vm1776_vm11 = vcmask 1041408   ;;  %vm1889_vm12 = vcmask 254976  }
   0x2   :  { %v1922_v4 = vunpack.c.l.bf16 %v1977_v1  ;;  %v1923_v5 = vunpack.c.h.bf16 %v1977_v1  ;;  %v1914_v6 = vunpack.c.l.bf16 %v1913_v2  ;;  %v1915_v7 = vunpack.c.h.bf16 %v1913_v2  ;;  %v1976_v8 = vld [vmem:[%s4108_s3 + $0x8] sm:$0xff]   ;;  %v1979_v14 = vld [vmem:[%s4108_s3 + $0x20] sm:$0xff]   ;;  %v1982_v23 = vld [vmem:[%s4108_s3 + $0x38] sm:$0xff]  }
   0x3   :  { %v1980_v9 = vld [vmem:[%s4108_s3 + $0x28] sm:$0xff]   ;;  %v1926_v10 = vunpack.c.l.bf16 %v1978_v3  ;;  %v1927_v11 = vunpack.c.h.bf16 %v1978_v3  ;;  %v1918_v12 = vunpack.c.l.bf16 %v1976_v8  ;;  %v1919_v13 = vunpack.c.h.bf16 %v1976_v8  ;;  %v1981_v24 = vld [vmem:[%s4108_s3 + $0x30] sm:$0xff]   ;;  %v1986_v32 = vld [vmem:[%s4109_s4 + $0x20] sm:$0xff]  }
   0x4   :  { %v2592_v15 = vpack.i.bf16 %v1923_v5, %v1922_v4  ;;  %v2594_v16 = vpack.i.bf16 %v1915_v7, %v1914_v6  ;;  %v1934_v17 = vunpack.c.l.bf16 %v1980_v9  ;;  %v1935_v18 = vunpack.c.h.bf16 %v1980_v9  ;;  %v1983_v31 = vld [vmem:[%s4109_s4 + $0x8] sm:$0xff]   ;;  %v1988_v39 = vld [vmem:[%s4109_s4 + $0x30] sm:$0xff]   ;;  %v1945_v40 = vld [vmem:[%s4109_s4] sm:$0xff]  }
   0x5   :  { %v2598_v19 = vpack.i.bf16 %v1927_v11, %v1926_v10  ;;  %v2600_v20 = vpack.i.bf16 %v1919_v13, %v1918_v12  ;;  %v1930_v21 = vunpack.c.l.bf16 %v1979_v14  ;;  %v1931_v22 = vunpack.c.h.bf16 %v1979_v14  ;;  %v1985_v42 = vld [vmem:[%s4109_s4 + $0x18] sm:$0xff]   ;;  %v1987_v46 = vld [vmem:[%s4109_s4 + $0x28] sm:$0xff]   ;;  %v63_v59 = vld [vmem:[%s4110_s1] sm:$0x3] }
   0x6   :  { %2007 = vperm.xlu1 %2005, %v2592_v15   ;;  %1996 = vperm.xlu0 %1994, %v2594_v16   ;;  %v2608_v25 = vpack.i.bf16 %v1935_v18, %v1934_v17  ;;  %v1942_v26 = vunpack.c.l.bf16 %v1982_v23  ;;  %v1943_v28 = vunpack.c.h.bf16 %v1982_v23  ;;  %v1938_v29 = vunpack.c.l.bf16 %v1981_v24  ;;  %v1989_v49 = vld [vmem:[%s4109_s4 + $0x38] sm:$0xff]   ;;  %v66_v60 = vld [vmem:[%s4110_s1 + $0x6] sm:$0x3]  ;;  %v64_v3 = vld [vmem:[%s4110_s1 + $0x2] sm:$0x3] }
   0x7   :  { %v2612_v27 = vpack.i.bf16 %v1931_v22, %v1930_v21  ;;  %v1939_v30 = vunpack.c.h.bf16 %v1981_v24  ;;  %v1950_v35 = vunpack.c.l.bf16 %v1983_v31  ;;  %v1951_v36 = vunpack.c.h.bf16 %v1983_v31  ;;  %v1902_v4 = vld [vmem:[%s4111_s7] ss:$0 sm:$0xff]  ;;  %v65_v5 = vld [vmem:[%s4110_s1 + $0x4] sm:$0x3]  ;;  %v68_v8 = vld [vmem:[%s4110_s1 + $0xa] sm:$0x3] }
   0x8   :  { %v2622_v33 = vpack.i.bf16 %v1943_v28, %v1942_v26  ;;  %v1962_v37 = vunpack.c.l.bf16 %v1986_v32  ;;  %v1963_v38 = vunpack.c.h.bf16 %v1986_v32  ;;  %v1970_v44 = vunpack.c.l.bf16 %v1988_v39  ;;  %v2687_v10 = vld [vmem:[%s4112_s0 + $0x8] sm:$0x3]  ;;  %v2702_v24 = vld [vmem:[%s4113_s6] ss:$0 sm:$0xff] }
   0x9   :  { %v2624_v34 = vpack.i.bf16 %v1939_v30, %v1938_v29  ;;  %v2634_v41 = vpack.i.bf16 %v1951_v36, %v1950_v35  ;;  %v1971_v45 = vunpack.c.h.bf16 %v1988_v39  ;;  %v1946_v47 = vunpack.c.l.bf16 %v1945_v40  ;;  %v67_v18 = vld [vmem:[%s4110_s1 + $0x8] sm:$0x3]  ;;  %v70_v29 = vld [vmem:[%s4110_s1 + $0xe] sm:$0x3]  ;;  %v2721_v35 = vld [vmem:[%s4112_s0 + $0xc] sm:$0x3] }
   0xa   :  { %2012 = vperm.xlu1 %2005, %v2598_v19   ;;  %2001 = vperm.xlu0 %1994, %v2600_v20   ;;  %v2639_v43 = vpack.i.bf16 %v1963_v38, %v1962_v37  ;;  %v1947_v48 = vunpack.c.h.bf16 %v1945_v40  ;;  %v1958_v50 = vunpack.c.l.bf16 %v1985_v42  ;;  %v1959_v51 = vunpack.c.h.bf16 %v1985_v42  ;;  %v69_v36 = vld [vmem:[%s4110_s1 + $0xc] sm:$0x3] }
   0xb   :  { %v1966_v53 = vunpack.c.l.bf16 %v1987_v46  ;;  %v1967_v54 = vunpack.c.h.bf16 %v1987_v46  ;;  %v1974_v55 = vunpack.c.l.bf16 %v1989_v49  ;;  %v1975_v56 = vunpack.c.h.bf16 %v1989_v49 }
   0xc   :  { %4179 = vst [vmem:[#allocation2_spill] sm:$0xff] %v2639_v43  ;;  %v2650_v57 = vpack.i.bf16 %v1971_v45, %v1970_v44  ;;  %v2652_v58 = vpack.i.bf16 %v1947_v48, %v1946_v47  ;;  %v2660_v61 = vpack.i.bf16 %v1959_v51, %v1958_v50  ;;  %v71_v1 = vunpack.c.l.bf16 %v63_v59 }
   0xd   :  { %v2662_v62 = vpack.i.bf16 %v1967_v54, %v1966_v53  ;;  %v2664_v63 = vpack.i.bf16 %v1975_v56, %v1974_v55  ;;  %v74_v2 = vunpack.c.l.bf16 %v66_v60  ;;  %v72_v9 = vunpack.c.l.bf16 %v64_v3 }
   0xe   :  { %2022 = vperm.xlu1 %2005, %v2608_v25   ;;  %2017 = vperm.xlu0 %1994, %v2612_v27   ;;  %v2677_v6 = vadd.f32 %v1902_v4, %v71_v1  ;;  %v73_v11 = vunpack.c.l.bf16 %v65_v5  ;;  %v76_v17 = vunpack.c.l.bf16 %v68_v8  ;;  %v43_v23 = vunpack.c.l.bf16 %v2687_v10 }
   0xf   :  { %v2679_v7 = vadd.f32 %v1902_v4, %v74_v2  ;;  %v2693_v14 = vadd.f32 %v1902_v4, %v72_v9  ;;  %v75_v31 = vunpack.c.l.bf16 %v67_v18  ;;  %v78_v40 = vunpack.c.l.bf16 %v70_v29 }
  0x10   :  { %v102_v12 = vmin.f32 %v2677_v6, 20.0  ;;  %v2705_v28 = vadd.f32 %v1902_v4, %v76_v17  ;;  %v2711_v30 = vadd.f32 %v1902_v4, %v73_v11  ;;  %v2716_v32 = vmul.f32 %v2702_v24, %v43_v23 }
  0x11   :  { %v105_v13 = vmin.f32 %v2679_v7, 20.0  ;;  %v103_v26 = vmin.f32 %v2693_v14, 20.0  ;;  %v2729_v39 = vadd.f32 %v1902_v4, %v75_v31  ;;  %v45_v44 = vunpack.c.l.bf16 %v2721_v35  ;;  %v2863_v35 = vld [vmem:[%s4114_s5 + $0x8] sm:$0xff] }
  0x12   :  { %2032 = vperm.xlu1 %2005, %v2622_v33   ;;  %2027 = vperm.xlu0 %1994, %v2624_v34   ;;  %v110_v21 = vmul.f32 1.442695, %v102_v12  ;;  %4180 = vst [vmem:[#allocation3_spill] sm:$0xff] %v2716_v32  ;;  %v107_v38 = vmin.f32 %v2705_v28, 20.0  ;;  %v77_v45 = vunpack.c.l.bf16 %v69_v36  ;;  %v104_v46 = vmin.f32 %v2711_v30, 20.0  ;;  %v1984_v36 = vld [vmem:[%s4109_s4 + $0x10] sm:$0xff]  }
  0x13   :  { %v116_v22 = vmul.f32 1.442695, %v105_v13  ;;  %v112_v37 = vmul.f32 1.442695, %v103_v26  ;;  %v106_v47 = vmin.f32 %v2729_v39, 20.0  ;;  %v2734_v48 = vadd.f32 %v1902_v4, %v78_v40 }
  0x14   :  { %2326 = vpow2.f32 %v110_v21  ;;  %v120_v42 = vmul.f32 1.442695, %v107_v38  ;;  %v4117_v49 = vmov 2   ;;  %v2738_v50 = vadd.f32 %v1902_v4, %v77_v45 }
  0x15   :  { %2328 = vpow2.f32 %v116_v22  ;;  %v2743_v51 = vmul.f32 %v2702_v24, %v45_v44  ;;  %v118_v53 = vmul.f32 1.442695, %v106_v47  ;;  %v109_v54 = vmin.f32 %v2734_v48, 20.0 }
  0x16   :  { %2036 = vset.pattern.permute.xlu1 %v4118_v52  ;;  %2111 = vperm.xlu0 %1994, %v2634_v41   ;;  %2330 = vpow2.f32 %v112_v37  ;;  %v108_v55 = vmin.f32 %v2738_v50, 20.0  ;;  %v114_v56 = vmul.f32 1.442695, %v104_v46  ;;  %v4121_v31 = vmov 3  }
  0x17   :  { %2038 = vperm.xlu1 %2036, %v2600_v20   ;;  %4181 = vst [vmem:[#allocation4_spill] sm:$0xff] %v2743_v51  ;;  %2332 = vpow2.f32 %v120_v42  ;;  %v124_v59 = vmul.f32 1.442695, %v109_v54  ;;  %v222_v37 = vlaneseq  ;;  %v1954_v42 = vunpack.c.l.bf16 %v1984_v36 }
  0x18   :  { %2334 = vpow2.f32 %v118_v53  ;;  %v122_v60 = vmul.f32 1.442695, %v108_v55  ;;  %v1955_v45 = vunpack.c.h.bf16 %v1984_v36  ;;  %vm98_vm0 = vcmp.gt.f32.partialorder %v2729_v39, 20.0 }
  0x19   :  { %2336 = vpow2.f32 %v124_v59  ;;  %v2763_v46 = vshrl.u32 %v222_v37, 7  ;;  %vm94_vm1 = vcmp.gt.f32.partialorder %v2677_v6, 20.0  ;;  %vm97_vm2 = vcmp.gt.f32.partialorder %v2679_v7, 20.0 }
  0x1a   :  { %2126 = vperm.xlu0 %1994, %v2639_v43   ;;  %2338 = vpow2.f32 %v122_v60  ;;  %v2769_v60 = vpack.i.bf16 %v1955_v45, %v1954_v42  ;;  %vm100_vm3 = vcmp.gt.f32.partialorder %v2738_v50, 20.0  ;;  %vm95_vm4 = vcmp.gt.f32.partialorder %v2693_v14, 20.0  ;;  %v2858_v42 = vld [vmem:[%s4114_s5] sm:$0xff] }
  0x1b   :  { %2043 = vperm.xlu1 %2036, %v2592_v15   ;;  %2340 = vpow2.f32 %v114_v56  ;;  %vm99_vm5 = vcmp.gt.f32.partialorder %v2705_v28, 20.0  ;;  %vm96_vm6 = vcmp.gt.f32.partialorder %v2711_v30, 20.0  ;;  %vm101_vm7 = vcmp.gt.f32.partialorder %v2734_v48, 20.0 }
  0x1e   :  { %2136 = vperm.xlu0 %1994, %v2650_v57   ;;  %v2327_v1 = vpop.eup %2326 }
  0x1f   :  { %2048 = vperm.xlu1 %2036, %v2612_v27   ;;  %v2329_v2 = vpop.eup %2328  ;;  %v126_v3 = vadd.f32 1.0, %v2327_v1 }
  0x20   :  { %v2331_v4 = vpop.eup %2330  ;;  %v129_v5 = vadd.f32 1.0, %v2329_v2  ;;  %v2779_v2 = vld [vmem:[%s4112_s0 + $0x4] sm:$0x3] }
  0x21   :  { %v2333_v8 = vpop.eup %2332  ;;  %2342 = vlog2.f32 %v126_v3  ;;  %v127_v11 = vadd.f32 1.0, %v2331_v4  ;;  %4182 = vst [vmem:[#allocation5_spill] sm:$0xff] %v2779_v2  ;;  %v2788_v4 = vld [vmem:[%s4112_s0] sm:$0x3] }
  0x22   :  { %2140 = vset.pattern.permute.xlu0 %v4118_v52  ;;  %v2335_v9 = vpop.eup %2334  ;;  %2344 = vlog2.f32 %v129_v5  ;;  %v131_v12 = vadd.f32 1.0, %v2333_v8 }
  0x23   :  { %2053 = vperm.xlu1 %2036, %v2624_v34   ;;  %2142 = vperm.xlu0 %2140, %v2594_v16   ;;  %v130_v13 = vadd.f32 1.0, %v2335_v9  ;;  %v2337_v17 = vpop.eup %2336 }
  0x24   :  { %v2339_v18 = vpop.eup %2338  ;;  %v133_v26 = vadd.f32 1.0, %v2337_v17  ;;  %v39_v17 = vunpack.c.l.bf16 %v2788_v4 }
  0x25   :  { %2346 = vlog2.f32 %v130_v13  ;;  %v2341_v21 = vpop.eup %2340  ;;  %v132_v22 = vadd.f32 1.0, %v2339_v18 }
  0x26   :  { %2348 = vlog2.f32 %v127_v11  ;;  %v128_v29 = vadd.f32 1.0, %v2341_v21  ;;  %v2831_v21 = vld [vmem:[%s4112_s0 + $0xe] sm:$0x3] }
  0x27   :  { %2057 = vset.pattern.permute.xlu1 %v4117_v49  ;;  %2147 = vperm.xlu0 %2140, %v2598_v19   ;;  %2350 = vlog2.f32 %v131_v12  ;;  %v2817_v12 = vld [vmem:[%s4112_s0 + $0xa] sm:$0x3]  ;;  %v4120_v45 = vunpack.c.l.bf16 %v2831_v21 }
  0x28   :  { %2059 = vperm.xlu1 %2057, %v2594_v16   ;;  %2352 = vlog2.f32 %v132_v22 }
  0x29   :  { %2354 = vlog2.f32 %v133_v26 }
  0x2a   :  { %2356 = vlog2.f32 %v128_v29 }
  0x2b   :  { %2152 = vperm.xlu0 %2140, %v2608_v25   ;;  %v2343_v38 = vpop.eup %2342 }
  0x2c   :  { %2064 = vperm.xlu1 %2057, %v2592_v15   ;;  %v2345_v40 = vpop.eup %2344  ;;  %v135_v53 = vmul.f32 0.6931472, %v2343_v38  ;;  %v4119_v38 = vunpack.c.l.bf16 %v2817_v12 }
  0x2d   :  { %v141_v55 = vmul.f32 0.6931472, %v2345_v40 }
  0x2f   :  { %2157 = vperm.xlu0 %2140, %v2622_v33   ;;  %v2347_v47 = vpop.eup %2346  ;;  %v2805_v9 = vsel %vm97_vm2, %v2679_v7, %v141_v55  ;;  %v2878_v55 = vsub.s32 1, %v2763_v46 }
  0x30   :  { %2069 = vperm.xlu1 %2057, %v2598_v19   ;;  %v2349_v54 = vpop.eup %2348  ;;  %v143_v56 = vmul.f32 0.6931472, %v2347_v47 }
  0x31   :  { %v2351_v59 = vpop.eup %2350  ;;  %v137_v10 = vmul.f32 0.6931472, %v2349_v54 }
  0x32   :  { %v2353_v1 = vpop.eup %2352  ;;  %v2782_v3 = vsel %vm98_vm0, %v2729_v39, %v143_v56  ;;  %v2802_v39 = vld [vmem:[%s4112_s0 + $0x6] sm:$0x3]  ;;  %v145_v13 = vmul.f32 0.6931472, %v2351_v59 }
  0x33   :  { %2167 = vperm.xlu0 %2140, %v2652_v58   ;;  %4183 = vst [vmem:[#allocation6_spill] sm:$0xff] %v2782_v3  ;;  %v2796_v5 = vmul.f32 %v2782_v3, %v43_v23  ;;  %v147_v8 = vmul.f32 0.6931472, %v2353_v1  ;;  %v2355_v11 = vpop.eup %2354  ;;  %v4123_v23 = vunpack.c.l.bf16 %v2779_v2 }
  0x34   :  { %2074 = vperm.xlu1 %2057, %v2608_v25   ;;  %v2357_v26 = vpop.eup %2356  ;;  %v149_v40 = vmul.f32 0.6931472, %v2355_v11 }
  0x35   :  { %v2836_v22 = vsel %vm100_vm3, %v2738_v50, %v147_v8  ;;  %v2852_v50 = vsel %vm95_vm4, %v2693_v14, %v137_v10  ;;  %v139_v47 = vmul.f32 0.6931472, %v2357_v26  ;;  %v2907_v10 = vmul.f32 %v2702_v24, %v39_v17 }
  0x36   :  { %4186 = vst [vmem:[#allocation9_spill] sm:$0xff] %v2836_v22  ;;  %v2846_v37 = vmul.f32 %v2836_v22, %v45_v44  ;;  %4187 = vst [vmem:[#allocation10_spill] sm:$0xff] %v2852_v50  ;;  %v2866_v44 = vsel %vm99_vm5, %v2705_v28, %v145_v13  ;;  %v2894_v8 = vsel %vm101_vm7, %v2734_v48, %v149_v40  ;;  %v2925_v26 = vsub.s32 2, %v2763_v46 }
  0x37   :  { %2183 = vperm.xlu0 %2140, %v2660_v61   ;;  %4190 = vst [vmem:[#allocation13_spill] sm:$0xff] %v2907_v10  ;;  %v2915_v48 = vmul.f32 %v2702_v24, %v4119_v38  ;;  %v2928_v40 = vsub.s32 3, %v2763_v46  ;;  %v4200_v10 = vunpack.c.l.bf16 %v2817_v12 }
  0x38   :  { %2079 = vperm.xlu1 %2057, %v2622_v33   ;;  %v2952_v36 = vrot.slane %v2846_v37, %v2878_v55 }
  0x39   :  { %4192 = vst [vmem:[#allocation15_spill] sm:$0xff] %v2915_v48  ;;  %4194 = vst [vmem:[#allocation17_spill] sm:$0xff] %v2928_v40 }
  0x3a   :  { %4196 = vst [vmem:[#allocation19_spill] sm:$0xff] %v2952_v36  ;;  %v3008_v36 = vmul.f32 %v2866_v44, %v4200_v10 }
  0x3b   :  { %2193 = vperm.xlu0 %2140, %v2662_v62  }
  0x3c   :  { %2083 = vset.pattern.permute.xlu1 %v4121_v31 }
  0x3d   :  { %2085 = vperm.xlu1 %2083, %v2600_v20  }
  0x3f   :  { %2203 = vperm.xlu0 %2140, %v2664_v63  }
  0x41   :  { %2090 = vperm.xlu1 %2083, %v2592_v15   ;;  %v2774_v15 = vsub.s32 0, %v2763_v46 }
  0x43   :  { %2207 = vset.pattern.permute.xlu0 %v4117_v49  ;;  %v2821_v7 = vrot.slane %v2796_v5, %v2774_v15  ;;  %v237_v29 = vrot.slane %v2805_v9, %v2774_v15  ;;  %v2872_v14 = vrot.slane %v2846_v37, %v2774_v15  ;;  %v229_v56 = vrot.slane %v2852_v50, %v2774_v15 }
  0x44   :  { %2209 = vperm.xlu0 %2207, %v2600_v20   ;;  %v2791_v20 = vsel %vm94_vm1, %v2677_v6, %v135_v53  ;;  %v2810_v6 = vld [vmem:[%s4112_s0 + $0x2] sm:$0x3]  ;;  %v241_v59 = vrot.slane %v2782_v3, %v2774_v15  ;;  %v245_v1 = vrot.slane %v2866_v44, %v2774_v15  ;;  %v2933_v49 = vsel %vm96_vm6, %v2711_v30, %v139_v47 }
  0x45   :  { %2095 = vperm.xlu1 %2083, %v2612_v27   ;;  %4184 = vst [vmem:[#allocation7_spill] sm:$0xff] %v2810_v6  ;;  %4185 = vst [vmem:[#allocation8_spill] sm:$0xff] %v2821_v7  ;;  %v225_v18 = vrot.slane %v2791_v20, %v2774_v15  ;;  %v260_v28 = vmul.f32 %v237_v29, %v2858_v42  ;;  %v261_v13 = vmul.f32 %v237_v29, %v2863_v35 }
  0x46   :  { %4188 = vst [vmem:[#allocation11_spill] sm:$0xff] %v2872_v14  ;;  %4195 = vst [vmem:[#allocation18_spill] sm:$0xff] %v2933_v49  ;;  %v253_v29 = vrot.slane %v2894_v8, %v2774_v15  ;;  %v256_v38 = vmul.f32 %v229_v56, %v2858_v42  ;;  %v264_v31 = vmul.f32 %v245_v1, %v2858_v42 }
  0x47   :  { %v254_v53 = vmul.f32 %v225_v18, %v2858_v42  ;;  %v255_v54 = vmul.f32 %v225_v18, %v2863_v35  ;;  %v2922_v18 = vmul.f32 %v2702_v24, %v4120_v45  ;;  %v282_v45 = vmul.f32 1.442695, %v260_v28 }
  0x48   :  { %2214 = vperm.xlu0 %2207, %v2612_v27   ;;  %v42_v27 = vunpack.c.l.bf16 %v2802_v39  ;;  %v2902_v39 = vrot.slane %v2796_v5, %v2878_v55  ;;  %v265_v30 = vmul.f32 %v245_v1, %v2863_v35  ;;  %v445_v47 = vrot.slane %v2852_v50, %v2878_v55 }
  0x49   :  { %2100 = vperm.xlu1 %2083, %v2624_v34   ;;  %4193 = vst [vmem:[#allocation16_spill] sm:$0xff] %v2922_v18  ;;  %v270_v52 = vmul.f32 1.442695, %v254_v53  ;;  %v272_v46 = vmul.f32 1.442695, %v255_v54  ;;  %v465_v53 = vrot.slane %v2836_v22, %v2878_v55  ;;  %v257_v54 = vmul.f32 %v229_v56, %v2863_v35 }
  0x4a   :  { %4189 = vst [vmem:[#allocation12_spill] sm:$0xff] %v2902_v39  ;;  %v2910_v11 = vmul.f32 %v2702_v24, %v42_v27  ;;  %v2942_v24 = vmul.f32 %v2933_v49, %v4123_v23  ;;  %v284_v23 = vmul.f32 1.442695, %v261_v13  ;;  %v2958_v28 = vrot.slane %v2933_v49, %v2774_v15 }
  0x4b   :  { %v2962_v1 = vrot.slane %v2933_v49, %v2878_v55  ;;  %2358 = vpow2.f32 %v270_v52  ;;  %v2967_v51 = vmul.f32 %v2791_v20, %v39_v17  ;;  %v268_v32 = vmul.f32 %v253_v29, %v2858_v42 }
  0x4c   :  { %2219 = vperm.xlu0 %2207, %v2624_v34   ;;  %v2888_v34 = vrot.slane %v2836_v22, %v2774_v15  ;;  %4191 = vst [vmem:[#allocation14_spill] sm:$0xff] %v2910_v11  ;;  %v274_v2 = vmul.f32 1.442695, %v256_v38  ;;  %2360 = vpow2.f32 %v272_v46  ;;  %v2972_v56 = vmul.f32 %v2805_v9, %v42_v27 }
  0x4d   :  { %2104 = vset.pattern.permute.xlu1 %v2523_v0  ;;  %v2898_v0 = vrot.slane %v2782_v3, %v2878_v55  ;;  %v290_v13 = vmul.f32 1.442695, %v264_v31  ;;  %v269_v18 = vmul.f32 %v253_v29, %v2863_v35  ;;  %v2977_v52 = vrot.slane %v2942_v24, %v2774_v15 }
  0x4e   :  { %2106 = vperm.xlu1 %2104, %v2652_v58   ;;  %2362 = vpow2.f32 %v282_v45  ;;  %v292_v4 = vmul.f32 1.442695, %v265_v30  ;;  %v472_v17 = vmul.f32 %v445_v47, %v2858_v42  ;;  %v276_v38 = vmul.f32 1.442695, %v257_v54 }
  0x4f   :  { %2364 = vpow2.f32 %v284_v23  ;;  %v473_v46 = vmul.f32 %v445_v47, %v2863_v35  ;;  %v2984_v27 = vrot.slane %v2942_v24, %v2878_v55  ;;  %v2988_v31 = vrot.slane %v2967_v51, %v2774_v15 }
  0x50   :  { %2230 = vperm.xlu0 %2207, %v2634_v41   ;;  %v298_v29 = vmul.f32 1.442695, %v268_v32  ;;  %2366 = vpow2.f32 %v274_v2  ;;  %v262_v45 = vmul.f32 %v241_v59, %v2858_v42  ;;  %v2994_v23 = vrot.slane %v2972_v56, %v2774_v15 }
  0x51   :  { %4197 = vst [vmem:[#allocation20_spill] sm:$0xff] %v2984_v27  ;;  %2368 = vpow2.f32 %v290_v13  ;;  %v300_v30 = vmul.f32 1.442695, %v269_v18  ;;  %v263_v47 = vmul.f32 %v241_v59, %v2863_v35  ;;  %v4198_v54 = vunpack.c.l.bf16 %v2810_v6 }
  0x52   :  { %2116 = vperm.xlu1 %2104, %v2769_v60   ;;  %2370 = vpow2.f32 %v292_v4  ;;  %v490_v32 = vmul.f32 1.442695, %v472_v17  ;;  %v266_v2 = vmul.f32 %v2888_v34, %v2858_v42  ;;  %v4199_v11 = vmov 3  }
  0x53   :  { %v3000_v48 = vmul.f32 %v2852_v50, %v4198_v54  ;;  %2372 = vpow2.f32 %v276_v38  ;;  %v492_v18 = vmul.f32 1.442695, %v473_v46  ;;  %v267_v59 = vmul.f32 %v2888_v34, %v2863_v35 }
  0x54   :  { %2245 = vperm.xlu0 %2207, %v2639_v43   ;;  %2374 = vpow2.f32 %v298_v29  ;;  %v4201_v13 = vunpack.c.l.bf16 %v2831_v21  ;;  %v286_v17 = vmul.f32 1.442695, %v262_v45  ;;  %v478_v12 = vmul.f32 %v2898_v0, %v2858_v42 }
  0x55   :  { %2376 = vpow2.f32 %v300_v30  ;;  %v288_v10 = vmul.f32 1.442695, %v263_v47  ;;  %v479_v38 = vmul.f32 %v2898_v0, %v2863_v35  ;;  %v2359_v34 = vpop.eup %2358  ;;  %v3027_v21 = vrot.slane %v3000_v48, %v2774_v15 }
  0x56   :  { %2121 = vperm.xlu1 %2104, %v2660_v61   ;;  %v3016_v4 = vmul.f32 %v2894_v8, %v4201_v13  ;;  %2378 = vpow2.f32 %v490_v32  ;;  %v294_v46 = vmul.f32 1.442695, %v266_v2  ;;  %v482_v29 = vmul.f32 %v465_v53, %v2858_v42  ;;  %v2361_v45 = vpop.eup %2360 }
  0x57   :  { %v3032_v30 = vrot.slane %v3008_v36, %v2774_v15  ;;  %2380 = vpow2.f32 %v492_v18  ;;  %v296_v47 = vmul.f32 1.442695, %v267_v59  ;;  %v483_v0 = vmul.f32 %v465_v53, %v2863_v35 }
  0x58   :  { %2255 = vperm.xlu0 %2207, %v2650_v57   ;;  %v2363_v54 = vpop.eup %2362  ;;  %v3038_v13 = vrot.slane %v3016_v4, %v2774_v15  ;;  %2382 = vpow2.f32 %v286_v17  ;;  %v502_v32 = vmul.f32 1.442695, %v478_v12  ;;  %v453_v2 = vrot.slane %v2805_v9, %v2878_v55 }
  0x59   :  { %4202 = vst [vmem:[#allocation21_spill] sm:$0xff] %v3032_v30  ;;  %v2365_v6 = vpop.eup %2364  ;;  %v4204_v39 = vmov 1   ;;  %v3045_v18 = vrot.slane %v3000_v48, %v2878_v55  ;;  %2384 = vpow2.f32 %v288_v10  ;;  %v504_v53 = vmul.f32 1.442695, %v479_v38 }
  0x5a   :  { %2131 = vperm.xlu1 %2104, %v2662_v62   ;;  %4203 = vst [vmem:[#allocation22_spill] sm:$0xff] %v3038_v13  ;;  %v2367_v59 = vpop.eup %2366  ;;  %2386 = vpow2.f32 %v294_v46  ;;  %v510_v15 = vmul.f32 1.442695, %v482_v29  ;;  %v633_v12 = vrot.slane %v2791_v20, %v2925_v26  ;;  %v3054_v13 = vmul.f32 0.0, %v2361_v45 }
  0x5b   :  { %4205 = vst [vmem:[#allocation23_spill] sm:$0xff] %v3045_v18  ;;  %v2369_v27 = vpop.eup %2368  ;;  %2388 = vpow2.f32 %v296_v47  ;;  %v512_v10 = vmul.f32 1.442695, %v483_v0  ;;  %v3057_v18 = vmul.f32 0.0, %v2363_v54  ;;  %v476_v46 = vmul.f32 %v453_v2, %v2858_v42 }
  0x5c   :  { %2259 = vset.pattern.permute.xlu0 %v4199_v11  ;;  %v2371_v38 = vpop.eup %2370  ;;  %2390 = vpow2.f32 %v502_v32  ;;  %v3062_v14 = vmul.f32 0.0, %v2365_v6  ;;  %v477_v45 = vmul.f32 %v453_v2, %v2863_v35  ;;  %v662_v0 = vmul.f32 %v633_v12, %v2858_v42 }
  0x5d   :  { %2261 = vperm.xlu0 %2259, %v2594_v16   ;;  %v441_v16 = vrot.slane %v2791_v20, %v2878_v55  ;;  %4206 = vst [vmem:[#allocation24_spill] sm:$0xff] %v3057_v18  ;;  %v2373_v29 = vpop.eup %2372  ;;  %2392 = vpow2.f32 %v504_v53  ;;  %v469_v54 = vrot.slane %v2894_v8, %v2878_v55  ;;  %v3071_v30 = vmul.f32 0.0, %v2369_v27 }
  0x5e   :  { %2162 = vperm.xlu1 %2104, %v2664_v63   ;;  %4207 = vst [vmem:[#allocation25_spill] sm:$0xff] %v3062_v14  ;;  %v2375_v47 = vpop.eup %2374  ;;  %2394 = vpow2.f32 %v510_v15  ;;  %v3073_v6 = vmul.f32 0.0, %v2367_v59  ;;  %v663_v53 = vmul.f32 %v633_v12, %v2863_v35  ;;  %v3084_v14 = vrot.slane %v2796_v5, %v2925_v26 }
  0x5f   :  { %v471_v17 = vmul.f32 %v441_v16, %v2863_v35  ;;  %v3069_v32 = vpop.eup %2376  ;;  %4208 = vst [vmem:[#allocation26_spill] sm:$0xff] %v3071_v30  ;;  %2396 = vpow2.f32 %v512_v10  ;;  %v500_v59 = vmul.f32 1.442695, %v477_v45  ;;  %v3091_v10 = vrot.slane %v2846_v37, %v2925_v26 }
  0x60   :  { %4209 = vst [vmem:[#allocation27_spill] sm:$0xff] %v3073_v6  ;;  %v3076_v2 = vpop.eup %2378  ;;  %4211 = vst [vmem:[#allocation29_spill] sm:$0xff] %v3084_v14  ;;  %v484_v30 = vmul.f32 %v469_v54, %v2858_v42  ;;  %v653_v14 = vrot.slane %v2866_v44, %v2925_v26  ;;  %v3104_v45 = vrot.slane %v2782_v3, %v2925_v26  ;;  %v3118_v18 = vmul.f32 0.0, %v2371_v38 }
  0x61   :  { %2266 = vperm.xlu0 %2259, %v2598_v19   ;;  %v470_v19 = vmul.f32 %v441_v16, %v2858_v42  ;;  %v461_v16 = vrot.slane %v2866_v44, %v2878_v55  ;;  %4210 = vst [vmem:[#allocation28_spill] sm:$0xff] %v3076_v2  ;;  %v3086_v27 = vpop.eup %2380  ;;  %4213 = vst [vmem:[#allocation31_spill] sm:$0xff] %v3091_v10  ;;  %v3108_v10 = vrot.slane %v2836_v22, %v2925_v26 }
  0x62   :  { %2171 = vset.pattern.permute.xlu1 %v4204_v39  ;;  %v3052_v39 = vmul.f32 0.0, %v2359_v34  ;;  %4212 = vst [vmem:[#allocation30_spill] sm:$0xff] %v3086_v27  ;;  %4214 = vst [vmem:[#allocation32_spill] sm:$0xff] %v3118_v18  ;;  %v3131_v38 = vrot.slane %v2967_v51, %v2878_v55 }
  0x63   :  { %2173 = vperm.xlu1 %2171, %v2634_v41   ;;  %v486_v34 = vmul.f32 1.442695, %v470_v19  ;;  %v498_v19 = vmul.f32 1.442695, %v476_v46  ;;  %v480_v15 = vmul.f32 %v461_v16, %v2858_v42  ;;  %v481_v12 = vmul.f32 %v461_v16, %v2863_v35 }
  0x64   :  { %v678_v46 = vmul.f32 1.442695, %v662_v0  ;;  %v485_v16 = vmul.f32 %v469_v54, %v2863_v35  ;;  %4216 = vst [vmem:[#allocation34_spill] sm:$0xff] %v3131_v38  ;;  %v3148_v38 = vrot.slane %v2972_v56, %v2878_v55 }
  0x65   :  { %2271 = vperm.xlu0 %2259, %v2608_v25   ;;  %v488_v25 = vmul.f32 1.442695, %v471_v17  ;;  %v645_v17 = vrot.slane %v2805_v9, %v2925_v26  ;;  %2398 = vpow2.f32 %v486_v34  ;;  %v680_v34 = vmul.f32 1.442695, %v663_v53 }
  0x66   :  { %v506_v0 = vmul.f32 1.442695, %v480_v15  ;;  %v661_v53 = vrot.slane %v2894_v8, %v2925_v26  ;;  %v508_v3 = vmul.f32 1.442695, %v481_v12  ;;  %v672_v15 = vmul.f32 %v653_v14, %v2858_v42  ;;  %4218 = vst [vmem:[#allocation35_spill] sm:$0xff] %v3148_v38 }
  0x67   :  { %2178 = vperm.xlu1 %2171, %v2769_v60   ;;  %2400 = vpow2.f32 %v488_v25  ;;  %v668_v2 = vmul.f32 %v645_v17, %v2858_v42  ;;  %v669_v22 = vmul.f32 %v645_v17, %v2863_v35  ;;  %v673_v17 = vmul.f32 %v653_v14, %v2863_v35 }
  0x68   :  { %2402 = vpow2.f32 %v498_v19  ;;  %v514_v19 = vmul.f32 1.442695, %v484_v30  ;;  %v676_v30 = vmul.f32 %v661_v53, %v2858_v42  ;;  %v4217_v14 = vmov 2  }
  0x69   :  { %2276 = vperm.xlu0 %2259, %v2622_v33   ;;  %v3093_v33 = vpop.eup %2382  ;;  %2404 = vpow2.f32 %v500_v59  ;;  %v516_v59 = vmul.f32 1.442695, %v485_v16  ;;  %v677_v16 = vmul.f32 %v661_v53, %v2863_v35 }
  0x6a   :  { %v3099_v27 = vpop.eup %2384  ;;  %2406 = vpow2.f32 %v678_v46  ;;  %v637_v46 = vrot.slane %v2852_v50, %v2925_v26 }
  0x6b   :  { %2188 = vperm.xlu1 %2171, %v2639_v43   ;;  %v3110_v25 = vpop.eup %2386  ;;  %v3124_v43 = vmul.f32 0.0, %v2373_v29  ;;  %2408 = vpow2.f32 %v680_v34  ;;  %v690_v29 = vmul.f32 1.442695, %v668_v2  ;;  %v692_v34 = vmul.f32 1.442695, %v669_v22 }
  0x6c   :  { %v3116_v54 = vpop.eup %2388  ;;  %2410 = vpow2.f32 %v506_v0  ;;  %v698_v2 = vmul.f32 1.442695, %v672_v15  ;;  %v258_v0 = vmul.f32 %v2958_v28, %v2858_v42  ;;  %v700_v22 = vmul.f32 1.442695, %v673_v17 }
  0x6d   :  { %2286 = vperm.xlu0 %2259, %v2652_v58   ;;  %v3121_v6 = vpop.eup %2390  ;;  %2412 = vpow2.f32 %v508_v3  ;;  %v3156_v3 = vmul.f32 0.0, %v3069_v32  ;;  %v706_v15 = vmul.f32 1.442695, %v676_v30  ;;  %v3170_v32 = vrot.slane %v3008_v36, %v2878_v55 }
  0x6e   :  { %v3127_v7 = vpop.eup %2392  ;;  %2414 = vpow2.f32 %v514_v19  ;;  %v3165_v19 = vrot.slane %v2967_v51, %v2925_v26  ;;  %v278_v38 = vmul.f32 1.442695, %v258_v0  ;;  %v674_v0 = vmul.f32 %v3108_v10, %v2858_v42 }
  0x6f   :  { %2198 = vperm.xlu1 %2171, %v2650_v57   ;;  %4215 = vst [vmem:[#allocation33_spill] sm:$0xff] %v3127_v7  ;;  %v3134_v12 = vpop.eup %2394  ;;  %v3142_v7 = vmul.f32 0.0, %v2375_v47  ;;  %2416 = vpow2.f32 %v516_v59  ;;  %v259_v47 = vmul.f32 %v2958_v28, %v2863_v35  ;;  %4220 = vst [vmem:[#allocation37_spill] sm:$0xff] %v3170_v32  ;;  %v708_v59 = vmul.f32 1.442695, %v677_v16 }
  0x70   :  { %v3140_v18 = vpop.eup %2396  ;;  %4219 = vst [vmem:[#allocation36_spill] sm:$0xff] %v3165_v19  ;;  %2418 = vpow2.f32 %v690_v29  ;;  %v665_v28 = vmul.f32 %v637_v46, %v2863_v35  ;;  %v670_v29 = vmul.f32 %v3104_v45, %v2858_v42  ;;  %v671_v16 = vmul.f32 %v3104_v45, %v2863_v35 }
  0x71   :  { %2302 = vperm.xlu0 %2259, %v2660_v61   ;;  %v3152_v50 = vpop.eup %2398  ;;  %2420 = vpow2.f32 %v692_v34  ;;  %v3185_v34 = vrot.slane %v2942_v24, %v2925_v26  ;;  %v825_v32 = vrot.slane %v2791_v20, %v2928_v40  ;;  %v675_v45 = vmul.f32 %v3108_v10, %v2863_v35 }
  0x72   :  { %v3160_v53 = vpop.eup %2400  ;;  %2422 = vpow2.f32 %v698_v2  ;;  %v474_v20 = vmul.f32 %v2962_v1, %v2858_v42  ;;  %v837_v10 = vrot.slane %v2805_v9, %v2928_v40 }
  0x73   :  { %2223 = vset.pattern.permute.xlu1 %v4217_v14  ;;  %v3173_v17 = vpop.eup %2402  ;;  %v3176_v14 = vmul.f32 0.0, %v3093_v33  ;;  %4221 = vst [vmem:[#allocation38_spill] sm:$0xff] %v3185_v34  ;;  %2424 = vpow2.f32 %v700_v22  ;;  %v3199_v22 = vmul.f32 0.0, %v3099_v27  ;;  %v696_v27 = vmul.f32 1.442695, %v671_v16 }
  0x74   :  { %2225 = vperm.xlu1 %2223, %v2652_v58   ;;  %v664_v58 = vmul.f32 %v637_v46, %v2858_v42  ;;  %v3180_v30 = vpop.eup %2404  ;;  %v280_v46 = vmul.f32 1.442695, %v259_v47  ;;  %2426 = vpow2.f32 %v706_v15  ;;  %v684_v47 = vmul.f32 1.442695, %v665_v28 }
  0x75   :  { %2312 = vperm.xlu0 %2259, %v2662_v62   ;;  %v3189_v33 = vpop.eup %2406  ;;  %2428 = vpow2.f32 %v708_v59  ;;  %v3206_v15 = vmul.f32 0.0, %v3110_v25  ;;  %v475_v59 = vmul.f32 %v2962_v1, %v2863_v35  ;;  %v702_v25 = vmul.f32 1.442695, %v674_v0 }
  0x76   :  { %4222 = vst [vmem:[#allocation39_spill] sm:$0xff] %v3189_v33  ;;  %v682_v2 = vmul.f32 1.442695, %v664_v58  ;;  %v3196_v19 = vpop.eup %2408  ;;  %2430 = vpow2.f32 %v278_v38  ;;  %v694_v58 = vmul.f32 1.442695, %v670_v29  ;;  %v854_v38 = vmul.f32 %v825_v32, %v2858_v42 }
  0x77   :  { %4223 = vst [vmem:[#allocation40_spill] sm:$0xff] %v3196_v19  ;;  %v3203_v34 = vpop.eup %2410  ;;  %2432 = vpow2.f32 %v280_v46  ;;  %v845_v29 = vrot.slane %v2866_v44, %v2928_v40  ;;  %v3229_v1 = vrot.slane %v3016_v4, %v2878_v55  ;;  %v704_v9 = vmul.f32 1.442695, %v675_v45 }
  0x78   :  { %2235 = vperm.xlu1 %2223, %v2769_v60   ;;  %v3210_v33 = vpop.eup %2412  ;;  %2434 = vpow2.f32 %v682_v2  ;;  %v3235_v16 = vrot.slane %v2972_v56, %v2925_v26  ;;  %v494_v2 = vmul.f32 1.442695, %v474_v20  ;;  %v855_v44 = vmul.f32 %v825_v32, %v2863_v35 }
  0x79   :  { %2322 = vperm.xlu0 %2259, %v2664_v63   ;;  %v3217_v28 = vpop.eup %2414  ;;  %2436 = vpow2.f32 %v684_v47  ;;  %v860_v55 = vmul.f32 %v837_v10, %v2858_v42  ;;  %v641_v47 = vrot.slane %v2933_v49, %v2925_v26  ;;  %v864_v20 = vmul.f32 %v845_v29, %v2858_v42 }
  0x7a   :  { %v3222_v19 = vpop.eup %2416  ;;  %4225 = vst [vmem:[#allocation42_spill] sm:$0xff] %v3235_v16  ;;  %2438 = vpow2.f32 %v694_v58  ;;  %v861_v58 = vmul.f32 %v837_v10, %v2863_v35  ;;  %v3266_v10 = vrot.slane %v2942_v24, %v2928_v40  ;;  %v865_v49 = vmul.f32 %v845_v29, %v2863_v35 }
  0x7b   :  { %v3231_v46 = vpop.eup %2418  ;;  %2440 = vpow2.f32 %v696_v27  ;;  %v3256_v27 = vrot.slane %v3016_v4, %v2925_v26  ;;  %v667_v29 = vmul.f32 %v641_v47, %v2863_v35 }
  0x7c   :  { %2240 = vperm.xlu1 %2223, %v2660_v61   ;;  %v3225_v61 = vmul.f32 0.0, %v3116_v54  ;;  %4224 = vst [vmem:[#allocation41_spill] sm:$0xff] %v3231_v46  ;;  %v3238_v0 = vpop.eup %2420  ;;  %v496_v54 = vmul.f32 1.442695, %v475_v59  ;;  %2442 = vpow2.f32 %v702_v25  ;;  %v870_v46 = vmul.f32 1.442695, %v854_v38 }
  0x7d   :  { %4226 = vst [vmem:[#allocation43_spill] sm:$0xff] %v3238_v0  ;;  %v3244_v45 = vpop.eup %2422  ;;  %4230 = vst [vmem:[#allocation47_spill] sm:$0xff] %v3256_v27  ;;  %v3260_v59 = vrot.slane %v3000_v48, %v2928_v40  ;;  %2444 = vpow2.f32 %v704_v9  ;;  %v872_v38 = vmul.f32 1.442695, %v855_v44  ;;  %v3274_v27 = vrot.slane %v3000_v48, %v2925_v26 }
  0x7e   :  { %4227 = vst [vmem:[#allocation44_spill] sm:$0xff] %v3244_v45  ;;  %v3248_v32 = vpop.eup %2424  ;;  %4233 = vst [vmem:[#allocation50_spill] sm:$0xff] %v3266_v10  ;;  %2446 = vpow2.f32 %v494_v2  ;;  %v882_v9 = vmul.f32 1.442695, %v860_v55  ;;  %v884_v2 = vmul.f32 1.442695, %v861_v58  ;;  %v3282_v48 = vrot.slane %v2796_v5, %v2928_v40 }
  0x7f   :  { %4228 = vst [vmem:[#allocation45_spill] sm:$0xff] %v3248_v32  ;;  %4231 = vst [vmem:[#allocation48_spill] sm:$0xff] %v3260_v59  ;;  %v3262_v25 = vpop.eup %2426  ;;  %2448 = vpow2.f32 %v496_v54  ;;  %v666_v59 = vmul.f32 %v641_v47, %v2858_v42  ;;  %v890_v44 = vmul.f32 1.442695, %v864_v20  ;;  %v3286_v42 = vrot.slane %v2846_v37, %v2928_v40 }
  0x80   :  { %2250 = vperm.xlu1 %2223, %v2662_v62   ;;  %v3252_v62 = vrot.slane %v3008_v36, %v2925_v26  ;;  %4232 = vst [vmem:[#allocation49_spill] sm:$0xff] %v3262_v25  ;;  %v3269_v32 = vpop.eup %2428  ;;  %2450 = vpow2.f32 %v870_v46  ;;  %v892_v26 = vmul.f32 1.442695, %v865_v49  ;;  %v3300_v20 = vrot.slane %v2967_v51, %v2928_v40 }
  0x81   :  { %4234 = vst [vmem:[#allocation51_spill] sm:$0xff] %v3269_v32  ;;  %v2431_v25 = vpop.eup %2430  ;;  %2452 = vpow2.f32 %v872_v38  ;;  %v686_v55 = vmul.f32 1.442695, %v666_v59 }
  0x82   :  { %4229 = vst [vmem:[#allocation46_spill] sm:$0xff] %v3252_v62  ;;  %v2433_v10 = vpop.eup %2432  ;;  %2454 = vpow2.f32 %v882_v9  ;;  %4235 = vst [vmem:[#allocation52_spill] sm:$0xff] %v3300_v20  ;;  %v3314_v9 = vrot.slane %v3008_v36, %v2928_v40  ;;  %v4253_v20 = vld [vmem:[#allocation11_spill] sm:$0xff] }
  0x83   :  { %v3278_v16 = vpop.eup %2434  ;;  %2456 = vpow2.f32 %v884_v2 }
  0x84   :  { %2281 = vperm.xlu1 %2223, %v2664_v63   ;;  %v3288_v46 = vpop.eup %2436  ;;  %2458 = vpow2.f32 %v890_v44  ;;  %4237 = vst [vmem:[#allocation54_spill] sm:$0xff] %v3314_v9  ;;  %v4247_v9 = vld [vmem:[#allocation24_spill] sm:$0xff] }
  0x85   :  { %v2008_v62 = vpop.permute.xlu1 %2007  ;;  %v1997_v24 = vpop.permute.xlu0 %1996  ;;  %2460 = vpow2.f32 %v892_v26 }
  0x86   :  { %v2010_v32 = vunpack.i.h.bf16 %v2008_v62  ;;  %v2009_v45 = vunpack.i.l.bf16 %v2008_v62  ;;  %v1999_v63 = vunpack.i.h.bf16 %v1997_v24  ;;  %v1998_v0 = vunpack.i.l.bf16 %v1997_v24  ;;  %v3293_v47 = vpop.eup %2438 }
  0x87   :  { %2462 = vpow2.f32 %v686_v55 }
  0x88   :  { %v426_v35 = vmul.f32 %v2009_v45, %v2977_v52  ;;  %v427_v54 = vmul.f32 %v2010_v32, %v2977_v52  ;;  %2290 = vset.pattern.permute.xlu1 %v4199_v11  ;;  %v422_v5 = vmul.f32 %v1998_v0, %v2988_v31  ;;  %v423_v58 = vmul.f32 %v1999_v63, %v2988_v31  ;;  %v3302_v52 = vpop.eup %2440 }
  0x89   :  { %v2013_v37 = vpop.permute.xlu1 %2012  ;;  %2292 = vperm.xlu1 %2290, %v2634_v41   ;;  %v2002_v49 = vpop.permute.xlu0 %2001  ;;  %v1018_v11 = vmul.f32 0.0, %v2431_v25  ;;  %v1019_v45 = vmul.f32 0.0, %v2433_v10  ;;  %v688_v32 = vmul.f32 1.442695, %v667_v29  ;;  %v3308_v31 = vrot.slane %v2972_v56, %v2928_v40  ;;  %v3319_v25 = vld [vmem:[%s4115_s2] sm:$0x3] }
  0x8a   :  { %v3304_v62 = vpop.eup %2442  ;;  %v2004_v0 = vunpack.i.h.bf16 %v2002_v49  ;;  %v2003_v59 = vunpack.i.l.bf16 %v2002_v49  ;;  %v2015_v51 = vunpack.i.h.bf16 %v2013_v37  ;;  %v2014_v38 = vunpack.i.l.bf16 %v2013_v37 }
  0x8b   :  { %4236 = vst [vmem:[#allocation53_spill] sm:$0xff] %v3308_v31  ;;  %v3310_v41 = vpop.eup %2444  ;;  %v3322_v24 = vadd.f32 %v3052_v39, %v422_v5  ;;  %v3325_v56 = vadd.f32 %v3054_v13, %v423_v58  ;;  %v3330_v26 = vadd.f32 %v1018_v11, %v426_v35  ;;  %v3332_v37 = vadd.f32 %v1019_v45, %v427_v54  ;;  %v4241_v11 = vld [vmem:[#allocation8_spill] sm:$0xff] }
  0x8c   :  { %v2447_v10 = vpop.eup %2446  ;;  %v424_v2 = vmul.f32 %v2003_v59, %v3027_v21  ;;  %v425_v44 = vmul.f32 %v2004_v0, %v3027_v21  ;;  %v3336_v39 = vrot.slane %v3016_v4, %v2928_v40  ;;  %2464 = vpow2.f32 %v688_v32  ;;  %v4242_v59 = vld [vmem:[#allocation2_spill] sm:$0xff] }
  0x8d   :  { %v2023_v29 = vpop.permute.xlu1 %2022  ;;  %2297 = vperm.xlu1 %2290, %v2769_v60   ;;  %v2018_v36 = vpop.permute.xlu0 %2017  ;;  %4238 = vst [vmem:[#allocation55_spill] sm:$0xff] %v3330_v26  ;;  %4239 = vst [vmem:[#allocation56_spill] sm:$0xff] %v3332_v37  ;;  %v3343_v60 = vrot.slane %v2894_v8, %v2928_v40  ;;  %v428_v35 = vmul.f32 %v2014_v38, %v2994_v23  ;;  %v429_v54 = vmul.f32 %v2015_v51, %v2994_v23  ;;  %v4244_v38 = vld [vmem:[#allocation27_spill] sm:$0xff] }
  0x8e   :  { %v2449_v63 = vpop.eup %2448  ;;  %4240 = vst [vmem:[#allocation57_spill] sm:$0xff] %v3336_v39  ;;  %v2020_v55 = vunpack.i.h.bf16 %v2018_v36  ;;  %v2019_v5 = vunpack.i.l.bf16 %v2018_v36  ;;  %v2025_v58 = vunpack.i.h.bf16 %v2023_v29  ;;  %v2024_v49 = vunpack.i.l.bf16 %v2023_v29 }
  0x8f   :  { %v3338_v13 = vpop.eup %2450  ;;  %v3356_v8 = vmul.f32 %v3152_v50, %v3322_v24  ;;  %v3360_v23 = vmul.f32 %v3160_v53, %v3325_v56  ;;  %v1032_v29 = vadd.f32 %v4244_v38, %v424_v2  ;;  %v3379_v2 = vadd.f32 %v4247_v9, %v428_v35  ;;  %v4254_v9 = vld [vmem:[#allocation33_spill] sm:$0xff] }
  0x90   :  { %v3347_v4 = vpop.eup %2452  ;;  %v430_v45 = vmul.f32 %v2019_v5, %v4241_v11  ;;  %v431_v32 = vmul.f32 %v2020_v55, %v4241_v11  ;;  %v1033_v5 = vadd.f32 %v3124_v43, %v425_v44  ;;  %v3367_v55 = vmul.f32 %v2447_v10, %v3330_v26  ;;  %v4249_v43 = vld [vmem:[#allocation25_spill] sm:$0xff] }
  0x91   :  { %v3351_v0 = vpop.permute.xlu1 %2032  ;;  %2307 = vperm.xlu1 %2290, %v4242_v59   ;;  %v2028_v36 = vpop.permute.xlu0 %2027  ;;  %v3370_v11 = vmul.f32 %v2449_v63, %v3332_v37  ;;  %4248 = vst [vmem:[#allocation24_spill] sm:$0xff] %v3379_v2  ;;  %v3382_v44 = vadd.f32 %v4249_v43, %v429_v54  ;;  %v4251_v10 = vld [vmem:[#allocation21_spill] sm:$0xff]  ;;  %v4256_v43 = vld [vmem:[#allocation28_spill] sm:$0xff] }
  0x92   :  { %v3362_v51 = vpop.eup %2454  ;;  %v2030_v50 = vunpack.i.h.bf16 %v2028_v36  ;;  %v2029_v21 = vunpack.i.l.bf16 %v2028_v36  ;;  %v1038_v40 = vadd.f32 %v3176_v14, %v430_v45  ;;  %v1039_v53 = vadd.f32 %v3199_v22, %v431_v32 }
  0x93   :  { %4243 = vst [vmem:[#allocation8_spill] sm:$0xff] %v3362_v51  ;;  %v3372_v59 = vpop.eup %2456  ;;  %4250 = vst [vmem:[#allocation25_spill] sm:$0xff] %v3382_v44  ;;  %v432_v38 = vmul.f32 %v2024_v49, %v4251_v10  ;;  %v433_v63 = vmul.f32 %v2025_v58, %v4251_v10  ;;  %v1217_v10 = vmul.f32 %v4256_v43, %v1032_v29 }
  0x94   :  { %4245 = vst [vmem:[#allocation2_spill] sm:$0xff] %v3372_v59  ;;  %v3376_v39 = vpop.eup %2458  ;;  %v434_v36 = vmul.f32 %v2029_v21, %v4253_v20  ;;  %v435_v14 = vmul.f32 %v2030_v50, %v4253_v20  ;;  %v3392_v45 = vmul.f32 %v3121_v6, %v1038_v40  ;;  %v3395_v35 = vmul.f32 %v4254_v9, %v1039_v53 }
  0x95   :  { %4246 = vst [vmem:[#allocation27_spill] sm:$0xff] %v3376_v39  ;;  %v3386_v31 = vpop.eup %2460  ;;  %2317 = vperm.xlu1 %2290, %v2650_v57   ;;  %v2112_v22 = vpop.permute.xlu0 %2111  ;;  %v2034_v9 = vunpack.i.l.bf16 %v3351_v0 }
  0x96   :  { %4252 = vst [vmem:[#allocation21_spill] sm:$0xff] %v3386_v31  ;;  %v3397_v54 = vpop.eup %2462  ;;  %v2114_v49 = vunpack.i.h.bf16 %v2112_v22  ;;  %v2113_v32 = vunpack.i.l.bf16 %v2112_v22  ;;  %v2039_v58 = vpop.permute.xlu1 %2038  ;;  %v4257_v31 = vld [vmem:[#allocation30_spill] sm:$0xff]  ;;  %v1042_v57 = vadd.f32 %v3206_v15, %v434_v36  ;;  %v1043_v50 = vadd.f32 %v3225_v61, %v435_v14 }
  0x97   :  { %4255 = vst [vmem:[#allocation11_spill] sm:$0xff] %v3397_v54  ;;  %v1218_v21 = vmul.f32 %v4257_v31, %v1033_v5  ;;  %v2041_v39 = vunpack.i.h.bf16 %v2039_v58  ;;  %v2040_v20 = vunpack.i.l.bf16 %v2039_v58  ;;  %v3403_v6 = vpop.eup %2464  ;;  %v3408_v22 = vmul.f32 %v3173_v17, %v3379_v2  ;;  %v4259_v54 = vld [vmem:[#allocation23_spill] sm:$0xff] }
  0x98   :  { %4258 = vst [vmem:[#allocation33_spill] sm:$0xff] %v3403_v6  ;;  %v1128_v37 = vmul.f32 %v2113_v32, %v1032_v29  ;;  %v1129_v26 = vmul.f32 %v2114_v49, %v1033_v5  ;;  %v3413_v58 = vmul.f32 %v3134_v12, %v1042_v57  ;;  %v3416_v15 = vmul.f32 %v3140_v18, %v1043_v50  ;;  %v4260_v6 = vld [vmem:[#allocation26_spill] sm:$0xff] }
  0x99   :  { %v616_v43 = vmul.f32 %v2040_v20, %v4259_v54  ;;  %v617_v31 = vmul.f32 %v2041_v39, %v4259_v54  ;;  %v2127_v59 = vpop.permute.xlu0 %2126  ;;  %v3426_v18 = vmul.f32 %v3180_v30, %v3382_v44 }
  0x9a   :  { %v1152_v61 = vsel %vm1142_vm8, %v1128_v37, 0.0  ;;  %v1153_v29 = vsel %vm1142_vm8, %v1129_v26, 0.0  ;;  %v2129_v5 = vunpack.i.h.bf16 %v2127_v59  ;;  %v2128_v36 = vunpack.i.l.bf16 %v2127_v59  ;;  %v2044_v14 = vpop.permute.xlu1 %2043  ;;  %v4261_v59 = vld [vmem:[#allocation22_spill] sm:$0xff] }
  0x9b   :  { %v1154_v17 = vadd.f32 %v1153_v29, %v1152_v61  ;;  %v3420_v49 = vadd.f32 %v1217_v10, %v616_v43  ;;  %v3422_v32 = vadd.f32 %v1218_v21, %v617_v31  ;;  %v2046_v39 = vunpack.i.h.bf16 %v2044_v14  ;;  %v4262_v61 = vld [vmem:[#allocation20_spill] sm:$0xff] }
  0x9c   :  { %v1134_v54 = vmul.f32 %v2128_v36, %v1038_v40  ;;  %v1135_v20 = vmul.f32 %v2129_v5, %v1039_v53  ;;  %v2045_v12 = vunpack.i.l.bf16 %v2044_v14  ;;  %v3429_v37 = vadd.f32 %v4260_v6, %v432_v38 }
  0x9d   :  { %v2035_v26 = vunpack.i.h.bf16 %v3351_v0  ;;  %v436_v2 = vmul.f32 %v2034_v9, %v4261_v59  ;;  %v619_v10 = vmul.f32 %v2046_v39, %v4262_v61  ;;  %v2137_v43 = vpop.permute.xlu0 %2136  ;;  %v1155_v30 = vrot.slane %v1154_v17, 4  ;;  %v4263_v39 = vld [vmem:[#allocation32_spill] sm:$0xff] }
  0x9e   :  { %v1179_v21 = vsel %vm1142_vm8, %v1134_v54, 0.0  ;;  %v1180_v40 = vsel %vm1142_vm8, %v1135_v20, 0.0  ;;  %v618_v53 = vmul.f32 %v2045_v12, %v4262_v61  ;;  %v2139_v31 = vunpack.i.h.bf16 %v2137_v43  ;;  %v2049_v29 = vpop.permute.xlu1 %2048  ;;  %v4264_v61 = vld [vmem:[#allocation12_spill] sm:$0xff] }
  0x9f   :  { %v1181_v5 = vadd.f32 %v1180_v40, %v1179_v21  ;;  %v2138_v36 = vunpack.i.l.bf16 %v2137_v43  ;;  %v2051_v38 = vunpack.i.h.bf16 %v2049_v29  ;;  %v2050_v14 = vunpack.i.l.bf16 %v2049_v29 }
  0xa0   :  { %v1139_v6 = vmul.f32 %v2139_v31, %v1043_v50  ;;  %v3438_v0 = vadd.f32 %v3367_v55, %v618_v53  ;;  %v3441_v9 = vadd.f32 %v3370_v11, %v619_v10  ;;  %v3444_v54 = vadd.f32 %v4263_v39, %v433_v63 }
  0xa1   :  { %v437_v20 = vmul.f32 %v2035_v26, %v4261_v59  ;;  %v1138_v12 = vmul.f32 %v2138_v36, %v1042_v57  ;;  %v623_v44 = vmul.f32 %v2051_v38, %v4264_v61  ;;  %v1182_v51 = vrot.slane %v1181_v5, 4 }
  0xa2   :  { %v1198_v43 = vsel %vm1142_vm8, %v1139_v6, 0.0  ;;  %v622_v50 = vmul.f32 %v2050_v14, %v4264_v61  ;;  %v2054_v21 = vpop.permute.xlu1 %2053  ;;  %v2143_v40 = vpop.permute.xlu0 %2142  ;;  %v3452_v55 = vmul.f32 %v3203_v34, %v3429_v37  ;;  %v3455_v11 = vadd.f32 %v3142_v7, %v436_v2  ;;  %v4268_v6 = vld [vmem:[#allocation34_spill] sm:$0xff] }
  0xa3   :  { %v1156_v63 = vadd.f32 %v1155_v30, %v1154_v17  ;;  %v1197_v26 = vsel %vm1142_vm8, %v1138_v12, 0.0  ;;  %v3459_v57 = vadd.f32 %v3395_v35, %v623_v44  ;;  %v2056_v53 = vunpack.i.h.bf16 %v2054_v21  ;;  %v4267_v17 = vld [vmem:[#allocation19_spill] sm:$0xff] }
  0xa4   :  { %4265 = vst [vmem:[#allocation28_spill] sm:$0xff] %v3455_v11  ;;  %v1199_v59 = vadd.f32 %v1198_v43, %v1197_v26  ;;  %v3462_v10 = vadd.f32 %v3392_v45, %v622_v50  ;;  %v2055_v31 = vunpack.i.l.bf16 %v2054_v21  ;;  %v3465_v29 = vadd.f32 %v3156_v3, %v437_v20 }
  0xa5   :  { %v2145_v34 = vunpack.i.h.bf16 %v2143_v40  ;;  %v2144_v36 = vunpack.i.l.bf16 %v2143_v40  ;;  %v1226_v7 = vmul.f32 %v3210_v33, %v3444_v54  ;;  %v1183_v2 = vadd.f32 %v1182_v51, %v1181_v5  ;;  %v4269_v40 = vld [vmem:[#allocation35_spill] sm:$0xff] }
  0xa6   :  { %4266 = vst [vmem:[#allocation30_spill] sm:$0xff] %v3462_v10  ;;  %v626_v30 = vmul.f32 %v2055_v31, %v4267_v17  ;;  %v627_v44 = vmul.f32 %v2056_v53, %v4267_v17  ;;  %v2148_v35 = vpop.permute.xlu0 %2147  ;;  %v3473_v45 = vmul.f32 %v3293_v47, %v3462_v10  ;;  %v1157_v38 = vrot.slane %v1156_v63, 2  ;;  %v4271_v17 = vld [vmem:[#allocation40_spill] sm:$0xff] }
  0xa7   :  { %v614_v14 = vmul.f32 %v2144_v36, %v4268_v6  ;;  %v615_v3 = vmul.f32 %v2145_v34, %v4268_v6  ;;  %v2060_v39 = vpop.permute.xlu1 %2059  ;;  %v1229_v20 = vmul.f32 %v3217_v28, %v3455_v11  ;;  %v1200_v33 = vrot.slane %v1199_v59, 4  ;;  %v4270_v34 = vld [vmem:[#allocation39_spill] sm:$0xff] }
  0xa8   :  { %v3480_v51 = vadd.f32 %v3413_v58, %v626_v30  ;;  %v3483_v5 = vadd.f32 %v3416_v15, %v627_v44  ;;  %v2150_v12 = vunpack.i.h.bf16 %v2148_v35  ;;  %v2149_v43 = vunpack.i.l.bf16 %v2148_v35 }
  0xa9   :  { %v1231_v47 = vadd.f32 %v3356_v8, %v614_v14  ;;  %v1232_v61 = vadd.f32 %v3360_v23, %v615_v3  ;;  %v1230_v50 = vmul.f32 %v3222_v19, %v3465_v29  ;;  %v1184_v21 = vrot.slane %v1183_v2, 2  ;;  %v4272_v19 = vld [vmem:[#allocation36_spill] sm:$0xff] }
  0xaa   :  { %v621_v26 = vmul.f32 %v2150_v12, %v4269_v40  ;;  %v2062_v28 = vunpack.i.h.bf16 %v2060_v39  ;;  %v2061_v53 = vunpack.i.l.bf16 %v2060_v39  ;;  %v2153_v31 = vpop.permute.xlu0 %2152  ;;  %v3490_v58 = vadd.f32 %v1157_v38, %v1156_v63 }
  0xab   :  { %v620_v15 = vmul.f32 %v2149_v43, %v4269_v40  ;;  %v1399_v36 = vmul.f32 %v4270_v34, %v1231_v47  ;;  %v1400_v8 = vmul.f32 %v4271_v17, %v1232_v61  ;;  %v2065_v30 = vpop.permute.xlu1 %2064  ;;  %v3495_v23 = vadd.f32 %v1200_v33, %v1199_v59  ;;  %v4273_v33 = vld [vmem:[#allocation37_spill] sm:$0xff] }
  0xac   :  { %v1238_v44 = vadd.f32 %v3426_v18, %v621_v26  ;;  %v806_v35 = vmul.f32 %v2061_v53, %v4272_v19  ;;  %v807_v6 = vmul.f32 %v2062_v28, %v4272_v19  ;;  %v2155_v3 = vunpack.i.h.bf16 %v2153_v31  ;;  %v4274_v26 = vld [vmem:[#allocation38_spill] sm:$0xff] }
  0xad   :  { %v1237_v14 = vadd.f32 %v3408_v22, %v620_v15  ;;  %v2154_v63 = vunpack.i.l.bf16 %v2153_v31  ;;  %v2067_v38 = vunpack.i.h.bf16 %v2065_v30  ;;  %v3501_v39 = vadd.f32 %v1184_v21, %v1183_v2 }
  0xae   :  { %v3503_v12 = vadd.f32 %v1399_v36, %v806_v35  ;;  %v3505_v43 = vadd.f32 %v1400_v8, %v807_v6  ;;  %v2066_v40 = vunpack.i.l.bf16 %v2065_v30  ;;  %v2158_v59 = vpop.permute.xlu0 %2157  ;;  %v625_v18 = vmul.f32 %v2155_v3, %v4273_v33  ;;  %v4277_v35 = vld [vmem:[#allocation42_spill] sm:$0xff]  ;;  %v4278_v3 = vld [vmem:[#allocation41_spill] sm:$0xff] }
  0xaf   :  { %v624_v34 = vmul.f32 %v2154_v63, %v4273_v33  ;;  %v3510_v53 = vmul.f32 %v2067_v38, %v4274_v26  ;;  %v2160_v28 = vunpack.i.h.bf16 %v2158_v59  ;;  %v2070_v22 = vpop.permute.xlu1 %2069  ;;  %v1202_v31 = vrot.slane %v3495_v23, 2  ;;  %v4279_v38 = vld [vmem:[#allocation43_spill] sm:$0xff] }
  0xb0   :  { %v3514_v2 = vmul.f32 %v2066_v40, %v4274_v26  ;;  %v2159_v21 = vunpack.i.l.bf16 %v2158_v59  ;;  %v2072_v15 = vunpack.i.h.bf16 %v2070_v22  ;;  %v1242_v17 = vadd.f32 %v1226_v7, %v625_v18 }
  0xb1   :  { %4275 = vst [vmem:[#allocation23_spill] sm:$0xff] %v3510_v53  ;;  %v1241_v36 = vadd.f32 %v3452_v55, %v624_v34  ;;  %v629_v8 = vmul.f32 %v2160_v28, %v3229_v1  ;;  %v2071_v30 = vunpack.i.l.bf16 %v2070_v22  ;;  %v1405_v63 = vmul.f32 %v4278_v3, %v1237_v14 }
  0xb2   :  { %4276 = vst [vmem:[#allocation26_spill] sm:$0xff] %v3514_v2  ;;  %v628_v19 = vmul.f32 %v2159_v21, %v3229_v1  ;;  %v813_v6 = vmul.f32 %v2072_v15, %v4277_v35  ;;  %v1406_v33 = vmul.f32 %v4279_v38, %v1238_v44  ;;  %v2168_v53 = vpop.permute.xlu0 %2167  ;;  %v4280_v15 = vld [vmem:[#allocation44_spill] sm:$0xff]  ;;  %v4281_v38 = vld [vmem:[#allocation46_spill] sm:$0xff]  ;;  %v4285_v2 = vld [vmem:[#allocation47_spill] sm:$0xff] }
  0xb3   :  { %v3522_v10 = vadd.f32 %v1230_v50, %v629_v8  ;;  %v812_v40 = vmul.f32 %v2071_v30, %v4277_v35  ;;  %v2170_v59 = vunpack.i.h.bf16 %v2168_v53  ;;  %v2169_v26 = vunpack.i.l.bf16 %v2168_v53  ;;  %v2075_v55 = vpop.permute.xlu1 %2074  ;;  %v4282_v30 = vld [vmem:[#allocation45_spill] sm:$0xff] }
  0xb4   :  { %v3525_v7 = vadd.f32 %v1229_v20, %v628_v19  ;;  %v3527_v34 = vadd.f32 %v1406_v33, %v813_v6  ;;  %v2077_v18 = vunpack.i.h.bf16 %v2075_v55  ;;  %v2076_v1 = vunpack.i.l.bf16 %v2075_v55  ;;  %v4283_v20 = vld [vmem:[#allocation49_spill] sm:$0xff] }
  0xb5   :  { %v3529_v28 = vadd.f32 %v1405_v63, %v812_v40  ;;  %v1311_v22 = vmul.f32 %v2169_v26, %v1231_v47  ;;  %v1312_v21 = vmul.f32 %v2170_v59, %v1232_v61  ;;  %v1409_v3 = vmul.f32 %v4280_v15, %v1241_v36 }
  0xb6   :  { %v816_v50 = vmul.f32 %v2076_v1, %v4281_v38  ;;  %v817_v8 = vmul.f32 %v2077_v18, %v4281_v38  ;;  %v1410_v35 = vmul.f32 %v4282_v30, %v1242_v17  ;;  %v2184_v53 = vpop.permute.xlu0 %2183  ;;  %v1413_v19 = vmul.f32 %v4283_v20, %v3525_v7  ;;  %v4284_v38 = vld [vmem:[#allocation51_spill] sm:$0xff] }
  0xb7   :  { %v1327_v6 = vsel %vm1142_vm8, %v1311_v22, 0.0  ;;  %v1328_v33 = vsel %vm1142_vm8, %v1312_v21, 0.0  ;;  %v2186_v63 = vunpack.i.h.bf16 %v2184_v53  ;;  %v2185_v40 = vunpack.i.l.bf16 %v2184_v53  ;;  %v2080_v47 = vpop.permute.xlu1 %2079 }
  0xb8   :  { %v1329_v61 = vadd.f32 %v1328_v33, %v1327_v6  ;;  %v3539_v59 = vadd.f32 %v1409_v3, %v816_v50  ;;  %v3541_v26 = vadd.f32 %v1410_v35, %v817_v8  ;;  %v2082_v55 = vunpack.i.h.bf16 %v2080_v47 }
  0xb9   :  { %v1317_v18 = vmul.f32 %v2185_v40, %v1237_v14  ;;  %v1318_v1 = vmul.f32 %v2186_v63, %v1238_v44  ;;  %v2081_v15 = vunpack.i.l.bf16 %v2080_v47  ;;  %v1414_v30 = vmul.f32 %v4284_v38, %v3522_v10 }
  0xba   :  { %v1330_v20 = vrot.slane %v1329_v61, 4  ;;  %v821_v22 = vmul.f32 %v2082_v55, %v4285_v2  ;;  %v2194_v11 = vpop.permute.xlu0 %2193  ;;  %v3548_v21 = vmul.f32 %v3302_v52, %v3459_v57  ;;  %v3552_v3 = vmul.f32 %v3304_v62, %v3480_v51 }
  0xbb   :  { %v1354_v50 = vsel %vm1142_vm8, %v1317_v18, 0.0  ;;  %v1355_v44 = vsel %vm1142_vm8, %v1318_v1, 0.0  ;;  %v820_v14 = vmul.f32 %v2081_v15, %v4285_v2  ;;  %v2196_v8 = vunpack.i.h.bf16 %v2194_v11 }
  0xbc   :  { %v1331_v35 = vadd.f32 %v1330_v20, %v1329_v61  ;;  %v1356_v53 = vadd.f32 %v1355_v44, %v1354_v50  ;;  %v3557_v6 = vadd.f32 %v1414_v30, %v821_v22  ;;  %v2195_v33 = vunpack.i.l.bf16 %v2194_v11  ;;  %v3559_v63 = vpop.permute.xlu1 %2085 }
  0xbd   :  { %4287 = vst [vmem:[#allocation20_spill] sm:$0xff] %v3559_v63  ;;  %v1203_v52 = vadd.f32 %v1202_v31, %v3495_v23  ;;  %v3562_v40 = vadd.f32 %v1413_v19, %v820_v14  ;;  %v1322_v62 = vmul.f32 %v2196_v8, %v1242_v17  ;;  %v4288_v47 = vunpack.c.l.bf16 %v3319_v25  ;;  %v3577_v31 = vld [vmem:[%s4114_s5] sm:$0xff]  ;;  %v3593_v14 = vld [vmem:[%s4114_s5 + $0x8] sm:$0xff] }
  0xbe   :  { %4286 = vst [vmem:[#allocation22_spill] sm:$0xff] %v3557_v6  ;;  %v1332_v18 = vrot.slane %v1331_v35, 2  ;;  %v1357_v1 = vrot.slane %v1356_v53, 4  ;;  %v1321_v2 = vmul.f32 %v2195_v33, %v1241_v36  ;;  %v2204_v15 = vpop.permute.xlu0 %2203  ;;  %v3570_v61 = vmul.f32 %v3310_v41, %v3483_v5  ;;  %4289 = vst [vmem:[#allocation32_spill] sm:$0xff] %v3577_v31 }
  0xbf   :  { %v3566_v55 = vmul.f32 -1.442695, %v4288_v47  ;;  %v1159_v11 = vrot.slane %v3490_v58, 1  ;;  %v1373_v38 = vsel %vm1142_vm8, %v1322_v62, 0.0  ;;  %v2206_v23 = vunpack.i.h.bf16 %v2204_v15  ;;  %4291 = vst [vmem:[#allocation19_spill] sm:$0xff] %v3593_v14 }
  0xc0   :  { %v3581_v17 = vmul.f32 %v3577_v31, %v3343_v60  ;;  %v1186_v36 = vrot.slane %v3501_v39, 1  ;;  %v1358_v19 = vadd.f32 %v1357_v1, %v1356_v53  ;;  %v1372_v41 = vsel %vm1142_vm8, %v1321_v2, 0.0  ;;  %v3585_v20 = vpop.permute.xlu1 %2090 }
  0xc1   :  { %v2205_v30 = vunpack.i.l.bf16 %v2204_v15  ;;  %4290 = vst [vmem:[#allocation12_spill] sm:$0xff] %v3585_v20  ;;  %v1374_v22 = vadd.f32 %v1373_v38, %v1372_v41  ;;  %v1326_v50 = vmul.f32 %v2206_v23, %v3522_v10  ;;  %v1401_v44 = vmul.f32 %v3278_v16, %v3420_v49 }
  0xc2   :  { %v3597_v8 = vmul.f32 %v3593_v14, %v3343_v60  ;;  %v1204_v53 = vrot.slane %v1203_v52, 1  ;;  %v1333_v33 = vadd.f32 %v1332_v18, %v1331_v35  ;;  %v1359_v62 = vrot.slane %v1358_v19, 2 }
  0xc3   :  { %v1325_v47 = vmul.f32 %v2205_v30, %v3525_v7  ;;  %v3601_v1 = vadd.f32 %v1159_v11, %v3490_v58  ;;  %v1375_v10 = vrot.slane %v1374_v22, 4  ;;  %v1391_v16 = vsel %vm1142_vm8, %v1326_v50, 0.0  ;;  %v2210_v2 = vpop.permute.xlu0 %2209 }
  0xc4   :  { %v1402_v15 = vmul.f32 %v3288_v46, %v3422_v32  ;;  %v3607_v38 = vadd.f32 %v1186_v36, %v3501_v39  ;;  %v1360_v60 = vadd.f32 %v1359_v62, %v1358_v19  ;;  %v2212_v35 = vunpack.i.h.bf16 %v2210_v2  ;;  %v2096_v18 = vpop.permute.xlu1 %2095 }
  0xc5   :  { %v1390_v23 = vsel %vm1142_vm8, %v1325_v47, 0.0  ;;  %v1376_v41 = vadd.f32 %v1375_v10, %v1374_v22  ;;  %v2211_v30 = vunpack.i.l.bf16 %v2210_v2  ;;  %v2098_v58 = vunpack.i.h.bf16 %v2096_v18 }
  0xc6   :  { %v1392_v7 = vadd.f32 %v1391_v16, %v1390_v23  ;;  %v3610_v11 = vadd.f32 %v1204_v53, %v1203_v52  ;;  %v1334_v20 = vrot.slane %v1333_v33, 1  ;;  %v809_v50 = vmul.f32 %v2212_v35, %v3274_v27  ;;  %v4294_v35 = vld [vmem:[#allocation29_spill] sm:$0xff] }
  0xc7   :  { %v2097_v14 = vunpack.i.l.bf16 %v2096_v18  ;;  %v1377_v31 = vrot.slane %v1376_v41, 2  ;;  %v808_v39 = vmul.f32 %v2211_v30, %v3274_v27  ;;  %v3615_v36 = vmul.f32 %v2098_v58, %v3282_v48  ;;  %v2215_v19 = vpop.permute.xlu0 %2214 }
  0xc8   :  { %v1393_v46 = vrot.slane %v1392_v7, 4  ;;  %v1361_v62 = vrot.slane %v1360_v60, 1  ;;  %v2217_v47 = vunpack.i.h.bf16 %v2215_v19  ;;  %v2216_v10 = vunpack.i.l.bf16 %v2215_v19  ;;  %v2101_v52 = vpop.permute.xlu1 %2100 }
  0xc9   :  { %4292 = vst [vmem:[#allocation34_spill] sm:$0xff] %v3615_v36  ;;  %v3618_v22 = vmul.f32 %v2097_v14, %v3282_v48  ;;  %v1378_v53 = vadd.f32 %v1377_v31, %v1376_v41  ;;  %v2103_v2 = vunpack.i.h.bf16 %v2101_v52  ;;  %v2102_v23 = vunpack.i.l.bf16 %v2101_v52 }
  0xca   :  { %v1394_v16 = vadd.f32 %v1393_v46, %v1392_v7  ;;  %v814_v18 = vmul.f32 %v2216_v10, %v4294_v35  ;;  %v815_v6 = vmul.f32 %v2217_v47, %v4294_v35  ;;  %v3622_v27 = vadd.f32 %v1401_v44, %v808_v39  ;;  %v4301_v47 = vld [vmem:[#allocation31_spill] sm:$0xff] }
  0xcb   :  { %4293 = vst [vmem:[#allocation35_spill] sm:$0xff] %v3618_v22  ;;  %v3624_v30 = vadd.f32 %v1402_v15, %v809_v50  ;;  %v1379_v58 = vrot.slane %v1378_v53, 1  ;;  %v3627_v48 = vmul.f32 %v2102_v23, %v3286_v42  ;;  %v3630_v14 = vmul.f32 %v2103_v2, %v3286_v42  ;;  %v2220_v31 = vpop.permute.xlu0 %2219  ;;  %v4307_v15 = vld [vmem:[#allocation56_spill] sm:$0xff] }
  0xcc   :  { %4295 = vst [vmem:[#allocation39_spill] sm:$0xff] %v3622_v27  ;;  %v1395_v36 = vrot.slane %v1394_v16, 2  ;;  %v2222_v41 = vunpack.i.h.bf16 %v2220_v31  ;;  %v2221_v7 = vunpack.i.l.bf16 %v2220_v31  ;;  %v3633_v46 = vadd.f32 %v3473_v45, %v814_v18 }
  0xcd   :  { %4296 = vst [vmem:[#allocation40_spill] sm:$0xff] %v3624_v30  ;;  %4297 = vst [vmem:[#allocation36_spill] sm:$0xff] %v3627_v48  ;;  %v3636_v19 = vadd.f32 %v3548_v21, %v815_v6  ;;  %v3638_v44 = vadd.f32 %v1334_v20, %v1333_v33  ;;  %v2107_v39 = vpop.permute.xlu1 %2106  ;;  %v3644_v42 = vmul.f32 %v3338_v13, %v3503_v12  ;;  %2466 = vpow2.f32 %v3566_v55 }
  0xce   :  { %4298 = vst [vmem:[#allocation37_spill] sm:$0xff] %v3630_v14  ;;  %4299 = vst [vmem:[#allocation38_spill] sm:$0xff] %v3633_v46  ;;  %v818_v10 = vmul.f32 %v2221_v7, %v4301_v47  ;;  %v819_v52 = vmul.f32 %v2222_v41, %v4301_v47  ;;  %v2109_v45 = vunpack.i.h.bf16 %v2107_v39  ;;  %v2108_v2 = vunpack.i.l.bf16 %v2107_v39 }
  0xcf   :  { %4300 = vst [vmem:[#allocation42_spill] sm:$0xff] %v3636_v19  ;;  %v3648_v23 = vadd.f32 %v1361_v62, %v1360_v60  ;;  %v3650_v21 = vadd.f32 %v1379_v58, %v1378_v53  ;;  %v3652_v6 = vadd.f32 %v1395_v36, %v1394_v16  ;;  %v2231_v20 = vpop.permute.xlu0 %2230  ;;  %v3656_v33 = vmul.f32 %v3347_v4, %v3505_v43  ;;  %v4304_v36 = vld [vmem:[#allocation8_spill] sm:$0xff]  ;;  %v4305_v4 = vld [vmem:[#allocation2_spill] sm:$0xff] }
  0xd0   :  { %v1126_v13 = vmul.f32 %v2108_v2, %v3322_v24  ;;  %v1127_v35 = vmul.f32 %v2109_v45, %v3325_v56  ;;  %v2233_v18 = vunpack.i.h.bf16 %v2231_v20  ;;  %v2232_v31 = vunpack.i.l.bf16 %v2231_v20 }
  0xd1   :  { %v2117_v41 = vpop.permute.xlu1 %2116  ;;  %v3661_v7 = vadd.f32 %v3552_v3, %v818_v10  ;;  %v3664_v60 = vadd.f32 %v3570_v61, %v819_v52  ;;  %v3668_v62 = vmul.f32 %v4304_v36, %v3529_v28  ;;  %v3672_v53 = vmul.f32 %v4305_v4, %v3527_v34  ;;  %v4306_v4 = vld [vmem:[#allocation55_spill] sm:$0xff] }
  0xd2   :  { %v1143_v24 = vsel %vm1142_vm8, %v1126_v13, 0.0  ;;  %v1144_v56 = vsel %vm1142_vm8, %v1127_v35, 0.0  ;;  %v1497_v16 = vmul.f32 %v2232_v31, %v3622_v27  ;;  %v1498_v3 = vmul.f32 %v2233_v18, %v3624_v30 }
  0xd3   :  { %4302 = vst [vmem:[#allocation41_spill] sm:$0xff] %v3661_v7  ;;  %4303 = vst [vmem:[#allocation43_spill] sm:$0xff] %v3664_v60  ;;  %v1145_v61 = vadd.f32 %v1144_v56, %v1143_v24  ;;  %v2119_v39 = vunpack.i.h.bf16 %v2117_v41  ;;  %v2118_v47 = vunpack.i.l.bf16 %v2117_v41  ;;  %v2246_v10 = vpop.permute.xlu0 %2245 }
  0xd4   :  { %v1520_v52 = vsel %vm1142_vm8, %v1497_v16, 0.0  ;;  %v1521_v45 = vsel %vm1142_vm8, %v1498_v3, 0.0  ;;  %v2248_v2 = vunpack.i.h.bf16 %v2246_v10  ;;  %v2247_v20 = vunpack.i.l.bf16 %v2246_v10 }
  0xd5   :  { %v1146_v36 = vrot.slane %v1145_v61, 4  ;;  %v1522_v13 = vadd.f32 %v1521_v45, %v1520_v52  ;;  %v1130_v35 = vmul.f32 %v2118_v47, %v4306_v4  ;;  %v1131_v31 = vmul.f32 %v2119_v39, %v4307_v15  ;;  %v2122_v50 = vpop.permute.xlu1 %2121  ;;  %v4308_v15 = vld [vmem:[#allocation24_spill] sm:$0xff] }
  0xd6   :  { %v1503_v18 = vmul.f32 %v2247_v20, %v3633_v46  ;;  %v1504_v24 = vmul.f32 %v2248_v2, %v3636_v19  ;;  %v2124_v56 = vunpack.i.h.bf16 %v2122_v50  ;;  %v2123_v41 = vunpack.i.l.bf16 %v2122_v50  ;;  %v4309_v2 = vld [vmem:[#allocation25_spill] sm:$0xff] }
  0xd7   :  { %v1147_v58 = vadd.f32 %v1146_v36, %v1145_v61  ;;  %v1523_v14 = vrot.slane %v1522_v13, 4  ;;  %v1161_v16 = vsel %vm1142_vm8, %v1130_v35, 0.0  ;;  %v1162_v3 = vsel %vm1142_vm8, %v1131_v31, 0.0  ;;  %v2256_v10 = vpop.permute.xlu0 %2255  ;;  %v3744_v30 = vpop.eup %2466 }
  0xd8   :  { %v1163_v48 = vadd.f32 %v1162_v3, %v1161_v16  ;;  %v1547_v52 = vsel %vm1142_vm8, %v1503_v18, 0.0  ;;  %v1548_v47 = vsel %vm1142_vm8, %v1504_v24, 0.0  ;;  %v1132_v39 = vmul.f32 %v2123_v41, %v4308_v15 }
  0xd9   :  { %v1148_v45 = vrot.slane %v1147_v58, 2  ;;  %v1524_v20 = vadd.f32 %v1523_v14, %v1522_v13  ;;  %v1549_v4 = vadd.f32 %v1548_v47, %v1547_v52  ;;  %v1133_v22 = vmul.f32 %v2124_v56, %v4309_v2  ;;  %v2132_v50 = vpop.permute.xlu1 %2131 }
  0xda   :  { %v1164_v61 = vrot.slane %v1163_v48, 4  ;;  %v1170_v36 = vsel %vm1142_vm8, %v1132_v39, 0.0  ;;  %v2258_v35 = vunpack.i.h.bf16 %v2256_v10  ;;  %v2257_v31 = vunpack.i.l.bf16 %v2256_v10 }
  0xdb   :  { %v1149_v19 = vadd.f32 %v1148_v45, %v1147_v58  ;;  %v1525_v16 = vrot.slane %v1524_v20, 2  ;;  %v1550_v3 = vrot.slane %v1549_v4, 4  ;;  %v1171_v18 = vsel %vm1142_vm8, %v1133_v22, 0.0 }
  0xdc   :  { %v1165_v24 = vadd.f32 %v1164_v61, %v1163_v48  ;;  %v1172_v46 = vadd.f32 %v1171_v18, %v1170_v36  ;;  %v1507_v41 = vmul.f32 %v2257_v31, %v3661_v7  ;;  %v1508_v14 = vmul.f32 %v2258_v35, %v3664_v60  ;;  %v3695_v13 = vpop.permute.xlu0 %2261  ;;  %v4310_v61 = vld [vmem:[#allocation27_spill] sm:$0xff] }
  0xdd   :  { %v1150_v56 = vrot.slane %v1149_v19, 1  ;;  %v1526_v52 = vadd.f32 %v1525_v16, %v1524_v20  ;;  %v1551_v47 = vadd.f32 %v1550_v3, %v1549_v4  ;;  %v2134_v15 = vunpack.i.h.bf16 %v2132_v50  ;;  %v2163_v39 = vpop.permute.xlu1 %2162 }
  0xde   :  { %v1166_v2 = vrot.slane %v1165_v24, 2  ;;  %v1173_v10 = vrot.slane %v1172_v46, 4  ;;  %v1565_v58 = vsel %vm1142_vm8, %v1507_v41, 0.0  ;;  %v1566_v45 = vsel %vm1142_vm8, %v1508_v14, 0.0  ;;  %v4311_v41 = vld [vmem:[#allocation21_spill] sm:$0xff] }
  0xdf   :  { %v1552_v22 = vrot.slane %v1551_v47, 2  ;;  %v1567_v48 = vadd.f32 %v1566_v45, %v1565_v58  ;;  %v3702_v36 = vmul.f32 %v4310_v61, %v3539_v59  ;;  %v2133_v20 = vunpack.i.l.bf16 %v2132_v50 }
  0xe0   :  { %v1167_v35 = vadd.f32 %v1166_v2, %v1165_v24  ;;  %v1174_v31 = vadd.f32 %v1173_v10, %v1172_v46  ;;  %v1137_v4 = vmul.f32 %v2134_v15, %v3444_v54  ;;  %v2267_v16 = vpop.permute.xlu0 %2266  ;;  %v1151_v3 = vadd.f32 %v1150_v56, %v1149_v19  ;;  %v4314_v56 = vld [vmem:[#allocation11_spill] sm:$0xff] }
  0xe1   :  { %v1527_v18 = vrot.slane %v1526_v52, 1  ;;  %v1568_v60 = vrot.slane %v1567_v48, 4  ;;  %v3707_v14 = vmul.f32 %v4311_v41, %v3541_v26  ;;  %v3709_v58 = vadd.f32 %v1552_v22, %v1551_v47  ;;  %v4315_v22 = vld [vmem:[#allocation33_spill] sm:$0xff] }
  0xe2   :  { %v1175_v55 = vrot.slane %v1174_v31, 2  ;;  %v1136_v45 = vmul.f32 %v2133_v20, %v3429_v37  ;;  %v1189_v61 = vsel %vm1142_vm8, %v1137_v4, 0.0  ;;  %v2174_v24 = vpop.permute.xlu1 %2173  ;;  %v4313_v46 = vrot.slane %v3652_v6, 1 }
  0xe3   :  { %4312 = vst [vmem:[#allocation44_spill] sm:$0xff] %v3709_v58  ;;  %v1168_v19 = vrot.slane %v1167_v35, 1  ;;  %v3718_v50 = vadd.f32 %v1568_v60, %v1567_v48  ;;  %v3722_v15 = vmul.f32 %v4314_v56, %v3438_v0  ;;  %v2165_v10 = vunpack.i.h.bf16 %v2163_v39  ;;  %v4318_v58 = vld [vmem:[#allocation53_spill] sm:$0xff] }
  0xe4   :  { %v3716_v54 = vadd.f32 %v4313_v46, %v3652_v6  ;;  %v1176_v47 = vadd.f32 %v1175_v55, %v1174_v31  ;;  %v1188_v2 = vsel %vm1142_vm8, %v1136_v45, 0.0  ;;  %v2272_v37 = vpop.permute.xlu0 %2271  ;;  %v3727_v20 = vmul.f32 %v4315_v22, %v3441_v9 }
  0xe5   :  { %v3731_v6 = vsel %vm1767_vm9, %v1151_v3, %v3638_v44  ;;  %v3733_v4 = vadd.f32 %v1527_v18, %v1526_v52  ;;  %v1190_v60 = vadd.f32 %v1189_v61, %v1188_v2  ;;  %v2263_v48 = vunpack.i.l.bf16 %v3695_v13  ;;  %v4316_v52 = vld [vmem:[#allocation28_spill] sm:$0xff] }
  0xe6   :  { %v1177_v31 = vrot.slane %v1176_v47, 1  ;;  %v2164_v55 = vunpack.i.l.bf16 %v2163_v39  ;;  %v1141_v45 = vmul.f32 %v2165_v10, %v3465_v29  ;;  %v3738_v46 = vadd.f32 %v1168_v19, %v1167_v35  ;;  %v2179_v44 = vpop.permute.xlu1 %2178  ;;  %v4317_v39 = vld [vmem:[#allocation52_spill] sm:$0xff] }
  0xe7   :  { %v1191_v22 = vrot.slane %v1190_v60, 4  ;;  %v2264_v7 = vunpack.i.h.bf16 %v3695_v13  ;;  %v2176_v2 = vunpack.i.h.bf16 %v2174_v24  ;;  %v998_v27 = vmul.f32 %v2263_v48, %v4317_v39 }
  0xe8   :  { %v1178_v3 = vadd.f32 %v1177_v31, %v1176_v47  ;;  %v1140_v18 = vmul.f32 %v2164_v55, %v4316_v52  ;;  %v1207_v61 = vsel %vm1142_vm8, %v1141_v45, 0.0  ;;  %v2269_v29 = vunpack.i.h.bf16 %v2267_v16  ;;  %v3753_v31 = vpop.permute.xlu0 %2276 }
  0xe9   :  { %v1192_v41 = vadd.f32 %v1191_v22, %v1190_v60  ;;  %v2268_v35 = vunpack.i.l.bf16 %v2267_v16  ;;  %v2175_v10 = vunpack.i.l.bf16 %v2174_v24  ;;  %v1314_v47 = vmul.f32 %v2176_v2, %v3422_v32 }
  0xea   :  { %v3749_v19 = vsel %vm1767_vm9, %v1178_v3, %v3648_v23  ;;  %v1206_v13 = vsel %vm1142_vm8, %v1140_v18, 0.0  ;;  %v999_v45 = vmul.f32 %v2264_v7, %v4317_v39  ;;  %v2274_v60 = vunpack.i.h.bf16 %v2272_v37  ;;  %v2189_v32 = vpop.permute.xlu1 %2188 }
  0xeb   :  { %v1193_v55 = vrot.slane %v1192_v41, 2  ;;  %v1208_v52 = vadd.f32 %v1207_v61, %v1206_v13  ;;  %v1313_v48 = vmul.f32 %v2175_v10, %v3420_v49  ;;  %v1337_v16 = vsel %vm1142_vm8, %v1314_v47, 0.0  ;;  %v4319_v61 = vld [vmem:[#allocation54_spill] sm:$0xff] }
  0xec   :  { %v2273_v22 = vunpack.i.l.bf16 %v2272_v37  ;;  %v2181_v56 = vunpack.i.h.bf16 %v2179_v44  ;;  %v3759_v18 = vmul.f32 %v2268_v35, %v4318_v58  ;;  %v2180_v24 = vunpack.i.l.bf16 %v2179_v44  ;;  %v2287_v47 = vpop.permute.xlu0 %2286 }
  0xed   :  { %v1194_v23 = vadd.f32 %v1193_v55, %v1192_v41  ;;  %v1209_v3 = vrot.slane %v1208_v52, 4  ;;  %v3762_v2 = vmul.f32 %v2269_v29, %v4318_v58  ;;  %v1336_v7 = vsel %vm1142_vm8, %v1313_v48, 0.0 }
  0xee   :  { %v3766_v39 = vmul.f32 %v2274_v60, %v4319_v61  ;;  %v1316_v49 = vmul.f32 %v2181_v56, %v3441_v9  ;;  %v1338_v10 = vadd.f32 %v1337_v16, %v1336_v7  ;;  %v1315_v41 = vmul.f32 %v2180_v24, %v3438_v0  ;;  %v2199_v7 = vpop.permute.xlu1 %2198 }
  0xef   :  { %v1195_v13 = vrot.slane %v1194_v23, 1  ;;  %v1210_v37 = vadd.f32 %v1209_v3, %v1208_v52  ;;  %v3771_v35 = vmul.f32 %v2273_v22, %v4319_v61  ;;  %v2191_v29 = vunpack.i.h.bf16 %v2189_v32 }
  0xf0   :  { %v1346_v44 = vsel %vm1142_vm8, %v1316_v49, 0.0  ;;  %v1339_v60 = vrot.slane %v1338_v10, 4  ;;  %v1345_v63 = vsel %vm1142_vm8, %v1315_v41, 0.0  ;;  %v2190_v52 = vunpack.i.l.bf16 %v2189_v32 }
  0xf1   :  { %v1196_v55 = vadd.f32 %v1195_v13, %v1194_v23  ;;  %v1211_v48 = vrot.slane %v1210_v37, 2  ;;  %v1347_v9 = vadd.f32 %v1346_v44, %v1345_v63  ;;  %v1320_v0 = vmul.f32 %v2191_v29, %v3459_v57  ;;  %v4320_v23 = vld [vmem:[#allocation30_spill] sm:$0xff] }
  0xf2   :  { %v1340_v3 = vadd.f32 %v1339_v60, %v1338_v10  ;;  %v2289_v24 = vunpack.i.h.bf16 %v2287_v47  ;;  %v1319_v49 = vmul.f32 %v2190_v52, %v4320_v23  ;;  %v2288_v41 = vunpack.i.l.bf16 %v2287_v47 }
  0xf3   :  { %v3780_v16 = vsel %vm1767_vm9, %v1196_v55, %v3650_v21  ;;  %v1212_v22 = vadd.f32 %v1211_v48, %v1210_v37  ;;  %v1348_v61 = vrot.slane %v1347_v9, 4  ;;  %v1364_v13 = vsel %vm1142_vm8, %v1320_v0, 0.0 }
  0xf4   :  { %v1341_v44 = vrot.slane %v1340_v3, 2  ;;  %v1599_v32 = vadd.f32 %v3644_v42, %v998_v27  ;;  %v1600_v57 = vadd.f32 %v3656_v33, %v999_v45  ;;  %v1363_v21 = vsel %vm1142_vm8, %v1319_v49, 0.0  ;;  %v2226_v49 = vpop.permute.xlu1 %2225 }
  0xf5   :  { %v1213_v63 = vrot.slane %v1212_v22, 1  ;;  %v1349_v29 = vadd.f32 %v1348_v61, %v1347_v9  ;;  %v2201_v55 = vunpack.i.h.bf16 %v2199_v7  ;;  %v2200_v37 = vunpack.i.l.bf16 %v2199_v7  ;;  %v2303_v9 = vpop.permute.xlu0 %2302 }
  0xf6   :  { %v1342_v48 = vadd.f32 %v1341_v44, %v1340_v3  ;;  %v1365_v60 = vadd.f32 %v1364_v13, %v1363_v21  ;;  %v1679_v56 = vmul.f32 %v2288_v41, %v1599_v32  ;;  %v1680_v52 = vmul.f32 %v2289_v24, %v1600_v57 }
  0xf7   :  { %v1214_v10 = vadd.f32 %v1213_v63, %v1212_v22  ;;  %v1350_v58 = vrot.slane %v1349_v29, 2  ;;  %v1323_v0 = vmul.f32 %v2200_v37, %v3480_v51  ;;  %v1324_v47 = vmul.f32 %v2201_v55, %v3483_v5 }
  0xf8   :  { %v1343_v42 = vrot.slane %v1342_v48, 1  ;;  %v1366_v33 = vrot.slane %v1365_v60, 4  ;;  %v1695_v45 = vsel %vm1142_vm8, %v1679_v56, 0.0  ;;  %v1696_v22 = vsel %vm1142_vm8, %v1680_v52, 0.0 }
  0xf9   :  { %v3791_v27 = vsel %vm1767_vm9, %v1214_v10, %v3716_v54  ;;  %v1351_v7 = vadd.f32 %v1350_v58, %v1349_v29  ;;  %v1381_v3 = vsel %vm1142_vm8, %v1323_v0, 0.0  ;;  %v1382_v24 = vsel %vm1142_vm8, %v1324_v47, 0.0  ;;  %v2313_v52 = vpop.permute.xlu0 %2312 }
  0xfa   :  { %v1344_v61 = vadd.f32 %v1343_v42, %v1342_v48  ;;  %v1367_v51 = vadd.f32 %v1366_v33, %v1365_v60  ;;  %v1697_v23 = vadd.f32 %v1696_v22, %v1695_v45  ;;  %v1383_v5 = vadd.f32 %v1382_v24, %v1381_v3  ;;  %v2236_v22 = vpop.permute.xlu1 %2235 }
  0xfb   :  { %v1352_v13 = vrot.slane %v1351_v7, 1  ;;  %v2305_v54 = vunpack.i.h.bf16 %v2303_v9  ;;  %v2304_v41 = vunpack.i.l.bf16 %v2303_v9  ;;  %v1605_v63 = vadd.f32 %v3668_v62, %v3759_v18 }
  0xfc   :  { %v3801_v58 = vsel %vm1767_vm9, %v3601_v1, %v1344_v61  ;;  %v1368_v56 = vrot.slane %v1367_v51, 2  ;;  %v1698_v44 = vrot.slane %v1697_v23, 4  ;;  %v1384_v32 = vrot.slane %v1383_v5, 4 }
  0xfd   :  { %v1353_v57 = vadd.f32 %v1352_v13, %v1351_v7  ;;  %v1606_v29 = vadd.f32 %v3672_v53, %v3762_v2  ;;  %v1685_v21 = vmul.f32 %v2304_v41, %v1605_v63  ;;  %v2228_v55 = vunpack.i.h.bf16 %v2226_v49  ;;  %v4321_v13 = vld [vmem:[#allocation57_spill] sm:$0xff] }
  0xfe   :  { %v1369_v37 = vadd.f32 %v1368_v56, %v1367_v51  ;;  %v1699_v10 = vadd.f32 %v1698_v44, %v1697_v23  ;;  %v1385_v48 = vadd.f32 %v1384_v32, %v1383_v5  ;;  %v2227_v60 = vunpack.i.l.bf16 %v2226_v49 }
  0xff   :  { %v3807_v62 = vsel %vm1767_vm9, %v3738_v46, %v1353_v57  ;;  %v1686_v1 = vmul.f32 %v2305_v54, %v1606_v29  ;;  %v1722_v18 = vsel %vm1142_vm8, %v1685_v21, 0.0  ;;  %v1496_v0 = vmul.f32 %v2228_v55, %v3505_v43  ;;  %v4323_v55 = vld [vmem:[#allocation26_spill] sm:$0xff] }
 0x100   :  { %v1370_v47 = vrot.slane %v1369_v37, 1  ;;  %v1700_v42 = vrot.slane %v1699_v10, 2  ;;  %v1386_v33 = vrot.slane %v1385_v48, 2  ;;  %v1495_v53 = vmul.f32 %v2227_v60, %v3503_v12 }
 0x101   :  { %v1723_v2 = vsel %vm1142_vm8, %v1686_v1, 0.0  ;;  %v1512_v45 = vsel %vm1142_vm8, %v1496_v0, 0.0  ;;  %v1841_v9 = vadd.f32 1.0, %v3744_v30  ;;  %v2315_v7 = vunpack.i.h.bf16 %v2313_v52  ;;  %v4325_v1 = vld [vmem:[#allocation23_spill] sm:$0xff] }
 0x102   :  { %v1371_v46 = vadd.f32 %v1370_v47, %v1369_v37  ;;  %v1701_v3 = vadd.f32 %v1700_v42, %v1699_v10  ;;  %v1387_v24 = vadd.f32 %v1386_v33, %v1385_v48  ;;  %v1724_v61 = vadd.f32 %v1723_v2, %v1722_v18  ;;  %v3834_v10 = vpop.permute.xlu0 %2322  ;;  %v2241_v48 = vpop.permute.xlu1 %2240 }
 0x103   :  { %v1511_v51 = vsel %vm1142_vm8, %v1495_v53, 0.0  ;;  %2468 = vrcp.f32 %v1841_v9  ;;  %v2314_v43 = vunpack.i.l.bf16 %v2313_v52  ;;  %v1609_v23 = vadd.f32 %v3702_v36, %v3771_v35 }
 0x104   :  { %v3820_v12 = vsel %vm1767_vm9, %v3607_v38, %v1371_v46  ;;  %v1702_v5 = vrot.slane %v1701_v3, 1  ;;  %v1388_v49 = vrot.slane %v1387_v24, 1  ;;  %v1725_v30 = vrot.slane %v1724_v61, 4 }
 0x105   :  { %v4322_v54 = vunpack.i.h.bf16 %v3753_v31  ;;  %v1513_v63 = vadd.f32 %v1512_v45, %v1511_v51  ;;  %v1610_v56 = vadd.f32 %v3707_v14, %v3766_v39  ;;  %v1689_v44 = vmul.f32 %v2314_v43, %v1609_v23 }
 0x106   :  { %v1389_v32 = vadd.f32 %v1388_v49, %v1387_v24  ;;  %v1726_v57 = vadd.f32 %v1725_v30, %v1724_v61  ;;  %v2238_v36 = vunpack.i.h.bf16 %v2236_v22  ;;  %v2237_v35 = vunpack.i.l.bf16 %v2236_v22  ;;  %v2251_v43 = vpop.permute.xlu1 %2250 }
 0x107   :  { %v3825_v41 = vmul.f32 %v4322_v54, %v4321_v13  ;;  %v1514_v29 = vrot.slane %v1513_v63, 4  ;;  %v1690_v38 = vmul.f32 %v2315_v7, %v1610_v56  ;;  %v1740_v21 = vsel %vm1142_vm8, %v1689_v44, 0.0  ;;  %v3859_v7 = vld [vmem:[%s4115_s2 + $0x6] sm:$0x3]  ;;  %v3873_v44 = vld [vmem:[%s4115_s2 + $0xa] sm:$0x3] }
 0x108   :  { %v3832_v37 = vadd.f32 %v3722_v15, %v4323_v55  ;;  %v4324_v60 = vunpack.i.l.bf16 %v3753_v31  ;;  %v1703_v39 = vadd.f32 %v1702_v5, %v1701_v3  ;;  %v3843_v52 = vsel %vm1767_vm9, %v3610_v11, %v1389_v32 }
 0x109   :  { %v3847_v18 = vadd.f32 %v3727_v20, %v4325_v1  ;;  %v1727_v0 = vrot.slane %v1726_v57, 2  ;;  %v1515_v15 = vadd.f32 %v1514_v29, %v1513_v63  ;;  %v1741_v47 = vsel %vm1142_vm8, %v1690_v38, 0.0 }
 0x10a   :  { %v3839_v14 = vmul.f32 %v4324_v60, %v4321_v13  ;;  %v1499_v42 = vmul.f32 %v2237_v35, %v3832_v37  ;;  %v1742_v31 = vadd.f32 %v1741_v47, %v1740_v21  ;;  %v2325_v53 = vunpack.i.h.bf16 %v3834_v10 }
 0x10b   :  { %v1500_v33 = vmul.f32 %v2238_v36, %v3847_v18  ;;  %v898_v11 = vmul.f32 1.442695, %v3581_v17  ;;  %v1516_v2 = vrot.slane %v1515_v15, 2  ;;  %v900_v20 = vmul.f32 1.442695, %v3597_v8 }
 0x10c   :  { %v1529_v45 = vsel %vm1142_vm8, %v1499_v42, 0.0  ;;  %v2243_v9 = vunpack.i.h.bf16 %v2241_v48  ;;  %v1743_v22 = vrot.slane %v1742_v31, 4  ;;  %v2324_v3 = vunpack.i.l.bf16 %v3834_v10 }
 0x10d   :  { %v1530_v46 = vsel %vm1142_vm8, %v1500_v33, 0.0  ;;  %2470 = vpow2.f32 %v898_v11  ;;  %v2469_v24 = vpop.eup %2468  ;;  %v1517_v61 = vadd.f32 %v1516_v2, %v1515_v15  ;;  %v2242_v51 = vunpack.i.l.bf16 %v2241_v48  ;;  %v2282_v33 = vpop.permute.xlu1 %2281  ;;  %v4327_v11 = vld [vmem:[#allocation13_spill] sm:$0xff] }
 0x10e   :  { %v1531_v17 = vadd.f32 %v1530_v46, %v1529_v45  ;;  %2472 = vpow2.f32 %v900_v20  ;;  %v3863_v23 = vadd.f32 %v1727_v0, %v1726_v57  ;;  %v4326_v8 = vunpack.c.l.bf16 %v3319_v25 }
 0x10f   :  { %v1744_v49 = vadd.f32 %v1743_v22, %v1742_v31  ;;  %v58_v30 = vunpack.c.l.bf16 %v3859_v7  ;;  %v1518_v13 = vrot.slane %v1517_v61, 1  ;;  %v1501_v63 = vmul.f32 %v2242_v51, %v3529_v28  ;;  %v4343_v7 = vld [vmem:[#allocation6_spill] sm:$0xff] }
 0x110   :  { %v1865_v5 = vmul.f32 %v2469_v24, %v4326_v8  ;;  %v1532_v54 = vrot.slane %v1531_v17, 4  ;;  %v1502_v56 = vmul.f32 %v2243_v9, %v3527_v34  ;;  %v2253_v57 = vunpack.i.h.bf16 %v2251_v43 }
 0x111   :  { %v1745_v32 = vrot.slane %v1744_v49, 2  ;;  %v1907_v25 = vmul.f32 -1.442695, %v58_v30  ;;  %v2252_v36 = vunpack.i.l.bf16 %v2251_v43  ;;  %v1519_v35 = vadd.f32 %v1518_v13, %v1517_v61  ;;  %v4328_v43 = vld [vmem:[#allocation22_spill] sm:$0xff] }
 0x112   :  { %v1533_v29 = vadd.f32 %v1532_v54, %v1531_v17  ;;  %v1538_v38 = vsel %vm1142_vm8, %v1501_v63, 0.0  ;;  %v1539_v28 = vsel %vm1142_vm8, %v1502_v56, 0.0  ;;  %v60_v55 = vunpack.c.l.bf16 %v3873_v44 }
 0x113   :  { %v3879_v21 = vadd.f32 %v1745_v32, %v1744_v49  ;;  %v1540_v34 = vadd.f32 %v1539_v28, %v1538_v38  ;;  %2474 = vpow2.f32 %v1907_v25  ;;  %v1777_v48 = vsel %vm1776_vm11, %v3731_v6, %v1519_v35 }
 0x114   :  { %v1534_v60 = vrot.slane %v1533_v29, 2  ;;  %v1505_v1 = vmul.f32 %v2252_v36, %v3539_v59  ;;  %v1506_v0 = vmul.f32 %v2253_v57, %v3541_v26  ;;  %v1729_v15 = vrot.slane %v3863_v23, 1 }
 0x115   :  { %v1786_v47 = vsel %vm1785_vm10, %v1777_v48, %v1703_v39  ;;  %v1541_v42 = vrot.slane %v1540_v34, 4  ;;  %v1909_v31 = vmul.f32 -1.442695, %v60_v55  ;;  %v1747_v59 = vrot.slane %v3879_v21, 1  ;;  %v3897_v39 = vld [vmem:[%s4115_s2 + $0xe] sm:$0x3] }
 0x116   :  { %v1809_v2 = vadd.f32 %v4327_v11, %v1786_v47  ;;  %v1535_v45 = vadd.f32 %v1534_v60, %v1533_v29  ;;  %v1556_v20 = vsel %vm1142_vm8, %v1505_v1, 0.0  ;;  %v1557_v6 = vsel %vm1142_vm8, %v1506_v0, 0.0 }
 0x117   :  { %v2471_v9 = vpop.eup %2470  ;;  %v1542_v26 = vadd.f32 %v1541_v42, %v1540_v34  ;;  %v1558_v22 = vadd.f32 %v1557_v6, %v1556_v20  ;;  %2476 = vpow2.f32 %v1909_v31  ;;  %v2284_v51 = vunpack.i.h.bf16 %v2282_v33 }
 0x118   :  { %v2473_v46 = vpop.eup %2472  ;;  %v1873_v24 = vmul.f32 %v1865_v5, %v1809_v2  ;;  %v1536_v61 = vrot.slane %v1535_v45, 1  ;;  %v1597_v17 = vmul.f32 %v2471_v9, %v3562_v40  ;;  %v2283_v54 = vunpack.i.l.bf16 %v2282_v33 }
 0x119   :  { %v1598_v8 = vmul.f32 %v2473_v46, %v4328_v43  ;;  %v1543_v49 = vrot.slane %v1542_v26, 2  ;;  %v1559_v13 = vrot.slane %v1558_v22, 4  ;;  %v62_v25 = vunpack.c.l.bf16 %v3897_v39 }
 0x11a   :  { %v1881_v63 = vpack.c.bf16 %v1873_v24, %v1873_v24  ;;  %v1537_v56 = vadd.f32 %v1536_v61, %v1535_v45  ;;  %v1613_v32 = vadd.f32 %v1597_v17, %v3839_v14  ;;  %v1509_v5 = vmul.f32 %v2283_v54, %v3562_v40  ;;  %v4330_v61 = vld [vmem:[#allocation17_spill] sm:$0xff]  ;;  %v4331_v17 = vld [vmem:[#allocation10_spill] sm:$0xff] }
 0x11b   :  { %v1614_v57 = vadd.f32 %v1598_v8, %v3825_v41  ;;  %v1544_v36 = vadd.f32 %v1543_v49, %v1542_v26  ;;  %v1560_v35 = vadd.f32 %v1559_v13, %v1558_v22  ;;  %v1510_v38 = vmul.f32 %v2284_v51, %v4328_v43  ;;  %v4332_v8 = vld [vmem:[#allocation32_spill] sm:$0xff]  ;;  %v4333_v13 = vld [vmem:[#allocation19_spill] sm:$0xff] }
 0x11c   :  { %1890 = vst.msk [vmem:[%s4116_s8] sm:$0x3] %vm1889_vm12, %v1881_v63  ;;  %v3911_v29 = vsel %vm1776_vm11, %v3807_v62, %v1537_v56  ;;  %v1693_v14 = vmul.f32 %v2324_v3, %v1613_v32  ;;  %v1911_v41 = vmul.f32 -1.442695, %v62_v25  ;;  %v1574_v60 = vsel %vm1142_vm8, %v1509_v5, 0.0  ;;  %v4334_v63 = vld [vmem:[#allocation48_spill] sm:$0xff] }
 0x11d   :  { %v2475_v28 = vpop.eup %2474  ;;  %v1694_v40 = vmul.f32 %v2325_v53, %v1614_v57  ;;  %v1545_v34 = vrot.slane %v1544_v36, 1  ;;  %v1561_v48 = vrot.slane %v1560_v35, 2  ;;  %v1575_v0 = vsel %vm1142_vm8, %v1510_v38, 0.0  ;;  %v3926_v3 = vld [vmem:[%s4115_s2 + $0x2] sm:$0x3]  ;;  %v4335_v56 = vld [vmem:[#allocation20_spill] sm:$0xff] }
 0x11e   :  { %v1758_v1 = vsel %vm1142_vm8, %v1693_v14, 0.0  ;;  %v1844_v62 = vadd.f32 1.0, %v2475_v28  ;;  %2478 = vpow2.f32 %v1911_v41  ;;  %v1576_v53 = vadd.f32 %v1575_v0, %v1574_v60  ;;  %v4340_v0 = vld [vmem:[#allocation18_spill] sm:$0xff] }
 0x11f   :  { %v1759_v47 = vsel %vm1142_vm8, %v1694_v40, 0.0  ;;  %v1546_v42 = vadd.f32 %v1545_v34, %v1544_v36  ;;  %v1562_v10 = vadd.f32 %v1561_v48, %v1560_v35  ;;  %v4329_v31 = vrot.slane %v3718_v50, 2 }
 0x120   :  { %v1730_v11 = vadd.f32 %v1729_v15, %v3863_v23  ;;  %v1760_v2 = vadd.f32 %v1759_v47, %v1758_v1  ;;  %2480 = vrcp.f32 %v1844_v62  ;;  %v1577_v9 = vrot.slane %v1576_v53, 4 }
 0x121   :  { %v3932_v33 = vadd.f32 %v4329_v31, %v3718_v50  ;;  %v2477_v45 = vpop.eup %2476  ;;  %v1780_v20 = vsel %vm1776_vm11, %v3749_v19, %v1546_v42  ;;  %v1563_v6 = vrot.slane %v1562_v10, 1  ;;  %v56_v26 = vunpack.c.l.bf16 %v3926_v3  ;;  %v4341_v42 = vld [vmem:[#allocation14_spill] sm:$0xff] }
 0x122   :  { %v1761_v22 = vrot.slane %v1760_v2, 4  ;;  %v1789_v46 = vsel %vm1785_vm10, %v1780_v20, %v1730_v11  ;;  %v1846_v24 = vadd.f32 1.0, %v2477_v45  ;;  %v829_v50 = vrot.slane %v4331_v17, %v4330_v61 }
 0x123   :  { %v1748_v51 = vadd.f32 %v1747_v59, %v3879_v21  ;;  %v1564_v23 = vadd.f32 %v1563_v6, %v1562_v10  ;;  %v1578_v15 = vadd.f32 %v1577_v9, %v1576_v53  ;;  %v3945_v43 = vsel %vm1776_vm11, %v3801_v58, %v3733_v4  ;;  %v3961_v4 = vld [vmem:[%s4115_s2 + $0x4] sm:$0x3]  ;;  %v3982_v6 = vld [vmem:[%s4115_s2 + $0x8] sm:$0x3] }
 0x124   :  { %v1762_v19 = vadd.f32 %v1761_v22, %v1760_v2  ;;  %2482 = vrcp.f32 %v1846_v24  ;;  %v856_v49 = vmul.f32 %v4332_v8, %v829_v50  ;;  %v857_v54 = vmul.f32 %v4333_v13, %v829_v50  ;;  %v4342_v22 = vld [vmem:[#allocation15_spill] sm:$0xff] }
 0x125   :  { %v4336_v32 = vunpack.i.l.bf16 %v4335_v56  ;;  %v1782_v21 = vsel %vm1776_vm11, %v3780_v16, %v1564_v23  ;;  %v1579_v59 = vrot.slane %v1578_v15, 2  ;;  %v1905_v36 = vmul.f32 -1.442695, %v56_v26  ;;  %v4338_v16 = vld [vmem:[#allocation44_spill] sm:$0xff] }
 0x126   :  { %v1763_v58 = vrot.slane %v1762_v19, 2  ;;  %v1791_v35 = vsel %vm1785_vm10, %v1782_v21, %v1748_v51  ;;  %v874_v5 = vmul.f32 1.442695, %v856_v49  ;;  %v876_v14 = vmul.f32 1.442695, %v857_v54  ;;  %v2293_v49 = vpop.permute.xlu1 %2292 }
 0x127   :  { %v3952_v57 = vmul.f32 %v4336_v32, %v4334_v63  ;;  %v4337_v38 = vunpack.i.h.bf16 %v4335_v56  ;;  %v4339_v28 = vrot.slane %v4338_v16, 1  ;;  %v1572_v34 = vrot.slane %v3932_v33, 1  ;;  %v4344_v56 = vld [vmem:[#allocation12_spill] sm:$0xff] }
 0x128   :  { %v1580_v48 = vadd.f32 %v1579_v59, %v1578_v15  ;;  %v2479_v60 = vpop.eup %2478  ;;  %v1764_v1 = vadd.f32 %v1763_v58, %v1762_v19  ;;  %2484 = vpow2.f32 %v874_v5  ;;  %v57_v62 = vunpack.c.l.bf16 %v3961_v4 }
 0x129   :  { %v3967_v41 = vmul.f32 %v4337_v38, %v4334_v63  ;;  %v1555_v40 = vadd.f32 %v4339_v28, %v4338_v16  ;;  %v833_v47 = vrot.slane %v4340_v0, %v4330_v61  ;;  %v1812_v10 = vadd.f32 %v4341_v42, %v1789_v46  ;;  %v2520_v42 = vld [vmem:[%s4114_s5] sm:$0xff] }
 0x12a   :  { %v1581_v53 = vrot.slane %v1580_v48, 1  ;;  %v1848_v31 = vadd.f32 1.0, %v2479_v60  ;;  %2486 = vpow2.f32 %v876_v14  ;;  %v2481_v11 = vpop.eup %2480  ;;  %v1765_v2 = vrot.slane %v1764_v1, 1 }
 0x12b   :  { %2488 = vpow2.f32 %v1905_v36  ;;  %v858_v45 = vmul.f32 %v4332_v8, %v833_v47  ;;  %v859_v20 = vmul.f32 %v4333_v13, %v833_v47  ;;  %v1868_v9 = vmul.f32 %v2481_v11, %v58_v30  ;;  %v2298_v47 = vpop.permute.xlu1 %2297 }
 0x12c   :  { %v1814_v46 = vadd.f32 %v4342_v22, %v1791_v35  ;;  %v1582_v24 = vadd.f32 %v1581_v53, %v1580_v48  ;;  %2490 = vrcp.f32 %v1848_v31  ;;  %v1766_v17 = vadd.f32 %v1765_v2, %v1764_v1  ;;  %v4006_v35 = vld [vmem:[%s4115_s2 + $0xc] sm:$0x3]  ;;  %v4347_v31 = vld [vmem:[#allocation16_spill] sm:$0xff] }
 0x12d   :  { %v878_v50 = vmul.f32 1.442695, %v858_v45  ;;  %v880_v51 = vmul.f32 1.442695, %v859_v20  ;;  %v1906_v23 = vmul.f32 -1.442695, %v57_v62  ;;  %v1876_v15 = vmul.f32 %v1868_v9, %v1812_v10 }
 0x12e   :  { %v1784_v19 = vsel %vm1776_vm11, %v3791_v27, %v1582_v24  ;;  %v59_v54 = vunpack.c.l.bf16 %v3982_v6  ;;  %v841_v30 = vrot.slane %v4343_v7, %v4330_v61  ;;  %v2483_v63 = vpop.eup %2482  ;;  %v2093_v32 = vunpack.i.h.bf16 %v4344_v56  ;;  %v4346_v1 = vld [vmem:[#allocation39_spill] sm:$0xff]  ;;  %v4348_v45 = vld [vmem:[#allocation40_spill] sm:$0xff] }
 0x12f   :  { %v1793_v21 = vsel %vm1785_vm10, %v1784_v19, %v1766_v17  ;;  %2492 = vpow2.f32 %v878_v50  ;;  %v3998_v59 = vsel %vm1776_vm11, %v3820_v12, %v1555_v40  ;;  %v1573_v36 = vadd.f32 %v1572_v34, %v3932_v33  ;;  %v4363_v6 = vld [vmem:[#allocation4_spill] sm:$0xff] }
 0x130   :  { %v1884_v58 = vpack.c.bf16 %v1876_v15, %v1876_v15  ;;  %v1870_v27 = vmul.f32 %v2483_v63, %v60_v55  ;;  %2494 = vpow2.f32 %v880_v51  ;;  %v862_v5 = vmul.f32 %v4332_v8, %v841_v30  ;;  %v4345_v55 = vld [vmem:[#allocation9_spill] sm:$0xff] }
 0x131   :  { %2496 = vpow2.f32 %v1906_v23  ;;  %v863_v14 = vmul.f32 %v4333_v13, %v841_v30  ;;  %v1908_v12 = vmul.f32 -1.442695, %v59_v54  ;;  %v2092_v33 = vunpack.i.l.bf16 %v4344_v56  ;;  %v4349_v23 = vld [vmem:[#allocation50_spill] sm:$0xff] }
 0x132   :  { %1893 = vst.msk [vmem:[%s4116_s8 + $0x6] sm:$0x3] %vm1889_vm12, %v1884_v58  ;;  %v1878_v44 = vmul.f32 %v1870_v27, %v1814_v46  ;;  %v849_v38 = vrot.slane %v4345_v55, %v4330_v61  ;;  %v4021_v16 = vsel %vm1776_vm11, %v3843_v52, %v1573_v36  ;;  %v2485_v8 = vpop.eup %2484  ;;  %v2294_v13 = vunpack.i.l.bf16 %v2293_v49  ;;  %v2521_v52 = vld [vmem:[%s4114_s5 + $0x8] sm:$0xff]  ;;  %v2308_v36 = vpop.permute.xlu1 %2307 }
 0x133   :  { %v886_v28 = vmul.f32 1.442695, %v862_v5  ;;  %v888_v40 = vmul.f32 1.442695, %v863_v14  ;;  %v61_v34 = vunpack.c.l.bf16 %v4006_v35  ;;  %v1585_v0 = vmul.f32 %v2485_v8, %v4346_v1 }
 0x134   :  { %v2487_v48 = vpop.eup %2486  ;;  %v1886_v60 = vpack.c.bf16 %v1878_v44, %v1878_v44  ;;  %v866_v61 = vmul.f32 %v2520_v42, %v849_v38  ;;  %v867_v10 = vmul.f32 %v2521_v52, %v849_v38  ;;  %v1816_v11 = vadd.f32 %v4347_v31, %v1793_v21 }
 0x135   :  { %v2489_v53 = vpop.eup %2488  ;;  %v2295_v2 = vunpack.i.h.bf16 %v2293_v49  ;;  %v1586_v20 = vmul.f32 %v2487_v48, %v4348_v45  ;;  %2498 = vpow2.f32 %v1908_v12  ;;  %v1601_v22 = vadd.f32 %v1585_v0, %v3952_v57 }
 0x136   :  { %v2491_v9 = vpop.eup %2490  ;;  %1895 = vst.msk [vmem:[%s4116_s8 + $0xa] sm:$0x3] %vm1889_vm12, %v1886_v60  ;;  %2500 = vpow2.f32 %v886_v28  ;;  %v894_v46 = vmul.f32 1.442695, %v866_v61  ;;  %v896_v24 = vmul.f32 1.442695, %v867_v10  ;;  %v1002_v15 = vmul.f32 %v2092_v33, %v4349_v23 }
 0x137   :  { %v1872_v17 = vmul.f32 %v2491_v9, %v62_v25  ;;  %v1602_v50 = vadd.f32 %v1586_v20, %v3967_v41  ;;  %2502 = vpow2.f32 %v888_v40  ;;  %v1910_v51 = vmul.f32 -1.442695, %v61_v34 }
 0x138   :  { %v1681_v19 = vmul.f32 %v2294_v13, %v1601_v22  ;;  %v1842_v49 = vadd.f32 1.0, %v2489_v53  ;;  %2504 = vpow2.f32 %v894_v46  ;;  %v1003_v57 = vmul.f32 %v2093_v32, %v4349_v23  ;;  %v4351_v53 = vld [vmem:[#allocation42_spill] sm:$0xff]  ;;  %v4353_v22 = vld [vmem:[#allocation41_spill] sm:$0xff]  ;;  %v4355_v23 = vld [vmem:[#allocation43_spill] sm:$0xff] }
 0x139   :  { %v2493_v7 = vpop.eup %2492  ;;  %v1880_v30 = vmul.f32 %v1872_v17, %v1816_v11  ;;  %v1682_v63 = vmul.f32 %v2295_v2, %v1602_v50  ;;  %2506 = vpow2.f32 %v896_v24  ;;  %v2300_v25 = vunpack.i.h.bf16 %v2298_v47  ;;  %v4352_v2 = vld [vmem:[#allocation35_spill] sm:$0xff]  ;;  %v4354_v50 = vld [vmem:[#allocation34_spill] sm:$0xff] }
 0x13a   :  { %v2495_v56 = vpop.eup %2494  ;;  %v1704_v39 = vsel %vm1142_vm8, %v1681_v19, 0.0  ;;  %v2299_v41 = vunpack.i.l.bf16 %v2298_v47  ;;  %v1587_v21 = vmul.f32 %v2493_v7, %v3832_v37  ;;  %2508 = vpow2.f32 %v1910_v51  ;;  %v4350_v47 = vld [vmem:[#allocation38_spill] sm:$0xff] }
 0x13b   :  { %v2497_v58 = vpop.eup %2496  ;;  %v1888_v27 = vpack.c.bf16 %v1880_v30, %v1880_v30  ;;  %v1705_v5 = vsel %vm1142_vm8, %v1682_v63, 0.0  ;;  %v1588_v14 = vmul.f32 %v2495_v56, %v3847_v18  ;;  %2510 = vrcp.f32 %v1842_v49  ;;  %v2318_v18 = vpop.permute.xlu1 %2317 }
 0x13c   :  { %v1706_v12 = vadd.f32 %v1705_v5, %v1704_v39  ;;  %v1603_v32 = vadd.f32 %v1587_v21, %v1002_v15  ;;  %v1843_v37 = vadd.f32 1.0, %v2497_v58  ;;  %v2310_v1 = vunpack.i.h.bf16 %v2308_v36  ;;  %v4358_v58 = vld [vmem:[#allocation7_spill] sm:$0xff] }
 0x13d   :  { %1897 = vst.msk [vmem:[%s4116_s8 + $0xe] sm:$0x3] %vm1889_vm12, %v1888_v27  ;;  %v1604_v33 = vadd.f32 %v1588_v14, %v1003_v57  ;;  %v2309_v0 = vunpack.i.l.bf16 %v2308_v36  ;;  %v2320_v20 = vunpack.i.h.bf16 %v2318_v18  ;;  %v2319_v9 = vunpack.i.l.bf16 %v2318_v18  ;;  %v4356_v57 = vld [vmem:[#allocation36_spill] sm:$0xff]  ;;  %v2522_v36 = vld [vmem:[%s4113_s6] ss:$0 sm:$0xff] }
 0x13e   :  { %v1707_v44 = vrot.slane %v1706_v12, 4  ;;  %v1683_v55 = vmul.f32 %v2299_v41, %v1603_v32  ;;  %2512 = vrcp.f32 %v1843_v37  ;;  %v4357_v41 = vld [vmem:[#allocation37_spill] sm:$0xff]  ;;  %v4359_v27 = vunpack.c.l.bf16 %v4358_v58 }
 0x13f   :  { %v2499_v38 = vpop.eup %2498  ;;  %v1684_v8 = vmul.f32 %v2300_v25, %v1604_v33 }
 0x140   :  { %v2501_v13 = vpop.eup %2500  ;;  %v1708_v28 = vadd.f32 %v1707_v44, %v1706_v12  ;;  %v1713_v40 = vsel %vm1142_vm8, %v1683_v55, 0.0  ;;  %v1845_v7 = vadd.f32 1.0, %v2499_v38  ;;  %v1802_v5 = vmul.f32 %v2522_v36, %v4359_v27 }
 0x141   :  { %v2503_v48 = vpop.eup %2502  ;;  %v1714_v60 = vsel %vm1142_vm8, %v1684_v8, 0.0  ;;  %v1591_v42 = vmul.f32 %v2501_v13, %v4350_v47 }
 0x142   :  { %v2505_v61 = vpop.eup %2504  ;;  %v1709_v52 = vrot.slane %v1708_v28, 2  ;;  %v1715_v10 = vadd.f32 %v1714_v60, %v1713_v40  ;;  %v1592_v31 = vmul.f32 %v2503_v48, %v4351_v53  ;;  %2514 = vrcp.f32 %v1845_v7 }
 0x143   :  { %v2507_v11 = vpop.eup %2506  ;;  %v1607_v45 = vadd.f32 %v1591_v42, %v4352_v2  ;;  %v1595_v46 = vmul.f32 %v2505_v61, %v4353_v22  ;;  %v4360_v42 = vld [vmem:[#allocation5_spill] sm:$0xff] }
 0x144   :  { %v1710_v24 = vadd.f32 %v1709_v52, %v1708_v28  ;;  %v1716_v17 = vrot.slane %v1715_v10, 4  ;;  %v1608_v51 = vadd.f32 %v1592_v31, %v4354_v50  ;;  %v1596_v15 = vmul.f32 %v2507_v11, %v4355_v23  ;;  %v2509_v19 = vpop.eup %2508 }
 0x145   :  { %v1687_v49 = vmul.f32 %v2309_v0, %v1607_v45  ;;  %v1611_v30 = vadd.f32 %v1595_v46, %v4356_v57  ;;  %v2511_v63 = vpop.eup %2510  ;;  %v1847_v32 = vadd.f32 1.0, %v2509_v19  ;;  %v4361_v61 = vunpack.c.l.bf16 %v4360_v42 }
 0x146   :  { %v1711_v56 = vrot.slane %v1710_v24, 1  ;;  %v1717_v39 = vadd.f32 %v1716_v17, %v1715_v10  ;;  %v1688_v25 = vmul.f32 %v2310_v1, %v1608_v51  ;;  %v1612_v21 = vadd.f32 %v1596_v15, %v4357_v41 }
 0x147   :  { %v1731_v14 = vsel %vm1142_vm8, %v1687_v49, 0.0  ;;  %v1691_v12 = vmul.f32 %v2319_v9, %v1611_v30  ;;  %v1866_v38 = vmul.f32 %v2511_v63, %v56_v26  ;;  %2516 = vrcp.f32 %v1847_v32  ;;  %v4362_v49 = vld [vmem:[#allocation3_spill] sm:$0xff] }
 0x148   :  { %v1712_v33 = vadd.f32 %v1711_v56, %v1710_v24  ;;  %v1718_v44 = vrot.slane %v1717_v39, 2  ;;  %v1732_v55 = vsel %vm1142_vm8, %v1688_v25, 0.0  ;;  %v1692_v37 = vmul.f32 %v2320_v20, %v1612_v21  ;;  %v2513_v0 = vpop.eup %2512 }
 0x149   :  { %v1733_v8 = vadd.f32 %v1732_v55, %v1731_v14  ;;  %v1749_v13 = vsel %vm1142_vm8, %v1691_v12, 0.0  ;;  %v1803_v3 = vmul.f32 %v2522_v36, %v4361_v61 }
 0x14a   :  { %v1787_v28 = vsel %vm1785_vm10, %v3945_v43, %v1712_v33  ;;  %v1719_v40 = vadd.f32 %v1718_v44, %v1717_v39  ;;  %v1750_v18 = vsel %vm1142_vm8, %v1692_v37, 0.0  ;;  %v1867_v43 = vmul.f32 %v2513_v0, %v57_v62 }
 0x14b   :  { %v1810_v48 = vadd.f32 %v1802_v5, %v1787_v28  ;;  %v1734_v60 = vrot.slane %v1733_v8, 4  ;;  %v1751_v1 = vadd.f32 %v1750_v18, %v1749_v13 }
 0x14c   :  { %v1720_v47 = vrot.slane %v1719_v40, 1  ;;  %v2515_v46 = vpop.eup %2514 }
 0x14d   :  { %v1874_v26 = vmul.f32 %v1866_v38, %v1810_v48  ;;  %v1735_v52 = vadd.f32 %v1734_v60, %v1733_v8  ;;  %v1752_v10 = vrot.slane %v1751_v1, 4  ;;  %v1869_v15 = vmul.f32 %v2515_v46, %v59_v54 }
 0x14e   :  { %v1721_v53 = vadd.f32 %v1720_v47, %v1719_v40 }
 0x14f   :  { %v1882_v31 = vpack.c.bf16 %v1874_v26, %v1874_v26  ;;  %v1736_v11 = vrot.slane %v1735_v52, 2  ;;  %v1753_v2 = vadd.f32 %v1752_v10, %v1751_v1 }
 0x150   :  { %v1788_v45 = vsel %vm1785_vm10, %v3911_v29, %v1721_v53 }
 0x151   :  { %1891 = vst.msk [vmem:[%s4116_s8 + $0x2] sm:$0x3] %vm1889_vm12, %v1882_v31  ;;  %v1811_v20 = vadd.f32 %v1803_v3, %v1788_v45  ;;  %v1737_v9 = vadd.f32 %v1736_v11, %v1735_v52  ;;  %v1754_v22 = vrot.slane %v1753_v2, 2  ;;  %v2517_v51 = vpop.eup %2516 }
 0x152   :  { %v1871_v57 = vmul.f32 %v2517_v51, %v61_v34 }
 0x153   :  { %v1875_v24 = vmul.f32 %v1867_v43, %v1811_v20  ;;  %v1738_v17 = vrot.slane %v1737_v9, 1  ;;  %v1755_v50 = vadd.f32 %v1754_v22, %v1753_v2 }
 0x155   :  { %v1883_v4 = vpack.c.bf16 %v1875_v24, %v1875_v24  ;;  %v1739_v62 = vadd.f32 %v1738_v17, %v1737_v9  ;;  %v1756_v23 = vrot.slane %v1755_v50, 1 }
 0x157   :  { %1892 = vst.msk [vmem:[%s4116_s8 + $0x4] sm:$0x3] %vm1889_vm12, %v1883_v4  ;;  %v1790_v29 = vsel %vm1785_vm10, %v3998_v59, %v1739_v62  ;;  %v1757_v19 = vadd.f32 %v1756_v23, %v1755_v50 }
 0x158   :  { %v1813_v7 = vadd.f32 %v4362_v49, %v1790_v29 }
 0x159   :  { %v1792_v30 = vsel %vm1785_vm10, %v4021_v16, %v1757_v19 }
 0x15a   :  { %v1877_v63 = vmul.f32 %v1869_v15, %v1813_v7  ;;  %v1815_v54 = vadd.f32 %v4363_v6, %v1792_v30 }
 0x15c   :  { %v1885_v56 = vpack.c.bf16 %v1877_v63, %v1877_v63  ;;  %v1879_v39 = vmul.f32 %v1871_v57, %v1815_v54 }
 0x15e   :  { %1894 = vst.msk [vmem:[%s4116_s8 + $0x8] sm:$0x3] %vm1889_vm12, %v1885_v56  ;;  %v1887_v59 = vpack.c.bf16 %v1879_v39, %v1879_v39 }
 0x160   :  { %1896 = vst.msk [vmem:[%s4116_s8 + $0xc] sm:$0x3] %vm1889_vm12, %v1887_v59 }

// kernel: _lambda_.51
= control target key start
LH: loop header
LB: loop body
LE: loop exit
PB: predicated region body
PF: predicated region fallthrough
CT: control target
= control target key end

     0   :  { %vm24_vm0 = vcmask 261120   ;;  %vm136_vm1 = vcmask 257024   ;;  %s242_s0 = inlined_call_operand.vmem [shape: bf16[40,32], index: 0, kind: input, shape index: {}]   ;;  %s243_s1 = inlined_call_operand.vmem [shape: f32[1,32], index: 1, kind: input, shape index: {}]   ;;  %s244_s2 = inlined_call_operand.vmem [shape: f32[1,32], index: 2, kind: input, shape index: {}]   ;;  %s245_s3 = inlined_call_operand.vmem [shape: bf16[40,32], index: 3, kind: output, shape index: {}]  }
   0x1   :  { %v159_v0 = vld [vmem:[%s242_s0] sm:$0xff]   ;;  %v166_v1 = vld [vmem:[%s242_s0 + $0x8] sm:$0xff]   ;;  %v18_v6 = vld [vmem:[%s242_s0 + $0x10] sm:$0xf] }
   0x2   :  { %v160_v2 = vunpack.c.l.bf16 %v159_v0  ;;  %v164_v3 = vunpack.c.l.bf16 %v166_v1  ;;  %v161_v4 = vunpack.c.h.bf16 %v159_v0  ;;  %v165_v5 = vunpack.c.h.bf16 %v166_v1  ;;  %v146_v54 = vld [vmem:[%s243_s1] ss:$0 sm:$0xff] }
   0x3   :  { %v23_v11 = vunpack.c.l.bf16 %v18_v6  ;;  %v147_v56 = vld [vmem:[%s244_s2] ss:$0 sm:$0xff] }
   0x4   :  { %v25_v7 = vsel %vm24_vm0, %v160_v2, 0.0  ;;  %v31_v8 = vsel %vm24_vm0, %v164_v3, 0.0  ;;  %v28_v9 = vsel %vm24_vm0, %v161_v4, 0.0  ;;  %v34_v10 = vsel %vm24_vm0, %v165_v5, 0.0 }
   0x5   :  { %26 = vadd.xlane.f32.xlu0 %v25_v7  ;;  %32 = vadd.xlane.f32.xlu1 %v31_v8  ;;  %v37_v12 = vsel %vm24_vm0, %v23_v11, 0.0 }
   0x9   :  { %29 = vadd.xlane.f32.xlu0 %v28_v9  ;;  %35 = vadd.xlane.f32.xlu1 %v34_v10 }
   0xd   :  { %38 = vadd.xlane.f32.xlu0 %v37_v12 }
  0x92   :  { %v27_v13 = vpop.xlane.xlu0 %26  ;;  %v33_v14 = vpop.xlane.xlu1 %32 }
  0x93   :  { %v41_v15 = vmul.f32 0.03125, %v27_v13  ;;  %v43_v16 = vmul.f32 0.03125, %v33_v14 }
  0x95   :  { %v46_v17 = vsub.f32 %v160_v2, %v41_v15  ;;  %v48_v18 = vsub.f32 %v164_v3, %v43_v16 }
  0x96   :  { %v30_v19 = vpop.xlane.xlu0 %29  ;;  %v36_v20 = vpop.xlane.xlu1 %35 }
  0x97   :  { %v42_v21 = vmul.f32 0.03125, %v30_v19  ;;  %v44_v22 = vmul.f32 0.03125, %v36_v20  ;;  %v51_v23 = vmul.f32 %v46_v17, %v46_v17  ;;  %v53_v24 = vmul.f32 %v48_v18, %v48_v18 }
  0x99   :  { %v47_v25 = vsub.f32 %v161_v4, %v42_v21  ;;  %v49_v26 = vsub.f32 %v165_v5, %v44_v22  ;;  %v56_v27 = vsel %vm24_vm0, %v51_v23, 0.0  ;;  %v62_v30 = vsel %vm24_vm0, %v53_v24, 0.0 }
  0x9a   :  { %57 = vadd.xlane.f32.xlu1 %v56_v27  ;;  %v39_v28 = vpop.xlane.xlu0 %38 }
  0x9b   :  { %v45_v29 = vmul.f32 0.03125, %v39_v28  ;;  %v52_v31 = vmul.f32 %v47_v25, %v47_v25  ;;  %v54_v32 = vmul.f32 %v49_v26, %v49_v26 }
  0x9d   :  { %v50_v33 = vsub.f32 %v23_v11, %v45_v29  ;;  %v59_v34 = vsel %vm24_vm0, %v52_v31, 0.0  ;;  %v65_v35 = vsel %vm24_vm0, %v54_v32, 0.0 }
  0x9e   :  { %63 = vadd.xlane.f32.xlu1 %v62_v30  ;;  %60 = vadd.xlane.f32.xlu0 %v59_v34 }
  0x9f   :  { %v55_v36 = vmul.f32 %v50_v33, %v50_v33 }
  0xa1   :  { %v68_v37 = vsel %vm24_vm0, %v55_v36, 0.0 }
  0xa2   :  { %66 = vadd.xlane.f32.xlu0 %v65_v35  ;;  %69 = vadd.xlane.f32.xlu1 %v68_v37 }
 0x127   :  { %v58_v38 = vpop.xlane.xlu1 %57 }
 0x128   :  { %v71_v39 = vmul.f32 0.03125, %v58_v38 }
 0x12a   :  { %v76_v40 = vadd.f32 1e-06, %v71_v39 }
 0x12b   :  { %v64_v41 = vpop.xlane.xlu1 %63  ;;  %v61_v42 = vpop.xlane.xlu0 %60 }
 0x12c   :  { %167 = vrsqrt.f32 %v76_v40  ;;  %v73_v43 = vmul.f32 0.03125, %v64_v41  ;;  %v72_v44 = vmul.f32 0.03125, %v61_v42 }
 0x12e   :  { %v78_v45 = vadd.f32 1e-06, %v73_v43  ;;  %v77_v46 = vadd.f32 1e-06, %v72_v44 }
 0x12f   :  { %v70_v47 = vpop.xlane.xlu1 %69  ;;  %v67_v48 = vpop.xlane.xlu0 %66 }
 0x130   :  { %169 = vrsqrt.f32 %v78_v45  ;;  %v75_v49 = vmul.f32 0.03125, %v70_v47  ;;  %v74_v50 = vmul.f32 0.03125, %v67_v48 }
 0x131   :  { %171 = vrsqrt.f32 %v77_v46 }
 0x132   :  { %v80_v51 = vadd.f32 1e-06, %v75_v49  ;;  %v79_v52 = vadd.f32 1e-06, %v74_v50 }
 0x134   :  { %173 = vrsqrt.f32 %v80_v51 }
 0x135   :  { %175 = vrsqrt.f32 %v79_v52 }
 0x136   :  { %v168_v53 = vpop.eup %167 }
 0x137   :  { %v86_v55 = vmul.f32 %v168_v53, %v46_v17 }
 0x139   :  { %v98_v57 = vmul.f32 %v146_v54, %v86_v55 }
 0x13a   :  { %v170_v58 = vpop.eup %169 }
 0x13b   :  { %v172_v59 = vpop.eup %171  ;;  %v110_v60 = vadd.f32 %v147_v56, %v98_v57  ;;  %v88_v61 = vmul.f32 %v170_v58, %v48_v18 }
 0x13c   :  { %v87_v62 = vmul.f32 %v172_v59, %v47_v25 }
 0x13d   :  { %v153_v63 = vpack.c.bf16 %v110_v60, %v110_v60  ;;  %v100_v0 = vmul.f32 %v146_v54, %v88_v61 }
 0x13e   :  { %v174_v1 = vpop.eup %173  ;;  %v99_v2 = vmul.f32 %v146_v54, %v87_v62 }
 0x13f   :  { %v176_v3 = vpop.eup %175  ;;  %137 = vst.msk [vmem:[%s245_s3] sm:$0xf] %vm136_vm1, %v153_v63  ;;  %v112_v4 = vadd.f32 %v147_v56, %v100_v0  ;;  %v90_v5 = vmul.f32 %v174_v1, %v50_v33 }
 0x140   :  { %v111_v6 = vadd.f32 %v147_v56, %v99_v2  ;;  %v89_v7 = vmul.f32 %v176_v3, %v49_v26 }
 0x141   :  { %v155_v8 = vpack.c.bf16 %v112_v4, %v112_v4  ;;  %v102_v9 = vmul.f32 %v146_v54, %v90_v5 }
 0x142   :  { %v154_v10 = vpack.c.bf16 %v111_v6, %v111_v6  ;;  %v101_v11 = vmul.f32 %v146_v54, %v89_v7 }
 0x143   :  { %139 = vst.msk [vmem:[%s245_s3 + $0x8] sm:$0xf] %vm136_vm1, %v155_v8  ;;  %v114_v12 = vadd.f32 %v147_v56, %v102_v9 }
 0x144   :  { %138 = vst.msk [vmem:[%s245_s3 + $0x4] sm:$0xf] %vm136_vm1, %v154_v10  ;;  %v113_v13 = vadd.f32 %v147_v56, %v101_v11 }
 0x145   :  { %v157_v14 = vpack.c.bf16 %v114_v12, %v114_v12 }
 0x146   :  { %v156_v15 = vpack.c.bf16 %v113_v13, %v113_v13 }
 0x147   :  { %141 = vst.msk [vmem:[%s245_s3 + $0x10] sm:$0xf] %vm136_vm1, %v157_v14 }
 0x148   :  { %140 = vst.msk [vmem:[%s245_s3 + $0xc] sm:$0xf] %vm136_vm1, %v156_v15 }

// kernel: _lambda_.52
= control target key start
LH: loop header
LB: loop body
LE: loop exit
PB: predicated region body
PF: predicated region fallthrough
CT: control target
= control target key end

     0   :  { %v331_v0 = vmov 0.0   ;;  %vm332_vm0 = vmmov 0   ;;  %s401_s1 = inlined_call_operand.vmem [shape: bf16[128,128], index: 1, kind: input, shape index: {}]   ;;  %s402_s0 = inlined_call_operand.vmem [shape: bf16[40,128], index: 0, kind: input, shape index: {}]   ;;  %s403_s2 = inlined_call_operand.vmem [shape: f32[1,128], index: 2, kind: input, shape index: {}]   ;;  %s404_s3 = inlined_call_operand.vmem [shape: bf16[40,128], index: 3, kind: output, shape index: {}]  }
   0x1   :  { %302 = vmatprep.subr.bf16.mxu1 %v331_v0  ;;  %v320_v1 = vld [vmem:[%s401_s1] sm:$0xff]   ;;  %274 = vmatprep.subr.bf16.mxu0 %v331_v0  ;;  %v321_v2 = vld [vmem:[%s401_s1 + $0x8] sm:$0xff]   ;;  %v322_v3 = vld [vmem:[%s401_s1 + $0x10] sm:$0xff]  }
   0x2   :  { %294 = vmatprep.mubr.msk.bf16.mxu1 %vm332_vm0, %v331_v0  ;;  %290 = vmatprep.mubr.msk.bf16.mxu0 %vm332_vm0, %v331_v0  ;;  %v323_v4 = vld [vmem:[%s401_s1 + $0x18] sm:$0xff]   ;;  %v324_v5 = vld [vmem:[%s401_s1 + $0x20] sm:$0xff]   ;;  %v325_v6 = vld [vmem:[%s401_s1 + $0x28] sm:$0xff]  }
   0x3   :  { %310 = vmatpush3.bf16.msra.mxu1 %v320_v1  ;;  %275 = vmatpush3.bf16.msra.mxu0 %v320_v1  ;;  %v326_v7 = vld [vmem:[%s401_s1 + $0x30] sm:$0xff]   ;;  %v327_v8 = vld [vmem:[%s401_s1 + $0x38] sm:$0xff]   ;;  %v328_v9 = vld [vmem:[%s402_s0 + $0x8] sm:$0xff]  }
   0x4   :  { %303 = vmatprep.subr.bf16.mxu1 %v331_v0  ;;  %276 = vmatprep.subr.bf16.mxu0 %v331_v0  ;;  %v329_v10 = vld [vmem:[%s402_s0] sm:$0xff]   ;;  %v330_v11 = vld [vmem:[%s402_s0 + $0x10] ss:$0 sps:$4 sm:$0xff]  }
   0x5   :  { %v241_v13 = vld [vmem:[%s403_s2] ss:$0 sm:$0xff] }
   0x7   :  { %311 = vmatpush3.bf16.msra.mxu1 %v321_v2  ;;  %277 = vmatpush3.bf16.msra.mxu0 %v321_v2 }
   0x8   :  { %304 = vmatprep.subr.bf16.mxu1 %v331_v0  ;;  %278 = vmatprep.subr.bf16.mxu0 %v331_v0 }
   0xb   :  { %312 = vmatpush3.bf16.msra.mxu1 %v322_v3  ;;  %279 = vmatpush3.bf16.msra.mxu0 %v322_v3 }
   0xc   :  { %305 = vmatprep.subr.bf16.mxu1 %v331_v0  ;;  %280 = vmatprep.subr.bf16.mxu0 %v331_v0 }
   0xf   :  { %313 = vmatpush3.bf16.msra.mxu1 %v323_v4  ;;  %281 = vmatpush3.bf16.msra.mxu0 %v323_v4 }
  0x10   :  { %306 = vmatprep.subr.bf16.mxu1 %v331_v0  ;;  %282 = vmatprep.subr.bf16.mxu0 %v331_v0 }
  0x13   :  { %314 = vmatpush3.bf16.msra.mxu1 %v324_v5  ;;  %283 = vmatpush3.bf16.msra.mxu0 %v324_v5 }
  0x14   :  { %307 = vmatprep.subr.bf16.mxu1 %v331_v0  ;;  %284 = vmatprep.subr.bf16.mxu0 %v331_v0 }
  0x17   :  { %315 = vmatpush3.bf16.msra.mxu1 %v325_v6  ;;  %285 = vmatpush3.bf16.msra.mxu0 %v325_v6 }
  0x18   :  { %308 = vmatprep.subr.bf16.mxu1 %v331_v0  ;;  %286 = vmatprep.subr.bf16.mxu0 %v331_v0 }
  0x1b   :  { %316 = vmatpush3.bf16.msra.mxu1 %v326_v7  ;;  %287 = vmatpush3.bf16.msra.mxu0 %v326_v7 }
  0x1c   :  { %309 = vmatprep.subr.bf16.mxu1 %v331_v0  ;;  %288 = vmatprep.subr.bf16.mxu0 %v331_v0 }
  0x1f   :  { %317 = vmatpush3.bf16.msra.mxu1 %v327_v8  ;;  %289 = vmatpush3.bf16.msra.mxu0 %v327_v8 }
  0x22   :  { %295 = vmatmul.mubr.bf16.vlgmr.msra.gmra.mrb[0].mxu1 %v328_v9  ;;  %291 = vmatmul.mubr.bf16.vlgmr.msra.gmra.mrb[0].mxu0 %v329_v10 }
  0x23   :  { %298 = vmatprep.mubr.msk.bf16.mxu1 %vm332_vm0, %v331_v0 }
  0x2a   :  { %299 = vmatmul.mubr.bf16.gmra.mrb[4].mxu1 %v330_v11 }
  0xf5   :  { %v156_v12 = vpop.f32.mrb[0].mxu1  ;;  %v148_v14 = vpop.f32.mrb[0].mxu0 }
  0xf6   :  { %v296_v15 = vpop.f32.mrb[1].mxu1  ;;  %v195_v16 = vadd.f32 %v241_v13, %v148_v14  ;;  %v292_v17 = vpop.f32.mrb[1].mxu0  ;;  %v197_v20 = vadd.f32 %v241_v13, %v156_v12 }
  0xf7   :  { %v159_v18 = vpop.f32.mrb[2].mxu1  ;;  %v151_v19 = vpop.f32.mrb[2].mxu0 }
  0xf8   :  { %v198_v21 = vadd.f32 %v241_v13, %v159_v18  ;;  %v297_v22 = vpop.f32.mrb[3].mxu1  ;;  %v196_v23 = vadd.f32 %v241_v13, %v151_v19  ;;  %v293_v24 = vpop.f32.mrb[3].mxu0 }
  0xfa   :  { %v260_v25 = vpack.c.bf16 %v198_v21, %v197_v20  ;;  %v255_v26 = vpack.c.bf16 %v196_v23, %v195_v16 }
  0xfc   :  { %262 = vst [vmem:[%s404_s3 + $0x8] sm:$0xff] %v260_v25   ;;  %256 = vst [vmem:[%s404_s3] sm:$0xff] %v255_v26  }
  0xfd   :  { %v164_v27 = vpop.f32.mrb[4].mxu1 }
  0xfe   :  { %v199_v28 = vadd.f32 %v241_v13, %v164_v27  ;;  %v300_v29 = vpop.f32.mrb[5].mxu1 }
  0xff   :  { %v167_v30 = vpop.f32.mrb[6].mxu1 }
 0x100   :  { %v251_v31 = vpack.c.bf16 %v199_v28, %v199_v28  ;;  %v301_v32 = vpop.f32.mrb[7].mxu1 }
 0x102   :  { %225 = vst [vmem:[%s404_s3 + $0x10] sm:$0xf] %v251_v31 }

// kernel: _lambda_.57
= control target key start
LH: loop header
LB: loop body
LE: loop exit
PB: predicated region body
PF: predicated region fallthrough
CT: control target
= control target key end

     0   :  { %v358_v0 = vmov 0.0   ;;  %vm359_vm0 = vmmov 0   ;;  %s442_s1 = inlined_call_operand.vmem [shape: bf16[128,128], index: 1, kind: input, shape index: {}]   ;;  %s443_s0 = inlined_call_operand.vmem [shape: bf16[40,128], index: 0, kind: input, shape index: {}]   ;;  %s444_s3 = inlined_call_operand.vmem [shape: bf16[40,128], index: 3, kind: input, shape index: {}]   ;;  %s445_s2 = inlined_call_operand.vmem [shape: f32[1,128], index: 2, kind: input, shape index: {}]   ;;  %s446_s4 = inlined_call_operand.vmem [shape: bf16[40,128], index: 4, kind: output, shape index: {}]  }
   0x1   :  { %329 = vmatprep.subr.bf16.mxu1 %v358_v0  ;;  %v347_v1 = vld [vmem:[%s442_s1] sm:$0xff]   ;;  %301 = vmatprep.subr.bf16.mxu0 %v358_v0  ;;  %v348_v2 = vld [vmem:[%s442_s1 + $0x8] sm:$0xff]   ;;  %v349_v3 = vld [vmem:[%s442_s1 + $0x10] sm:$0xff]  }
   0x2   :  { %321 = vmatprep.mubr.msk.bf16.mxu1 %vm359_vm0, %v358_v0  ;;  %317 = vmatprep.mubr.msk.bf16.mxu0 %vm359_vm0, %v358_v0  ;;  %v350_v4 = vld [vmem:[%s442_s1 + $0x18] sm:$0xff]   ;;  %v351_v5 = vld [vmem:[%s442_s1 + $0x20] sm:$0xff]   ;;  %v352_v6 = vld [vmem:[%s442_s1 + $0x28] sm:$0xff]  }
   0x3   :  { %337 = vmatpush3.bf16.msra.mxu1 %v347_v1  ;;  %302 = vmatpush3.bf16.msra.mxu0 %v347_v1  ;;  %v353_v7 = vld [vmem:[%s442_s1 + $0x30] sm:$0xff]   ;;  %v354_v8 = vld [vmem:[%s442_s1 + $0x38] sm:$0xff]   ;;  %v355_v9 = vld [vmem:[%s443_s0 + $0x8] sm:$0xff]  }
   0x4   :  { %330 = vmatprep.subr.bf16.mxu1 %v358_v0  ;;  %303 = vmatprep.subr.bf16.mxu0 %v358_v0  ;;  %v356_v10 = vld [vmem:[%s443_s0] sm:$0xff]   ;;  %v357_v11 = vld [vmem:[%s443_s0 + $0x10] ss:$0 sps:$4 sm:$0xff]   ;;  %v288_v13 = vld [vmem:[%s444_s3 + $0x8] sm:$0xff]  }
   0x5   :  { %v271_v12 = vld [vmem:[%s444_s3] sm:$0xff]   ;;  %v276_v17 = vunpack.c.l.bf16 %v288_v13  ;;  %v277_v21 = vunpack.c.h.bf16 %v288_v13  ;;  %v207_v32 = vld [vmem:[%s444_s3 + $0x10] sm:$0xf] }
   0x6   :  { %v259_v14 = vld [vmem:[%s445_s2] ss:$0 sm:$0xff]  ;;  %v272_v15 = vunpack.c.l.bf16 %v271_v12  ;;  %v273_v24 = vunpack.c.h.bf16 %v271_v12  ;;  %v212_v38 = vunpack.c.l.bf16 %v207_v32 }
   0x7   :  { %338 = vmatpush3.bf16.msra.mxu1 %v348_v2  ;;  %304 = vmatpush3.bf16.msra.mxu0 %v348_v2 }
   0x8   :  { %331 = vmatprep.subr.bf16.mxu1 %v358_v0  ;;  %305 = vmatprep.subr.bf16.mxu0 %v358_v0 }
   0xb   :  { %339 = vmatpush3.bf16.msra.mxu1 %v349_v3  ;;  %306 = vmatpush3.bf16.msra.mxu0 %v349_v3 }
   0xc   :  { %332 = vmatprep.subr.bf16.mxu1 %v358_v0  ;;  %307 = vmatprep.subr.bf16.mxu0 %v358_v0 }
   0xf   :  { %340 = vmatpush3.bf16.msra.mxu1 %v350_v4  ;;  %308 = vmatpush3.bf16.msra.mxu0 %v350_v4 }
  0x10   :  { %333 = vmatprep.subr.bf16.mxu1 %v358_v0  ;;  %309 = vmatprep.subr.bf16.mxu0 %v358_v0 }
  0x13   :  { %341 = vmatpush3.bf16.msra.mxu1 %v351_v5  ;;  %310 = vmatpush3.bf16.msra.mxu0 %v351_v5 }
  0x14   :  { %334 = vmatprep.subr.bf16.mxu1 %v358_v0  ;;  %311 = vmatprep.subr.bf16.mxu0 %v358_v0 }
  0x17   :  { %342 = vmatpush3.bf16.msra.mxu1 %v352_v6  ;;  %312 = vmatpush3.bf16.msra.mxu0 %v352_v6 }
  0x18   :  { %335 = vmatprep.subr.bf16.mxu1 %v358_v0  ;;  %313 = vmatprep.subr.bf16.mxu0 %v358_v0 }
  0x1b   :  { %343 = vmatpush3.bf16.msra.mxu1 %v353_v7  ;;  %314 = vmatpush3.bf16.msra.mxu0 %v353_v7 }
  0x1c   :  { %336 = vmatprep.subr.bf16.mxu1 %v358_v0  ;;  %315 = vmatprep.subr.bf16.mxu0 %v358_v0 }
  0x1f   :  { %344 = vmatpush3.bf16.msra.mxu1 %v354_v8  ;;  %316 = vmatpush3.bf16.msra.mxu0 %v354_v8 }
  0x22   :  { %322 = vmatmul.mubr.bf16.vlgmr.msra.gmra.mrb[0].mxu1 %v355_v9  ;;  %318 = vmatmul.mubr.bf16.vlgmr.msra.gmra.mrb[0].mxu0 %v356_v10 }
  0x23   :  { %325 = vmatprep.mubr.msk.bf16.mxu1 %vm359_vm0, %v358_v0 }
  0x2a   :  { %326 = vmatmul.mubr.bf16.gmra.mrb[4].mxu1 %v357_v11 }
  0xf5   :  { %v159_v16 = vpop.f32.mrb[0].mxu1  ;;  %v151_v18 = vpop.f32.mrb[0].mxu0 }
  0xf6   :  { %v200_v19 = vadd.f32 %v259_v14, %v159_v16  ;;  %v323_v20 = vpop.f32.mrb[1].mxu1  ;;  %v198_v22 = vadd.f32 %v259_v14, %v151_v18  ;;  %v319_v23 = vpop.f32.mrb[1].mxu0 }
  0xf7   :  { %v162_v25 = vpop.f32.mrb[2].mxu1  ;;  %v154_v26 = vpop.f32.mrb[2].mxu0 }
  0xf8   :  { %v201_v27 = vadd.f32 %v259_v14, %v162_v25  ;;  %v213_v28 = vadd.f32 %v272_v15, %v198_v22  ;;  %v324_v29 = vpop.f32.mrb[3].mxu1  ;;  %v199_v30 = vadd.f32 %v259_v14, %v154_v26  ;;  %v320_v31 = vpop.f32.mrb[3].mxu0  ;;  %v215_v33 = vadd.f32 %v276_v17, %v200_v19 }
  0xfa   :  { %v216_v34 = vadd.f32 %v277_v21, %v201_v27  ;;  %v214_v35 = vadd.f32 %v273_v24, %v199_v30 }
  0xfc   :  { %v286_v36 = vpack.c.bf16 %v216_v34, %v215_v33  ;;  %v281_v37 = vpack.c.bf16 %v214_v35, %v213_v28 }
  0xfd   :  { %v167_v39 = vpop.f32.mrb[4].mxu1 }
  0xfe   :  { %289 = vst [vmem:[%s446_s4 + $0x8] sm:$0xff] %v286_v36   ;;  %282 = vst [vmem:[%s446_s4] sm:$0xff] %v281_v37   ;;  %v202_v40 = vadd.f32 %v259_v14, %v167_v39  ;;  %v327_v41 = vpop.f32.mrb[5].mxu1 }
  0xff   :  { %v170_v42 = vpop.f32.mrb[6].mxu1 }
 0x100   :  { %v217_v43 = vadd.f32 %v212_v38, %v202_v40  ;;  %v328_v44 = vpop.f32.mrb[7].mxu1 }
 0x102   :  { %v269_v45 = vpack.c.bf16 %v217_v43, %v217_v43 }
 0x104   :  { %243 = vst [vmem:[%s446_s4 + $0x10] sm:$0xf] %v269_v45 }

// kernel: _lambda_.56
= control target key start
LH: loop header
LB: loop body
LE: loop exit
PB: predicated region body
PF: predicated region fallthrough
CT: control target
= control target key end

     0   :  { %v366_v0 = vmov 0.0   ;;  %vm367_vm0 = vmmov 0   ;;  %s436_s1 = inlined_call_operand.vmem [shape: bf16[128,128], index: 1, kind: input, shape index: {}]   ;;  %s437_s0 = inlined_call_operand.vmem [shape: bf16[40,128], index: 0, kind: input, shape index: {}]   ;;  %s438_s2 = inlined_call_operand.vmem [shape: f32[1,128], index: 2, kind: input, shape index: {}]   ;;  %s439_s3 = inlined_call_operand.vmem [shape: bf16[40,128], index: 3, kind: output, shape index: {}]  }
   0x1   :  { %299 = vmatprep.subr.bf16.mxu0 %v366_v0  ;;  %327 = vmatprep.subr.bf16.mxu1 %v366_v0  ;;  %v345_v1 = vld [vmem:[%s436_s1] sm:$0xff]   ;;  %v346_v2 = vld [vmem:[%s436_s1 + $0x8] sm:$0xff]   ;;  %v347_v3 = vld [vmem:[%s436_s1 + $0x10] sm:$0xff]  }
   0x2   :  { %315 = vmatprep.mubr.msk.bf16.mxu0 %vm367_vm0, %v366_v0  ;;  %319 = vmatprep.mubr.msk.bf16.mxu1 %vm367_vm0, %v366_v0  ;;  %v348_v4 = vld [vmem:[%s436_s1 + $0x18] sm:$0xff]   ;;  %v349_v5 = vld [vmem:[%s436_s1 + $0x20] sm:$0xff]   ;;  %v350_v6 = vld [vmem:[%s436_s1 + $0x28] sm:$0xff]  }
   0x3   :  { %300 = vmatpush3.bf16.msra.mxu0 %v345_v1  ;;  %335 = vmatpush3.bf16.msra.mxu1 %v345_v1  ;;  %v351_v7 = vld [vmem:[%s436_s1 + $0x30] sm:$0xff]   ;;  %v352_v8 = vld [vmem:[%s436_s1 + $0x38] sm:$0xff]   ;;  %v353_v9 = vld [vmem:[%s437_s0] sm:$0xff]  }
   0x4   :  { %301 = vmatprep.subr.bf16.mxu0 %v366_v0  ;;  %328 = vmatprep.subr.bf16.mxu1 %v366_v0  ;;  %v354_v10 = vld [vmem:[%s437_s0 + $0x8] sm:$0xff]   ;;  %v355_v11 = vld [vmem:[%s437_s0 + $0x10] ss:$0 sps:$4 sm:$0xff]   ;;  %v266_v12 = vld [vmem:[%s438_s2] ss:$0 sm:$0xff] }
   0x7   :  { %302 = vmatpush3.bf16.msra.mxu0 %v346_v2  ;;  %336 = vmatpush3.bf16.msra.mxu1 %v346_v2 }
   0x8   :  { %303 = vmatprep.subr.bf16.mxu0 %v366_v0  ;;  %329 = vmatprep.subr.bf16.mxu1 %v366_v0 }
   0xb   :  { %304 = vmatpush3.bf16.msra.mxu0 %v347_v3  ;;  %337 = vmatpush3.bf16.msra.mxu1 %v347_v3 }
   0xc   :  { %305 = vmatprep.subr.bf16.mxu0 %v366_v0  ;;  %330 = vmatprep.subr.bf16.mxu1 %v366_v0 }
   0xf   :  { %306 = vmatpush3.bf16.msra.mxu0 %v348_v4  ;;  %338 = vmatpush3.bf16.msra.mxu1 %v348_v4 }
  0x10   :  { %307 = vmatprep.subr.bf16.mxu0 %v366_v0  ;;  %331 = vmatprep.subr.bf16.mxu1 %v366_v0 }
  0x13   :  { %308 = vmatpush3.bf16.msra.mxu0 %v349_v5  ;;  %339 = vmatpush3.bf16.msra.mxu1 %v349_v5 }
  0x14   :  { %309 = vmatprep.subr.bf16.mxu0 %v366_v0  ;;  %332 = vmatprep.subr.bf16.mxu1 %v366_v0 }
  0x17   :  { %310 = vmatpush3.bf16.msra.mxu0 %v350_v6  ;;  %340 = vmatpush3.bf16.msra.mxu1 %v350_v6 }
  0x18   :  { %311 = vmatprep.subr.bf16.mxu0 %v366_v0  ;;  %333 = vmatprep.subr.bf16.mxu1 %v366_v0 }
  0x1b   :  { %312 = vmatpush3.bf16.msra.mxu0 %v351_v7  ;;  %341 = vmatpush3.bf16.msra.mxu1 %v351_v7 }
  0x1c   :  { %313 = vmatprep.subr.bf16.mxu0 %v366_v0  ;;  %334 = vmatprep.subr.bf16.mxu1 %v366_v0 }
  0x1f   :  { %314 = vmatpush3.bf16.msra.mxu0 %v352_v8  ;;  %342 = vmatpush3.bf16.msra.mxu1 %v352_v8 }
  0x22   :  { %316 = vmatmul.mubr.bf16.vlgmr.msra.gmra.mrb[0].mxu0 %v353_v9  ;;  %320 = vmatmul.mubr.bf16.vlgmr.msra.gmra.mrb[0].mxu1 %v354_v10 }
  0x23   :  { %323 = vmatprep.mubr.msk.bf16.mxu1 %vm367_vm0, %v366_v0 }
  0x2a   :  { %324 = vmatmul.mubr.bf16.gmra.mrb[4].mxu1 %v355_v11 }
  0xf5   :  { %v148_v13 = vpop.f32.mrb[0].mxu0  ;;  %v156_v14 = vpop.f32.mrb[0].mxu1 }
  0xf6   :  { %v195_v15 = vadd.f32 %v266_v12, %v148_v13  ;;  %v197_v16 = vadd.f32 %v266_v12, %v156_v14  ;;  %v317_v17 = vpop.f32.mrb[1].mxu0  ;;  %v321_v18 = vpop.f32.mrb[1].mxu1 }
  0xf7   :  { %v151_v19 = vpop.f32.mrb[2].mxu0  ;;  %v159_v20 = vpop.f32.mrb[2].mxu1 }
  0xf8   :  { %v205_v21 = vmul.f32 0.70710677, %v195_v15  ;;  %v207_v22 = vmul.f32 0.70710677, %v197_v16  ;;  %v196_v23 = vadd.f32 %v266_v12, %v151_v19  ;;  %v198_v24 = vadd.f32 %v266_v12, %v159_v20  ;;  %v322_v25 = vpop.f32.mrb[3].mxu1  ;;  %v318_v26 = vpop.f32.mrb[3].mxu0 }
  0xf9   :  { %v200_v41 = vmul.f32 0.5, %v195_v15  ;;  %v202_v44 = vmul.f32 0.5, %v197_v16 }
  0xfa   :  { %356 = verf.f32 %v205_v21  ;;  %v206_v27 = vmul.f32 0.70710677, %v196_v23  ;;  %v208_v28 = vmul.f32 0.70710677, %v198_v24  ;;  %v201_v42 = vmul.f32 0.5, %v196_v23 }
  0xfb   :  { %358 = verf.f32 %v207_v22  ;;  %v203_v45 = vmul.f32 0.5, %v198_v24 }
  0xfc   :  { %360 = verf.f32 %v206_v27 }
  0xfd   :  { %v164_v29 = vpop.f32.mrb[4].mxu1  ;;  %362 = verf.f32 %v208_v28 }
  0xfe   :  { %v199_v30 = vadd.f32 %v266_v12, %v164_v29  ;;  %v325_v31 = vpop.f32.mrb[5].mxu1 }
  0xff   :  { %v167_v32 = vpop.f32.mrb[6].mxu1 }
 0x100   :  { %v209_v33 = vmul.f32 0.70710677, %v199_v30  ;;  %v326_v34 = vpop.f32.mrb[7].mxu1  ;;  %v204_v54 = vmul.f32 0.5, %v199_v30 }
 0x102   :  { %364 = verf.f32 %v209_v33 }
 0x104   :  { %v357_v35 = vpop.eup %356 }
 0x105   :  { %v359_v36 = vpop.eup %358  ;;  %v215_v37 = vadd.f32 1.0, %v357_v35 }
 0x106   :  { %v361_v38 = vpop.eup %360  ;;  %v217_v39 = vadd.f32 1.0, %v359_v36 }
 0x107   :  { %v363_v40 = vpop.eup %362  ;;  %v216_v43 = vadd.f32 1.0, %v361_v38  ;;  %v220_v47 = vmul.f32 %v215_v37, %v200_v41 }
 0x108   :  { %v218_v46 = vadd.f32 1.0, %v363_v40  ;;  %v222_v49 = vmul.f32 %v217_v39, %v202_v44 }
 0x109   :  { %v221_v48 = vmul.f32 %v216_v43, %v201_v42 }
 0x10a   :  { %v223_v50 = vmul.f32 %v218_v46, %v203_v45 }
 0x10b   :  { %v280_v52 = vpack.c.bf16 %v221_v48, %v220_v47 }
 0x10c   :  { %v365_v51 = vpop.eup %364  ;;  %v285_v53 = vpack.c.bf16 %v223_v50, %v222_v49 }
 0x10d   :  { %v219_v55 = vadd.f32 1.0, %v365_v51  ;;  %281 = vst [vmem:[%s439_s3] sm:$0xff] %v280_v52  }
 0x10e   :  { %287 = vst [vmem:[%s439_s3 + $0x8] sm:$0xff] %v285_v53  }
 0x10f   :  { %v224_v56 = vmul.f32 %v219_v55, %v204_v54 }
 0x111   :  { %v276_v57 = vpack.c.bf16 %v224_v56, %v224_v56 }
 0x113   :  { %250 = vst [vmem:[%s439_s3 + $0x10] sm:$0xf] %v276_v57 }

// kernel: _lambda_.53
= control target key start
LH: loop header
LB: loop body
LE: loop exit
PB: predicated region body
PF: predicated region fallthrough
CT: control target
= control target key end

     0   :  { %vm30_vm0 = vcmask 64512   ;;  %v2867_v0 = vmov 0.0   ;;  %vm2868_vm1 = vmmov 0   ;;  %vm329_vm2 = vcmask 1043456   ;;  %s2869_s5 = smov 120   ;;  %s2871_s14 = smov 104   ;;  %s3483_s1 = inlined_call_operand.vmem [shape: bf16[5,8,32], index: 1, kind: input, shape index: {}]   ;;  %s3484_s0 = inlined_call_operand.vmem [shape: bf16[5,8,32], index: 0, kind: input, shape index: {}]   ;;  %s3485_s2 = inlined_call_operand.vmem [shape: bf16[5,8,32], index: 2, kind: input, shape index: {}]   ;;  %s3486_s3 = inlined_call_operand.vmem [shape: bf16[5,8,32], index: 3, kind: output, shape index: {}]  }
   0x1   :  { %2494 = vmatprep.subr.bf16.mxu0 %v2867_v0  ;;  %v2899_v1 = vld [vmem:[%s3483_s1] sm:$0xf]  ;;  %2500 = vmatprep.subr.bf16.mxu1 %v2867_v0  ;;  %v2905_v2 = vld [vmem:[%s3483_s1 + $0x4] sm:$0xf]  ;;  %v2920_v5 = vld [vmem:[%s3483_s1 + $0x8] sm:$0xf] }
   0x2   :  { %v35_v3 = vsel %vm30_vm0, %v2899_v1, 0  ;;  %v81_v4 = vsel %vm30_vm0, %v2905_v2, 0  ;;  %2496 = vmatprep.mubr.msk.bf16.mxu0 %vm2868_vm1, %v2867_v0  ;;  %2502 = vmatprep.mubr.msk.bf16.mxu1 %vm2868_vm1, %v2867_v0  ;;  %v2925_v6 = vld [vmem:[%s3483_s1 + $0xc] sm:$0xf]  ;;  %v2930_v7 = vld [vmem:[%s3484_s0] sm:$0xf] }
   0x3   :  { %2495 = vmatpush3.bf16.xpose.msra.mxu0 %v35_v3  ;;  %2501 = vmatpush3.bf16.xpose.msra.mxu1 %v81_v4  ;;  %v2935_v8 = vld [vmem:[%s3484_s0 + $0x4] sm:$0xf]  ;;  %v127_v9 = vsel %vm30_vm0, %v2920_v5, 0  ;;  %v173_v10 = vsel %vm30_vm0, %v2925_v6, 0  ;;  %v2951_v11 = vld [vmem:[%s3483_s1 + $0x10] sm:$0xf] }
   0x4   :  { %2506 = vmatprep.subr.bf16.mxu0 %v2867_v0  ;;  %2512 = vmatprep.subr.bf16.mxu1 %v2867_v0  ;;  %v2959_v12 = vld [vmem:[%s3484_s0 + $0x8] sm:$0xf]  ;;  %v2964_v13 = vld [vmem:[%s3484_s0 + $0xc] sm:$0xf]  ;;  %v219_v14 = vsel %vm30_vm0, %v2951_v11, 0  ;;  %s2872_s15 = smov 8  }
   0x5   :  { %v2980_v15 = vld [vmem:[%s3484_s0 + $0x10] sm:$0xf]  ;;  %s2873_s16 = smov 16   ;;  %s2874_s17 = smov 24   ;;  %vm2332_vm3 = vcmask 130048   ;;  %vm2338_vm4 = vcmask 195584  }
   0x6   :  { %vm2349_vm5 = vcmask 257024  }
   0xa   :  { %2497 = vmatmul.mubr.msk.bf16.vlgmr.msra.gmra.mrb[0].mxu0 %vm30_vm0, %v2930_v7  ;;  %2503 = vmatmul.mubr.msk.bf16.vlgmr.msra.gmra.mrb[0].mxu1 %vm30_vm0, %v2935_v8 }
   0xb   :  { %2507 = vmatpush3.bf16.xpose.msra.mxu0 %v127_v9  ;;  %2513 = vmatpush3.bf16.xpose.msra.mxu1 %v173_v10  ;;  %v3003_v9 = vcombine.low %v2930_v7, %v2930_v7  ;;  %v3008_v10 = vld [vmem:[%s3485_s2] sm:$0xf]  ;;  %v3021_v7 = vld [vmem:[%s3485_s2 + $0x4] sm:$0xf] }
   0xc   :  { %2508 = vmatprep.mubr.msk.bf16.mxu0 %vm2868_vm1, %v2867_v0  ;;  %2518 = vmatprep.subr.bf16.mxu0 %v2867_v0 }
   0xd   :  { %2514 = vmatprep.mubr.msk.bf16.mxu1 %vm2868_vm1, %v2867_v0  ;;  %2524 = vmatprep.subr.bf16.mxu1 %v2867_v0 }
  0x12   :  { %2509 = vmatmul.mubr.msk.bf16.vlgmr.msra.gmra.mrb[4].mxu0 %vm30_vm0, %v2959_v12  ;;  %2515 = vmatmul.mubr.msk.bf16.vlgmr.msra.gmra.mrb[4].mxu1 %vm30_vm0, %v2964_v13 }
  0x13   :  { %2519 = vmatpush3.bf16.xpose.msra.mxu0 %v219_v14  ;;  %2520 = vmatprep.mubr.msk.bf16.mxu0 %vm2868_vm1, %v2867_v0  ;;  %v3012_v14 = vcombine.low %v2905_v2, %v2905_v2  ;;  %v3030_v2 = vcombine.low %v2920_v5, %v2920_v5  ;;  %v3049_v5 = vcombine.low %v2925_v6, %v2925_v6 }
  0x14   :  { %2526 = vmatprep.mubr.msk.bf16.mxu1 %vm2868_vm1, %v2867_v0  ;;  %2530 = vmatprep.subr.bf16.mxu0 %v2867_v0 }
  0x1a   :  { %2521 = vmatmul.mubr.msk.bf16.vlgmr.msra.gmra.mrb[8].mxu0 %vm30_vm0, %v2980_v15 }
  0x1b   :  { %2532 = vmatprep.mubr.msk.bf16.mxu0 %vm2868_vm1, %v2867_v0 }
  0xdd   :  { %v71_v16 = vpop.f32.mrb[0].mxu0  ;;  %v117_v17 = vpop.f32.mrb[0].mxu1 }
  0xde   :  { %v261_v18 = vmul.f32 0.35355338, %v71_v16  ;;  %v2498_v19 = vpop.f32.mrb[1].mxu0  ;;  %v262_v20 = vmul.f32 0.35355338, %v117_v17  ;;  %v2504_v21 = vpop.f32.mrb[1].mxu1 }
  0xdf   :  { %v74_v22 = vpop.f32.mrb[2].mxu0  ;;  %v120_v23 = vpop.f32.mrb[2].mxu1  ;;  %v331_v16 = vsel %vm329_vm2, %v3008_v10, 0  ;;  %v377_v17 = vsel %vm329_vm2, %v3021_v7, 0  ;;  %v3043_v19 = vcombine.low %v2935_v8, %v2935_v8 }
  0xe0   :  { %v2499_v24 = vpop.f32.mrb[3].mxu0  ;;  %v266_v25 = vsel %vm30_vm0, %v261_v18, -inf  ;;  %v2505_v26 = vpop.f32.mrb[3].mxu1  ;;  %v269_v27 = vsel %vm30_vm0, %v262_v20, -inf  ;;  %2525 = vmatpush3.bf16.msra.mxu1 %v331_v16  ;;  %2531 = vmatpush3.bf16.msra.mxu0 %v377_v17  ;;  %v3065_v23 = vcombine.low %v2959_v12, %v2959_v12 }
  0xe1   :  { %267 = vmax.xlane.f32.xlu0 %v266_v25  ;;  %2536 = vmatprep.subr.bf16.mxu1 %v2867_v0  ;;  %v3077_v24 = vcombine.low %v2980_v15, %v2980_v15 }
  0xe2   :  { %2542 = vmatprep.subr.bf16.mxu0 %v2867_v0 }
  0xe5   :  { %270 = vmax.xlane.f32.xlu0 %v269_v27  ;;  %v163_v28 = vpop.f32.mrb[4].mxu0  ;;  %v209_v29 = vpop.f32.mrb[4].mxu1 }
  0xe6   :  { %v263_v30 = vmul.f32 0.35355338, %v163_v28  ;;  %v2510_v31 = vpop.f32.mrb[5].mxu0  ;;  %v264_v32 = vmul.f32 0.35355338, %v209_v29  ;;  %v2516_v33 = vpop.f32.mrb[5].mxu1 }
  0xe7   :  { %v166_v34 = vpop.f32.mrb[6].mxu0  ;;  %v212_v35 = vpop.f32.mrb[6].mxu1 }
  0xe8   :  { %v2511_v36 = vpop.f32.mrb[7].mxu0  ;;  %v272_v37 = vsel %vm30_vm0, %v263_v30, -inf  ;;  %v2517_v38 = vpop.f32.mrb[7].mxu1  ;;  %v275_v39 = vsel %vm30_vm0, %v264_v32, -inf }
  0xe9   :  { %273 = vmax.xlane.f32.xlu1 %v272_v37  ;;  %v3102_v37 = vld [vmem:[%s3485_s2 + $0x10] sm:$0xf] }
  0xed   :  { %276 = vmax.xlane.f32.xlu1 %v275_v39  ;;  %v255_v40 = vpop.f32.mrb[8].mxu0 }
  0xee   :  { %v265_v41 = vmul.f32 0.35355338, %v255_v40  ;;  %v2522_v42 = vpop.f32.mrb[9].mxu0 }
  0xef   :  { %v258_v43 = vpop.f32.mrb[10].mxu0 }
  0xf0   :  { %v278_v44 = vsel %vm30_vm0, %v265_v41, -inf  ;;  %v2523_v45 = vpop.f32.mrb[11].mxu0 }
  0xf1   :  { %279 = vmax.xlane.f32.xlu0 %v278_v44 }
 0x16e   :  { %v268_v46 = vpop.xlane.xlu0 %267 }
 0x16f   :  { %v281_v47 = vsub.f32 %v261_v18, %v268_v46  ;;  %v3034_v18 = vcombine.low %v2899_v1, %v2899_v1  ;;  %v3055_v1 = vcombine.low %v2964_v13, %v2964_v13  ;;  %v3071_v13 = vcombine.low %v2951_v11, %v2951_v11  ;;  %v3084_v11 = vld [vmem:[%s3485_s2 + $0x8] sm:$0xf] }
 0x171   :  { %v286_v48 = vmul.f32 1.442695, %v281_v47 }
 0x172   :  { %v271_v49 = vpop.xlane.xlu0 %270 }
 0x173   :  { %2787 = vpow2.f32 %v286_v48  ;;  %v282_v50 = vsub.f32 %v262_v20, %v271_v49 }
 0x175   :  { %v288_v51 = vmul.f32 1.442695, %v282_v50 }
 0x176   :  { %v274_v52 = vpop.xlane.xlu1 %273 }
 0x177   :  { %2789 = vpow2.f32 %v288_v51  ;;  %v283_v53 = vsub.f32 %v263_v30, %v274_v52  ;;  %v423_v30 = vsel %vm329_vm2, %v3084_v11, 0 }
 0x179   :  { %v290_v54 = vmul.f32 1.442695, %v283_v53 }
 0x17a   :  { %v277_v55 = vpop.xlane.xlu1 %276 }
 0x17b   :  { %2791 = vpow2.f32 %v290_v54  ;;  %v284_v56 = vsub.f32 %v264_v32, %v277_v55  ;;  %v3091_v32 = vld [vmem:[%s3485_s2 + $0xc] sm:$0xf]  ;;  %s2870_s2 = smov 112  }
 0x17c   :  { %v469_v35 = vsel %vm329_vm2, %v3091_v32, 0 }
 0x17d   :  { %v2788_v57 = vpop.eup %2787  ;;  %v292_v58 = vmul.f32 1.442695, %v284_v56 }
 0x17e   :  { %v296_v59 = vsel %vm30_vm0, %v2788_v57, 0.0  ;;  %v280_v20 = vpop.xlane.xlu0 %279 }
 0x17f   :  { %2793 = vpow2.f32 %v292_v58  ;;  %297 = vadd.xlane.f32.xlu1 %v296_v59  ;;  %v285_v8 = vsub.f32 %v265_v41, %v280_v20  ;;  %v515_v41 = vsel %vm329_vm2, %v3102_v37, 0 }
 0x181   :  { %v2790_v60 = vpop.eup %2789  ;;  %v294_v21 = vmul.f32 1.442695, %v285_v8 }
 0x182   :  { %v299_v61 = vsel %vm30_vm0, %v2790_v60, 0.0 }
 0x183   :  { %300 = vadd.xlane.f32.xlu0 %v299_v61  ;;  %2795 = vpow2.f32 %v294_v21 }
 0x185   :  { %v2993_v62 = vpop.eup %2791 }
 0x186   :  { %v302_v63 = vsel %vm30_vm0, %v2993_v62, 0.0 }
 0x187   :  { %303 = vadd.xlane.f32.xlu1 %v302_v63 }
 0x189   :  { %v2997_v3 = vpop.eup %2793 }
 0x18a   :  { %v305_v4 = vsel %vm30_vm0, %v2997_v3, 0.0 }
 0x18b   :  { %306 = vadd.xlane.f32.xlu0 %v305_v4 }
 0x18d   :  { %v3059_v22 = vpop.eup %2795 }
 0x18e   :  { %v308_v6 = vsel %vm30_vm0, %v3059_v22, 0.0 }
 0x198   :  { %560 = vrot.lane.b32.xlu1 %v3003_v9, %s2869_s5 }
 0x19c   :  { %621 = vrot.lane.b32.xlu1 %v3012_v14, %s2869_s5 }
 0x1a0   :  { %677 = vrot.lane.b32.xlu1 %v3030_v2, %s2869_s5 }
 0x1a1   :  { %565 = vrot.lane.b32.xlu0 %v3034_v18, %s2869_s5 }
 0x1a5   :  { %616 = vrot.lane.b32.xlu0 %v3043_v19, %s2869_s5 }
 0x1a9   :  { %733 = vrot.lane.b32.xlu0 %v3049_v5, %s2869_s5 }
 0x1ad   :  { %728 = vrot.lane.b32.xlu0 %v3055_v1, %s2869_s5 }
 0x1c4   :  { %309 = vadd.xlane.f32.xlu1 %v308_v6 }
 0x1d5   :  { %672 = vrot.lane.b32.xlu1 %v3065_v23, %s2869_s5 }
 0x1d9   :  { %789 = vrot.lane.b32.xlu1 %v3071_v13, %s2869_s5 }
 0x1dd   :  { %784 = vrot.lane.b32.xlu1 %v3077_v24, %s2869_s5 }
 0x20c   :  { %v298_v25 = vpop.xlane.xlu1 %297 }
 0x20d   :  { %2797 = vrcp.f32 %v298_v25 }
 0x210   :  { %v301_v12 = vpop.xlane.xlu0 %300 }
 0x211   :  { %2799 = vrcp.f32 %v301_v12 }
 0x214   :  { %v304_v26 = vpop.xlane.xlu1 %303 }
 0x215   :  { %2801 = vrcp.f32 %v304_v26 }
 0x217   :  { %v2798_v27 = vpop.eup %2797 }
 0x218   :  { %v316_v28 = vmul.f32 %v2798_v27, %v2788_v57  ;;  %v307_v29 = vpop.xlane.xlu0 %306  ;;  %v561_v39 = vpop.permute.xlu1 %560 }
 0x219   :  { %2803 = vrcp.f32 %v307_v29 }
 0x21a   :  { %v321_v15 = vpack.c.bf16 %v316_v28, %v316_v28 }
 0x21b   :  { %v2800_v31 = vpop.eup %2799 }
 0x21c   :  { %v317_v33 = vmul.f32 %v2800_v31, %v2790_v60  ;;  %2527 = vmatmul.mubr.msk.bf16.vlgmr.msra.gmra.mrb[8].mxu1 %vm30_vm0, %v321_v15  ;;  %v566_v44 = vpop.permute.xlu0 %565  ;;  %v622_v47 = vpop.permute.xlu1 %621 }
 0x21d   :  { %2537 = vmatpush3.bf16.msra.mxu1 %v423_v30  ;;  %2538 = vmatprep.mubr.msk.bf16.mxu1 %vm2868_vm1, %v2867_v0  ;;  %v571_v46 = vsel %vm30_vm0, %v566_v44, 0  ;;  %v627_v59 = vsel %vm30_vm0, %v622_v47, 0 }
 0x21e   :  { %v322_v34 = vpack.c.bf16 %v317_v33, %v317_v33  ;;  %2548 = vmatprep.subr.bf16.mxu1 %v2867_v0 }
 0x21f   :  { %v2802_v36 = vpop.eup %2801 }
 0x220   :  { %v318_v38 = vmul.f32 %v2802_v36, %v2993_v62  ;;  %2533 = vmatmul.mubr.msk.bf16.vlgmr.msra.gmra.mrb[12].mxu0 %vm30_vm0, %v322_v34  ;;  %v678_v48 = vpop.permute.xlu1 %677  ;;  %v617_v56 = vpop.permute.xlu0 %616 }
 0x221   :  { %2543 = vmatpush3.bf16.msra.mxu0 %v469_v35  ;;  %2544 = vmatprep.mubr.msk.bf16.mxu0 %vm2868_vm1, %v2867_v0  ;;  %v683_v49 = vsel %vm30_vm0, %v678_v48, 0 }
 0x222   :  { %v323_v40 = vpack.c.bf16 %v318_v38, %v318_v38  ;;  %2554 = vmatprep.subr.bf16.mxu0 %v2867_v0 }
 0x223   :  { %v2804_v42 = vpop.eup %2803 }
 0x224   :  { %v319_v43 = vmul.f32 %v2804_v42, %v2997_v3  ;;  %2539 = vmatmul.mubr.msk.bf16.vlgmr.msra.gmra.mrb[12].mxu1 %vm30_vm0, %v323_v40  ;;  %v734_v60 = vpop.permute.xlu0 %733 }
 0x225   :  { %2549 = vmatpush3.bf16.msra.mxu1 %v515_v41  ;;  %2550 = vmatprep.mubr.msk.bf16.mxu1 %vm2868_vm1, %v2867_v0  ;;  %v739_v61 = vsel %vm30_vm0, %v734_v60, 0 }
 0x226   :  { %v324_v45 = vpack.c.bf16 %v319_v43, %v319_v43  ;;  %2560 = vmatprep.subr.bf16.mxu1 %v2867_v0 }
 0x228   :  { %2545 = vmatmul.mubr.msk.bf16.vlgmr.msra.gmra.mrb[16].mxu0 %vm30_vm0, %v324_v45  ;;  %v729_v62 = vpop.permute.xlu0 %728 }
 0x229   :  { %2556 = vmatprep.mubr.msk.bf16.mxu0 %vm2868_vm1, %v2867_v0 }
 0x22a   :  { %2555 = vmatpush3.bf16.xpose.msra.mxu0 %v571_v46 }
 0x22b   :  { %2566 = vmatprep.subr.bf16.mxu0 %v2867_v0 }
 0x231   :  { %2557 = vmatmul.mubr.msk.bf16.vlgmr.msra.gmra.mrb[20].mxu0 %vm30_vm0, %v561_v39 }
 0x232   :  { %2567 = vmatpush3.bf16.xpose.msra.mxu0 %v683_v49  ;;  %2568 = vmatprep.mubr.msk.bf16.mxu0 %vm2868_vm1, %v2867_v0 }
 0x233   :  { %2578 = vmatprep.subr.bf16.mxu0 %v2867_v0 }
 0x251   :  { %v310_v50 = vpop.xlane.xlu1 %309 }
 0x252   :  { %2805 = vrcp.f32 %v310_v50 }
 0x255   :  { %v673_v51 = vpop.permute.xlu1 %672 }
 0x256   :  { %2569 = vmatmul.mubr.msk.bf16.vlgmr.msra.gmra.mrb[24].mxu0 %vm30_vm0, %v673_v51 }
 0x257   :  { %2580 = vmatprep.mubr.msk.bf16.mxu0 %vm2868_vm1, %v2867_v0 }
 0x259   :  { %v790_v52 = vpop.permute.xlu1 %789 }
 0x25a   :  { %v795_v53 = vsel %vm30_vm0, %v790_v52, 0 }
 0x25b   :  { %2579 = vmatpush3.bf16.xpose.msra.mxu0 %v795_v53 }
 0x25c   :  { %v2806_v54 = vpop.eup %2805  ;;  %2590 = vmatprep.subr.bf16.mxu0 %v2867_v0 }
 0x25d   :  { %v320_v55 = vmul.f32 %v2806_v54, %v3059_v22  ;;  %v785_v58 = vpop.permute.xlu1 %784 }
 0x25f   :  { %v325_v57 = vpack.c.bf16 %v320_v55, %v320_v55 }
 0x261   :  { %2551 = vmatmul.mubr.msk.bf16.vlgmr.msra.gmra.mrb[16].mxu1 %vm30_vm0, %v325_v57 }
 0x262   :  { %2561 = vmatpush3.bf16.xpose.msra.mxu1 %v627_v59  ;;  %2562 = vmatprep.mubr.msk.bf16.mxu1 %vm2868_vm1, %v2867_v0 }
 0x263   :  { %2572 = vmatprep.subr.bf16.mxu1 %v2867_v0  ;;  %2581 = vmatmul.mubr.msk.bf16.vlgmr.msra.gmra.mrb[28].mxu0 %vm30_vm0, %v785_v58 }
 0x264   :  { %2592 = vmatprep.mubr.msk.bf16.mxu0 %vm2868_vm1, %v2867_v0 }
 0x269   :  { %2563 = vmatmul.mubr.msk.bf16.vlgmr.msra.gmra.mrb[20].mxu1 %vm30_vm0, %v617_v56 }
 0x26a   :  { %2573 = vmatpush3.bf16.xpose.msra.mxu1 %v739_v61  ;;  %2574 = vmatprep.mubr.msk.bf16.mxu1 %vm2868_vm1, %v2867_v0 }
 0x26b   :  { %2584 = vmatprep.subr.bf16.mxu1 %v2867_v0 }
 0x271   :  { %2575 = vmatmul.mubr.msk.bf16.vlgmr.msra.gmra.mrb[24].mxu1 %vm30_vm0, %v729_v62 }
 0x272   :  { %2586 = vmatprep.mubr.msk.bf16.mxu1 %vm2868_vm1, %v2867_v0 }
 0x2ef   :  { %v3148_v63 = vpop.f32.mrb[8].mxu1 }
 0x2f0   :  { %v2528_v3 = vpop.f32.mrb[9].mxu1 }
 0x2f1   :  { %v370_v4 = vpop.f32.mrb[10].mxu1 }
 0x2f2   :  { %v2529_v16 = vpop.f32.mrb[11].mxu1 }
 0x2f3   :  { %v3150_v17 = vpop.f32.mrb[12].mxu0  ;;  %v3165_v16 = vcombine.low %v3021_v7, %v3021_v7  ;;  %v3183_v7 = vcombine.low %v3008_v10, %v3008_v10 }
 0x2f4   :  { %v2534_v20 = vpop.f32.mrb[13].mxu0 }
 0x2f5   :  { %v416_v8 = vpop.f32.mrb[14].mxu0  ;;  %v3171_v20 = vcombine.low %v3084_v11, %v3084_v11 }
 0x2f6   :  { %v2535_v21 = vpop.f32.mrb[15].mxu0  ;;  %v3177_v8 = vcombine.low %v3091_v32, %v3091_v32 }
 0x2f7   :  { %v3152_v22 = vpop.f32.mrb[12].mxu1 }
 0x2f8   :  { %v2540_v6 = vpop.f32.mrb[13].mxu1 }
 0x2f9   :  { %v462_v25 = vpop.f32.mrb[14].mxu1 }
 0x2fa   :  { %v2541_v12 = vpop.f32.mrb[15].mxu1 }
 0x2fb   :  { %v3154_v26 = vpop.f32.mrb[16].mxu0 }
 0x2fc   :  { %v2546_v27 = vpop.f32.mrb[17].mxu0 }
 0x2fd   :  { %v508_v28 = vpop.f32.mrb[18].mxu0 }
 0x2fe   :  { %v2547_v29 = vpop.f32.mrb[19].mxu0 }
 0x304   :  { %v607_v15 = vpop.f32.mrb[20].mxu0 }
 0x305   :  { %v837_v30 = vmul.f32 0.35355338, %v607_v15  ;;  %v2558_v31 = vpop.f32.mrb[21].mxu0 }
 0x306   :  { %v610_v33 = vpop.f32.mrb[22].mxu0 }
 0x307   :  { %v2559_v34 = vpop.f32.mrb[23].mxu0  ;;  %v842_v35 = vsel %vm30_vm0, %v837_v30, -inf }
 0x308   :  { %843 = vmax.xlane.f32.xlu0 %v842_v35 }
 0x329   :  { %v719_v36 = vpop.f32.mrb[24].mxu0 }
 0x32a   :  { %v839_v38 = vmul.f32 0.35355338, %v719_v36  ;;  %v2570_v39 = vpop.f32.mrb[25].mxu0 }
 0x32b   :  { %v722_v40 = vpop.f32.mrb[26].mxu0 }
 0x32c   :  { %v848_v41 = vsel %vm30_vm0, %v839_v38, -inf  ;;  %v2571_v42 = vpop.f32.mrb[27].mxu0 }
 0x32d   :  { %849 = vmax.xlane.f32.xlu0 %v848_v41 }
 0x334   :  { %v3158_v43 = vpop.f32.mrb[16].mxu1 }
 0x335   :  { %v2552_v44 = vpop.f32.mrb[17].mxu1 }
 0x336   :  { %v554_v45 = vpop.f32.mrb[18].mxu1  ;;  %v831_v46 = vpop.f32.mrb[28].mxu0 }
 0x337   :  { %v2553_v47 = vpop.f32.mrb[19].mxu1  ;;  %v2582_v48 = vpop.f32.mrb[29].mxu0  ;;  %v841_v59 = vmul.f32 0.35355338, %v831_v46  ;;  %v3198_v45 = vcombine.low %v3102_v37, %v3102_v37 }
 0x338   :  { %v834_v49 = vpop.f32.mrb[30].mxu0 }
 0x339   :  { %v2583_v50 = vpop.f32.mrb[31].mxu0  ;;  %v854_v4 = vsel %vm30_vm0, %v841_v59, -inf }
 0x33c   :  { %v663_v51 = vpop.f32.mrb[20].mxu1 }
 0x33d   :  { %v838_v52 = vmul.f32 0.35355338, %v663_v51  ;;  %v2564_v53 = vpop.f32.mrb[21].mxu1 }
 0x33e   :  { %v666_v54 = vpop.f32.mrb[22].mxu1 }
 0x33f   :  { %v2565_v55 = vpop.f32.mrb[23].mxu1  ;;  %v845_v56 = vsel %vm30_vm0, %v838_v52, -inf }
 0x340   :  { %846 = vmax.xlane.f32.xlu1 %v845_v56 }
 0x344   :  { %v775_v57 = vpop.f32.mrb[24].mxu1 }
 0x345   :  { %v840_v58 = vmul.f32 0.35355338, %v775_v57  ;;  %v2576_v60 = vpop.f32.mrb[25].mxu1 }
 0x346   :  { %v778_v61 = vpop.f32.mrb[26].mxu1 }
 0x347   :  { %v851_v62 = vsel %vm30_vm0, %v840_v58, -inf  ;;  %v2577_v3 = vpop.f32.mrb[27].mxu1 }
 0x348   :  { %852 = vmax.xlane.f32.xlu0 %v851_v62 }
 0x34c   :  { %855 = vmax.xlane.f32.xlu0 %v854_v4 }
 0x351   :  { %956 = vrot.lane.b32.xlu1 %v3165_v16, %s2869_s5 }
 0x355   :  { %1007 = vrot.lane.b32.xlu1 %v3171_v20, %s2869_s5 }
 0x359   :  { %1058 = vrot.lane.b32.xlu1 %v3177_v8, %s2869_s5 }
 0x362   :  { %905 = vrot.lane.b32.xlu0 %v3183_v7, %s2869_s5 }
 0x395   :  { %v844_v21 = vpop.xlane.xlu0 %843 }
 0x396   :  { %v857_v11 = vsub.f32 %v837_v30, %v844_v21 }
 0x398   :  { %v862_v6 = vmul.f32 1.442695, %v857_v11 }
 0x39a   :  { %2807 = vpow2.f32 %v862_v6 }
 0x3a4   :  { %v2808_v25 = vpop.eup %2807 }
 0x3a5   :  { %v872_v12 = vsel %vm30_vm0, %v2808_v25, 0.0 }
 0x3a6   :  { %873 = vadd.xlane.f32.xlu1 %v872_v12 }
 0x3ba   :  { %v850_v32 = vpop.xlane.xlu0 %849 }
 0x3bb   :  { %v859_v27 = vsub.f32 %v839_v38, %v850_v32 }
 0x3bd   :  { %v866_v28 = vmul.f32 1.442695, %v859_v27 }
 0x3bf   :  { %2809 = vpow2.f32 %v866_v28 }
 0x3c9   :  { %v2810_v29 = vpop.eup %2809 }
 0x3ca   :  { %v878_v15 = vsel %vm30_vm0, %v2810_v29, 0.0 }
 0x3cb   :  { %879 = vadd.xlane.f32.xlu1 %v878_v15 }
 0x3cd   :  { %v847_v10 = vpop.xlane.xlu1 %846 }
 0x3ce   :  { %v858_v31 = vsub.f32 %v838_v52, %v847_v10 }
 0x3d0   :  { %v864_v33 = vmul.f32 1.442695, %v858_v31 }
 0x3d1   :  { %v957_v34 = vpop.permute.xlu1 %956 }
 0x3d2   :  { %2811 = vpow2.f32 %v864_v33  ;;  %v962_v30 = vsel %vm329_vm2, %v957_v34, 0 }
 0x3d3   :  { %2591 = vmatpush3.bf16.msra.mxu0 %v962_v30 }
 0x3d4   :  { %2602 = vmatprep.subr.bf16.mxu0 %v2867_v0 }
 0x3d5   :  { %v853_v35 = vpop.xlane.xlu0 %852  ;;  %v1008_v37 = vpop.permute.xlu1 %1007 }
 0x3d6   :  { %v860_v47 = vsub.f32 %v840_v58, %v853_v35  ;;  %v1013_v57 = vsel %vm329_vm2, %v1008_v37, 0 }
 0x3d8   :  { %v868_v49 = vmul.f32 1.442695, %v860_v47 }
 0x3d9   :  { %v856_v36 = vpop.xlane.xlu0 %855  ;;  %v1059_v52 = vpop.permute.xlu1 %1058 }
 0x3da   :  { %v861_v42 = vsub.f32 %v841_v59, %v856_v36 }
 0x3dc   :  { %v2812_v39 = vpop.eup %2811  ;;  %1159 = vrot.lane.b32.xlu1 %v3034_v18, %s2870_s2  ;;  %v870_v44 = vmul.f32 1.442695, %v861_v42 }
 0x3dd   :  { %v875_v38 = vsel %vm30_vm0, %v2812_v39, 0.0  ;;  %v906_v40 = vpop.permute.xlu0 %905 }
 0x3de   :  { %876 = vadd.xlane.f32.xlu0 %v875_v38  ;;  %v911_v41 = vsel %vm329_vm2, %v906_v40, 0  ;;  %2813 = vpow2.f32 %v870_v44 }
 0x3df   :  { %2585 = vmatpush3.bf16.msra.mxu1 %v911_v41  ;;  %2815 = vpow2.f32 %v868_v49 }
 0x3e0   :  { %2596 = vmatprep.subr.bf16.mxu1 %v2867_v0 }
 0x3e8   :  { %v2814_v46 = vpop.eup %2813 }
 0x3e9   :  { %v884_v48 = vsel %vm30_vm0, %v2814_v46, 0.0  ;;  %v2816_v50 = vpop.eup %2815 }
 0x3ea   :  { %v881_v51 = vsel %vm30_vm0, %v2816_v50, 0.0 }
 0x3f4   :  { %1109 = vrot.lane.b32.xlu0 %v3198_v45, %s2869_s5 }
 0x400   :  { %885 = vadd.xlane.f32.xlu1 %v884_v48 }
 0x411   :  { %1157 = vrot.lane.b32.xlu1 %v3003_v9, %s2870_s2 }
 0x413   :  { %882 = vadd.xlane.f32.xlu0 %v881_v51 }
 0x415   :  { %1259 = vrot.lane.b32.xlu1 %v3030_v2, %s2870_s2 }
 0x419   :  { %1257 = vrot.lane.b32.xlu1 %v3065_v23, %s2870_s2 }
 0x41d   :  { %1359 = vrot.lane.b32.xlu1 %v3071_v13, %s2870_s2 }
 0x421   :  { %1520 = vrot.lane.b32.xlu1 %v3165_v16, %s2870_s2 }
 0x429   :  { %1209 = vrot.lane.b32.xlu0 %v3012_v14, %s2870_s2 }
 0x42d   :  { %1207 = vrot.lane.b32.xlu0 %v3043_v19, %s2870_s2 }
 0x431   :  { %1309 = vrot.lane.b32.xlu0 %v3049_v5, %s2870_s2 }
 0x433   :  { %v874_v53 = vpop.xlane.xlu1 %873 }
 0x434   :  { %2817 = vrcp.f32 %v874_v53 }
 0x435   :  { %1307 = vrot.lane.b32.xlu0 %v3055_v1, %s2870_s2 }
 0x439   :  { %1357 = vrot.lane.b32.xlu0 %v3077_v24, %s2870_s2 }
 0x43e   :  { %v2818_v54 = vpop.eup %2817 }
 0x43f   :  { %v892_v55 = vmul.f32 %v2818_v54, %v2808_v25  ;;  %v1064_v25 = vsel %vm329_vm2, %v1059_v52, 0 }
 0x441   :  { %v897_v56 = vpack.c.bf16 %v892_v55, %v892_v55 }
 0x443   :  { %2587 = vmatmul.mubr.msk.bf16.vlgmr.msra.gmra.mrb[28].mxu1 %vm30_vm0, %v897_v56 }
 0x444   :  { %2597 = vmatpush3.bf16.msra.mxu1 %v1013_v57  ;;  %2598 = vmatprep.mubr.msk.bf16.mxu1 %vm2868_vm1, %v2867_v0 }
 0x445   :  { %2608 = vmatprep.subr.bf16.mxu1 %v2867_v0 }
 0x458   :  { %v880_v58 = vpop.xlane.xlu1 %879 }
 0x459   :  { %2819 = vrcp.f32 %v880_v58 }
 0x45c   :  { %v1160_v12 = vpop.permute.xlu1 %1159 }
 0x45d   :  { %v1165_v40 = vsel %vm30_vm0, %v1160_v12, 0 }
 0x463   :  { %v2820_v59 = vpop.eup %2819 }
 0x464   :  { %v894_v60 = vmul.f32 %v2820_v59, %v2810_v29 }
 0x466   :  { %v899_v61 = vpack.c.bf16 %v894_v60, %v894_v60 }
 0x468   :  { %2599 = vmatmul.mubr.msk.bf16.vlgmr.msra.gmra.mrb[32].mxu1 %vm30_vm0, %v899_v61 }
 0x469   :  { %2610 = vmatprep.mubr.msk.bf16.mxu1 %vm2868_vm1, %v2867_v0 }
 0x46b   :  { %v877_v62 = vpop.xlane.xlu0 %876 }
 0x46c   :  { %2821 = vrcp.f32 %v877_v62 }
 0x46f   :  { %v1110_v3 = vpop.permute.xlu0 %1109 }
 0x470   :  { %v1115_v4 = vsel %vm329_vm2, %v1110_v3, 0 }
 0x471   :  { %2609 = vmatpush3.bf16.msra.mxu1 %v1115_v4 }
 0x472   :  { %2620 = vmatprep.subr.bf16.mxu1 %v2867_v0 }
 0x476   :  { %v2822_v21 = vpop.eup %2821 }
 0x477   :  { %v893_v11 = vmul.f32 %v2822_v21, %v2812_v39 }
 0x479   :  { %v898_v6 = vpack.c.bf16 %v893_v11, %v893_v11 }
 0x47b   :  { %2593 = vmatmul.mubr.msk.bf16.vlgmr.msra.gmra.mrb[32].mxu0 %vm30_vm0, %v898_v6 }
 0x47c   :  { %2603 = vmatpush3.bf16.msra.mxu0 %v1064_v25  ;;  %2604 = vmatprep.mubr.msk.bf16.mxu0 %vm2868_vm1, %v2867_v0 }
 0x47d   :  { %2614 = vmatprep.subr.bf16.mxu0 %v2867_v0 }
 0x48d   :  { %v886_v32 = vpop.xlane.xlu1 %885 }
 0x48e   :  { %2823 = vrcp.f32 %v886_v32 }
 0x491   :  { %v1158_v36 = vpop.permute.xlu1 %1157 }
 0x495   :  { %v1260_v42 = vpop.permute.xlu1 %1259 }
 0x496   :  { %v1265_v44 = vsel %vm30_vm0, %v1260_v42, 0 }
 0x498   :  { %v2824_v27 = vpop.eup %2823 }
 0x499   :  { %v896_v28 = vmul.f32 %v2824_v27, %v2814_v46  ;;  %v1258_v46 = vpop.permute.xlu1 %1257 }
 0x49b   :  { %v901_v29 = vpack.c.bf16 %v896_v28, %v896_v28 }
 0x49d   :  { %2611 = vmatmul.mubr.msk.bf16.vlgmr.msra.gmra.mrb[36].mxu1 %vm30_vm0, %v901_v29  ;;  %v1360_v47 = vpop.permute.xlu1 %1359 }
 0x49e   :  { %2622 = vmatprep.mubr.msk.bf16.mxu1 %vm2868_vm1, %v2867_v0  ;;  %v1365_v48 = vsel %vm30_vm0, %v1360_v47, 0 }
 0x4a0   :  { %v883_v15 = vpop.xlane.xlu0 %882 }
 0x4a1   :  { %2825 = vrcp.f32 %v883_v15  ;;  %v1521_v57 = vpop.permute.xlu1 %1520 }
 0x4a2   :  { %v1526_v58 = vsel %vm329_vm2, %v1521_v57, 0 }
 0x4a4   :  { %v1210_v10 = vpop.permute.xlu0 %1209 }
 0x4a5   :  { %v1215_v31 = vsel %vm30_vm0, %v1210_v10, 0 }
 0x4a6   :  { %2621 = vmatpush3.bf16.xpose.msra.mxu1 %v1215_v31 }
 0x4a7   :  { %2632 = vmatprep.subr.bf16.mxu1 %v2867_v0 }
 0x4a8   :  { %v1208_v33 = vpop.permute.xlu0 %1207 }
 0x4ab   :  { %v2826_v34 = vpop.eup %2825 }
 0x4ac   :  { %v895_v30 = vmul.f32 %v2826_v34, %v2816_v50  ;;  %v1310_v35 = vpop.permute.xlu0 %1309 }
 0x4ad   :  { %2623 = vmatmul.mubr.msk.bf16.vlgmr.msra.gmra.mrb[40].mxu1 %vm30_vm0, %v1208_v33  ;;  %v1315_v39 = vsel %vm30_vm0, %v1310_v35, 0 }
 0x4ae   :  { %v900_v38 = vpack.c.bf16 %v895_v30, %v895_v30  ;;  %2633 = vmatpush3.bf16.xpose.msra.mxu1 %v1315_v39  ;;  %2634 = vmatprep.mubr.msk.bf16.mxu1 %vm2868_vm1, %v2867_v0 }
 0x4af   :  { %2644 = vmatprep.subr.bf16.mxu1 %v2867_v0 }
 0x4b0   :  { %2605 = vmatmul.mubr.msk.bf16.vlgmr.msra.gmra.mrb[36].mxu0 %vm30_vm0, %v900_v38  ;;  %v1308_v41 = vpop.permute.xlu0 %1307 }
 0x4b1   :  { %2615 = vmatpush3.bf16.xpose.msra.mxu0 %v1165_v40  ;;  %2616 = vmatprep.mubr.msk.bf16.mxu0 %vm2868_vm1, %v2867_v0 }
 0x4b2   :  { %2626 = vmatprep.subr.bf16.mxu0 %v2867_v0 }
 0x4b4   :  { %v1358_v49 = vpop.permute.xlu0 %1357 }
 0x4b5   :  { %2635 = vmatmul.mubr.msk.bf16.vlgmr.msra.gmra.mrb[44].mxu1 %vm30_vm0, %v1308_v41 }
 0x4b6   :  { %2646 = vmatprep.mubr.msk.bf16.mxu1 %vm2868_vm1, %v2867_v0 }
 0x4b8   :  { %2617 = vmatmul.mubr.msk.bf16.vlgmr.msra.gmra.mrb[40].mxu0 %vm30_vm0, %v1158_v36 }
 0x4b9   :  { %2627 = vmatpush3.bf16.xpose.msra.mxu0 %v1265_v44  ;;  %2628 = vmatprep.mubr.msk.bf16.mxu0 %vm2868_vm1, %v2867_v0 }
 0x4ba   :  { %2638 = vmatprep.subr.bf16.mxu0 %v2867_v0 }
 0x4c0   :  { %2629 = vmatmul.mubr.msk.bf16.vlgmr.msra.gmra.mrb[44].mxu0 %vm30_vm0, %v1258_v46 }
 0x4c1   :  { %2639 = vmatpush3.bf16.xpose.msra.mxu0 %v1365_v48  ;;  %2640 = vmatprep.mubr.msk.bf16.mxu0 %vm2868_vm1, %v2867_v0 }
 0x4c2   :  { %2650 = vmatprep.subr.bf16.mxu0 %v2867_v0 }
 0x4c8   :  { %2641 = vmatmul.mubr.msk.bf16.vlgmr.msra.gmra.mrb[48].mxu0 %vm30_vm0, %v1358_v49 }
 0x4c9   :  { %2652 = vmatprep.mubr.msk.bf16.mxu0 %vm2868_vm1, %v2867_v0  ;;  %2651 = vmatpush3.bf16.msra.mxu0 %v1526_v58 }
 0x4ca   :  { %2662 = vmatprep.subr.bf16.mxu0 %v2867_v0 }
 0x516   :  { %v3270_v50 = vpop.f32.mrb[28].mxu1 }
 0x517   :  { %v2588_v51 = vpop.f32.mrb[29].mxu1 }
 0x518   :  { %v950_v37 = vpop.f32.mrb[30].mxu1 }
 0x519   :  { %v2589_v52 = vpop.f32.mrb[31].mxu1 }
 0x53b   :  { %v3272_v53 = vpop.f32.mrb[32].mxu1 }
 0x53c   :  { %v2600_v54 = vpop.f32.mrb[33].mxu1 }
 0x53d   :  { %v1052_v55 = vpop.f32.mrb[34].mxu1 }
 0x53e   :  { %v2601_v56 = vpop.f32.mrb[35].mxu1 }
 0x54e   :  { %v3276_v59 = vpop.f32.mrb[32].mxu0 }
 0x54f   :  { %v2742_v60 = vpack.i.bf16 %v3276_v59, %v3270_v50  ;;  %v2594_v61 = vpop.f32.mrb[33].mxu0 }
 0x550   :  { %v1001_v62 = vpop.f32.mrb[34].mxu0 }
 0x551   :  { %v2595_v3 = vpop.f32.mrb[35].mxu0 }
 0x570   :  { %v3280_v4 = vpop.f32.mrb[36].mxu1 }
 0x571   :  { %v2612_v21 = vpop.f32.mrb[37].mxu1 }
 0x572   :  { %v1154_v11 = vpop.f32.mrb[38].mxu1 }
 0x573   :  { %v2613_v6 = vpop.f32.mrb[39].mxu1 }
 0x580   :  { %v1251_v25 = vpop.f32.mrb[40].mxu1 }
 0x581   :  { %v1408_v12 = vmul.f32 0.35355338, %v1251_v25  ;;  %v2624_v32 = vpop.f32.mrb[41].mxu1 }
 0x582   :  { %v1254_v27 = vpop.f32.mrb[42].mxu1 }
 0x583   :  { %v3282_v28 = vpop.f32.mrb[36].mxu0  ;;  %v1415_v29 = vsel %vm30_vm0, %v1408_v12, -inf  ;;  %v2625_v15 = vpop.f32.mrb[43].mxu1 }
 0x584   :  { %v2747_v10 = vpack.i.bf16 %v3282_v28, %v3272_v53  ;;  %1416 = vmax.xlane.f32.xlu0 %v1415_v29  ;;  %v2606_v31 = vpop.f32.mrb[37].mxu0 }
 0x585   :  { %v1103_v33 = vpop.f32.mrb[38].mxu0 }
 0x586   :  { %v2607_v34 = vpop.f32.mrb[39].mxu0 }
 0x588   :  { %v1351_v30 = vpop.f32.mrb[44].mxu1 }
 0x589   :  { %v2636_v35 = vpop.f32.mrb[45].mxu1  ;;  %v1410_v51 = vmul.f32 0.35355338, %v1351_v30 }
 0x58a   :  { %v1354_v36 = vpop.f32.mrb[46].mxu1 }
 0x58b   :  { %v1201_v39 = vpop.f32.mrb[40].mxu0  ;;  %v2637_v38 = vpop.f32.mrb[47].mxu1  ;;  %v1421_v55 = vsel %vm30_vm0, %v1410_v51, -inf }
 0x58c   :  { %v1407_v40 = vmul.f32 0.35355338, %v1201_v39  ;;  %v2618_v41 = vpop.f32.mrb[41].mxu0 }
 0x58d   :  { %v1204_v42 = vpop.f32.mrb[42].mxu0 }
 0x58e   :  { %v2619_v44 = vpop.f32.mrb[43].mxu0  ;;  %v1412_v46 = vsel %vm30_vm0, %v1407_v40, -inf }
 0x58f   :  { %1413 = vmax.xlane.f32.xlu1 %v1412_v46 }
 0x593   :  { %v1301_v47 = vpop.f32.mrb[44].mxu0 }
 0x594   :  { %v1409_v48 = vmul.f32 0.35355338, %v1301_v47  ;;  %v2630_v49 = vpop.f32.mrb[45].mxu0 }
 0x595   :  { %v1304_v37 = vpop.f32.mrb[46].mxu0 }
 0x596   :  { %v2631_v52 = vpop.f32.mrb[47].mxu0  ;;  %v1418_v54 = vsel %vm30_vm0, %v1409_v48, -inf }
 0x597   :  { %1419 = vmax.xlane.f32.xlu0 %v1418_v54 }
 0x59b   :  { %1422 = vmax.xlane.f32.xlu0 %v1421_v55  ;;  %v1401_v56 = vpop.f32.mrb[48].mxu0 }
 0x59c   :  { %v2642_v57 = vpop.f32.mrb[49].mxu0  ;;  %v1411_v62 = vmul.f32 0.35355338, %v1401_v56 }
 0x59d   :  { %v1404_v58 = vpop.f32.mrb[50].mxu0 }
 0x59e   :  { %v2643_v61 = vpop.f32.mrb[51].mxu0  ;;  %v1424_v3 = vsel %vm30_vm0, %v1411_v62, -inf }
 0x5a0   :  { %1616 = vrot.lane.b32.xlu1 %v3177_v8, %s2870_s2 }
 0x5b1   :  { %1472 = vrot.lane.b32.xlu0 %v3183_v7, %s2870_s2 }
 0x5c4   :  { %1425 = vmax.xlane.f32.xlu1 %v1424_v3 }
 0x5d5   :  { %1568 = vrot.lane.b32.xlu1 %v3171_v20, %s2870_s2 }
 0x611   :  { %v1417_v21 = vpop.xlane.xlu0 %1416 }
 0x612   :  { %v1428_v11 = vsub.f32 %v1408_v12, %v1417_v21 }
 0x614   :  { %v1434_v6 = vmul.f32 1.442695, %v1428_v11 }
 0x616   :  { %2827 = vpow2.f32 %v1434_v6 }
 0x61c   :  { %v1414_v25 = vpop.xlane.xlu1 %1413 }
 0x61d   :  { %v1427_v32 = vsub.f32 %v1407_v40, %v1414_v25 }
 0x61f   :  { %v1432_v27 = vmul.f32 1.442695, %v1427_v32 }
 0x620   :  { %v2828_v29 = vpop.eup %2827  ;;  %v1617_v44 = vpop.permute.xlu1 %1616 }
 0x621   :  { %2829 = vpow2.f32 %v1432_v27  ;;  %v1445_v15 = vsel %vm30_vm0, %v2828_v29, 0.0  ;;  %v1622_v54 = vsel %vm329_vm2, %v1617_v44, 0 }
 0x622   :  { %1446 = vadd.xlane.f32.xlu1 %v1445_v15 }
 0x624   :  { %v1420_v31 = vpop.xlane.xlu0 %1419 }
 0x625   :  { %v1429_v33 = vsub.f32 %v1409_v48, %v1420_v31 }
 0x627   :  { %v1436_v34 = vmul.f32 1.442695, %v1429_v33 }
 0x628   :  { %v1423_v30 = vpop.xlane.xlu0 %1422 }
 0x629   :  { %2831 = vpow2.f32 %v1436_v34  ;;  %v1430_v41 = vsub.f32 %v1410_v51, %v1423_v30 }
 0x62b   :  { %v2830_v35 = vpop.eup %2829  ;;  %v1438_v42 = vmul.f32 1.442695, %v1430_v41 }
 0x62c   :  { %v1442_v36 = vsel %vm30_vm0, %v2830_v35, 0.0  ;;  %v1473_v39 = vpop.permute.xlu0 %1472 }
 0x62d   :  { %1443 = vadd.xlane.f32.xlu0 %v1442_v36  ;;  %v1478_v12 = vsel %vm329_vm2, %v1473_v39, 0  ;;  %2833 = vpow2.f32 %v1438_v42 }
 0x62e   :  { %2645 = vmatpush3.bf16.msra.mxu1 %v1478_v12 }
 0x62f   :  { %2656 = vmatprep.subr.bf16.mxu1 %v2867_v0 }
 0x633   :  { %v2832_v38 = vpop.eup %2831  ;;  %1664 = vrot.lane.b32.xlu1 %v3198_v45, %s2870_s2 }
 0x634   :  { %v1448_v40 = vsel %vm30_vm0, %v2832_v38, 0.0 }
 0x635   :  { %1449 = vadd.xlane.f32.xlu0 %v1448_v40 }
 0x637   :  { %v2834_v47 = vpop.eup %2833 }
 0x638   :  { %v1451_v49 = vsel %vm30_vm0, %v2834_v47, 0.0 }
 0x64b   :  { %1714 = vrot.lane.b32.xlu0 %v3034_v18, %s2871_s14 }
 0x651   :  { %v1426_v46 = vpop.xlane.xlu1 %1425 }
 0x652   :  { %v1431_v48 = vsub.f32 %v1411_v62, %v1426_v46 }
 0x654   :  { %v1440_v37 = vmul.f32 1.442695, %v1431_v48 }
 0x656   :  { %2835 = vpow2.f32 %v1440_v37 }
 0x657   :  { %1452 = vadd.xlane.f32.xlu1 %v1451_v49 }
 0x660   :  { %v3307_v52 = vpop.eup %2835 }
 0x661   :  { %v1454_v51 = vsel %vm30_vm0, %v3307_v52, 0.0 }
 0x668   :  { %1712 = vrot.lane.b32.xlu1 %v3003_v9, %s2871_s14  ;;  %v1569_v9 = vpop.permute.xlu1 %1568 }
 0x669   :  { %v1574_v55 = vsel %vm329_vm2, %v1569_v9, 0 }
 0x66a   :  { %1455 = vadd.xlane.f32.xlu0 %v1454_v51 }
 0x66c   :  { %1814 = vrot.lane.b32.xlu1 %v3030_v2, %s2871_s14 }
 0x670   :  { %1812 = vrot.lane.b32.xlu1 %v3065_v23, %s2871_s14 }
 0x674   :  { %1914 = vrot.lane.b32.xlu1 %v3071_v13, %s2871_s14 }
 0x678   :  { %1912 = vrot.lane.b32.xlu1 %v3077_v24, %s2871_s14 }
 0x680   :  { %1764 = vrot.lane.b32.xlu0 %v3012_v14, %s2871_s14 }
 0x684   :  { %1762 = vrot.lane.b32.xlu0 %v3043_v19, %s2871_s14 }
 0x688   :  { %1864 = vrot.lane.b32.xlu0 %v3049_v5, %s2871_s14 }
 0x68c   :  { %1862 = vrot.lane.b32.xlu0 %v3055_v1, %s2871_s14 }
 0x6af   :  { %v1447_v2 = vpop.xlane.xlu1 %1446 }
 0x6b0   :  { %2837 = vrcp.f32 %v1447_v2 }
 0x6b3   :  { %v1665_v58 = vpop.permute.xlu1 %1664 }
 0x6b4   :  { %v1670_v62 = vsel %vm329_vm2, %v1665_v58, 0 }
 0x6ba   :  { %v2838_v18 = vpop.eup %2837  ;;  %v1444_v23 = vpop.xlane.xlu0 %1443 }
 0x6bb   :  { %v1463_v13 = vmul.f32 %v2838_v18, %v2828_v29  ;;  %2839 = vrcp.f32 %v1444_v23 }
 0x6bd   :  { %v1468_v24 = vpack.c.bf16 %v1463_v13, %v1463_v13 }
 0x6bf   :  { %2653 = vmatmul.mubr.msk.bf16.vlgmr.msra.gmra.mrb[52].mxu0 %vm30_vm0, %v1468_v24 }
 0x6c0   :  { %2663 = vmatpush3.bf16.msra.mxu0 %v1622_v54  ;;  %2664 = vmatprep.mubr.msk.bf16.mxu0 %vm2868_vm1, %v2867_v0 }
 0x6c1   :  { %2674 = vmatprep.subr.bf16.mxu0 %v2867_v0 }
 0x6c2   :  { %v1450_v14 = vpop.xlane.xlu0 %1449 }
 0x6c3   :  { %2841 = vrcp.f32 %v1450_v14 }
 0x6c5   :  { %v2840_v19 = vpop.eup %2839 }
 0x6c6   :  { %v1462_v5 = vmul.f32 %v2840_v19, %v2830_v35  ;;  %v1715_v6 = vpop.permute.xlu0 %1714 }
 0x6c7   :  { %v1720_v27 = vsel %vm30_vm0, %v1715_v6, 0 }
 0x6c8   :  { %v1467_v1 = vpack.c.bf16 %v1462_v5, %v1462_v5 }
 0x6ca   :  { %2647 = vmatmul.mubr.msk.bf16.vlgmr.msra.gmra.mrb[48].mxu1 %vm30_vm0, %v1467_v1 }
 0x6cb   :  { %2657 = vmatpush3.bf16.msra.mxu1 %v1574_v55  ;;  %2658 = vmatprep.mubr.msk.bf16.mxu1 %vm2868_vm1, %v2867_v0 }
 0x6cc   :  { %2668 = vmatprep.subr.bf16.mxu1 %v2867_v0 }
 0x6cd   :  { %v2842_v56 = vpop.eup %2841 }
 0x6ce   :  { %v1464_v57 = vmul.f32 %v2842_v56, %v2832_v38 }
 0x6d0   :  { %v1469_v61 = vpack.c.bf16 %v1464_v57, %v1464_v57 }
 0x6d2   :  { %2659 = vmatmul.mubr.msk.bf16.vlgmr.msra.gmra.mrb[52].mxu1 %vm30_vm0, %v1469_v61 }
 0x6d3   :  { %2669 = vmatpush3.bf16.msra.mxu1 %v1670_v62  ;;  %2670 = vmatprep.mubr.msk.bf16.mxu1 %vm2868_vm1, %v2867_v0 }
 0x6d4   :  { %2680 = vmatprep.subr.bf16.mxu1 %v2867_v0 }
 0x6e4   :  { %v1453_v3 = vpop.xlane.xlu1 %1452 }
 0x6e5   :  { %2843 = vrcp.f32 %v1453_v3 }
 0x6e8   :  { %v1713_v25 = vpop.permute.xlu1 %1712 }
 0x6ec   :  { %v1815_v15 = vpop.permute.xlu1 %1814 }
 0x6ed   :  { %v1820_v31 = vsel %vm30_vm0, %v1815_v15, 0 }
 0x6ef   :  { %v2844_v21 = vpop.eup %2843 }
 0x6f0   :  { %v1465_v11 = vmul.f32 %v2844_v21, %v2834_v47  ;;  %v1813_v33 = vpop.permute.xlu1 %1812 }
 0x6f2   :  { %v1470_v32 = vpack.c.bf16 %v1465_v11, %v1465_v11 }
 0x6f4   :  { %2665 = vmatmul.mubr.msk.bf16.vlgmr.msra.gmra.mrb[56].mxu0 %vm30_vm0, %v1470_v32  ;;  %v1915_v30 = vpop.permute.xlu1 %1914 }
 0x6f5   :  { %2675 = vmatpush3.bf16.xpose.msra.mxu0 %v1720_v27  ;;  %2676 = vmatprep.mubr.msk.bf16.mxu0 %vm2868_vm1, %v2867_v0  ;;  %v1920_v36 = vsel %vm30_vm0, %v1915_v30, 0 }
 0x6f6   :  { %2686 = vmatprep.subr.bf16.mxu0 %v2867_v0 }
 0x6f7   :  { %v1456_v29 = vpop.xlane.xlu0 %1455 }
 0x6f8   :  { %2845 = vrcp.f32 %v1456_v29  ;;  %v1913_v41 = vpop.permute.xlu1 %1912 }
 0x6fb   :  { %v1765_v34 = vpop.permute.xlu0 %1764 }
 0x6fc   :  { %2677 = vmatmul.mubr.msk.bf16.vlgmr.msra.gmra.mrb[60].mxu0 %vm30_vm0, %v1713_v25  ;;  %v1770_v38 = vsel %vm30_vm0, %v1765_v34, 0 }
 0x6fd   :  { %2687 = vmatpush3.bf16.xpose.msra.mxu0 %v1820_v31  ;;  %2688 = vmatprep.mubr.msk.bf16.mxu0 %vm2868_vm1, %v2867_v0 }
 0x6fe   :  { %2698 = vmatprep.subr.bf16.mxu0 %v2867_v0 }
 0x6ff   :  { %v1763_v12 = vpop.permute.xlu0 %1762 }
 0x702   :  { %v2846_v35 = vpop.eup %2845 }
 0x703   :  { %v1466_v39 = vmul.f32 %v2846_v35, %v3307_v52  ;;  %v1865_v42 = vpop.permute.xlu0 %1864 }
 0x704   :  { %2689 = vmatmul.mubr.msk.bf16.vlgmr.msra.gmra.mrb[64].mxu0 %vm30_vm0, %v1813_v33  ;;  %v1870_v44 = vsel %vm30_vm0, %v1865_v42, 0 }
 0x705   :  { %v1471_v40 = vpack.c.bf16 %v1466_v39, %v1466_v39  ;;  %2699 = vmatpush3.bf16.xpose.msra.mxu0 %v1920_v36  ;;  %2700 = vmatprep.mubr.msk.bf16.mxu0 %vm2868_vm1, %v2867_v0 }
 0x706   :  { %2710 = vmatprep.subr.bf16.mxu0 %v2867_v0 }
 0x707   :  { %2671 = vmatmul.mubr.msk.bf16.vlgmr.msra.gmra.mrb[56].mxu1 %vm30_vm0, %v1471_v40  ;;  %v1863_v46 = vpop.permute.xlu0 %1862 }
 0x708   :  { %2681 = vmatpush3.bf16.xpose.msra.mxu1 %v1770_v38  ;;  %2682 = vmatprep.mubr.msk.bf16.mxu1 %vm2868_vm1, %v2867_v0 }
 0x709   :  { %2692 = vmatprep.subr.bf16.mxu1 %v2867_v0 }
 0x70c   :  { %2701 = vmatmul.mubr.msk.bf16.vlgmr.msra.gmra.mrb[68].mxu0 %vm30_vm0, %v1913_v41 }
 0x70d   :  { %2712 = vmatprep.mubr.msk.bf16.mxu0 %vm2868_vm1, %v2867_v0 }
 0x70f   :  { %2683 = vmatmul.mubr.msk.bf16.vlgmr.msra.gmra.mrb[60].mxu1 %vm30_vm0, %v1763_v12 }
 0x710   :  { %2693 = vmatpush3.bf16.xpose.msra.mxu1 %v1870_v44  ;;  %2694 = vmatprep.mubr.msk.bf16.mxu1 %vm2868_vm1, %v2867_v0 }
 0x711   :  { %2704 = vmatprep.subr.bf16.mxu1 %v2867_v0 }
 0x717   :  { %2695 = vmatmul.mubr.msk.bf16.vlgmr.msra.gmra.mrb[64].mxu1 %vm30_vm0, %v1863_v46 }
 0x718   :  { %2706 = vmatprep.mubr.msk.bf16.mxu1 %vm2868_vm1, %v2867_v0 }
 0x792   :  { %v3376_v47 = vpop.f32.mrb[52].mxu0 }
 0x793   :  { %v2654_v48 = vpop.f32.mrb[53].mxu0 }
 0x794   :  { %v1565_v49 = vpop.f32.mrb[54].mxu0 }
 0x795   :  { %v2655_v37 = vpop.f32.mrb[55].mxu0 }
 0x79d   :  { %v3378_v52 = vpop.f32.mrb[48].mxu1 }
 0x79e   :  { %v2752_v51 = vpack.i.bf16 %v3376_v47, %v3378_v52  ;;  %v2648_v9 = vpop.f32.mrb[49].mxu1 }
 0x79f   :  { %v1517_v2 = vpop.f32.mrb[50].mxu1 }
 0x7a0   :  { %v2649_v18 = vpop.f32.mrb[51].mxu1 }
 0x7a5   :  { %v3382_v23 = vpop.f32.mrb[52].mxu1 }
 0x7a6   :  { %v2660_v13 = vpop.f32.mrb[53].mxu1 }
 0x7a7   :  { %v1613_v24 = vpop.f32.mrb[54].mxu1 }
 0x7a8   :  { %v2661_v54 = vpop.f32.mrb[55].mxu1 }
 0x7c7   :  { %v3384_v14 = vpop.f32.mrb[56].mxu0 }
 0x7c8   :  { %v2757_v19 = vpack.i.bf16 %v3384_v14, %v3382_v23  ;;  %v2666_v5 = vpop.f32.mrb[57].mxu0 }
 0x7c9   :  { %v1661_v1 = vpop.f32.mrb[58].mxu0 }
 0x7ca   :  { %v2667_v55 = vpop.f32.mrb[59].mxu0 }
 0x7cf   :  { %v1756_v56 = vpop.f32.mrb[60].mxu0 }
 0x7d0   :  { %v1962_v57 = vmul.f32 0.35355338, %v1756_v56  ;;  %v2678_v58 = vpop.f32.mrb[61].mxu0 }
 0x7d1   :  { %v1759_v61 = vpop.f32.mrb[62].mxu0 }
 0x7d2   :  { %v1967_v62 = vsel %vm30_vm0, %v1962_v57, -inf  ;;  %v2679_v3 = vpop.f32.mrb[63].mxu0 }
 0x7d3   :  { %1968 = vmax.xlane.f32.xlu0 %v1967_v62 }
 0x7d7   :  { %v1856_v21 = vpop.f32.mrb[64].mxu0 }
 0x7d8   :  { %v1964_v11 = vmul.f32 0.35355338, %v1856_v21  ;;  %v2690_v6 = vpop.f32.mrb[65].mxu0 }
 0x7d9   :  { %v1859_v25 = vpop.f32.mrb[66].mxu0 }
 0x7da   :  { %v3389_v32 = vpop.f32.mrb[56].mxu1  ;;  %v1973_v27 = vsel %vm30_vm0, %v1964_v11, -inf  ;;  %v2691_v29 = vpop.f32.mrb[67].mxu0 }
 0x7db   :  { %v2672_v15 = vpop.f32.mrb[57].mxu1  ;;  %1974 = vmax.xlane.f32.xlu0 %v1973_v27 }
 0x7dc   :  { %v1709_v31 = vpop.f32.mrb[58].mxu1 }
 0x7dd   :  { %v2673_v33 = vpop.f32.mrb[59].mxu1 }
 0x7df   :  { %v1956_v34 = vpop.f32.mrb[68].mxu0 }
 0x7e0   :  { %v2702_v30 = vpop.f32.mrb[69].mxu0  ;;  %v1966_v49 = vmul.f32 0.35355338, %v1956_v34 }
 0x7e1   :  { %v1959_v35 = vpop.f32.mrb[70].mxu0 }
 0x7e2   :  { %v1806_v36 = vpop.f32.mrb[60].mxu1  ;;  %v2703_v39 = vpop.f32.mrb[71].mxu0  ;;  %v1979_v18 = vsel %vm30_vm0, %v1966_v49, -inf }
 0x7e3   :  { %v1963_v12 = vmul.f32 0.35355338, %v1806_v36  ;;  %v2684_v38 = vpop.f32.mrb[61].mxu1 }
 0x7e4   :  { %v1809_v40 = vpop.f32.mrb[62].mxu1 }
 0x7e5   :  { %v2685_v41 = vpop.f32.mrb[63].mxu1  ;;  %v1970_v42 = vsel %vm30_vm0, %v1963_v12, -inf }
 0x7e6   :  { %1971 = vmax.xlane.f32.xlu1 %v1970_v42 }
 0x7ea   :  { %v1906_v44 = vpop.f32.mrb[64].mxu1 }
 0x7eb   :  { %v1965_v46 = vmul.f32 0.35355338, %v1906_v44  ;;  %v2696_v48 = vpop.f32.mrb[65].mxu1 }
 0x7ec   :  { %v1909_v37 = vpop.f32.mrb[66].mxu1 }
 0x7ed   :  { %v2697_v9 = vpop.f32.mrb[67].mxu1  ;;  %v1976_v2 = vsel %vm30_vm0, %v1965_v46, -inf }
 0x7ee   :  { %1977 = vmax.xlane.f32.xlu0 %v1976_v2 }
 0x7f2   :  { %1980 = vmax.xlane.f32.xlu0 %v1979_v18 }
 0x7f7   :  { %2075 = vrot.lane.b32.xlu1 %v3165_v16, %s2871_s14 }
 0x7fb   :  { %2123 = vrot.lane.b32.xlu1 %v3171_v20, %s2871_s14 }
 0x808   :  { %2027 = vrot.lane.b32.xlu0 %v3183_v7, %s2871_s14 }
 0x860   :  { %v1969_v13 = vpop.xlane.xlu0 %1968 }
 0x861   :  { %v1982_v24 = vsub.f32 %v1962_v57, %v1969_v13 }
 0x863   :  { %v1987_v54 = vmul.f32 1.442695, %v1982_v24 }
 0x865   :  { %2847 = vpow2.f32 %v1987_v54 }
 0x868   :  { %v1975_v5 = vpop.xlane.xlu0 %1974 }
 0x869   :  { %v1984_v1 = vsub.f32 %v1964_v11, %v1975_v5 }
 0x86b   :  { %v1991_v55 = vmul.f32 1.442695, %v1984_v1 }
 0x86d   :  { %2849 = vpow2.f32 %v1991_v55 }
 0x86f   :  { %v2848_v56 = vpop.eup %2847 }
 0x870   :  { %v1997_v58 = vsel %vm30_vm0, %v2848_v56, 0.0 }
 0x871   :  { %1998 = vadd.xlane.f32.xlu1 %v1997_v58 }
 0x873   :  { %v1972_v61 = vpop.xlane.xlu1 %1971 }
 0x874   :  { %v1983_v16 = vsub.f32 %v1963_v12, %v1972_v61 }
 0x876   :  { %v1989_v62 = vmul.f32 1.442695, %v1983_v16 }
 0x877   :  { %v2850_v3 = vpop.eup %2849  ;;  %v2076_v20 = vpop.permute.xlu1 %2075 }
 0x878   :  { %2851 = vpow2.f32 %v1989_v62  ;;  %v2003_v7 = vsel %vm30_vm0, %v2850_v3, 0.0  ;;  %v2081_v57 = vsel %vm329_vm2, %v2076_v20, 0 }
 0x879   :  { %2004 = vadd.xlane.f32.xlu1 %v2003_v7  ;;  %2711 = vmatpush3.bf16.msra.mxu0 %v2081_v57 }
 0x87a   :  { %2722 = vmatprep.subr.bf16.mxu0 %v2867_v0 }
 0x87b   :  { %v1978_v21 = vpop.xlane.xlu0 %1977 }
 0x87c   :  { %v1985_v11 = vsub.f32 %v1965_v46, %v1978_v21 }
 0x87e   :  { %v1993_v6 = vmul.f32 1.442695, %v1985_v11 }
 0x87f   :  { %v1981_v25 = vpop.xlane.xlu0 %1980 }
 0x880   :  { %2853 = vpow2.f32 %v1993_v6  ;;  %v1986_v27 = vsub.f32 %v1966_v49, %v1981_v25 }
 0x882   :  { %v2852_v29 = vpop.eup %2851  ;;  %v1995_v15 = vmul.f32 1.442695, %v1986_v27 }
 0x883   :  { %v2000_v31 = vsel %vm30_vm0, %v2852_v29, 0.0  ;;  %v2028_v33 = vpop.permute.xlu0 %2027 }
 0x884   :  { %2855 = vpow2.f32 %v1995_v15  ;;  %2001 = vadd.xlane.f32.xlu0 %v2000_v31  ;;  %v2033_v34 = vsel %vm329_vm2, %v2028_v33, 0 }
 0x885   :  { %2705 = vmatpush3.bf16.msra.mxu1 %v2033_v34 }
 0x886   :  { %2716 = vmatprep.subr.bf16.mxu1 %v2867_v0 }
 0x88a   :  { %v2854_v30 = vpop.eup %2853 }
 0x88b   :  { %v2006_v35 = vsel %vm30_vm0, %v2854_v30, 0.0 }
 0x88c   :  { %2007 = vadd.xlane.f32.xlu0 %v2006_v35 }
 0x88e   :  { %v2856_v36 = vpop.eup %2855 }
 0x88f   :  { %v2009_v39 = vsel %vm30_vm0, %v2856_v36, 0.0 }
 0x890   :  { %2010 = vadd.xlane.f32.xlu1 %v2009_v39 }
 0x8a1   :  { %2171 = vrot.lane.b32.xlu1 %v3177_v8, %s2871_s14  ;;  %v2124_v8 = vpop.permute.xlu1 %2123 }
 0x8a2   :  { %2219 = vrot.lane.b32.xlu0 %v3198_v45, %s2871_s14 }
 0x8a5   :  { %2743 = vrot.lane.b32.xlu1 %v2742_v60, %s2872_s15 }
 0x8a6   :  { %2748 = vrot.lane.b32.xlu0 %v2747_v10, %s2872_s15 }
 0x8a9   :  { %2280 = vrot.lane.b32.xlu1 %v3280_v4, %s2872_s15  ;;  %v2129_v4 = vsel %vm329_vm2, %v2124_v8, 0 }
 0x8aa   :  { %2753 = vrot.lane.b32.xlu0 %v2752_v51, %s2873_s16 }
 0x8ad   :  { %2758 = vrot.lane.b32.xlu1 %v2757_v19, %s2873_s16 }
 0x8ae   :  { %2300 = vrot.lane.b32.xlu0 %v3389_v32, %s2873_s16 }
 0x8fe   :  { %v1999_v45 = vpop.xlane.xlu1 %1998 }
 0x8ff   :  { %2857 = vrcp.f32 %v1999_v45 }
 0x906   :  { %v2005_v50 = vpop.xlane.xlu1 %2004 }
 0x907   :  { %2859 = vrcp.f32 %v2005_v50 }
 0x909   :  { %v2858_v53 = vpop.eup %2857 }
 0x90a   :  { %v2017_v59 = vmul.f32 %v2858_v53, %v2848_v56 }
 0x90c   :  { %v2022_v60 = vpack.c.bf16 %v2017_v59, %v2017_v59 }
 0x90e   :  { %2707 = vmatmul.mubr.msk.bf16.vlgmr.msra.gmra.mrb[68].mxu1 %vm30_vm0, %v2022_v60 }
 0x90f   :  { %2717 = vmatpush3.bf16.msra.mxu1 %v2129_v4  ;;  %2718 = vmatprep.mubr.msk.bf16.mxu1 %vm2868_vm1, %v2867_v0 }
 0x910   :  { %2728 = vmatprep.subr.bf16.mxu1 %v2867_v0 }
 0x911   :  { %v2860_v28 = vpop.eup %2859  ;;  %v2002_v10 = vpop.xlane.xlu0 %2001 }
 0x912   :  { %v2019_v47 = vmul.f32 %v2860_v28, %v2850_v3  ;;  %2861 = vrcp.f32 %v2002_v10 }
 0x914   :  { %v2024_v52 = vpack.c.bf16 %v2019_v47, %v2019_v47 }
 0x916   :  { %2719 = vmatmul.mubr.msk.bf16.vlgmr.msra.gmra.mrb[72].mxu1 %vm30_vm0, %v2024_v52 }
 0x917   :  { %2730 = vmatprep.mubr.msk.bf16.mxu1 %vm2868_vm1, %v2867_v0 }
 0x919   :  { %v2008_v51 = vpop.xlane.xlu0 %2007 }
 0x91a   :  { %2863 = vrcp.f32 %v2008_v51 }
 0x91c   :  { %v2862_v23 = vpop.eup %2861 }
 0x91d   :  { %v2018_v14 = vmul.f32 %v2862_v23, %v2852_v29  ;;  %v2011_v19 = vpop.xlane.xlu1 %2010  ;;  %v2220_v32 = vpop.permute.xlu0 %2219 }
 0x91e   :  { %2865 = vrcp.f32 %v2011_v19  ;;  %v2225_v12 = vsel %vm329_vm2, %v2220_v32, 0 }
 0x91f   :  { %v2023_v38 = vpack.c.bf16 %v2018_v14, %v2018_v14  ;;  %2729 = vmatpush3.bf16.msra.mxu1 %v2225_v12 }
 0x921   :  { %v2172_v40 = vpop.permute.xlu1 %2171  ;;  %2713 = vmatmul.mubr.msk.bf16.vlgmr.msra.gmra.mrb[72].mxu0 %vm30_vm0, %v2023_v38  ;;  %v2749_v27 = vpop.permute.xlu0 %2748 }
 0x922   :  { %v2177_v41 = vsel %vm329_vm2, %v2172_v40, 0  ;;  %2724 = vmatprep.mubr.msk.bf16.mxu0 %vm2868_vm1, %v2867_v0  ;;  %v2751_v47 = vunpack.i.h.bf16 %v2749_v27  ;;  %v2750_v52 = vunpack.i.l.bf16 %v2749_v27 }
 0x923   :  { %2723 = vmatpush3.bf16.msra.mxu0 %v2177_v41 }
 0x924   :  { %v2864_v42 = vpop.eup %2863  ;;  %v2330_v19 = vsel %vm30_vm0, %v3154_v26, %v2751_v47  ;;  %v2329_v32 = vsel %vm30_vm0, %v3152_v22, %v2750_v52 }
 0x925   :  { %v2020_v44 = vmul.f32 %v2864_v42, %v2854_v30  ;;  %v2744_v25 = vpop.permute.xlu1 %2743  ;;  %v2754_v33 = vpop.permute.xlu0 %2753 }
 0x926   :  { %v2746_v15 = vunpack.i.h.bf16 %v2744_v25  ;;  %v2745_v31 = vunpack.i.l.bf16 %v2744_v25  ;;  %v2756_v30 = vunpack.i.h.bf16 %v2754_v33  ;;  %v2755_v35 = vunpack.i.l.bf16 %v2754_v33 }
 0x927   :  { %v2025_v46 = vpack.c.bf16 %v2020_v44, %v2020_v44 }
 0x928   :  { %v2866_v48 = vpop.eup %2865  ;;  %v2327_v39 = vsel %vm30_vm0, %v3148_v63, %v2745_v31 }
 0x929   :  { %v2021_v49 = vmul.f32 %v2866_v48, %v2856_v36  ;;  %2725 = vmatmul.mubr.msk.bf16.vlgmr.msra.gmra.mrb[76].mxu0 %vm30_vm0, %v2025_v46  ;;  %v2281_v29 = vpop.permute.xlu1 %2280  ;;  %v2328_v36 = vsel %vm30_vm0, %v3150_v17, %v2746_v15  ;;  %v2333_v59 = vsel %vm2332_vm3, %v2327_v39, %v2755_v35  ;;  %v2301_v28 = vpop.permute.xlu0 %2300 }
 0x92a   :  { %v2334_v53 = vsel %vm2332_vm3, %v2328_v36, %v2756_v30  ;;  %v2331_v23 = vsel %vm30_vm0, %v3158_v43, %v2281_v29 }
 0x92b   :  { %v2026_v37 = vpack.c.bf16 %v2021_v49, %v2021_v49  ;;  %v2337_v40 = vsel %vm2332_vm3, %v2331_v23, %v2301_v28 }
 0x92d   :  { %2731 = vmatmul.mubr.msk.bf16.vlgmr.msra.gmra.mrb[76].mxu1 %vm30_vm0, %v2026_v37  ;;  %v2759_v34 = vpop.permute.xlu1 %2758 }
 0x92e   :  { %v2761_v63 = vunpack.i.h.bf16 %v2759_v34  ;;  %v2760_v51 = vunpack.i.l.bf16 %v2759_v34 }
 0x930   :  { %v2335_v41 = vsel %vm2332_vm3, %v2329_v32, %v2760_v51  ;;  %v2336_v42 = vsel %vm2332_vm3, %v2330_v19, %v2761_v63 }
 0x9e1   :  { %v2069_v9 = vpop.f32.mrb[68].mxu1 }
 0x9e2   :  { %v2708_v2 = vpop.f32.mrb[69].mxu1 }
 0x9e3   :  { %v2072_v18 = vpop.f32.mrb[70].mxu1 }
 0x9e4   :  { %v2709_v13 = vpop.f32.mrb[71].mxu1 }
 0x9e9   :  { %v2165_v24 = vpop.f32.mrb[72].mxu1 }
 0x9ea   :  { %v2720_v54 = vpop.f32.mrb[73].mxu1 }
 0x9eb   :  { %v2168_v5 = vpop.f32.mrb[74].mxu1 }
 0x9ec   :  { %v2721_v1 = vpop.f32.mrb[75].mxu1 }
 0x9f4   :  { %v2117_v0 = vpop.f32.mrb[72].mxu0 }
 0x9f5   :  { %v2762_v55 = vpack.i.bf16 %v2117_v0, %v2069_v9  ;;  %v2714_v56 = vpop.f32.mrb[73].mxu0 }
 0x9f6   :  { %v2120_v58 = vpop.f32.mrb[74].mxu0 }
 0x9f7   :  { %2763 = vrot.lane.b32.xlu1 %v2762_v55, %s2874_s17  ;;  %v2715_v61 = vpop.f32.mrb[75].mxu0 }
 0x9fc   :  { %v2213_v16 = vpop.f32.mrb[76].mxu0 }
 0x9fd   :  { %v2767_v62 = vpack.i.bf16 %v2213_v16, %v2165_v24  ;;  %v2726_v3 = vpop.f32.mrb[77].mxu0 }
 0x9fe   :  { %v2216_v20 = vpop.f32.mrb[78].mxu0 }
 0x9ff   :  { %2768 = vrot.lane.b32.xlu0 %v2767_v62, %s2874_s17  ;;  %v2727_v7 = vpop.f32.mrb[79].mxu0 }
 0xa00   :  { %v2261_v57 = vpop.f32.mrb[76].mxu1 }
 0xa01   :  { %v2732_v21 = vpop.f32.mrb[77].mxu1  ;;  %2320 = vrot.lane.b32.xlu1 %v2261_v57, %s2874_s17 }
 0xa02   :  { %v2264_v11 = vpop.f32.mrb[78].mxu1 }
 0xa03   :  { %v2733_v6 = vpop.f32.mrb[79].mxu1 }
 0xa69   :  { %v2764_v8 = vpop.permute.xlu1 %2763 }
 0xa6a   :  { %v2766_v45 = vunpack.i.h.bf16 %v2764_v8  ;;  %v2765_v50 = vunpack.i.l.bf16 %v2764_v8 }
 0xa6c   :  { %v2340_v60 = vsel %vm2338_vm4, %v2334_v53, %v2766_v45  ;;  %v2339_v4 = vsel %vm2338_vm4, %v2333_v59, %v2765_v50 }
 0xa6d   :  { %v2345_v10 = vpack.c.bf16 %v2340_v60, %v2340_v60  ;;  %v2344_v17 = vpack.c.bf16 %v2339_v4, %v2339_v4 }
 0xa6f   :  { %2351 = vst.msk [vmem:[%s3486_s3 + $0x4] sm:$0xf] %vm2349_vm5, %v2345_v10  ;;  %2350 = vst.msk [vmem:[%s3486_s3] sm:$0xf] %vm2349_vm5, %v2344_v17 }
 0xa71   :  { %v2769_v14 = vpop.permute.xlu0 %2768 }
 0xa72   :  { %v2771_v12 = vunpack.i.h.bf16 %v2769_v14  ;;  %v2770_v38 = vunpack.i.l.bf16 %v2769_v14 }
 0xa73   :  { %v2321_v44 = vpop.permute.xlu1 %2320 }
 0xa74   :  { %v2342_v46 = vsel %vm2338_vm4, %v2336_v42, %v2771_v12  ;;  %v2341_v43 = vsel %vm2338_vm4, %v2335_v41, %v2770_v38  ;;  %v2343_v48 = vsel %vm2338_vm4, %v2337_v40, %v2321_v44 }
 0xa75   :  { %v2347_v49 = vpack.c.bf16 %v2342_v46, %v2342_v46  ;;  %v2346_v26 = vpack.c.bf16 %v2341_v43, %v2341_v43  ;;  %v2348_v37 = vpack.c.bf16 %v2343_v48, %v2343_v48 }
 0xa77   :  { %2353 = vst.msk [vmem:[%s3486_s3 + $0xc] sm:$0xf] %vm2349_vm5, %v2347_v49  ;;  %2352 = vst.msk [vmem:[%s3486_s3 + $0x8] sm:$0xf] %vm2349_vm5, %v2346_v26 }
 0xa78   :  { %2354 = vst.msk [vmem:[%s3486_s3 + $0x10] sm:$0xf] %vm2349_vm5, %v2348_v37 }

// kernel: _lambda_.77
= control target key start
LH: loop header
LB: loop body
LE: loop exit
PB: predicated region body
PF: predicated region fallthrough
CT: control target
= control target key end

     0   :  { %v193_v0 = vmov 0.0   ;;  %vm194_vm0 = vmmov 0   ;;  %s248_s1 = inlined_call_operand.vmem [shape: bf16[128,128], index: 1, kind: input, shape index: {}]   ;;  %s249_s0 = inlined_call_operand.vmem [shape: bf16[8,128], index: 0, kind: input, shape index: {}]   ;;  %s250_s2 = inlined_call_operand.vmem [shape: f32[1,128], index: 2, kind: input, shape index: {}]   ;;  %s251_s3 = inlined_call_operand.vmem [shape: f32[8,128], index: 3, kind: output, shape index: {}]  }
   0x1   :  { %163 = vmatprep.subr.bf16.mxu0 %v193_v0  ;;  %v185_v1 = vld [vmem:[%s248_s1] sm:$0xff]   ;;  %179 = vmatprep.mubr.msk.bf16.mxu0 %vm194_vm0, %v193_v0  ;;  %v186_v2 = vld [vmem:[%s248_s1 + $0x8] sm:$0xff]   ;;  %v187_v3 = vld [vmem:[%s248_s1 + $0x10] sm:$0xff]  }
   0x2   :  { %164 = vmatpush3.bf16.msra.mxu0 %v185_v1  ;;  %v188_v4 = vld [vmem:[%s248_s1 + $0x18] sm:$0xff]   ;;  %v189_v5 = vld [vmem:[%s248_s1 + $0x20] sm:$0xff]   ;;  %v190_v6 = vld [vmem:[%s248_s1 + $0x28] sm:$0xff]  }
   0x3   :  { %165 = vmatprep.subr.bf16.mxu0 %v193_v0  ;;  %v191_v7 = vld [vmem:[%s248_s1 + $0x30] sm:$0xff]   ;;  %v192_v8 = vld [vmem:[%s248_s1 + $0x38] sm:$0xff]   ;;  %v21_v9 = vld [vmem:[%s249_s0] sm:$0xf] }
   0x4   :  { %v153_v10 = vld [vmem:[%s250_s2] ss:$0 sm:$0xff] }
   0x6   :  { %166 = vmatpush3.bf16.msra.mxu0 %v186_v2 }
   0x7   :  { %167 = vmatprep.subr.bf16.mxu0 %v193_v0 }
   0xa   :  { %168 = vmatpush3.bf16.msra.mxu0 %v187_v3 }
   0xb   :  { %169 = vmatprep.subr.bf16.mxu0 %v193_v0 }
   0xe   :  { %170 = vmatpush3.bf16.msra.mxu0 %v188_v4 }
   0xf   :  { %171 = vmatprep.subr.bf16.mxu0 %v193_v0 }
  0x12   :  { %172 = vmatpush3.bf16.msra.mxu0 %v189_v5 }
  0x13   :  { %173 = vmatprep.subr.bf16.mxu0 %v193_v0 }
  0x16   :  { %174 = vmatpush3.bf16.msra.mxu0 %v190_v6 }
  0x17   :  { %175 = vmatprep.subr.bf16.mxu0 %v193_v0 }
  0x1a   :  { %176 = vmatpush3.bf16.msra.mxu0 %v191_v7 }
  0x1b   :  { %177 = vmatprep.subr.bf16.mxu0 %v193_v0 }
  0x1e   :  { %178 = vmatpush3.bf16.msra.mxu0 %v192_v8 }
  0x21   :  { %180 = vmatmul.mubr.bf16.vlgmr.msra.gmra.mrb[0].mxu0 %v21_v9 }
  0xf4   :  { %v120_v11 = vpop.f32.mrb[0].mxu0 }
  0xf5   :  { %v139_v12 = vadd.f32 %v153_v10, %v120_v11  ;;  %v181_v13 = vpop.f32.mrb[1].mxu0 }
  0xf6   :  { %v123_v14 = vpop.f32.mrb[2].mxu0 }
  0xf7   :  { %140 = vst [vmem:[%s251_s3] sm:$0xff] %v139_v12  ;;  %v182_v15 = vpop.f32.mrb[3].mxu0 }

</bundles_post_ra>
